<compile_context>
chip_gen: v7x
topology: tpu7x:2x2x1
jax: 0.10.0
libtpu: 0.0.40
codegen_flags: <defaults>
</compile_context>

<pallas_src>
import functools
import math

import jax
import jax.numpy as jnp
from jax import lax
from jax.experimental import pallas as pl
from jax.experimental.pallas import tpu as pltpu

# ----------------------------- hyper params ----------------------------------
PAD_VALUE = -11.5129251        # MelSpectrogramFSConfig.pad_value
N_MELS    = 80                 # MelSpectrogramFSConfig.n_mels
N_MEL_PAD = 128                # lane-dense mel projection; sliced back to 80 in the wrapper
VOCAB     = 40                 # phoneme-ish vocab
VOCAB_PAD = 128                # one-hot embedding matmul width (lane-dense)
D_MODEL   = 128
N_HEADS   = 2
D_HEAD    = D_MODEL // N_HEADS
HEAD_PAD  = 128                # each head zero-padded to a full lane tile
D_FF      = 256
D_PRED    = 128
N_ENC     = 2
N_DEC     = 2
MAX_DUR   = 4                  # per-token duration clamp

B_EX      = 2                  # batch
T_TEXT    = 8                  # token sequence length
T_MEL     = T_TEXT * MAX_DUR   # fixed mel frame budget


# --------------------------- in-kernel helpers --------------------------------
def _layer_norm(x, g_ref, b_ref, eps=1e-5):
    mu = jnp.mean(x, axis=-1, keepdims=True)
    var = jnp.mean((x - mu) ** 2, axis=-1, keepdims=True)
    return (x - mu) * lax.rsqrt(var + eps) * g_ref[...] + b_ref[...]


def _softmax_rows(s):
    m = jnp.max(s, axis=-1, keepdims=True)
    e = jnp.exp(s - m)
    return e * pl.reciprocal(jnp.sum(e, axis=-1, keepdims=True), approx=True)


def _mha(x, p, key_bias=None):
    """Self-attention for one sequence [S, D]; heads folded lane-dense (pad 64->128)."""
    qkv = jnp.dot(x, p["w_qkv"][...], preferred_element_type=jnp.float32) + p["b_qkv"][...]
    scale = 1.0 / math.sqrt(D_HEAD)
    hw = N_HEADS * HEAD_PAD
    heads = []
    for h in range(N_HEADS):
        c = h * HEAD_PAD
        q = qkv[:, c:c + HEAD_PAD]
        k = qkv[:, hw + c:hw + c + HEAD_PAD]
        v = qkv[:, 2 * hw + c:2 * hw + c + HEAD_PAD]
        # q @ k^T without materializing a transpose (contract last dims); pad lanes are
        # exactly zero so they contribute nothing to the scores.
        s = lax.dot_general(q, k, (((1,), (1,)), ((), ())),
                            preferred_element_type=jnp.float32) * scale
        if key_bias is not None:
            s = s + key_bias
        heads.append(jnp.dot(_softmax_rows(s), v, preferred_element_type=jnp.float32))
    o = jnp.concatenate(heads, axis=-1)                                   # [S, 2*HEAD_PAD]
    return jnp.dot(o, p["w_o"][...], preferred_element_type=jnp.float32) + p["b_o"][...]


def _ffn(x, p):
    h = jnp.dot(x, p["w_ff1"][...], preferred_element_type=jnp.float32) + p["b_ff1"][...]
    h = jnp.maximum(h, 0.0)
    return jnp.dot(h, p["w_ff2"][...], preferred_element_type=jnp.float32) + p["b_ff2"][...]


def _fft_block(x, p, key_bias=None):
    h = _layer_norm(x + _mha(x, p, key_bias), p["ln1_g"], p["ln1_b"])
    return _layer_norm(h + _ffn(h, p), p["ln2_g"], p["ln2_b"])


def _variance_predictors(x, P):
    """dur/pitch/energy heads; the three layer-1 GEMMs are batched into one wide GEMM."""
    h1 = jnp.dot(x, P["vp_w1"][...], preferred_element_type=jnp.float32) + P["vp_b1"][...]
    h1 = jnp.maximum(h1, 0.0)                                             # [S, 3*D_PRED]
    outs = []
    for i, vp in enumerate(P["vp"]):
        h = h1[:, i * D_PRED:(i + 1) * D_PRED]
        h = _layer_norm(h, vp["ln1_g"], vp["ln1_b"])
        h = jnp.maximum(jnp.dot(h, vp["w2"][...], preferred_element_type=jnp.float32)
                        + vp["b2"][...], 0.0)
        h = _layer_norm(h, vp["ln2_g"], vp["ln2_b"])
        outs.append(jnp.dot(h, vp["w3"][...], preferred_element_type=jnp.float32)
                    + vp["b3"][...])                                      # [S, 1]
    return outs


# ------------------------------ fused kernel ----------------------------------
def _fs2_kernel(treedef, n_leaves, tok_ref, *rest):
    param_refs = rest[:n_leaves]
    out_ref = rest[-1]
    P = jax.tree_util.tree_unflatten(treedef, list(param_refs))

    # ---- token embedding (one-hot matmul) + positional encoding --------------
    tok = tok_ref[0]                                                      # [T_text, 1] int32
    vocab_iota = lax.broadcasted_iota(jnp.int32, (T_TEXT, VOCAB_PAD), 1)
    onehot = (vocab_iota == tok).astype(jnp.float32)                      # [T_text, VOCAB_PAD]
    x = jnp.dot(onehot, P["embed"][...], preferred_element_type=jnp.float32)
    x = x + P["pos_text"][...]                                            # [T_text, D]

    # ---- encoder FFT blocks ---------------------------------------------------
    for p in P["enc"]:
        x = _fft_block(x, p)

    # ---- variance adaptor -----------------------------------------------------
    log_dur, pitch, energy = _variance_predictors(x, P)                   # each [T_text, 1]
    x = x + pitch * P["pitch_w"][...] + energy * P["energy_w"][...]
    # round-half-up instead of ties-to-even (differences only at exact .5 ties)
    dur = jnp.clip(jnp.floor(jnp.exp(log_dur) - 1.0 + 0.5), 1.0, float(MAX_DUR))

    # ---- length regulator: frame f -> token t iff cum[t-1] <= f < cum[t] ------
    tri = (lax.broadcasted_iota(jnp.int32, (T_TEXT, T_TEXT), 1)
           <= lax.broadcasted_iota(jnp.int32, (T_TEXT, T_TEXT), 0)).astype(jnp.float32)
    cum = jnp.dot(tri, dur, preferred_element_type=jnp.float32)           # [T_text, 1]
    prev = cum - dur                                                      # [T_text, 1]
    fr = lax.broadcasted_iota(jnp.int32, (T_TEXT, T_MEL), 1).astype(jnp.float32)
    sel = jnp.logical_and(fr >= prev, fr < cum).astype(jnp.float32)       # [T_text, T_mel]
    mel_x = jnp.dot(sel.T, x, preferred_element_type=jnp.float32)         # [T_mel, D]
    mel_x = mel_x + P["pos_mel"][...]

    total = jnp.sum(dur, axis=0, keepdims=True)                           # [1, 1] total frames
    fr_col = lax.broadcasted_iota(jnp.int32, (T_MEL, 1), 0).astype(jnp.float32)
    fr_row = lax.broadcasted_iota(jnp.int32, (1, T_MEL), 1).astype(jnp.float32)
    valid = (fr_col < total).astype(jnp.float32)                          # [T_mel, 1]
    key_bias = jnp.where(fr_row < total, 0.0, -1e9)                       # [1, T_mel]

    # ---- decoder FFT blocks (padded frames masked out of attention keys) ------
    for p in P["dec"]:
        mel_x = _fft_block(mel_x, p, key_bias=key_bias)

    # ---- mel projection (lane-dense 128-wide) + pad-value fill ----------------
    mel = jnp.dot(mel_x, P["w_mel"][...], preferred_element_type=jnp.float32) + P["b_mel"][...]
    mel = jnp.where(valid > 0.0, mel, PAD_VALUE)
    out_ref[0] = mel.astype(out_ref.dtype)


# ------------------------------ host wrapper -----------------------------------
def fastspeech2_forward(params, tokens):
    """tokens: int32 [B, T_text] -> mel_output f32 [B, N_MELS, T_MEL]."""
    B = tokens.shape[0]
    leaves, treedef = jax.tree_util.tree_flatten(params)
    kernel = functools.partial(_fs2_kernel, treedef, len(leaves))

    def _const_map(nd):
        return lambda b: (0,) * nd

    in_specs = [pl.BlockSpec((1, T_TEXT, 1), lambda b: (b, 0, 0))]
    in_specs += [pl.BlockSpec(leaf.shape, _const_map(leaf.ndim)) for leaf in leaves]

    mel_pad = pl.pallas_call(
        kernel,
        out_shape=jax.ShapeDtypeStruct((B, T_MEL, N_MEL_PAD), jnp.float32),
        grid=(B,),
        in_specs=in_specs,
        out_specs=pl.BlockSpec((1, T_MEL, N_MEL_PAD), lambda b: (b, 0, 0)),
        compiler_params=pltpu.CompilerParams(
            dimension_semantics=("parallel",),            # v7x: one batch element per core
            vmem_limit_bytes=32 * 1024 * 1024,            # safe on v5e/v6e/v7x
        ),
    )(tokens.reshape(B, T_TEXT, 1), *leaves)

    # Lane-dense kernel output [B, T_mel, 128] -> SpeechBrain layout [B, n_mels, T_mel].
    return jnp.transpose(mel_pad[:, :, :N_MELS], (0, 2, 1))


# ----------------------------- parameter init ----------------------------------
def _dense(key, k, n, scale=0.05):
    return jax.random.normal(key, (k, n), jnp.float32) * scale


def _pad_heads_cols(w):
    """[D, N_HEADS*D_HEAD] -> [D, N_HEADS*HEAD_PAD]; zero-pad each head to 128 lanes."""
    d = w.shape[0]
    w = w.reshape(d, N_HEADS, D_HEAD)
    w = jnp.pad(w, ((0, 0), (0, 0), (0, HEAD_PAD - D_HEAD)))
    return w.reshape(d, N_HEADS * HEAD_PAD)


def _pad_heads_rows(w):
    """[N_HEADS*D_HEAD, D] -> [N_HEADS*HEAD_PAD, D]; zero rows for the padded head lanes."""
    d = w.shape[1]
    w = w.reshape(N_HEADS, D_HEAD, d)
    w = jnp.pad(w, ((0, 0), (0, HEAD_PAD - D_HEAD), (0, 0)))
    return w.reshape(N_HEADS * HEAD_PAD, d)


def init_fft_block(key):
    ks = jax.random.split(key, 6)
    w_q = _pad_heads_cols(_dense(ks[0], D_MODEL, D_MODEL))
    w_k = _pad_heads_cols(_dense(ks[1], D_MODEL, D_MODEL))
    w_v = _pad_heads_cols(_dense(ks[2], D_MODEL, D_MODEL))
    return {
        "w_qkv": jnp.concatenate([w_q, w_k, w_v], axis=-1),          # [D, 3*N_HEADS*HEAD_PAD]
        "b_qkv": jnp.zeros((1, 3 * N_HEADS * HEAD_PAD), jnp.float32),
        "w_o": _pad_heads_rows(_dense(ks[3], D_MODEL, D_MODEL)),     # [N_HEADS*HEAD_PAD, D]
        "b_o": jnp.zeros((1, D_MODEL), jnp.float32),
        "w_ff1": _dense(ks[4], D_MODEL, D_FF), "b_ff1": jnp.zeros((1, D_FF), jnp.float32),
        "w_ff2": _dense(ks[5], D_FF, D_MODEL), "b_ff2": jnp.zeros((1, D_MODEL), jnp.float32),
        "ln1_g": jnp.ones((1, D_MODEL), jnp.float32), "ln1_b": jnp.zeros((1, D_MODEL), jnp.float32),
        "ln2_g": jnp.ones((1, D_MODEL), jnp.float32), "ln2_b": jnp.zeros((1, D_MODEL), jnp.float32),
    }


def init_predictor_tail(key):
    ks = jax.random.split(key, 2)
    return {
        "ln1_g": jnp.ones((1, D_PRED), jnp.float32), "ln1_b": jnp.zeros((1, D_PRED), jnp.float32),
        "w2": _dense(ks[0], D_PRED, D_PRED), "b2": jnp.zeros((1, D_PRED), jnp.float32),
        "ln2_g": jnp.ones((1, D_PRED), jnp.float32), "ln2_b": jnp.zeros((1, D_PRED), jnp.float32),
        "w3": _dense(ks[1], D_PRED, 1), "b3": jnp.zeros((1, 1), jnp.float32),
    }


def sinusoid_pos(t, d):
    pos = jnp.arange(t, dtype=jnp.float32)[:, None]
    i = jnp.arange(d, dtype=jnp.float32)[None, :]
    angle = pos / jnp.power(10000.0, (2.0 * jnp.floor(i / 2.0)) / d)
    return jnp.where(i % 2 == 0, jnp.sin(angle), jnp.cos(angle))


def init_params(key):
    keys = jax.random.split(key, 10)
    embed = jnp.pad(jax.random.normal(keys[0], (VOCAB, D_MODEL), jnp.float32) * 0.1,
                    ((0, VOCAB_PAD - VOCAB), (0, 0)))
    w_mel = jnp.pad(_dense(keys[8], D_MODEL, N_MELS), ((0, 0), (0, N_MEL_PAD - N_MELS)))
    return {
        "embed": embed,                                              # [VOCAB_PAD, D]
        "pos_text": sinusoid_pos(T_TEXT, D_MODEL),                   # [T_text, D]
        "pos_mel": sinusoid_pos(T_MEL, D_MODEL),                     # [T_mel, D]
        "enc": [init_fft_block(k) for k in jax.random.split(keys[1], N_ENC)],
        "dec": [init_fft_block(k) for k in jax.random.split(keys[2], N_DEC)],
        "vp_w1": jnp.concatenate([_dense(k, D_MODEL, D_PRED)
                                  for k in jax.random.split(keys[3], 3)], axis=-1),
        "vp_b1": jnp.zeros((1, 3 * D_PRED), jnp.float32),
        "vp": [init_predictor_tail(k) for k in jax.random.split(keys[4], 3)],
        "pitch_w": jax.random.normal(keys[6], (1, D_MODEL), jnp.float32) * 0.05,
        "energy_w": jax.random.normal(keys[7], (1, D_MODEL), jnp.float32) * 0.05,
        "w_mel": w_mel,                                              # [D, N_MEL_PAD]
        "b_mel": jnp.zeros((1, N_MEL_PAD), jnp.float32),
    }


# ----------------------------------- main ---------------------------------------
if __name__ == "__main__":
    key = jax.random.PRNGKey(0)
    pkey, tkey = jax.random.split(key)
    params = init_params(pkey)
    tokens = jax.random.randint(tkey, (B_EX, T_TEXT), 0, VOCAB, dtype=jnp.int32)

    mel_output = jax.jit(fastspeech2_forward)(params, tokens)
    mel_output = jax.block_until_ready(mel_output)

    assert mel_output.shape == (B_EX, N_MELS, T_MEL), mel_output.shape
    assert mel_output.dtype == jnp.float32
    assert bool(jnp.all(jnp.isfinite(mel_output)))
    print("KERNEL_OK")
</pallas_src>

<mosaic_0001>
module attributes {stable_mosaic.version = 11 : i64} {
  func.func @_fs2_kernel(%arg0: i32, %arg1: memref<1x8x1xi32, #tpu.memory_space<vmem>>, %arg2: memref<1x128xf32, #tpu.memory_space<vmem>>, %arg3: memref<1x256xf32, #tpu.memory_space<vmem>>, %arg4: memref<1x128xf32, #tpu.memory_space<vmem>>, %arg5: memref<1x128xf32, #tpu.memory_space<vmem>>, %arg6: memref<1x768xf32, #tpu.memory_space<vmem>>, %arg7: memref<1x128xf32, #tpu.memory_space<vmem>>, %arg8: memref<1x128xf32, #tpu.memory_space<vmem>>, %arg9: memref<1x128xf32, #tpu.memory_space<vmem>>, %arg10: memref<1x128xf32, #tpu.memory_space<vmem>>, %arg11: memref<128x256xf32, #tpu.memory_space<vmem>>, %arg12: memref<256x128xf32, #tpu.memory_space<vmem>>, %arg13: memref<256x128xf32, #tpu.memory_space<vmem>>, %arg14: memref<128x768xf32, #tpu.memory_space<vmem>>, %arg15: memref<1x256xf32, #tpu.memory_space<vmem>>, %arg16: memref<1x128xf32, #tpu.memory_space<vmem>>, %arg17: memref<1x128xf32, #tpu.memory_space<vmem>>, %arg18: memref<1x768xf32, #tpu.memory_space<vmem>>, %arg19: memref<1x128xf32, #tpu.memory_space<vmem>>, %arg20: memref<1x128xf32, #tpu.memory_space<vmem>>, %arg21: memref<1x128xf32, #tpu.memory_space<vmem>>, %arg22: memref<1x128xf32, #tpu.memory_space<vmem>>, %arg23: memref<128x256xf32, #tpu.memory_space<vmem>>, %arg24: memref<256x128xf32, #tpu.memory_space<vmem>>, %arg25: memref<256x128xf32, #tpu.memory_space<vmem>>, %arg26: memref<128x768xf32, #tpu.memory_space<vmem>>, %arg27: memref<128x128xf32, #tpu.memory_space<vmem>>, %arg28: memref<1x256xf32, #tpu.memory_space<vmem>>, %arg29: memref<1x128xf32, #tpu.memory_space<vmem>>, %arg30: memref<1x128xf32, #tpu.memory_space<vmem>>, %arg31: memref<1x768xf32, #tpu.memory_space<vmem>>, %arg32: memref<1x128xf32, #tpu.memory_space<vmem>>, %arg33: memref<1x128xf32, #tpu.memory_space<vmem>>, %arg34: memref<1x128xf32, #tpu.memory_space<vmem>>, %arg35: memref<1x128xf32, #tpu.memory_space<vmem>>, %arg36: memref<128x256xf32, #tpu.memory_space<vmem>>, %arg37: memref<256x128xf32, #tpu.memory_space<vmem>>, %arg38: memref<256x128xf32, #tpu.memory_space<vmem>>, %arg39: memref<128x768xf32, #tpu.memory_space<vmem>>, %arg40: memref<1x256xf32, #tpu.memory_space<vmem>>, %arg41: memref<1x128xf32, #tpu.memory_space<vmem>>, %arg42: memref<1x128xf32, #tpu.memory_space<vmem>>, %arg43: memref<1x768xf32, #tpu.memory_space<vmem>>, %arg44: memref<1x128xf32, #tpu.memory_space<vmem>>, %arg45: memref<1x128xf32, #tpu.memory_space<vmem>>, %arg46: memref<1x128xf32, #tpu.memory_space<vmem>>, %arg47: memref<1x128xf32, #tpu.memory_space<vmem>>, %arg48: memref<128x256xf32, #tpu.memory_space<vmem>>, %arg49: memref<256x128xf32, #tpu.memory_space<vmem>>, %arg50: memref<256x128xf32, #tpu.memory_space<vmem>>, %arg51: memref<128x768xf32, #tpu.memory_space<vmem>>, %arg52: memref<1x128xf32, #tpu.memory_space<vmem>>, %arg53: memref<1x128xf32, #tpu.memory_space<vmem>>, %arg54: memref<32x128xf32, #tpu.memory_space<vmem>>, %arg55: memref<8x128xf32, #tpu.memory_space<vmem>>, %arg56: memref<1x128xf32, #tpu.memory_space<vmem>>, %arg57: memref<1x1xf32, #tpu.memory_space<vmem>>, %arg58: memref<1x128xf32, #tpu.memory_space<vmem>>, %arg59: memref<1x128xf32, #tpu.memory_space<vmem>>, %arg60: memref<1x128xf32, #tpu.memory_space<vmem>>, %arg61: memref<1x128xf32, #tpu.memory_space<vmem>>, %arg62: memref<128x128xf32, #tpu.memory_space<vmem>>, %arg63: memref<128x1xf32, #tpu.memory_space<vmem>>, %arg64: memref<1x128xf32, #tpu.memory_space<vmem>>, %arg65: memref<1x1xf32, #tpu.memory_space<vmem>>, %arg66: memref<1x128xf32, #tpu.memory_space<vmem>>, %arg67: memref<1x128xf32, #tpu.memory_space<vmem>>, %arg68: memref<1x128xf32, #tpu.memory_space<vmem>>, %arg69: memref<1x128xf32, #tpu.memory_space<vmem>>, %arg70: memref<128x128xf32, #tpu.memory_space<vmem>>, %arg71: memref<128x1xf32, #tpu.memory_space<vmem>>, %arg72: memref<1x128xf32, #tpu.memory_space<vmem>>, %arg73: memref<1x1xf32, #tpu.memory_space<vmem>>, %arg74: memref<1x128xf32, #tpu.memory_space<vmem>>, %arg75: memref<1x128xf32, #tpu.memory_space<vmem>>, %arg76: memref<1x128xf32, #tpu.memory_space<vmem>>, %arg77: memref<1x128xf32, #tpu.memory_space<vmem>>, %arg78: memref<128x128xf32, #tpu.memory_space<vmem>>, %arg79: memref<128x1xf32, #tpu.memory_space<vmem>>, %arg80: memref<1x384xf32, #tpu.memory_space<vmem>>, %arg81: memref<128x384xf32, #tpu.memory_space<vmem>>, %arg82: memref<128x128xf32, #tpu.memory_space<vmem>>, %arg83: memref<1x32x128xf32, #tpu.memory_space<vmem>>) attributes {dimension_semantics = [#tpu.dimension_semantics<parallel>], iteration_bounds = array<i64: 2>, scalar_prefetch = 0 : i64, scratch_operands = 0 : i64, tpu.core_type = #tpu.core_type<tc>, window_params = [{transform_indices = @transform_0, window_bounds = array<i64: 1, 8, 1>}, {pipeline_mode = #tpu.pipeline_mode<synchronous>, transform_indices = @transform_1, window_bounds = array<i64: 1, 128>}, {pipeline_mode = #tpu.pipeline_mode<synchronous>, transform_indices = @transform_2, window_bounds = array<i64: 1, 256>}, {pipeline_mode = #tpu.pipeline_mode<synchronous>, transform_indices = @transform_3, window_bounds = array<i64: 1, 128>}, {pipeline_mode = #tpu.pipeline_mode<synchronous>, transform_indices = @transform_4, window_bounds = array<i64: 1, 128>}, {pipeline_mode = #tpu.pipeline_mode<synchronous>, transform_indices = @transform_5, window_bounds = array<i64: 1, 768>}, {pipeline_mode = #tpu.pipeline_mode<synchronous>, transform_indices = @transform_6, window_bounds = array<i64: 1, 128>}, {pipeline_mode = #tpu.pipeline_mode<synchronous>, transform_indices = @transform_7, window_bounds = array<i64: 1, 128>}, {pipeline_mode = #tpu.pipeline_mode<synchronous>, transform_indices = @transform_8, window_bounds = array<i64: 1, 128>}, {pipeline_mode = #tpu.pipeline_mode<synchronous>, transform_indices = @transform_9, window_bounds = array<i64: 1, 128>}, {pipeline_mode = #tpu.pipeline_mode<synchronous>, transform_indices = @transform_10, window_bounds = array<i64: 128, 256>}, {pipeline_mode = #tpu.pipeline_mode<synchronous>, transform_indices = @transform_11, window_bounds = array<i64: 256, 128>}, {pipeline_mode = #tpu.pipeline_mode<synchronous>, transform_indices = @transform_12, window_bounds = array<i64: 256, 128>}, {pipeline_mode = #tpu.pipeline_mode<synchronous>, transform_indices = @transform_13, window_bounds = array<i64: 128, 768>}, {pipeline_mode = #tpu.pipeline_mode<synchronous>, transform_indices = @transform_14, window_bounds = array<i64: 1, 256>}, {pipeline_mode = #tpu.pipeline_mode<synchronous>, transform_indices = @transform_15, window_bounds = array<i64: 1, 128>}, {pipeline_mode = #tpu.pipeline_mode<synchronous>, transform_indices = @transform_16, window_bounds = array<i64: 1, 128>}, {pipeline_mode = #tpu.pipeline_mode<synchronous>, transform_indices = @transform_17, window_bounds = array<i64: 1, 768>}, {pipeline_mode = #tpu.pipeline_mode<synchronous>, transform_indices = @transform_18, window_bounds = array<i64: 1, 128>}, {pipeline_mode = #tpu.pipeline_mode<synchronous>, transform_indices = @transform_19, window_bounds = array<i64: 1, 128>}, {pipeline_mode = #tpu.pipeline_mode<synchronous>, transform_indices = @transform_20, window_bounds = array<i64: 1, 128>}, {pipeline_mode = #tpu.pipeline_mode<synchronous>, transform_indices = @transform_21, window_bounds = array<i64: 1, 128>}, {pipeline_mode = #tpu.pipeline_mode<synchronous>, transform_indices = @transform_22, window_bounds = array<i64: 128, 256>}, {pipeline_mode = #tpu.pipeline_mode<synchronous>, transform_indices = @transform_23, window_bounds = array<i64: 256, 128>}, {pipeline_mode = #tpu.pipeline_mode<synchronous>, transform_indices = @transform_24, window_bounds = array<i64: 256, 128>}, {pipeline_mode = #tpu.pipeline_mode<synchronous>, transform_indices = @transform_25, window_bounds = array<i64: 128, 768>}, {pipeline_mode = #tpu.pipeline_mode<synchronous>, transform_indices = @transform_26, window_bounds = array<i64: 128, 128>}, {pipeline_mode = #tpu.pipeline_mode<synchronous>, transform_indices = @transform_27, window_bounds = array<i64: 1, 256>}, {pipeline_mode = #tpu.pipeline_mode<synchronous>, transform_indices = @transform_28, window_bounds = array<i64: 1, 128>}, {pipeline_mode = #tpu.pipeline_mode<synchronous>, transform_indices = @transform_29, window_bounds = array<i64: 1, 128>}, {pipeline_mode = #tpu.pipeline_mode<synchronous>, transform_indices = @transform_30, window_bounds = array<i64: 1, 768>}, {pipeline_mode = #tpu.pipeline_mode<synchronous>, transform_indices = @transform_31, window_bounds = array<i64: 1, 128>}, {pipeline_mode = #tpu.pipeline_mode<synchronous>, transform_indices = @transform_32, window_bounds = array<i64: 1, 128>}, {pipeline_mode = #tpu.pipeline_mode<synchronous>, transform_indices = @transform_33, window_bounds = array<i64: 1, 128>}, {pipeline_mode = #tpu.pipeline_mode<synchronous>, transform_indices = @transform_34, window_bounds = array<i64: 1, 128>}, {pipeline_mode = #tpu.pipeline_mode<synchronous>, transform_indices = @transform_35, window_bounds = array<i64: 128, 256>}, {pipeline_mode = #tpu.pipeline_mode<synchronous>, transform_indices = @transform_36, window_bounds = array<i64: 256, 128>}, {pipeline_mode = #tpu.pipeline_mode<synchronous>, transform_indices = @transform_37, window_bounds = array<i64: 256, 128>}, {pipeline_mode = #tpu.pipeline_mode<synchronous>, transform_indices = @transform_38, window_bounds = array<i64: 128, 768>}, {pipeline_mode = #tpu.pipeline_mode<synchronous>, transform_indices = @transform_39, window_bounds = array<i64: 1, 256>}, {pipeline_mode = #tpu.pipeline_mode<synchronous>, transform_indices = @transform_40, window_bounds = array<i64: 1, 128>}, {pipeline_mode = #tpu.pipeline_mode<synchronous>, transform_indices = @transform_41, window_bounds = array<i64: 1, 128>}, {pipeline_mode = #tpu.pipeline_mode<synchronous>, transform_indices = @transform_42, window_bounds = array<i64: 1, 768>}, {pipeline_mode = #tpu.pipeline_mode<synchronous>, transform_indices = @transform_43, window_bounds = array<i64: 1, 128>}, {pipeline_mode = #tpu.pipeline_mode<synchronous>, transform_indices = @transform_44, window_bounds = array<i64: 1, 128>}, {pipeline_mode = #tpu.pipeline_mode<synchronous>, transform_indices = @transform_45, window_bounds = array<i64: 1, 128>}, {pipeline_mode = #tpu.pipeline_mode<synchronous>, transform_indices = @transform_46, window_bounds = array<i64: 1, 128>}, {pipeline_mode = #tpu.pipeline_mode<synchronous>, transform_indices = @transform_47, window_bounds = array<i64: 128, 256>}, {pipeline_mode = #tpu.pipeline_mode<synchronous>, transform_indices = @transform_48, window_bounds = array<i64: 256, 128>}, {pipeline_mode = #tpu.pipeline_mode<synchronous>, transform_indices = @transform_49, window_bounds = array<i64: 256, 128>}, {pipeline_mode = #tpu.pipeline_mode<synchronous>, transform_indices = @transform_50, window_bounds = array<i64: 128, 768>}, {pipeline_mode = #tpu.pipeline_mode<synchronous>, transform_indices = @transform_51, window_bounds = array<i64: 1, 128>}, {pipeline_mode = #tpu.pipeline_mode<synchronous>, transform_indices = @transform_52, window_bounds = array<i64: 1, 128>}, {pipeline_mode = #tpu.pipeline_mode<synchronous>, transform_indices = @transform_53, window_bounds = array<i64: 32, 128>}, {pipeline_mode = #tpu.pipeline_mode<synchronous>, transform_indices = @transform_54, window_bounds = array<i64: 8, 128>}, {pipeline_mode = #tpu.pipeline_mode<synchronous>, transform_indices = @transform_55, window_bounds = array<i64: 1, 128>}, {pipeline_mode = #tpu.pipeline_mode<synchronous>, transform_indices = @transform_56, window_bounds = array<i64: 1, 1>}, {pipeline_mode = #tpu.pipeline_mode<synchronous>, transform_indices = @transform_57, window_bounds = array<i64: 1, 128>}, {pipeline_mode = #tpu.pipeline_mode<synchronous>, transform_indices = @transform_58, window_bounds = array<i64: 1, 128>}, {pipeline_mode = #tpu.pipeline_mode<synchronous>, transform_indices = @transform_59, window_bounds = array<i64: 1, 128>}, {pipeline_mode = #tpu.pipeline_mode<synchronous>, transform_indices = @transform_60, window_bounds = array<i64: 1, 128>}, {pipeline_mode = #tpu.pipeline_mode<synchronous>, transform_indices = @transform_61, window_bounds = array<i64: 128, 128>}, {pipeline_mode = #tpu.pipeline_mode<synchronous>, transform_indices = @transform_62, window_bounds = array<i64: 128, 1>}, {pipeline_mode = #tpu.pipeline_mode<synchronous>, transform_indices = @transform_63, window_bounds = array<i64: 1, 128>}, {pipeline_mode = #tpu.pipeline_mode<synchronous>, transform_indices = @transform_64, window_bounds = array<i64: 1, 1>}, {pipeline_mode = #tpu.pipeline_mode<synchronous>, transform_indices = @transform_65, window_bounds = array<i64: 1, 128>}, {pipeline_mode = #tpu.pipeline_mode<synchronous>, transform_indices = @transform_66, window_bounds = array<i64: 1, 128>}, {pipeline_mode = #tpu.pipeline_mode<synchronous>, transform_indices = @transform_67, window_bounds = array<i64: 1, 128>}, {pipeline_mode = #tpu.pipeline_mode<synchronous>, transform_indices = @transform_68, window_bounds = array<i64: 1, 128>}, {pipeline_mode = #tpu.pipeline_mode<synchronous>, transform_indices = @transform_69, window_bounds = array<i64: 128, 128>}, {pipeline_mode = #tpu.pipeline_mode<synchronous>, transform_indices = @transform_70, window_bounds = array<i64: 128, 1>}, {pipeline_mode = #tpu.pipeline_mode<synchronous>, transform_indices = @transform_71, window_bounds = array<i64: 1, 128>}, {pipeline_mode = #tpu.pipeline_mode<synchronous>, transform_indices = @transform_72, window_bounds = array<i64: 1, 1>}, {pipeline_mode = #tpu.pipeline_mode<synchronous>, transform_indices = @transform_73, window_bounds = array<i64: 1, 128>}, {pipeline_mode = #tpu.pipeline_mode<synchronous>, transform_indices = @transform_74, window_bounds = array<i64: 1, 128>}, {pipeline_mode = #tpu.pipeline_mode<synchronous>, transform_indices = @transform_75, window_bounds = array<i64: 1, 128>}, {pipeline_mode = #tpu.pipeline_mode<synchronous>, transform_indices = @transform_76, window_bounds = array<i64: 1, 128>}, {pipeline_mode = #tpu.pipeline_mode<synchronous>, transform_indices = @transform_77, window_bounds = array<i64: 128, 128>}, {pipeline_mode = #tpu.pipeline_mode<synchronous>, transform_indices = @transform_78, window_bounds = array<i64: 128, 1>}, {pipeline_mode = #tpu.pipeline_mode<synchronous>, transform_indices = @transform_79, window_bounds = array<i64: 1, 384>}, {pipeline_mode = #tpu.pipeline_mode<synchronous>, transform_indices = @transform_80, window_bounds = array<i64: 128, 384>}, {pipeline_mode = #tpu.pipeline_mode<synchronous>, transform_indices = @transform_81, window_bounds = array<i64: 128, 128>}, {transform_indices = @transform_82, window_bounds = array<i64: 1, 32, 128>}]} {
    %c0 = arith.constant 0 : index
    %c0_0 = arith.constant 0 : index
    %c0_1 = arith.constant 0 : index
    %0 = vector.load %arg1[%c0, %c0_0, %c0_1] : memref<1x8x1xi32, #tpu.memory_space<vmem>>, vector<1x8x1xi32>
    %1 = vector.shape_cast %0 : vector<1x8x1xi32> to vector<8x1xi32>
    %2 = tpu.iota {dimensions = array<i32: 1>} : vector<8x128xi32>
    %3 = vector.broadcast %1 : vector<8x1xi32> to vector<8x128xi32>
    %4 = arith.cmpi eq, %2, %3 : vector<8x128xi32>
    %5 = arith.extui %4 : vector<8x128xi1> to vector<8x128xi32>
    %6 = arith.sitofp %5 : vector<8x128xi32> to vector<8x128xf32>
    %c0_2 = arith.constant 0 : index
    %c0_3 = arith.constant 0 : index
    %7 = vector.load %arg27[%c0_2, %c0_3] : memref<128x128xf32, #tpu.memory_space<vmem>>, vector<128x128xf32>
    %cst = arith.constant dense<0.000000e+00> : vector<8x128xf32>
    %8 = tpu.matmul %6, %7, %cst {dimension_numbers = #tpu.dot_dimension_numbers<[1], [0], [0], [1], [0, 0, 1, 1], [], []>} : vector<8x128xf32>, vector<128x128xf32>, vector<8x128xf32> -> vector<8x128xf32>
    %c0_4 = arith.constant 0 : index
    %c0_5 = arith.constant 0 : index
    %9 = vector.load %arg55[%c0_4, %c0_5] : memref<8x128xf32, #tpu.memory_space<vmem>>, vector<8x128xf32>
    %10 = arith.addf %8, %9 : vector<8x128xf32>
    %c0_6 = arith.constant 0 : index
    %c0_7 = arith.constant 0 : index
    %11 = vector.load %arg39[%c0_6, %c0_7] : memref<128x768xf32, #tpu.memory_space<vmem>>, vector<128x768xf32>
    %cst_8 = arith.constant dense<0.000000e+00> : vector<8x768xf32>
    %12 = tpu.matmul %10, %11, %cst_8 {dimension_numbers = #tpu.dot_dimension_numbers<[1], [0], [0], [1], [0, 0, 1, 1], [], []>} : vector<8x128xf32>, vector<128x768xf32>, vector<8x768xf32> -> vector<8x768xf32>
    %c0_9 = arith.constant 0 : index
    %c0_10 = arith.constant 0 : index
    %13 = vector.load %arg31[%c0_9, %c0_10] : memref<1x768xf32, #tpu.memory_space<vmem>>, vector<1x768xf32>
    %14 = vector.broadcast %13 : vector<1x768xf32> to vector<8x768xf32>
    %15 = arith.addf %12, %14 : vector<8x768xf32>
    %16 = vector.extract_strided_slice %15 {offsets = [0, 0], sizes = [8, 128], strides = [1, 1]} : vector<8x768xf32> to vector<8x128xf32>
    %17 = vector.extract_strided_slice %15 {offsets = [0, 256], sizes = [8, 128], strides = [1, 1]} : vector<8x768xf32> to vector<8x128xf32>
    %18 = vector.extract_strided_slice %15 {offsets = [0, 512], sizes = [8, 128], strides = [1, 1]} : vector<8x768xf32> to vector<8x128xf32>
    %cst_11 = arith.constant dense<0.000000e+00> : vector<8x8xf32>
    %19 = tpu.matmul %16, %17, %cst_11 {dimension_numbers = #tpu.dot_dimension_numbers<[1], [1], [0], [0], [0, 0, 1, 0], [], []>} : vector<8x128xf32>, vector<8x128xf32>, vector<8x8xf32> -> vector<8x8xf32>
    %cst_12 = arith.constant 1.250000e-01 : f32
    %20 = vector.broadcast %cst_12 : f32 to vector<8x8xf32>
    %21 = arith.mulf %19, %20 : vector<8x8xf32>
    %cst_13 = arith.constant dense<0xFF800000> : vector<8xf32>
    %22 = vector.multi_reduction <maximumf>, %21, %cst_13 [1] : vector<8x8xf32> to vector<8xf32>
    %23 = vector.shape_cast %22 : vector<8xf32> to vector<8x1xf32>
    %24 = vector.broadcast %23 : vector<8x1xf32> to vector<8x8xf32>
    %25 = arith.subf %21, %24 : vector<8x8xf32>
    %26 = math.exp %25 : vector<8x8xf32>
    %cst_14 = arith.constant dense<0.000000e+00> : vector<8xf32>
    %27 = vector.multi_reduction <add>, %26, %cst_14 [1] : vector<8x8xf32> to vector<8xf32>
    %28 = vector.shape_cast %27 : vector<8xf32> to vector<8x1xf32>
    %29 = tpu.reciprocal %28 {approx = true} : vector<8x1xf32> -> vector<8x1xf32>
    %30 = vector.broadcast %29 : vector<8x1xf32> to vector<8x8xf32>
    %31 = arith.mulf %26, %30 : vector<8x8xf32>
    %cst_15 = arith.constant dense<0.000000e+00> : vector<8x128xf32>
    %32 = tpu.matmul %31, %18, %cst_15 {dimension_numbers = #tpu.dot_dimension_numbers<[1], [0], [0], [1], [0, 0, 1, 1], [], []>} : vector<8x8xf32>, vector<8x128xf32>, vector<8x128xf32> -> vector<8x128xf32>
    %33 = vector.extract_strided_slice %15 {offsets = [0, 128], sizes = [8, 128], strides = [1, 1]} : vector<8x768xf32> to vector<8x128xf32>
    %34 = vector.extract_strided_slice %15 {offsets = [0, 384], sizes = [8, 128], strides = [1, 1]} : vector<8x768xf32> to vector<8x128xf32>
    %35 = vector.extract_strided_slice %15 {offsets = [0, 640], sizes = [8, 128], strides = [1, 1]} : vector<8x768xf32> to vector<8x128xf32>
    %cst_16 = arith.constant dense<0.000000e+00> : vector<8x8xf32>
    %36 = tpu.matmul %33, %34, %cst_16 {dimension_numbers = #tpu.dot_dimension_numbers<[1], [1], [0], [0], [0, 0, 1, 0], [], []>} : vector<8x128xf32>, vector<8x128xf32>, vector<8x8xf32> -> vector<8x8xf32>
    %cst_17 = arith.constant 1.250000e-01 : f32
    %37 = vector.broadcast %cst_17 : f32 to vector<8x8xf32>
    %38 = arith.mulf %36, %37 : vector<8x8xf32>
    %cst_18 = arith.constant dense<0xFF800000> : vector<8xf32>
    %39 = vector.multi_reduction <maximumf>, %38, %cst_18 [1] : vector<8x8xf32> to vector<8xf32>
    %40 = vector.shape_cast %39 : vector<8xf32> to vector<8x1xf32>
    %41 = vector.broadcast %40 : vector<8x1xf32> to vector<8x8xf32>
    %42 = arith.subf %38, %41 : vector<8x8xf32>
    %43 = math.exp %42 : vector<8x8xf32>
    %cst_19 = arith.constant dense<0.000000e+00> : vector<8xf32>
    %44 = vector.multi_reduction <add>, %43, %cst_19 [1] : vector<8x8xf32> to vector<8xf32>
    %45 = vector.shape_cast %44 : vector<8xf32> to vector<8x1xf32>
    %46 = tpu.reciprocal %45 {approx = true} : vector<8x1xf32> -> vector<8x1xf32>
    %47 = vector.broadcast %46 : vector<8x1xf32> to vector<8x8xf32>
    %48 = arith.mulf %43, %47 : vector<8x8xf32>
    %cst_20 = arith.constant dense<0.000000e+00> : vector<8x128xf32>
    %49 = tpu.matmul %48, %35, %cst_20 {dimension_numbers = #tpu.dot_dimension_numbers<[1], [0], [0], [1], [0, 0, 1, 1], [], []>} : vector<8x8xf32>, vector<8x128xf32>, vector<8x128xf32> -> vector<8x128xf32>
    %50 = tpu.concatenate %32, %49 in 1 : vector<8x128xf32>, vector<8x128xf32> -> vector<8x256xf32>
    %c0_21 = arith.constant 0 : index
    %c0_22 = arith.constant 0 : index
    %51 = vector.load %arg38[%c0_21, %c0_22] : memref<256x128xf32, #tpu.memory_space<vmem>>, vector<256x128xf32>
    %cst_23 = arith.constant dense<0.000000e+00> : vector<8x128xf32>
    %52 = tpu.matmul %50, %51, %cst_23 {dimension_numbers = #tpu.dot_dimension_numbers<[1], [0], [0], [1], [0, 0, 1, 1], [], []>} : vector<8x256xf32>, vector<256x128xf32>, vector<8x128xf32> -> vector<8x128xf32>
    %c0_24 = arith.constant 0 : index
    %c0_25 = arith.constant 0 : index
    %53 = vector.load %arg30[%c0_24, %c0_25] : memref<1x128xf32, #tpu.memory_space<vmem>>, vector<1x128xf32>
    %54 = vector.broadcast %53 : vector<1x128xf32> to vector<8x128xf32>
    %55 = arith.addf %52, %54 : vector<8x128xf32>
    %56 = arith.addf %10, %55 : vector<8x128xf32>
    %cst_26 = arith.constant dense<0.000000e+00> : vector<8xf32>
    %57 = vector.multi_reduction <add>, %56, %cst_26 [1] : vector<8x128xf32> to vector<8xf32>
    %58 = vector.shape_cast %57 : vector<8xf32> to vector<8x1xf32>
    %cst_27 = arith.constant 1.280000e+02 : f32
    %59 = vector.broadcast %cst_27 : f32 to vector<8x1xf32>
    %60 = arith.divf %58, %59 : vector<8x1xf32>
    %61 = vector.broadcast %60 : vector<8x1xf32> to vector<8x128xf32>
    %62 = arith.subf %56, %61 : vector<8x128xf32>
    %63 = arith.mulf %62, %62 : vector<8x128xf32>
    %cst_28 = arith.constant dense<0.000000e+00> : vector<8xf32>
    %64 = vector.multi_reduction <add>, %63, %cst_28 [1] : vector<8x128xf32> to vector<8xf32>
    %65 = vector.shape_cast %64 : vector<8xf32> to vector<8x1xf32>
    %cst_29 = arith.constant 1.280000e+02 : f32
    %66 = vector.broadcast %cst_29 : f32 to vector<8x1xf32>
    %67 = arith.divf %65, %66 : vector<8x1xf32>
    %68 = vector.broadcast %60 : vector<8x1xf32> to vector<8x128xf32>
    %69 = arith.subf %56, %68 : vector<8x128xf32>
    %cst_30 = arith.constant 9.99999974E-6 : f32
    %70 = vector.broadcast %cst_30 : f32 to vector<8x1xf32>
    %71 = arith.addf %67, %70 : vector<8x1xf32>
    %72 = math.rsqrt %71 : vector<8x1xf32>
    %73 = vector.broadcast %72 : vector<8x1xf32> to vector<8x128xf32>
    %74 = arith.mulf %69, %73 : vector<8x128xf32>
    %c0_31 = arith.constant 0 : index
    %c0_32 = arith.constant 0 : index
    %75 = vector.load %arg33[%c0_31, %c0_32] : memref<1x128xf32, #tpu.memory_space<vmem>>, vector<1x128xf32>
    %76 = vector.broadcast %75 : vector<1x128xf32> to vector<8x128xf32>
    %77 = arith.mulf %74, %76 : vector<8x128xf32>
    %c0_33 = arith.constant 0 : index
    %c0_34 = arith.constant 0 : index
    %78 = vector.load %arg32[%c0_33, %c0_34] : memref<1x128xf32, #tpu.memory_space<vmem>>, vector<1x128xf32>
    %79 = vector.broadcast %78 : vector<1x128xf32> to vector<8x128xf32>
    %80 = arith.addf %77, %79 : vector<8x128xf32>
    %c0_35 = arith.constant 0 : index
    %c0_36 = arith.constant 0 : index
    %81 = vector.load %arg36[%c0_35, %c0_36] : memref<128x256xf32, #tpu.memory_space<vmem>>, vector<128x256xf32>
    %cst_37 = arith.constant dense<0.000000e+00> : vector<8x256xf32>
    %82 = tpu.matmul %80, %81, %cst_37 {dimension_numbers = #tpu.dot_dimension_numbers<[1], [0], [0], [1], [0, 0, 1, 1], [], []>} : vector<8x128xf32>, vector<128x256xf32>, vector<8x256xf32> -> vector<8x256xf32>
    %c0_38 = arith.constant 0 : index
    %c0_39 = arith.constant 0 : index
    %83 = vector.load %arg28[%c0_38, %c0_39] : memref<1x256xf32, #tpu.memory_space<vmem>>, vector<1x256xf32>
    %84 = vector.broadcast %83 : vector<1x256xf32> to vector<8x256xf32>
    %85 = arith.addf %82, %84 : vector<8x256xf32>
    %cst_40 = arith.constant 0.000000e+00 : f32
    %86 = vector.broadcast %cst_40 : f32 to vector<8x256xf32>
    %87 = arith.maximumf %85, %86 : vector<8x256xf32>
    %c0_41 = arith.constant 0 : index
    %c0_42 = arith.constant 0 : index
    %88 = vector.load %arg37[%c0_41, %c0_42] : memref<256x128xf32, #tpu.memory_space<vmem>>, vector<256x128xf32>
    %cst_43 = arith.constant dense<0.000000e+00> : vector<8x128xf32>
    %89 = tpu.matmul %87, %88, %cst_43 {dimension_numbers = #tpu.dot_dimension_numbers<[1], [0], [0], [1], [0, 0, 1, 1], [], []>} : vector<8x256xf32>, vector<256x128xf32>, vector<8x128xf32> -> vector<8x128xf32>
    %c0_44 = arith.constant 0 : index
    %c0_45 = arith.constant 0 : index
    %90 = vector.load %arg29[%c0_44, %c0_45] : memref<1x128xf32, #tpu.memory_space<vmem>>, vector<1x128xf32>
    %91 = vector.broadcast %90 : vector<1x128xf32> to vector<8x128xf32>
    %92 = arith.addf %89, %91 : vector<8x128xf32>
    %93 = arith.addf %80, %92 : vector<8x128xf32>
    %cst_46 = arith.constant dense<0.000000e+00> : vector<8xf32>
    %94 = vector.multi_reduction <add>, %93, %cst_46 [1] : vector<8x128xf32> to vector<8xf32>
    %95 = vector.shape_cast %94 : vector<8xf32> to vector<8x1xf32>
    %cst_47 = arith.constant 1.280000e+02 : f32
    %96 = vector.broadcast %cst_47 : f32 to vector<8x1xf32>
    %97 = arith.divf %95, %96 : vector<8x1xf32>
    %98 = vector.broadcast %97 : vector<8x1xf32> to vector<8x128xf32>
    %99 = arith.subf %93, %98 : vector<8x128xf32>
    %100 = arith.mulf %99, %99 : vector<8x128xf32>
    %cst_48 = arith.constant dense<0.000000e+00> : vector<8xf32>
    %101 = vector.multi_reduction <add>, %100, %cst_48 [1] : vector<8x128xf32> to vector<8xf32>
    %102 = vector.shape_cast %101 : vector<8xf32> to vector<8x1xf32>
    %cst_49 = arith.constant 1.280000e+02 : f32
    %103 = vector.broadcast %cst_49 : f32 to vector<8x1xf32>
    %104 = arith.divf %102, %103 : vector<8x1xf32>
    %105 = vector.broadcast %97 : vector<8x1xf32> to vector<8x128xf32>
    %106 = arith.subf %93, %105 : vector<8x128xf32>
    %cst_50 = arith.constant 9.99999974E-6 : f32
    %107 = vector.broadcast %cst_50 : f32 to vector<8x1xf32>
    %108 = arith.addf %104, %107 : vector<8x1xf32>
    %109 = math.rsqrt %108 : vector<8x1xf32>
    %110 = vector.broadcast %109 : vector<8x1xf32> to vector<8x128xf32>
    %111 = arith.mulf %106, %110 : vector<8x128xf32>
    %c0_51 = arith.constant 0 : index
    %c0_52 = arith.constant 0 : index
    %112 = vector.load %arg35[%c0_51, %c0_52] : memref<1x128xf32, #tpu.memory_space<vmem>>, vector<1x128xf32>
    %113 = vector.broadcast %112 : vector<1x128xf32> to vector<8x128xf32>
    %114 = arith.mulf %111, %113 : vector<8x128xf32>
    %c0_53 = arith.constant 0 : index
    %c0_54 = arith.constant 0 : index
    %115 = vector.load %arg34[%c0_53, %c0_54] : memref<1x128xf32, #tpu.memory_space<vmem>>, vector<1x128xf32>
    %116 = vector.broadcast %115 : vector<1x128xf32> to vector<8x128xf32>
    %117 = arith.addf %114, %116 : vector<8x128xf32>
    %c0_55 = arith.constant 0 : index
    %c0_56 = arith.constant 0 : index
    %118 = vector.load %arg51[%c0_55, %c0_56] : memref<128x768xf32, #tpu.memory_space<vmem>>, vector<128x768xf32>
    %cst_57 = arith.constant dense<0.000000e+00> : vector<8x768xf32>
    %119 = tpu.matmul %117, %118, %cst_57 {dimension_numbers = #tpu.dot_dimension_numbers<[1], [0], [0], [1], [0, 0, 1, 1], [], []>} : vector<8x128xf32>, vector<128x768xf32>, vector<8x768xf32> -> vector<8x768xf32>
    %c0_58 = arith.constant 0 : index
    %c0_59 = arith.constant 0 : index
    %120 = vector.load %arg43[%c0_58, %c0_59] : memref<1x768xf32, #tpu.memory_space<vmem>>, vector<1x768xf32>
    %121 = vector.broadcast %120 : vector<1x768xf32> to vector<8x768xf32>
    %122 = arith.addf %119, %121 : vector<8x768xf32>
    %123 = vector.extract_strided_slice %122 {offsets = [0, 0], sizes = [8, 128], strides = [1, 1]} : vector<8x768xf32> to vector<8x128xf32>
    %124 = vector.extract_strided_slice %122 {offsets = [0, 256], sizes = [8, 128], strides = [1, 1]} : vector<8x768xf32> to vector<8x128xf32>
    %125 = vector.extract_strided_slice %122 {offsets = [0, 512], sizes = [8, 128], strides = [1, 1]} : vector<8x768xf32> to vector<8x128xf32>
    %cst_60 = arith.constant dense<0.000000e+00> : vector<8x8xf32>
    %126 = tpu.matmul %123, %124, %cst_60 {dimension_numbers = #tpu.dot_dimension_numbers<[1], [1], [0], [0], [0, 0, 1, 0], [], []>} : vector<8x128xf32>, vector<8x128xf32>, vector<8x8xf32> -> vector<8x8xf32>
    %cst_61 = arith.constant 1.250000e-01 : f32
    %127 = vector.broadcast %cst_61 : f32 to vector<8x8xf32>
    %128 = arith.mulf %126, %127 : vector<8x8xf32>
    %cst_62 = arith.constant dense<0xFF800000> : vector<8xf32>
    %129 = vector.multi_reduction <maximumf>, %128, %cst_62 [1] : vector<8x8xf32> to vector<8xf32>
    %130 = vector.shape_cast %129 : vector<8xf32> to vector<8x1xf32>
    %131 = vector.broadcast %130 : vector<8x1xf32> to vector<8x8xf32>
    %132 = arith.subf %128, %131 : vector<8x8xf32>
    %133 = math.exp %132 : vector<8x8xf32>
    %cst_63 = arith.constant dense<0.000000e+00> : vector<8xf32>
    %134 = vector.multi_reduction <add>, %133, %cst_63 [1] : vector<8x8xf32> to vector<8xf32>
    %135 = vector.shape_cast %134 : vector<8xf32> to vector<8x1xf32>
    %136 = tpu.reciprocal %135 {approx = true} : vector<8x1xf32> -> vector<8x1xf32>
    %137 = vector.broadcast %136 : vector<8x1xf32> to vector<8x8xf32>
    %138 = arith.mulf %133, %137 : vector<8x8xf32>
    %cst_64 = arith.constant dense<0.000000e+00> : vector<8x128xf32>
    %139 = tpu.matmul %138, %125, %cst_64 {dimension_numbers = #tpu.dot_dimension_numbers<[1], [0], [0], [1], [0, 0, 1, 1], [], []>} : vector<8x8xf32>, vector<8x128xf32>, vector<8x128xf32> -> vector<8x128xf32>
    %140 = vector.extract_strided_slice %122 {offsets = [0, 128], sizes = [8, 128], strides = [1, 1]} : vector<8x768xf32> to vector<8x128xf32>
    %141 = vector.extract_strided_slice %122 {offsets = [0, 384], sizes = [8, 128], strides = [1, 1]} : vector<8x768xf32> to vector<8x128xf32>
    %142 = vector.extract_strided_slice %122 {offsets = [0, 640], sizes = [8, 128], strides = [1, 1]} : vector<8x768xf32> to vector<8x128xf32>
    %cst_65 = arith.constant dense<0.000000e+00> : vector<8x8xf32>
    %143 = tpu.matmul %140, %141, %cst_65 {dimension_numbers = #tpu.dot_dimension_numbers<[1], [1], [0], [0], [0, 0, 1, 0], [], []>} : vector<8x128xf32>, vector<8x128xf32>, vector<8x8xf32> -> vector<8x8xf32>
    %cst_66 = arith.constant 1.250000e-01 : f32
    %144 = vector.broadcast %cst_66 : f32 to vector<8x8xf32>
    %145 = arith.mulf %143, %144 : vector<8x8xf32>
    %cst_67 = arith.constant dense<0xFF800000> : vector<8xf32>
    %146 = vector.multi_reduction <maximumf>, %145, %cst_67 [1] : vector<8x8xf32> to vector<8xf32>
    %147 = vector.shape_cast %146 : vector<8xf32> to vector<8x1xf32>
    %148 = vector.broadcast %147 : vector<8x1xf32> to vector<8x8xf32>
    %149 = arith.subf %145, %148 : vector<8x8xf32>
    %150 = math.exp %149 : vector<8x8xf32>
    %cst_68 = arith.constant dense<0.000000e+00> : vector<8xf32>
    %151 = vector.multi_reduction <add>, %150, %cst_68 [1] : vector<8x8xf32> to vector<8xf32>
    %152 = vector.shape_cast %151 : vector<8xf32> to vector<8x1xf32>
    %153 = tpu.reciprocal %152 {approx = true} : vector<8x1xf32> -> vector<8x1xf32>
    %154 = vector.broadcast %153 : vector<8x1xf32> to vector<8x8xf32>
    %155 = arith.mulf %150, %154 : vector<8x8xf32>
    %cst_69 = arith.constant dense<0.000000e+00> : vector<8x128xf32>
    %156 = tpu.matmul %155, %142, %cst_69 {dimension_numbers = #tpu.dot_dimension_numbers<[1], [0], [0], [1], [0, 0, 1, 1], [], []>} : vector<8x8xf32>, vector<8x128xf32>, vector<8x128xf32> -> vector<8x128xf32>
    %157 = tpu.concatenate %139, %156 in 1 : vector<8x128xf32>, vector<8x128xf32> -> vector<8x256xf32>
    %c0_70 = arith.constant 0 : index
    %c0_71 = arith.constant 0 : index
    %158 = vector.load %arg50[%c0_70, %c0_71] : memref<256x128xf32, #tpu.memory_space<vmem>>, vector<256x128xf32>
    %cst_72 = arith.constant dense<0.000000e+00> : vector<8x128xf32>
    %159 = tpu.matmul %157, %158, %cst_72 {dimension_numbers = #tpu.dot_dimension_numbers<[1], [0], [0], [1], [0, 0, 1, 1], [], []>} : vector<8x256xf32>, vector<256x128xf32>, vector<8x128xf32> -> vector<8x128xf32>
    %c0_73 = arith.constant 0 : index
    %c0_74 = arith.constant 0 : index
    %160 = vector.load %arg42[%c0_73, %c0_74] : memref<1x128xf32, #tpu.memory_space<vmem>>, vector<1x128xf32>
    %161 = vector.broadcast %160 : vector<1x128xf32> to vector<8x128xf32>
    %162 = arith.addf %159, %161 : vector<8x128xf32>
    %163 = arith.addf %117, %162 : vector<8x128xf32>
    %cst_75 = arith.constant dense<0.000000e+00> : vector<8xf32>
    %164 = vector.multi_reduction <add>, %163, %cst_75 [1] : vector<8x128xf32> to vector<8xf32>
    %165 = vector.shape_cast %164 : vector<8xf32> to vector<8x1xf32>
    %cst_76 = arith.constant 1.280000e+02 : f32
    %166 = vector.broadcast %cst_76 : f32 to vector<8x1xf32>
    %167 = arith.divf %165, %166 : vector<8x1xf32>
    %168 = vector.broadcast %167 : vector<8x1xf32> to vector<8x128xf32>
    %169 = arith.subf %163, %168 : vector<8x128xf32>
    %170 = arith.mulf %169, %169 : vector<8x128xf32>
    %cst_77 = arith.constant dense<0.000000e+00> : vector<8xf32>
    %171 = vector.multi_reduction <add>, %170, %cst_77 [1] : vector<8x128xf32> to vector<8xf32>
    %172 = vector.shape_cast %171 : vector<8xf32> to vector<8x1xf32>
    %cst_78 = arith.constant 1.280000e+02 : f32
    %173 = vector.broadcast %cst_78 : f32 to vector<8x1xf32>
    %174 = arith.divf %172, %173 : vector<8x1xf32>
    %175 = vector.broadcast %167 : vector<8x1xf32> to vector<8x128xf32>
    %176 = arith.subf %163, %175 : vector<8x128xf32>
    %cst_79 = arith.constant 9.99999974E-6 : f32
    %177 = vector.broadcast %cst_79 : f32 to vector<8x1xf32>
    %178 = arith.addf %174, %177 : vector<8x1xf32>
    %179 = math.rsqrt %178 : vector<8x1xf32>
    %180 = vector.broadcast %179 : vector<8x1xf32> to vector<8x128xf32>
    %181 = arith.mulf %176, %180 : vector<8x128xf32>
    %c0_80 = arith.constant 0 : index
    %c0_81 = arith.constant 0 : index
    %182 = vector.load %arg45[%c0_80, %c0_81] : memref<1x128xf32, #tpu.memory_space<vmem>>, vector<1x128xf32>
    %183 = vector.broadcast %182 : vector<1x128xf32> to vector<8x128xf32>
    %184 = arith.mulf %181, %183 : vector<8x128xf32>
    %c0_82 = arith.constant 0 : index
    %c0_83 = arith.constant 0 : index
    %185 = vector.load %arg44[%c0_82, %c0_83] : memref<1x128xf32, #tpu.memory_space<vmem>>, vector<1x128xf32>
    %186 = vector.broadcast %185 : vector<1x128xf32> to vector<8x128xf32>
    %187 = arith.addf %184, %186 : vector<8x128xf32>
    %c0_84 = arith.constant 0 : index
    %c0_85 = arith.constant 0 : index
    %188 = vector.load %arg48[%c0_84, %c0_85] : memref<128x256xf32, #tpu.memory_space<vmem>>, vector<128x256xf32>
    %cst_86 = arith.constant dense<0.000000e+00> : vector<8x256xf32>
    %189 = tpu.matmul %187, %188, %cst_86 {dimension_numbers = #tpu.dot_dimension_numbers<[1], [0], [0], [1], [0, 0, 1, 1], [], []>} : vector<8x128xf32>, vector<128x256xf32>, vector<8x256xf32> -> vector<8x256xf32>
    %c0_87 = arith.constant 0 : index
    %c0_88 = arith.constant 0 : index
    %190 = vector.load %arg40[%c0_87, %c0_88] : memref<1x256xf32, #tpu.memory_space<vmem>>, vector<1x256xf32>
    %191 = vector.broadcast %190 : vector<1x256xf32> to vector<8x256xf32>
    %192 = arith.addf %189, %191 : vector<8x256xf32>
    %cst_89 = arith.constant 0.000000e+00 : f32
    %193 = vector.broadcast %cst_89 : f32 to vector<8x256xf32>
    %194 = arith.maximumf %192, %193 : vector<8x256xf32>
    %c0_90 = arith.constant 0 : index
    %c0_91 = arith.constant 0 : index
    %195 = vector.load %arg49[%c0_90, %c0_91] : memref<256x128xf32, #tpu.memory_space<vmem>>, vector<256x128xf32>
    %cst_92 = arith.constant dense<0.000000e+00> : vector<8x128xf32>
    %196 = tpu.matmul %194, %195, %cst_92 {dimension_numbers = #tpu.dot_dimension_numbers<[1], [0], [0], [1], [0, 0, 1, 1], [], []>} : vector<8x256xf32>, vector<256x128xf32>, vector<8x128xf32> -> vector<8x128xf32>
    %c0_93 = arith.constant 0 : index
    %c0_94 = arith.constant 0 : index
    %197 = vector.load %arg41[%c0_93, %c0_94] : memref<1x128xf32, #tpu.memory_space<vmem>>, vector<1x128xf32>
    %198 = vector.broadcast %197 : vector<1x128xf32> to vector<8x128xf32>
    %199 = arith.addf %196, %198 : vector<8x128xf32>
    %200 = arith.addf %187, %199 : vector<8x128xf32>
    %cst_95 = arith.constant dense<0.000000e+00> : vector<8xf32>
    %201 = vector.multi_reduction <add>, %200, %cst_95 [1] : vector<8x128xf32> to vector<8xf32>
    %202 = vector.shape_cast %201 : vector<8xf32> to vector<8x1xf32>
    %cst_96 = arith.constant 1.280000e+02 : f32
    %203 = vector.broadcast %cst_96 : f32 to vector<8x1xf32>
    %204 = arith.divf %202, %203 : vector<8x1xf32>
    %205 = vector.broadcast %204 : vector<8x1xf32> to vector<8x128xf32>
    %206 = arith.subf %200, %205 : vector<8x128xf32>
    %207 = arith.mulf %206, %206 : vector<8x128xf32>
    %cst_97 = arith.constant dense<0.000000e+00> : vector<8xf32>
    %208 = vector.multi_reduction <add>, %207, %cst_97 [1] : vector<8x128xf32> to vector<8xf32>
    %209 = vector.shape_cast %208 : vector<8xf32> to vector<8x1xf32>
    %cst_98 = arith.constant 1.280000e+02 : f32
    %210 = vector.broadcast %cst_98 : f32 to vector<8x1xf32>
    %211 = arith.divf %209, %210 : vector<8x1xf32>
    %212 = vector.broadcast %204 : vector<8x1xf32> to vector<8x128xf32>
    %213 = arith.subf %200, %212 : vector<8x128xf32>
    %cst_99 = arith.constant 9.99999974E-6 : f32
    %214 = vector.broadcast %cst_99 : f32 to vector<8x1xf32>
    %215 = arith.addf %211, %214 : vector<8x1xf32>
    %216 = math.rsqrt %215 : vector<8x1xf32>
    %217 = vector.broadcast %216 : vector<8x1xf32> to vector<8x128xf32>
    %218 = arith.mulf %213, %217 : vector<8x128xf32>
    %c0_100 = arith.constant 0 : index
    %c0_101 = arith.constant 0 : index
    %219 = vector.load %arg47[%c0_100, %c0_101] : memref<1x128xf32, #tpu.memory_space<vmem>>, vector<1x128xf32>
    %220 = vector.broadcast %219 : vector<1x128xf32> to vector<8x128xf32>
    %221 = arith.mulf %218, %220 : vector<8x128xf32>
    %c0_102 = arith.constant 0 : index
    %c0_103 = arith.constant 0 : index
    %222 = vector.load %arg46[%c0_102, %c0_103] : memref<1x128xf32, #tpu.memory_space<vmem>>, vector<1x128xf32>
    %223 = vector.broadcast %222 : vector<1x128xf32> to vector<8x128xf32>
    %224 = arith.addf %221, %223 : vector<8x128xf32>
    %c0_104 = arith.constant 0 : index
    %c0_105 = arith.constant 0 : index
    %225 = vector.load %arg81[%c0_104, %c0_105] : memref<128x384xf32, #tpu.memory_space<vmem>>, vector<128x384xf32>
    %cst_106 = arith.constant dense<0.000000e+00> : vector<8x384xf32>
    %226 = tpu.matmul %224, %225, %cst_106 {dimension_numbers = #tpu.dot_dimension_numbers<[1], [0], [0], [1], [0, 0, 1, 1], [], []>} : vector<8x128xf32>, vector<128x384xf32>, vector<8x384xf32> -> vector<8x384xf32>
    %c0_107 = arith.constant 0 : index
    %c0_108 = arith.constant 0 : index
    %227 = vector.load %arg80[%c0_107, %c0_108] : memref<1x384xf32, #tpu.memory_space<vmem>>, vector<1x384xf32>
    %228 = vector.broadcast %227 : vector<1x384xf32> to vector<8x384xf32>
    %229 = arith.addf %226, %228 : vector<8x384xf32>
    %cst_109 = arith.constant 0.000000e+00 : f32
    %230 = vector.broadcast %cst_109 : f32 to vector<8x384xf32>
    %231 = arith.maximumf %229, %230 : vector<8x384xf32>
    %232 = vector.extract_strided_slice %231 {offsets = [0, 0], sizes = [8, 128], strides = [1, 1]} : vector<8x384xf32> to vector<8x128xf32>
    %cst_110 = arith.constant dense<0.000000e+00> : vector<8xf32>
    %233 = vector.multi_reduction <add>, %232, %cst_110 [1] : vector<8x128xf32> to vector<8xf32>
    %234 = vector.shape_cast %233 : vector<8xf32> to vector<8x1xf32>
    %cst_111 = arith.constant 1.280000e+02 : f32
    %235 = vector.broadcast %cst_111 : f32 to vector<8x1xf32>
    %236 = arith.divf %234, %235 : vector<8x1xf32>
    %237 = vector.broadcast %236 : vector<8x1xf32> to vector<8x128xf32>
    %238 = arith.subf %232, %237 : vector<8x128xf32>
    %239 = arith.mulf %238, %238 : vector<8x128xf32>
    %cst_112 = arith.constant dense<0.000000e+00> : vector<8xf32>
    %240 = vector.multi_reduction <add>, %239, %cst_112 [1] : vector<8x128xf32> to vector<8xf32>
    %241 = vector.shape_cast %240 : vector<8xf32> to vector<8x1xf32>
    %cst_113 = arith.constant 1.280000e+02 : f32
    %242 = vector.broadcast %cst_113 : f32 to vector<8x1xf32>
    %243 = arith.divf %241, %242 : vector<8x1xf32>
    %244 = vector.broadcast %236 : vector<8x1xf32> to vector<8x128xf32>
    %245 = arith.subf %232, %244 : vector<8x128xf32>
    %cst_114 = arith.constant 9.99999974E-6 : f32
    %246 = vector.broadcast %cst_114 : f32 to vector<8x1xf32>
    %247 = arith.addf %243, %246 : vector<8x1xf32>
    %248 = math.rsqrt %247 : vector<8x1xf32>
    %249 = vector.broadcast %248 : vector<8x1xf32> to vector<8x128xf32>
    %250 = arith.mulf %245, %249 : vector<8x128xf32>
    %c0_115 = arith.constant 0 : index
    %c0_116 = arith.constant 0 : index
    %251 = vector.load %arg59[%c0_115, %c0_116] : memref<1x128xf32, #tpu.memory_space<vmem>>, vector<1x128xf32>
    %252 = vector.broadcast %251 : vector<1x128xf32> to vector<8x128xf32>
    %253 = arith.mulf %250, %252 : vector<8x128xf32>
    %c0_117 = arith.constant 0 : index
    %c0_118 = arith.constant 0 : index
    %254 = vector.load %arg58[%c0_117, %c0_118] : memref<1x128xf32, #tpu.memory_space<vmem>>, vector<1x128xf32>
    %255 = vector.broadcast %254 : vector<1x128xf32> to vector<8x128xf32>
    %256 = arith.addf %253, %255 : vector<8x128xf32>
    %c0_119 = arith.constant 0 : index
    %c0_120 = arith.constant 0 : index
    %257 = vector.load %arg62[%c0_119, %c0_120] : memref<128x128xf32, #tpu.memory_space<vmem>>, vector<128x128xf32>
    %cst_121 = arith.constant dense<0.000000e+00> : vector<8x128xf32>
    %258 = tpu.matmul %256, %257, %cst_121 {dimension_numbers = #tpu.dot_dimension_numbers<[1], [0], [0], [1], [0, 0, 1, 1], [], []>} : vector<8x128xf32>, vector<128x128xf32>, vector<8x128xf32> -> vector<8x128xf32>
    %c0_122 = arith.constant 0 : index
    %c0_123 = arith.constant 0 : index
    %259 = vector.load %arg56[%c0_122, %c0_123] : memref<1x128xf32, #tpu.memory_space<vmem>>, vector<1x128xf32>
    %260 = vector.broadcast %259 : vector<1x128xf32> to vector<8x128xf32>
    %261 = arith.addf %258, %260 : vector<8x128xf32>
    %cst_124 = arith.constant 0.000000e+00 : f32
    %262 = vector.broadcast %cst_124 : f32 to vector<8x128xf32>
    %263 = arith.maximumf %261, %262 : vector<8x128xf32>
    %cst_125 = arith.constant dense<0.000000e+00> : vector<8xf32>
    %264 = vector.multi_reduction <add>, %263, %cst_125 [1] : vector<8x128xf32> to vector<8xf32>
    %265 = vector.shape_cast %264 : vector<8xf32> to vector<8x1xf32>
    %cst_126 = arith.constant 1.280000e+02 : f32
    %266 = vector.broadcast %cst_126 : f32 to vector<8x1xf32>
    %267 = arith.divf %265, %266 : vector<8x1xf32>
    %268 = vector.broadcast %267 : vector<8x1xf32> to vector<8x128xf32>
    %269 = arith.subf %263, %268 : vector<8x128xf32>
    %270 = arith.mulf %269, %269 : vector<8x128xf32>
    %cst_127 = arith.constant dense<0.000000e+00> : vector<8xf32>
    %271 = vector.multi_reduction <add>, %270, %cst_127 [1] : vector<8x128xf32> to vector<8xf32>
    %272 = vector.shape_cast %271 : vector<8xf32> to vector<8x1xf32>
    %cst_128 = arith.constant 1.280000e+02 : f32
    %273 = vector.broadcast %cst_128 : f32 to vector<8x1xf32>
    %274 = arith.divf %272, %273 : vector<8x1xf32>
    %275 = vector.broadcast %267 : vector<8x1xf32> to vector<8x128xf32>
    %276 = arith.subf %263, %275 : vector<8x128xf32>
    %cst_129 = arith.constant 9.99999974E-6 : f32
    %277 = vector.broadcast %cst_129 : f32 to vector<8x1xf32>
    %278 = arith.addf %274, %277 : vector<8x1xf32>
    %279 = math.rsqrt %278 : vector<8x1xf32>
    %280 = vector.broadcast %279 : vector<8x1xf32> to vector<8x128xf32>
    %281 = arith.mulf %276, %280 : vector<8x128xf32>
    %c0_130 = arith.constant 0 : index
    %c0_131 = arith.constant 0 : index
    %282 = vector.load %arg61[%c0_130, %c0_131] : memref<1x128xf32, #tpu.memory_space<vmem>>, vector<1x128xf32>
    %283 = vector.broadcast %282 : vector<1x128xf32> to vector<8x128xf32>
    %284 = arith.mulf %281, %283 : vector<8x128xf32>
    %c0_132 = arith.constant 0 : index
    %c0_133 = arith.constant 0 : index
    %285 = vector.load %arg60[%c0_132, %c0_133] : memref<1x128xf32, #tpu.memory_space<vmem>>, vector<1x128xf32>
    %286 = vector.broadcast %285 : vector<1x128xf32> to vector<8x128xf32>
    %287 = arith.addf %284, %286 : vector<8x128xf32>
    %c0_134 = arith.constant 0 : index
    %c0_135 = arith.constant 0 : index
    %288 = vector.load %arg63[%c0_134, %c0_135] : memref<128x1xf32, #tpu.memory_space<vmem>>, vector<128x1xf32>
    %cst_136 = arith.constant dense<0.000000e+00> : vector<8x1xf32>
    %289 = tpu.matmul %287, %288, %cst_136 {dimension_numbers = #tpu.dot_dimension_numbers<[1], [0], [0], [1], [0, 0, 1, 1], [], []>} : vector<8x128xf32>, vector<128x1xf32>, vector<8x1xf32> -> vector<8x1xf32>
    %c0_137 = arith.constant 0 : index
    %c0_138 = arith.constant 0 : index
    %290 = vector.load %arg57[%c0_137, %c0_138] : memref<1x1xf32, #tpu.memory_space<vmem>>, vector<1x1xf32>
    %291 = vector.broadcast %290 : vector<1x1xf32> to vector<8x1xf32>
    %292 = arith.addf %289, %291 : vector<8x1xf32>
    %293 = vector.extract_strided_slice %231 {offsets = [0, 128], sizes = [8, 128], strides = [1, 1]} : vector<8x384xf32> to vector<8x128xf32>
    %cst_139 = arith.constant dense<0.000000e+00> : vector<8xf32>
    %294 = vector.multi_reduction <add>, %293, %cst_139 [1] : vector<8x128xf32> to vector<8xf32>
    %295 = vector.shape_cast %294 : vector<8xf32> to vector<8x1xf32>
    %cst_140 = arith.constant 1.280000e+02 : f32
    %296 = vector.broadcast %cst_140 : f32 to vector<8x1xf32>
    %297 = arith.divf %295, %296 : vector<8x1xf32>
    %298 = vector.broadcast %297 : vector<8x1xf32> to vector<8x128xf32>
    %299 = arith.subf %293, %298 : vector<8x128xf32>
    %300 = arith.mulf %299, %299 : vector<8x128xf32>
    %cst_141 = arith.constant dense<0.000000e+00> : vector<8xf32>
    %301 = vector.multi_reduction <add>, %300, %cst_141 [1] : vector<8x128xf32> to vector<8xf32>
    %302 = vector.shape_cast %301 : vector<8xf32> to vector<8x1xf32>
    %cst_142 = arith.constant 1.280000e+02 : f32
    %303 = vector.broadcast %cst_142 : f32 to vector<8x1xf32>
    %304 = arith.divf %302, %303 : vector<8x1xf32>
    %305 = vector.broadcast %297 : vector<8x1xf32> to vector<8x128xf32>
    %306 = arith.subf %293, %305 : vector<8x128xf32>
    %cst_143 = arith.constant 9.99999974E-6 : f32
    %307 = vector.broadcast %cst_143 : f32 to vector<8x1xf32>
    %308 = arith.addf %304, %307 : vector<8x1xf32>
    %309 = math.rsqrt %308 : vector<8x1xf32>
    %310 = vector.broadcast %309 : vector<8x1xf32> to vector<8x128xf32>
    %311 = arith.mulf %306, %310 : vector<8x128xf32>
    %c0_144 = arith.constant 0 : index
    %c0_145 = arith.constant 0 : index
    %312 = vector.load %arg67[%c0_144, %c0_145] : memref<1x128xf32, #tpu.memory_space<vmem>>, vector<1x128xf32>
    %313 = vector.broadcast %312 : vector<1x128xf32> to vector<8x128xf32>
    %314 = arith.mulf %311, %313 : vector<8x128xf32>
    %c0_146 = arith.constant 0 : index
    %c0_147 = arith.constant 0 : index
    %315 = vector.load %arg66[%c0_146, %c0_147] : memref<1x128xf32, #tpu.memory_space<vmem>>, vector<1x128xf32>
    %316 = vector.broadcast %315 : vector<1x128xf32> to vector<8x128xf32>
    %317 = arith.addf %314, %316 : vector<8x128xf32>
    %c0_148 = arith.constant 0 : index
    %c0_149 = arith.constant 0 : index
    %318 = vector.load %arg70[%c0_148, %c0_149] : memref<128x128xf32, #tpu.memory_space<vmem>>, vector<128x128xf32>
    %cst_150 = arith.constant dense<0.000000e+00> : vector<8x128xf32>
    %319 = tpu.matmul %317, %318, %cst_150 {dimension_numbers = #tpu.dot_dimension_numbers<[1], [0], [0], [1], [0, 0, 1, 1], [], []>} : vector<8x128xf32>, vector<128x128xf32>, vector<8x128xf32> -> vector<8x128xf32>
    %c0_151 = arith.constant 0 : index
    %c0_152 = arith.constant 0 : index
    %320 = vector.load %arg64[%c0_151, %c0_152] : memref<1x128xf32, #tpu.memory_space<vmem>>, vector<1x128xf32>
    %321 = vector.broadcast %320 : vector<1x128xf32> to vector<8x128xf32>
    %322 = arith.addf %319, %321 : vector<8x128xf32>
    %cst_153 = arith.constant 0.000000e+00 : f32
    %323 = vector.broadcast %cst_153 : f32 to vector<8x128xf32>
    %324 = arith.maximumf %322, %323 : vector<8x128xf32>
    %cst_154 = arith.constant dense<0.000000e+00> : vector<8xf32>
    %325 = vector.multi_reduction <add>, %324, %cst_154 [1] : vector<8x128xf32> to vector<8xf32>
    %326 = vector.shape_cast %325 : vector<8xf32> to vector<8x1xf32>
    %cst_155 = arith.constant 1.280000e+02 : f32
    %327 = vector.broadcast %cst_155 : f32 to vector<8x1xf32>
    %328 = arith.divf %326, %327 : vector<8x1xf32>
    %329 = vector.broadcast %328 : vector<8x1xf32> to vector<8x128xf32>
    %330 = arith.subf %324, %329 : vector<8x128xf32>
    %331 = arith.mulf %330, %330 : vector<8x128xf32>
    %cst_156 = arith.constant dense<0.000000e+00> : vector<8xf32>
    %332 = vector.multi_reduction <add>, %331, %cst_156 [1] : vector<8x128xf32> to vector<8xf32>
    %333 = vector.shape_cast %332 : vector<8xf32> to vector<8x1xf32>
    %cst_157 = arith.constant 1.280000e+02 : f32
    %334 = vector.broadcast %cst_157 : f32 to vector<8x1xf32>
    %335 = arith.divf %333, %334 : vector<8x1xf32>
    %336 = vector.broadcast %328 : vector<8x1xf32> to vector<8x128xf32>
    %337 = arith.subf %324, %336 : vector<8x128xf32>
    %cst_158 = arith.constant 9.99999974E-6 : f32
    %338 = vector.broadcast %cst_158 : f32 to vector<8x1xf32>
    %339 = arith.addf %335, %338 : vector<8x1xf32>
    %340 = math.rsqrt %339 : vector<8x1xf32>
    %341 = vector.broadcast %340 : vector<8x1xf32> to vector<8x128xf32>
    %342 = arith.mulf %337, %341 : vector<8x128xf32>
    %c0_159 = arith.constant 0 : index
    %c0_160 = arith.constant 0 : index
    %343 = vector.load %arg69[%c0_159, %c0_160] : memref<1x128xf32, #tpu.memory_space<vmem>>, vector<1x128xf32>
    %344 = vector.broadcast %343 : vector<1x128xf32> to vector<8x128xf32>
    %345 = arith.mulf %342, %344 : vector<8x128xf32>
    %c0_161 = arith.constant 0 : index
    %c0_162 = arith.constant 0 : index
    %346 = vector.load %arg68[%c0_161, %c0_162] : memref<1x128xf32, #tpu.memory_space<vmem>>, vector<1x128xf32>
    %347 = vector.broadcast %346 : vector<1x128xf32> to vector<8x128xf32>
    %348 = arith.addf %345, %347 : vector<8x128xf32>
    %c0_163 = arith.constant 0 : index
    %c0_164 = arith.constant 0 : index
    %349 = vector.load %arg71[%c0_163, %c0_164] : memref<128x1xf32, #tpu.memory_space<vmem>>, vector<128x1xf32>
    %cst_165 = arith.constant dense<0.000000e+00> : vector<8x1xf32>
    %350 = tpu.matmul %348, %349, %cst_165 {dimension_numbers = #tpu.dot_dimension_numbers<[1], [0], [0], [1], [0, 0, 1, 1], [], []>} : vector<8x128xf32>, vector<128x1xf32>, vector<8x1xf32> -> vector<8x1xf32>
    %c0_166 = arith.constant 0 : index
    %c0_167 = arith.constant 0 : index
    %351 = vector.load %arg65[%c0_166, %c0_167] : memref<1x1xf32, #tpu.memory_space<vmem>>, vector<1x1xf32>
    %352 = vector.broadcast %351 : vector<1x1xf32> to vector<8x1xf32>
    %353 = arith.addf %350, %352 : vector<8x1xf32>
    %354 = vector.extract_strided_slice %231 {offsets = [0, 256], sizes = [8, 128], strides = [1, 1]} : vector<8x384xf32> to vector<8x128xf32>
    %cst_168 = arith.constant dense<0.000000e+00> : vector<8xf32>
    %355 = vector.multi_reduction <add>, %354, %cst_168 [1] : vector<8x128xf32> to vector<8xf32>
    %356 = vector.shape_cast %355 : vector<8xf32> to vector<8x1xf32>
    %cst_169 = arith.constant 1.280000e+02 : f32
    %357 = vector.broadcast %cst_169 : f32 to vector<8x1xf32>
    %358 = arith.divf %356, %357 : vector<8x1xf32>
    %359 = vector.broadcast %358 : vector<8x1xf32> to vector<8x128xf32>
    %360 = arith.subf %354, %359 : vector<8x128xf32>
    %361 = arith.mulf %360, %360 : vector<8x128xf32>
    %cst_170 = arith.constant dense<0.000000e+00> : vector<8xf32>
    %362 = vector.multi_reduction <add>, %361, %cst_170 [1] : vector<8x128xf32> to vector<8xf32>
    %363 = vector.shape_cast %362 : vector<8xf32> to vector<8x1xf32>
    %cst_171 = arith.constant 1.280000e+02 : f32
    %364 = vector.broadcast %cst_171 : f32 to vector<8x1xf32>
    %365 = arith.divf %363, %364 : vector<8x1xf32>
    %366 = vector.broadcast %358 : vector<8x1xf32> to vector<8x128xf32>
    %367 = arith.subf %354, %366 : vector<8x128xf32>
    %cst_172 = arith.constant 9.99999974E-6 : f32
    %368 = vector.broadcast %cst_172 : f32 to vector<8x1xf32>
    %369 = arith.addf %365, %368 : vector<8x1xf32>
    %370 = math.rsqrt %369 : vector<8x1xf32>
    %371 = vector.broadcast %370 : vector<8x1xf32> to vector<8x128xf32>
    %372 = arith.mulf %367, %371 : vector<8x128xf32>
    %c0_173 = arith.constant 0 : index
    %c0_174 = arith.constant 0 : index
    %373 = vector.load %arg75[%c0_173, %c0_174] : memref<1x128xf32, #tpu.memory_space<vmem>>, vector<1x128xf32>
    %374 = vector.broadcast %373 : vector<1x128xf32> to vector<8x128xf32>
    %375 = arith.mulf %372, %374 : vector<8x128xf32>
    %c0_175 = arith.constant 0 : index
    %c0_176 = arith.constant 0 : index
    %376 = vector.load %arg74[%c0_175, %c0_176] : memref<1x128xf32, #tpu.memory_space<vmem>>, vector<1x128xf32>
    %377 = vector.broadcast %376 : vector<1x128xf32> to vector<8x128xf32>
    %378 = arith.addf %375, %377 : vector<8x128xf32>
    %c0_177 = arith.constant 0 : index
    %c0_178 = arith.constant 0 : index
    %379 = vector.load %arg78[%c0_177, %c0_178] : memref<128x128xf32, #tpu.memory_space<vmem>>, vector<128x128xf32>
    %cst_179 = arith.constant dense<0.000000e+00> : vector<8x128xf32>
    %380 = tpu.matmul %378, %379, %cst_179 {dimension_numbers = #tpu.dot_dimension_numbers<[1], [0], [0], [1], [0, 0, 1, 1], [], []>} : vector<8x128xf32>, vector<128x128xf32>, vector<8x128xf32> -> vector<8x128xf32>
    %c0_180 = arith.constant 0 : index
    %c0_181 = arith.constant 0 : index
    %381 = vector.load %arg72[%c0_180, %c0_181] : memref<1x128xf32, #tpu.memory_space<vmem>>, vector<1x128xf32>
    %382 = vector.broadcast %381 : vector<1x128xf32> to vector<8x128xf32>
    %383 = arith.addf %380, %382 : vector<8x128xf32>
    %cst_182 = arith.constant 0.000000e+00 : f32
    %384 = vector.broadcast %cst_182 : f32 to vector<8x128xf32>
    %385 = arith.maximumf %383, %384 : vector<8x128xf32>
    %cst_183 = arith.constant dense<0.000000e+00> : vector<8xf32>
    %386 = vector.multi_reduction <add>, %385, %cst_183 [1] : vector<8x128xf32> to vector<8xf32>
    %387 = vector.shape_cast %386 : vector<8xf32> to vector<8x1xf32>
    %cst_184 = arith.constant 1.280000e+02 : f32
    %388 = vector.broadcast %cst_184 : f32 to vector<8x1xf32>
    %389 = arith.divf %387, %388 : vector<8x1xf32>
    %390 = vector.broadcast %389 : vector<8x1xf32> to vector<8x128xf32>
    %391 = arith.subf %385, %390 : vector<8x128xf32>
    %392 = arith.mulf %391, %391 : vector<8x128xf32>
    %cst_185 = arith.constant dense<0.000000e+00> : vector<8xf32>
    %393 = vector.multi_reduction <add>, %392, %cst_185 [1] : vector<8x128xf32> to vector<8xf32>
    %394 = vector.shape_cast %393 : vector<8xf32> to vector<8x1xf32>
    %cst_186 = arith.constant 1.280000e+02 : f32
    %395 = vector.broadcast %cst_186 : f32 to vector<8x1xf32>
    %396 = arith.divf %394, %395 : vector<8x1xf32>
    %397 = vector.broadcast %389 : vector<8x1xf32> to vector<8x128xf32>
    %398 = arith.subf %385, %397 : vector<8x128xf32>
    %cst_187 = arith.constant 9.99999974E-6 : f32
    %399 = vector.broadcast %cst_187 : f32 to vector<8x1xf32>
    %400 = arith.addf %396, %399 : vector<8x1xf32>
    %401 = math.rsqrt %400 : vector<8x1xf32>
    %402 = vector.broadcast %401 : vector<8x1xf32> to vector<8x128xf32>
    %403 = arith.mulf %398, %402 : vector<8x128xf32>
    %c0_188 = arith.constant 0 : index
    %c0_189 = arith.constant 0 : index
    %404 = vector.load %arg77[%c0_188, %c0_189] : memref<1x128xf32, #tpu.memory_space<vmem>>, vector<1x128xf32>
    %405 = vector.broadcast %404 : vector<1x128xf32> to vector<8x128xf32>
    %406 = arith.mulf %403, %405 : vector<8x128xf32>
    %c0_190 = arith.constant 0 : index
    %c0_191 = arith.constant 0 : index
    %407 = vector.load %arg76[%c0_190, %c0_191] : memref<1x128xf32, #tpu.memory_space<vmem>>, vector<1x128xf32>
    %408 = vector.broadcast %407 : vector<1x128xf32> to vector<8x128xf32>
    %409 = arith.addf %406, %408 : vector<8x128xf32>
    %c0_192 = arith.constant 0 : index
    %c0_193 = arith.constant 0 : index
    %410 = vector.load %arg79[%c0_192, %c0_193] : memref<128x1xf32, #tpu.memory_space<vmem>>, vector<128x1xf32>
    %cst_194 = arith.constant dense<0.000000e+00> : vector<8x1xf32>
    %411 = tpu.matmul %409, %410, %cst_194 {dimension_numbers = #tpu.dot_dimension_numbers<[1], [0], [0], [1], [0, 0, 1, 1], [], []>} : vector<8x128xf32>, vector<128x1xf32>, vector<8x1xf32> -> vector<8x1xf32>
    %c0_195 = arith.constant 0 : index
    %c0_196 = arith.constant 0 : index
    %412 = vector.load %arg73[%c0_195, %c0_196] : memref<1x1xf32, #tpu.memory_space<vmem>>, vector<1x1xf32>
    %413 = vector.broadcast %412 : vector<1x1xf32> to vector<8x1xf32>
    %414 = arith.addf %411, %413 : vector<8x1xf32>
    %c0_197 = arith.constant 0 : index
    %c0_198 = arith.constant 0 : index
    %415 = vector.load %arg53[%c0_197, %c0_198] : memref<1x128xf32, #tpu.memory_space<vmem>>, vector<1x128xf32>
    %416 = vector.broadcast %353 : vector<8x1xf32> to vector<8x128xf32>
    %417 = vector.broadcast %415 : vector<1x128xf32> to vector<8x128xf32>
    %418 = arith.mulf %416, %417 : vector<8x128xf32>
    %419 = arith.addf %224, %418 : vector<8x128xf32>
    %c0_199 = arith.constant 0 : index
    %c0_200 = arith.constant 0 : index
    %420 = vector.load %arg52[%c0_199, %c0_200] : memref<1x128xf32, #tpu.memory_space<vmem>>, vector<1x128xf32>
    %421 = vector.broadcast %414 : vector<8x1xf32> to vector<8x128xf32>
    %422 = vector.broadcast %420 : vector<1x128xf32> to vector<8x128xf32>
    %423 = arith.mulf %421, %422 : vector<8x128xf32>
    %424 = arith.addf %419, %423 : vector<8x128xf32>
    %425 = math.exp %292 : vector<8x1xf32>
    %cst_201 = arith.constant 1.000000e+00 : f32
    %426 = vector.broadcast %cst_201 : f32 to vector<8x1xf32>
    %427 = arith.subf %425, %426 : vector<8x1xf32>
    %cst_202 = arith.constant 5.000000e-01 : f32
    %428 = vector.broadcast %cst_202 : f32 to vector<8x1xf32>
    %429 = arith.addf %427, %428 : vector<8x1xf32>
    %430 = math.floor %429 : vector<8x1xf32>
    %cst_203 = arith.constant 1.000000e+00 : f32
    %cst_204 = arith.constant 4.000000e+00 : f32
    %431 = vector.broadcast %cst_203 : f32 to vector<8x1xf32>
    %432 = arith.maximumf %431, %430 : vector<8x1xf32>
    %433 = vector.broadcast %cst_204 : f32 to vector<8x1xf32>
    %434 = arith.minimumf %433, %432 : vector<8x1xf32>
    %435 = tpu.iota {dimensions = array<i32: 1>} : vector<8x8xi32>
    %436 = tpu.iota {dimensions = array<i32: 0>} : vector<8x8xi32>
    %437 = arith.cmpi sle, %435, %436 : vector<8x8xi32>
    %438 = arith.extui %437 : vector<8x8xi1> to vector<8x8xi32>
    %439 = arith.sitofp %438 : vector<8x8xi32> to vector<8x8xf32>
    %cst_205 = arith.constant dense<0.000000e+00> : vector<8x1xf32>
    %440 = tpu.matmul %439, %434, %cst_205 {dimension_numbers = #tpu.dot_dimension_numbers<[1], [0], [0], [1], [0, 0, 1, 1], [], []>} : vector<8x8xf32>, vector<8x1xf32>, vector<8x1xf32> -> vector<8x1xf32>
    %441 = arith.subf %440, %434 : vector<8x1xf32>
    %442 = tpu.iota {dimensions = array<i32: 1>} : vector<8x32xi32>
    %443 = arith.sitofp %442 : vector<8x32xi32> to vector<8x32xf32>
    %444 = vector.broadcast %441 : vector<8x1xf32> to vector<8x32xf32>
    %445 = arith.cmpf oge, %443, %444 : vector<8x32xf32>
    %446 = vector.broadcast %440 : vector<8x1xf32> to vector<8x32xf32>
    %447 = arith.cmpf olt, %443, %446 : vector<8x32xf32>
    %448 = arith.andi %445, %447 : vector<8x32xi1>
    %449 = arith.extui %448 : vector<8x32xi1> to vector<8x32xi32>
    %450 = arith.sitofp %449 : vector<8x32xi32> to vector<8x32xf32>
    %451 = tpu.transpose %450, [1, 0] : vector<8x32xf32> -> vector<32x8xf32>
    %cst_206 = arith.constant dense<0.000000e+00> : vector<32x128xf32>
    %452 = tpu.matmul %451, %424, %cst_206 {dimension_numbers = #tpu.dot_dimension_numbers<[1], [0], [0], [1], [0, 0, 1, 1], [], []>} : vector<32x8xf32>, vector<8x128xf32>, vector<32x128xf32> -> vector<32x128xf32>
    %c0_207 = arith.constant 0 : index
    %c0_208 = arith.constant 0 : index
    %453 = vector.load %arg54[%c0_207, %c0_208] : memref<32x128xf32, #tpu.memory_space<vmem>>, vector<32x128xf32>
    %454 = arith.addf %452, %453 : vector<32x128xf32>
    %cst_209 = arith.constant dense<0.000000e+00> : vector<1xf32>
    %455 = vector.multi_reduction <add>, %434, %cst_209 [0] : vector<8x1xf32> to vector<1xf32>
    %456 = vector.shape_cast %455 : vector<1xf32> to vector<1x1xf32>
    %457 = tpu.iota {dimensions = array<i32: 0>} : vector<32x1xi32>
    %458 = arith.sitofp %457 : vector<32x1xi32> to vector<32x1xf32>
    %459 = tpu.iota {dimensions = array<i32: 1>} : vector<1x32xi32>
    %460 = arith.sitofp %459 : vector<1x32xi32> to vector<1x32xf32>
    %461 = vector.broadcast %456 : vector<1x1xf32> to vector<32x1xf32>
    %462 = arith.cmpf olt, %458, %461 : vector<32x1xf32>
    %463 = arith.extui %462 : vector<32x1xi1> to vector<32x1xi32>
    %464 = arith.sitofp %463 : vector<32x1xi32> to vector<32x1xf32>
    %465 = vector.broadcast %456 : vector<1x1xf32> to vector<1x32xf32>
    %466 = arith.cmpf olt, %460, %465 : vector<1x32xf32>
    %cst_210 = arith.constant 0.000000e+00 : f32
    %cst_211 = arith.constant -1.000000e+09 : f32
    %467 = vector.broadcast %cst_210 : f32 to vector<1x32xf32>
    %468 = vector.broadcast %cst_211 : f32 to vector<1x32xf32>
    %469 = arith.select %466, %467, %468 : vector<1x32xi1>, vector<1x32xf32>
    %c0_212 = arith.constant 0 : index
    %c0_213 = arith.constant 0 : index
    %470 = vector.load %arg14[%c0_212, %c0_213] : memref<128x768xf32, #tpu.memory_space<vmem>>, vector<128x768xf32>
    %cst_214 = arith.constant dense<0.000000e+00> : vector<32x768xf32>
    %471 = tpu.matmul %454, %470, %cst_214 {dimension_numbers = #tpu.dot_dimension_numbers<[1], [0], [0], [1], [0, 0, 1, 1], [], []>} : vector<32x128xf32>, vector<128x768xf32>, vector<32x768xf32> -> vector<32x768xf32>
    %c0_215 = arith.constant 0 : index
    %c0_216 = arith.constant 0 : index
    %472 = vector.load %arg6[%c0_215, %c0_216] : memref<1x768xf32, #tpu.memory_space<vmem>>, vector<1x768xf32>
    %473 = vector.broadcast %472 : vector<1x768xf32> to vector<32x768xf32>
    %474 = arith.addf %471, %473 : vector<32x768xf32>
    %475 = vector.extract_strided_slice %474 {offsets = [0, 0], sizes = [32, 128], strides = [1, 1]} : vector<32x768xf32> to vector<32x128xf32>
    %476 = vector.extract_strided_slice %474 {offsets = [0, 256], sizes = [32, 128], strides = [1, 1]} : vector<32x768xf32> to vector<32x128xf32>
    %477 = vector.extract_strided_slice %474 {offsets = [0, 512], sizes = [32, 128], strides = [1, 1]} : vector<32x768xf32> to vector<32x128xf32>
    %cst_217 = arith.constant dense<0.000000e+00> : vector<32x32xf32>
    %478 = tpu.matmul %475, %476, %cst_217 {dimension_numbers = #tpu.dot_dimension_numbers<[1], [1], [0], [0], [0, 0, 1, 0], [], []>} : vector<32x128xf32>, vector<32x128xf32>, vector<32x32xf32> -> vector<32x32xf32>
    %cst_218 = arith.constant 1.250000e-01 : f32
    %479 = vector.broadcast %cst_218 : f32 to vector<32x32xf32>
    %480 = arith.mulf %478, %479 : vector<32x32xf32>
    %481 = vector.broadcast %469 : vector<1x32xf32> to vector<32x32xf32>
    %482 = arith.addf %480, %481 : vector<32x32xf32>
    %cst_219 = arith.constant dense<0xFF800000> : vector<32xf32>
    %483 = vector.multi_reduction <maximumf>, %482, %cst_219 [1] : vector<32x32xf32> to vector<32xf32>
    %484 = vector.shape_cast %483 : vector<32xf32> to vector<32x1xf32>
    %485 = vector.broadcast %484 : vector<32x1xf32> to vector<32x32xf32>
    %486 = arith.subf %482, %485 : vector<32x32xf32>
    %487 = math.exp %486 : vector<32x32xf32>
    %cst_220 = arith.constant dense<0.000000e+00> : vector<32xf32>
    %488 = vector.multi_reduction <add>, %487, %cst_220 [1] : vector<32x32xf32> to vector<32xf32>
    %489 = vector.shape_cast %488 : vector<32xf32> to vector<32x1xf32>
    %490 = tpu.reciprocal %489 {approx = true} : vector<32x1xf32> -> vector<32x1xf32>
    %491 = vector.broadcast %490 : vector<32x1xf32> to vector<32x32xf32>
    %492 = arith.mulf %487, %491 : vector<32x32xf32>
    %cst_221 = arith.constant dense<0.000000e+00> : vector<32x128xf32>
    %493 = tpu.matmul %492, %477, %cst_221 {dimension_numbers = #tpu.dot_dimension_numbers<[1], [0], [0], [1], [0, 0, 1, 1], [], []>} : vector<32x32xf32>, vector<32x128xf32>, vector<32x128xf32> -> vector<32x128xf32>
    %494 = vector.extract_strided_slice %474 {offsets = [0, 128], sizes = [32, 128], strides = [1, 1]} : vector<32x768xf32> to vector<32x128xf32>
    %495 = vector.extract_strided_slice %474 {offsets = [0, 384], sizes = [32, 128], strides = [1, 1]} : vector<32x768xf32> to vector<32x128xf32>
    %496 = vector.extract_strided_slice %474 {offsets = [0, 640], sizes = [32, 128], strides = [1, 1]} : vector<32x768xf32> to vector<32x128xf32>
    %cst_222 = arith.constant dense<0.000000e+00> : vector<32x32xf32>
    %497 = tpu.matmul %494, %495, %cst_222 {dimension_numbers = #tpu.dot_dimension_numbers<[1], [1], [0], [0], [0, 0, 1, 0], [], []>} : vector<32x128xf32>, vector<32x128xf32>, vector<32x32xf32> -> vector<32x32xf32>
    %cst_223 = arith.constant 1.250000e-01 : f32
    %498 = vector.broadcast %cst_223 : f32 to vector<32x32xf32>
    %499 = arith.mulf %497, %498 : vector<32x32xf32>
    %500 = vector.broadcast %469 : vector<1x32xf32> to vector<32x32xf32>
    %501 = arith.addf %499, %500 : vector<32x32xf32>
    %cst_224 = arith.constant dense<0xFF800000> : vector<32xf32>
    %502 = vector.multi_reduction <maximumf>, %501, %cst_224 [1] : vector<32x32xf32> to vector<32xf32>
    %503 = vector.shape_cast %502 : vector<32xf32> to vector<32x1xf32>
    %504 = vector.broadcast %503 : vector<32x1xf32> to vector<32x32xf32>
    %505 = arith.subf %501, %504 : vector<32x32xf32>
    %506 = math.exp %505 : vector<32x32xf32>
    %cst_225 = arith.constant dense<0.000000e+00> : vector<32xf32>
    %507 = vector.multi_reduction <add>, %506, %cst_225 [1] : vector<32x32xf32> to vector<32xf32>
    %508 = vector.shape_cast %507 : vector<32xf32> to vector<32x1xf32>
    %509 = tpu.reciprocal %508 {approx = true} : vector<32x1xf32> -> vector<32x1xf32>
    %510 = vector.broadcast %509 : vector<32x1xf32> to vector<32x32xf32>
    %511 = arith.mulf %506, %510 : vector<32x32xf32>
    %cst_226 = arith.constant dense<0.000000e+00> : vector<32x128xf32>
    %512 = tpu.matmul %511, %496, %cst_226 {dimension_numbers = #tpu.dot_dimension_numbers<[1], [0], [0], [1], [0, 0, 1, 1], [], []>} : vector<32x32xf32>, vector<32x128xf32>, vector<32x128xf32> -> vector<32x128xf32>
    %513 = tpu.concatenate %493, %512 in 1 : vector<32x128xf32>, vector<32x128xf32> -> vector<32x256xf32>
    %c0_227 = arith.constant 0 : index
    %c0_228 = arith.constant 0 : index
    %514 = vector.load %arg13[%c0_227, %c0_228] : memref<256x128xf32, #tpu.memory_space<vmem>>, vector<256x128xf32>
    %cst_229 = arith.constant dense<0.000000e+00> : vector<32x128xf32>
    %515 = tpu.matmul %513, %514, %cst_229 {dimension_numbers = #tpu.dot_dimension_numbers<[1], [0], [0], [1], [0, 0, 1, 1], [], []>} : vector<32x256xf32>, vector<256x128xf32>, vector<32x128xf32> -> vector<32x128xf32>
    %c0_230 = arith.constant 0 : index
    %c0_231 = arith.constant 0 : index
    %516 = vector.load %arg5[%c0_230, %c0_231] : memref<1x128xf32, #tpu.memory_space<vmem>>, vector<1x128xf32>
    %517 = vector.broadcast %516 : vector<1x128xf32> to vector<32x128xf32>
    %518 = arith.addf %515, %517 : vector<32x128xf32>
    %519 = arith.addf %454, %518 : vector<32x128xf32>
    %cst_232 = arith.constant dense<0.000000e+00> : vector<32xf32>
    %520 = vector.multi_reduction <add>, %519, %cst_232 [1] : vector<32x128xf32> to vector<32xf32>
    %521 = vector.shape_cast %520 : vector<32xf32> to vector<32x1xf32>
    %cst_233 = arith.constant 1.280000e+02 : f32
    %522 = vector.broadcast %cst_233 : f32 to vector<32x1xf32>
    %523 = arith.divf %521, %522 : vector<32x1xf32>
    %524 = vector.broadcast %523 : vector<32x1xf32> to vector<32x128xf32>
    %525 = arith.subf %519, %524 : vector<32x128xf32>
    %526 = arith.mulf %525, %525 : vector<32x128xf32>
    %cst_234 = arith.constant dense<0.000000e+00> : vector<32xf32>
    %527 = vector.multi_reduction <add>, %526, %cst_234 [1] : vector<32x128xf32> to vector<32xf32>
    %528 = vector.shape_cast %527 : vector<32xf32> to vector<32x1xf32>
    %cst_235 = arith.constant 1.280000e+02 : f32
    %529 = vector.broadcast %cst_235 : f32 to vector<32x1xf32>
    %530 = arith.divf %528, %529 : vector<32x1xf32>
    %531 = vector.broadcast %523 : vector<32x1xf32> to vector<32x128xf32>
    %532 = arith.subf %519, %531 : vector<32x128xf32>
    %cst_236 = arith.constant 9.99999974E-6 : f32
    %533 = vector.broadcast %cst_236 : f32 to vector<32x1xf32>
    %534 = arith.addf %530, %533 : vector<32x1xf32>
    %535 = math.rsqrt %534 : vector<32x1xf32>
    %536 = vector.broadcast %535 : vector<32x1xf32> to vector<32x128xf32>
    %537 = arith.mulf %532, %536 : vector<32x128xf32>
    %c0_237 = arith.constant 0 : index
    %c0_238 = arith.constant 0 : index
    %538 = vector.load %arg8[%c0_237, %c0_238] : memref<1x128xf32, #tpu.memory_space<vmem>>, vector<1x128xf32>
    %539 = vector.broadcast %538 : vector<1x128xf32> to vector<32x128xf32>
    %540 = arith.mulf %537, %539 : vector<32x128xf32>
    %c0_239 = arith.constant 0 : index
    %c0_240 = arith.constant 0 : index
    %541 = vector.load %arg7[%c0_239, %c0_240] : memref<1x128xf32, #tpu.memory_space<vmem>>, vector<1x128xf32>
    %542 = vector.broadcast %541 : vector<1x128xf32> to vector<32x128xf32>
    %543 = arith.addf %540, %542 : vector<32x128xf32>
    %c0_241 = arith.constant 0 : index
    %c0_242 = arith.constant 0 : index
    %544 = vector.load %arg11[%c0_241, %c0_242] : memref<128x256xf32, #tpu.memory_space<vmem>>, vector<128x256xf32>
    %cst_243 = arith.constant dense<0.000000e+00> : vector<32x256xf32>
    %545 = tpu.matmul %543, %544, %cst_243 {dimension_numbers = #tpu.dot_dimension_numbers<[1], [0], [0], [1], [0, 0, 1, 1], [], []>} : vector<32x128xf32>, vector<128x256xf32>, vector<32x256xf32> -> vector<32x256xf32>
    %c0_244 = arith.constant 0 : index
    %c0_245 = arith.constant 0 : index
    %546 = vector.load %arg3[%c0_244, %c0_245] : memref<1x256xf32, #tpu.memory_space<vmem>>, vector<1x256xf32>
    %547 = vector.broadcast %546 : vector<1x256xf32> to vector<32x256xf32>
    %548 = arith.addf %545, %547 : vector<32x256xf32>
    %cst_246 = arith.constant 0.000000e+00 : f32
    %549 = vector.broadcast %cst_246 : f32 to vector<32x256xf32>
    %550 = arith.maximumf %548, %549 : vector<32x256xf32>
    %c0_247 = arith.constant 0 : index
    %c0_248 = arith.constant 0 : index
    %551 = vector.load %arg12[%c0_247, %c0_248] : memref<256x128xf32, #tpu.memory_space<vmem>>, vector<256x128xf32>
    %cst_249 = arith.constant dense<0.000000e+00> : vector<32x128xf32>
    %552 = tpu.matmul %550, %551, %cst_249 {dimension_numbers = #tpu.dot_dimension_numbers<[1], [0], [0], [1], [0, 0, 1, 1], [], []>} : vector<32x256xf32>, vector<256x128xf32>, vector<32x128xf32> -> vector<32x128xf32>
    %c0_250 = arith.constant 0 : index
    %c0_251 = arith.constant 0 : index
    %553 = vector.load %arg4[%c0_250, %c0_251] : memref<1x128xf32, #tpu.memory_space<vmem>>, vector<1x128xf32>
    %554 = vector.broadcast %553 : vector<1x128xf32> to vector<32x128xf32>
    %555 = arith.addf %552, %554 : vector<32x128xf32>
    %556 = arith.addf %543, %555 : vector<32x128xf32>
    %cst_252 = arith.constant dense<0.000000e+00> : vector<32xf32>
    %557 = vector.multi_reduction <add>, %556, %cst_252 [1] : vector<32x128xf32> to vector<32xf32>
    %558 = vector.shape_cast %557 : vector<32xf32> to vector<32x1xf32>
    %cst_253 = arith.constant 1.280000e+02 : f32
    %559 = vector.broadcast %cst_253 : f32 to vector<32x1xf32>
    %560 = arith.divf %558, %559 : vector<32x1xf32>
    %561 = vector.broadcast %560 : vector<32x1xf32> to vector<32x128xf32>
    %562 = arith.subf %556, %561 : vector<32x128xf32>
    %563 = arith.mulf %562, %562 : vector<32x128xf32>
    %cst_254 = arith.constant dense<0.000000e+00> : vector<32xf32>
    %564 = vector.multi_reduction <add>, %563, %cst_254 [1] : vector<32x128xf32> to vector<32xf32>
    %565 = vector.shape_cast %564 : vector<32xf32> to vector<32x1xf32>
    %cst_255 = arith.constant 1.280000e+02 : f32
    %566 = vector.broadcast %cst_255 : f32 to vector<32x1xf32>
    %567 = arith.divf %565, %566 : vector<32x1xf32>
    %568 = vector.broadcast %560 : vector<32x1xf32> to vector<32x128xf32>
    %569 = arith.subf %556, %568 : vector<32x128xf32>
    %cst_256 = arith.constant 9.99999974E-6 : f32
    %570 = vector.broadcast %cst_256 : f32 to vector<32x1xf32>
    %571 = arith.addf %567, %570 : vector<32x1xf32>
    %572 = math.rsqrt %571 : vector<32x1xf32>
    %573 = vector.broadcast %572 : vector<32x1xf32> to vector<32x128xf32>
    %574 = arith.mulf %569, %573 : vector<32x128xf32>
    %c0_257 = arith.constant 0 : index
    %c0_258 = arith.constant 0 : index
    %575 = vector.load %arg10[%c0_257, %c0_258] : memref<1x128xf32, #tpu.memory_space<vmem>>, vector<1x128xf32>
    %576 = vector.broadcast %575 : vector<1x128xf32> to vector<32x128xf32>
    %577 = arith.mulf %574, %576 : vector<32x128xf32>
    %c0_259 = arith.constant 0 : index
    %c0_260 = arith.constant 0 : index
    %578 = vector.load %arg9[%c0_259, %c0_260] : memref<1x128xf32, #tpu.memory_space<vmem>>, vector<1x128xf32>
    %579 = vector.broadcast %578 : vector<1x128xf32> to vector<32x128xf32>
    %580 = arith.addf %577, %579 : vector<32x128xf32>
    %c0_261 = arith.constant 0 : index
    %c0_262 = arith.constant 0 : index
    %581 = vector.load %arg26[%c0_261, %c0_262] : memref<128x768xf32, #tpu.memory_space<vmem>>, vector<128x768xf32>
    %cst_263 = arith.constant dense<0.000000e+00> : vector<32x768xf32>
    %582 = tpu.matmul %580, %581, %cst_263 {dimension_numbers = #tpu.dot_dimension_numbers<[1], [0], [0], [1], [0, 0, 1, 1], [], []>} : vector<32x128xf32>, vector<128x768xf32>, vector<32x768xf32> -> vector<32x768xf32>
    %c0_264 = arith.constant 0 : index
    %c0_265 = arith.constant 0 : index
    %583 = vector.load %arg18[%c0_264, %c0_265] : memref<1x768xf32, #tpu.memory_space<vmem>>, vector<1x768xf32>
    %584 = vector.broadcast %583 : vector<1x768xf32> to vector<32x768xf32>
    %585 = arith.addf %582, %584 : vector<32x768xf32>
    %586 = vector.extract_strided_slice %585 {offsets = [0, 0], sizes = [32, 128], strides = [1, 1]} : vector<32x768xf32> to vector<32x128xf32>
    %587 = vector.extract_strided_slice %585 {offsets = [0, 256], sizes = [32, 128], strides = [1, 1]} : vector<32x768xf32> to vector<32x128xf32>
    %588 = vector.extract_strided_slice %585 {offsets = [0, 512], sizes = [32, 128], strides = [1, 1]} : vector<32x768xf32> to vector<32x128xf32>
    %cst_266 = arith.constant dense<0.000000e+00> : vector<32x32xf32>
    %589 = tpu.matmul %586, %587, %cst_266 {dimension_numbers = #tpu.dot_dimension_numbers<[1], [1], [0], [0], [0, 0, 1, 0], [], []>} : vector<32x128xf32>, vector<32x128xf32>, vector<32x32xf32> -> vector<32x32xf32>
    %cst_267 = arith.constant 1.250000e-01 : f32
    %590 = vector.broadcast %cst_267 : f32 to vector<32x32xf32>
    %591 = arith.mulf %589, %590 : vector<32x32xf32>
    %592 = vector.broadcast %469 : vector<1x32xf32> to vector<32x32xf32>
    %593 = arith.addf %591, %592 : vector<32x32xf32>
    %cst_268 = arith.constant dense<0xFF800000> : vector<32xf32>
    %594 = vector.multi_reduction <maximumf>, %593, %cst_268 [1] : vector<32x32xf32> to vector<32xf32>
    %595 = vector.shape_cast %594 : vector<32xf32> to vector<32x1xf32>
    %596 = vector.broadcast %595 : vector<32x1xf32> to vector<32x32xf32>
    %597 = arith.subf %593, %596 : vector<32x32xf32>
    %598 = math.exp %597 : vector<32x32xf32>
    %cst_269 = arith.constant dense<0.000000e+00> : vector<32xf32>
    %599 = vector.multi_reduction <add>, %598, %cst_269 [1] : vector<32x32xf32> to vector<32xf32>
    %600 = vector.shape_cast %599 : vector<32xf32> to vector<32x1xf32>
    %601 = tpu.reciprocal %600 {approx = true} : vector<32x1xf32> -> vector<32x1xf32>
    %602 = vector.broadcast %601 : vector<32x1xf32> to vector<32x32xf32>
    %603 = arith.mulf %598, %602 : vector<32x32xf32>
    %cst_270 = arith.constant dense<0.000000e+00> : vector<32x128xf32>
    %604 = tpu.matmul %603, %588, %cst_270 {dimension_numbers = #tpu.dot_dimension_numbers<[1], [0], [0], [1], [0, 0, 1, 1], [], []>} : vector<32x32xf32>, vector<32x128xf32>, vector<32x128xf32> -> vector<32x128xf32>
    %605 = vector.extract_strided_slice %585 {offsets = [0, 128], sizes = [32, 128], strides = [1, 1]} : vector<32x768xf32> to vector<32x128xf32>
    %606 = vector.extract_strided_slice %585 {offsets = [0, 384], sizes = [32, 128], strides = [1, 1]} : vector<32x768xf32> to vector<32x128xf32>
    %607 = vector.extract_strided_slice %585 {offsets = [0, 640], sizes = [32, 128], strides = [1, 1]} : vector<32x768xf32> to vector<32x128xf32>
    %cst_271 = arith.constant dense<0.000000e+00> : vector<32x32xf32>
    %608 = tpu.matmul %605, %606, %cst_271 {dimension_numbers = #tpu.dot_dimension_numbers<[1], [1], [0], [0], [0, 0, 1, 0], [], []>} : vector<32x128xf32>, vector<32x128xf32>, vector<32x32xf32> -> vector<32x32xf32>
    %cst_272 = arith.constant 1.250000e-01 : f32
    %609 = vector.broadcast %cst_272 : f32 to vector<32x32xf32>
    %610 = arith.mulf %608, %609 : vector<32x32xf32>
    %611 = vector.broadcast %469 : vector<1x32xf32> to vector<32x32xf32>
    %612 = arith.addf %610, %611 : vector<32x32xf32>
    %cst_273 = arith.constant dense<0xFF800000> : vector<32xf32>
    %613 = vector.multi_reduction <maximumf>, %612, %cst_273 [1] : vector<32x32xf32> to vector<32xf32>
    %614 = vector.shape_cast %613 : vector<32xf32> to vector<32x1xf32>
    %615 = vector.broadcast %614 : vector<32x1xf32> to vector<32x32xf32>
    %616 = arith.subf %612, %615 : vector<32x32xf32>
    %617 = math.exp %616 : vector<32x32xf32>
    %cst_274 = arith.constant dense<0.000000e+00> : vector<32xf32>
    %618 = vector.multi_reduction <add>, %617, %cst_274 [1] : vector<32x32xf32> to vector<32xf32>
    %619 = vector.shape_cast %618 : vector<32xf32> to vector<32x1xf32>
    %620 = tpu.reciprocal %619 {approx = true} : vector<32x1xf32> -> vector<32x1xf32>
    %621 = vector.broadcast %620 : vector<32x1xf32> to vector<32x32xf32>
    %622 = arith.mulf %617, %621 : vector<32x32xf32>
    %cst_275 = arith.constant dense<0.000000e+00> : vector<32x128xf32>
    %623 = tpu.matmul %622, %607, %cst_275 {dimension_numbers = #tpu.dot_dimension_numbers<[1], [0], [0], [1], [0, 0, 1, 1], [], []>} : vector<32x32xf32>, vector<32x128xf32>, vector<32x128xf32> -> vector<32x128xf32>
    %624 = tpu.concatenate %604, %623 in 1 : vector<32x128xf32>, vector<32x128xf32> -> vector<32x256xf32>
    %c0_276 = arith.constant 0 : index
    %c0_277 = arith.constant 0 : index
    %625 = vector.load %arg25[%c0_276, %c0_277] : memref<256x128xf32, #tpu.memory_space<vmem>>, vector<256x128xf32>
    %cst_278 = arith.constant dense<0.000000e+00> : vector<32x128xf32>
    %626 = tpu.matmul %624, %625, %cst_278 {dimension_numbers = #tpu.dot_dimension_numbers<[1], [0], [0], [1], [0, 0, 1, 1], [], []>} : vector<32x256xf32>, vector<256x128xf32>, vector<32x128xf32> -> vector<32x128xf32>
    %c0_279 = arith.constant 0 : index
    %c0_280 = arith.constant 0 : index
    %627 = vector.load %arg17[%c0_279, %c0_280] : memref<1x128xf32, #tpu.memory_space<vmem>>, vector<1x128xf32>
    %628 = vector.broadcast %627 : vector<1x128xf32> to vector<32x128xf32>
    %629 = arith.addf %626, %628 : vector<32x128xf32>
    %630 = arith.addf %580, %629 : vector<32x128xf32>
    %cst_281 = arith.constant dense<0.000000e+00> : vector<32xf32>
    %631 = vector.multi_reduction <add>, %630, %cst_281 [1] : vector<32x128xf32> to vector<32xf32>
    %632 = vector.shape_cast %631 : vector<32xf32> to vector<32x1xf32>
    %cst_282 = arith.constant 1.280000e+02 : f32
    %633 = vector.broadcast %cst_282 : f32 to vector<32x1xf32>
    %634 = arith.divf %632, %633 : vector<32x1xf32>
    %635 = vector.broadcast %634 : vector<32x1xf32> to vector<32x128xf32>
    %636 = arith.subf %630, %635 : vector<32x128xf32>
    %637 = arith.mulf %636, %636 : vector<32x128xf32>
    %cst_283 = arith.constant dense<0.000000e+00> : vector<32xf32>
    %638 = vector.multi_reduction <add>, %637, %cst_283 [1] : vector<32x128xf32> to vector<32xf32>
    %639 = vector.shape_cast %638 : vector<32xf32> to vector<32x1xf32>
    %cst_284 = arith.constant 1.280000e+02 : f32
    %640 = vector.broadcast %cst_284 : f32 to vector<32x1xf32>
    %641 = arith.divf %639, %640 : vector<32x1xf32>
    %642 = vector.broadcast %634 : vector<32x1xf32> to vector<32x128xf32>
    %643 = arith.subf %630, %642 : vector<32x128xf32>
    %cst_285 = arith.constant 9.99999974E-6 : f32
    %644 = vector.broadcast %cst_285 : f32 to vector<32x1xf32>
    %645 = arith.addf %641, %644 : vector<32x1xf32>
    %646 = math.rsqrt %645 : vector<32x1xf32>
    %647 = vector.broadcast %646 : vector<32x1xf32> to vector<32x128xf32>
    %648 = arith.mulf %643, %647 : vector<32x128xf32>
    %c0_286 = arith.constant 0 : index
    %c0_287 = arith.constant 0 : index
    %649 = vector.load %arg20[%c0_286, %c0_287] : memref<1x128xf32, #tpu.memory_space<vmem>>, vector<1x128xf32>
    %650 = vector.broadcast %649 : vector<1x128xf32> to vector<32x128xf32>
    %651 = arith.mulf %648, %650 : vector<32x128xf32>
    %c0_288 = arith.constant 0 : index
    %c0_289 = arith.constant 0 : index
    %652 = vector.load %arg19[%c0_288, %c0_289] : memref<1x128xf32, #tpu.memory_space<vmem>>, vector<1x128xf32>
    %653 = vector.broadcast %652 : vector<1x128xf32> to vector<32x128xf32>
    %654 = arith.addf %651, %653 : vector<32x128xf32>
    %c0_290 = arith.constant 0 : index
    %c0_291 = arith.constant 0 : index
    %655 = vector.load %arg23[%c0_290, %c0_291] : memref<128x256xf32, #tpu.memory_space<vmem>>, vector<128x256xf32>
    %cst_292 = arith.constant dense<0.000000e+00> : vector<32x256xf32>
    %656 = tpu.matmul %654, %655, %cst_292 {dimension_numbers = #tpu.dot_dimension_numbers<[1], [0], [0], [1], [0, 0, 1, 1], [], []>} : vector<32x128xf32>, vector<128x256xf32>, vector<32x256xf32> -> vector<32x256xf32>
    %c0_293 = arith.constant 0 : index
    %c0_294 = arith.constant 0 : index
    %657 = vector.load %arg15[%c0_293, %c0_294] : memref<1x256xf32, #tpu.memory_space<vmem>>, vector<1x256xf32>
    %658 = vector.broadcast %657 : vector<1x256xf32> to vector<32x256xf32>
    %659 = arith.addf %656, %658 : vector<32x256xf32>
    %cst_295 = arith.constant 0.000000e+00 : f32
    %660 = vector.broadcast %cst_295 : f32 to vector<32x256xf32>
    %661 = arith.maximumf %659, %660 : vector<32x256xf32>
    %c0_296 = arith.constant 0 : index
    %c0_297 = arith.constant 0 : index
    %662 = vector.load %arg24[%c0_296, %c0_297] : memref<256x128xf32, #tpu.memory_space<vmem>>, vector<256x128xf32>
    %cst_298 = arith.constant dense<0.000000e+00> : vector<32x128xf32>
    %663 = tpu.matmul %661, %662, %cst_298 {dimension_numbers = #tpu.dot_dimension_numbers<[1], [0], [0], [1], [0, 0, 1, 1], [], []>} : vector<32x256xf32>, vector<256x128xf32>, vector<32x128xf32> -> vector<32x128xf32>
    %c0_299 = arith.constant 0 : index
    %c0_300 = arith.constant 0 : index
    %664 = vector.load %arg16[%c0_299, %c0_300] : memref<1x128xf32, #tpu.memory_space<vmem>>, vector<1x128xf32>
    %665 = vector.broadcast %664 : vector<1x128xf32> to vector<32x128xf32>
    %666 = arith.addf %663, %665 : vector<32x128xf32>
    %667 = arith.addf %654, %666 : vector<32x128xf32>
    %cst_301 = arith.constant dense<0.000000e+00> : vector<32xf32>
    %668 = vector.multi_reduction <add>, %667, %cst_301 [1] : vector<32x128xf32> to vector<32xf32>
    %669 = vector.shape_cast %668 : vector<32xf32> to vector<32x1xf32>
    %cst_302 = arith.constant 1.280000e+02 : f32
    %670 = vector.broadcast %cst_302 : f32 to vector<32x1xf32>
    %671 = arith.divf %669, %670 : vector<32x1xf32>
    %672 = vector.broadcast %671 : vector<32x1xf32> to vector<32x128xf32>
    %673 = arith.subf %667, %672 : vector<32x128xf32>
    %674 = arith.mulf %673, %673 : vector<32x128xf32>
    %cst_303 = arith.constant dense<0.000000e+00> : vector<32xf32>
    %675 = vector.multi_reduction <add>, %674, %cst_303 [1] : vector<32x128xf32> to vector<32xf32>
    %676 = vector.shape_cast %675 : vector<32xf32> to vector<32x1xf32>
    %cst_304 = arith.constant 1.280000e+02 : f32
    %677 = vector.broadcast %cst_304 : f32 to vector<32x1xf32>
    %678 = arith.divf %676, %677 : vector<32x1xf32>
    %679 = vector.broadcast %671 : vector<32x1xf32> to vector<32x128xf32>
    %680 = arith.subf %667, %679 : vector<32x128xf32>
    %cst_305 = arith.constant 9.99999974E-6 : f32
    %681 = vector.broadcast %cst_305 : f32 to vector<32x1xf32>
    %682 = arith.addf %678, %681 : vector<32x1xf32>
    %683 = math.rsqrt %682 : vector<32x1xf32>
    %684 = vector.broadcast %683 : vector<32x1xf32> to vector<32x128xf32>
    %685 = arith.mulf %680, %684 : vector<32x128xf32>
    %c0_306 = arith.constant 0 : index
    %c0_307 = arith.constant 0 : index
    %686 = vector.load %arg22[%c0_306, %c0_307] : memref<1x128xf32, #tpu.memory_space<vmem>>, vector<1x128xf32>
    %687 = vector.broadcast %686 : vector<1x128xf32> to vector<32x128xf32>
    %688 = arith.mulf %685, %687 : vector<32x128xf32>
    %c0_308 = arith.constant 0 : index
    %c0_309 = arith.constant 0 : index
    %689 = vector.load %arg21[%c0_308, %c0_309] : memref<1x128xf32, #tpu.memory_space<vmem>>, vector<1x128xf32>
    %690 = vector.broadcast %689 : vector<1x128xf32> to vector<32x128xf32>
    %691 = arith.addf %688, %690 : vector<32x128xf32>
    %c0_310 = arith.constant 0 : index
    %c0_311 = arith.constant 0 : index
    %692 = vector.load %arg82[%c0_310, %c0_311] : memref<128x128xf32, #tpu.memory_space<vmem>>, vector<128x128xf32>
    %cst_312 = arith.constant dense<0.000000e+00> : vector<32x128xf32>
    %693 = tpu.matmul %691, %692, %cst_312 {dimension_numbers = #tpu.dot_dimension_numbers<[1], [0], [0], [1], [0, 0, 1, 1], [], []>} : vector<32x128xf32>, vector<128x128xf32>, vector<32x128xf32> -> vector<32x128xf32>
    %c0_313 = arith.constant 0 : index
    %c0_314 = arith.constant 0 : index
    %694 = vector.load %arg2[%c0_313, %c0_314] : memref<1x128xf32, #tpu.memory_space<vmem>>, vector<1x128xf32>
    %695 = vector.broadcast %694 : vector<1x128xf32> to vector<32x128xf32>
    %696 = arith.addf %693, %695 : vector<32x128xf32>
    %cst_315 = arith.constant 0.000000e+00 : f32
    %697 = vector.broadcast %cst_315 : f32 to vector<32x1xf32>
    %698 = arith.cmpf ogt, %464, %697 : vector<32x1xf32>
    %cst_316 = arith.constant -11.5129251 : f32
    %699 = vector.shape_cast %698 : vector<32x1xi1> to vector<32x1xi1>
    %700 = vector.broadcast %699 : vector<32x1xi1> to vector<32x128xi1>
    %701 = vector.broadcast %cst_316 : f32 to vector<32x128xf32>
    %702 = arith.select %700, %696, %701 : vector<32x128xi1>, vector<32x128xf32>
    %c0_317 = arith.constant 0 : index
    %c0_318 = arith.constant 0 : index
    %c0_319 = arith.constant 0 : index
    %703 = vector.load %arg83[%c0_317, %c0_318, %c0_319] : memref<1x32x128xf32, #tpu.memory_space<vmem>>, vector<1x32x128xf32>
    %704 = vector.shape_cast %703 : vector<1x32x128xf32> to vector<32x128xf32>
    %705 = vector.shape_cast %702 : vector<32x128xf32> to vector<1x32x128xf32>
    tpu.vector_store %arg83[%c0_317, %c0_318, %c0_319], %705 {strides = array<i32>} : memref<1x32x128xf32, #tpu.memory_space<vmem>>, vector<1x32x128xf32>,
    return
  }
  func.func @transform_0(%arg0: i32) -> (i32, i32, i32) {
    %c0_i32 = arith.constant 0 : i32
    %c0_i32_0 = arith.constant 0 : i32
    %c0_i32_1 = arith.constant 0 : i32
    return %arg0, %c0_i32, %c0_i32_0 : i32, i32, i32
  }
  func.func @transform_1(%arg0: i32) -> (i32, i32) {
    %c0_i32 = arith.constant 0 : i32
    %c0_i32_0 = arith.constant 0 : i32
    %c0_i32_1 = arith.constant 0 : i32
    return %c0_i32, %c0_i32_0 : i32, i32
  }
  func.func @transform_2(%arg0: i32) -> (i32, i32) {
    %c0_i32 = arith.constant 0 : i32
    %c0_i32_0 = arith.constant 0 : i32
    %c0_i32_1 = arith.constant 0 : i32
    return %c0_i32, %c0_i32_0 : i32, i32
  }
  func.func @transform_3(%arg0: i32) -> (i32, i32) {
    %c0_i32 = arith.constant 0 : i32
    %c0_i32_0 = arith.constant 0 : i32
    %c0_i32_1 = arith.constant 0 : i32
    return %c0_i32, %c0_i32_0 : i32, i32
  }
  func.func @transform_4(%arg0: i32) -> (i32, i32) {
    %c0_i32 = arith.constant 0 : i32
    %c0_i32_0 = arith.constant 0 : i32
    %c0_i32_1 = arith.constant 0 : i32
    return %c0_i32, %c0_i32_0 : i32, i32
  }
  func.func @transform_5(%arg0: i32) -> (i32, i32) {
    %c0_i32 = arith.constant 0 : i32
    %c0_i32_0 = arith.constant 0 : i32
    %c0_i32_1 = arith.constant 0 : i32
    return %c0_i32, %c0_i32_0 : i32, i32
  }
  func.func @transform_6(%arg0: i32) -> (i32, i32) {
    %c0_i32 = arith.constant 0 : i32
    %c0_i32_0 = arith.constant 0 : i32
    %c0_i32_1 = arith.constant 0 : i32
    return %c0_i32, %c0_i32_0 : i32, i32
  }
  func.func @transform_7(%arg0: i32) -> (i32, i32) {
    %c0_i32 = arith.constant 0 : i32
    %c0_i32_0 = arith.constant 0 : i32
    %c0_i32_1 = arith.constant 0 : i32
    return %c0_i32, %c0_i32_0 : i32, i32
  }
  func.func @transform_8(%arg0: i32) -> (i32, i32) {
    %c0_i32 = arith.constant 0 : i32
    %c0_i32_0 = arith.constant 0 : i32
    %c0_i32_1 = arith.constant 0 : i32
    return %c0_i32, %c0_i32_0 : i32, i32
  }
  func.func @transform_9(%arg0: i32) -> (i32, i32) {
    %c0_i32 = arith.constant 0 : i32
    %c0_i32_0 = arith.constant 0 : i32
    %c0_i32_1 = arith.constant 0 : i32
    return %c0_i32, %c0_i32_0 : i32, i32
  }
  func.func @transform_10(%arg0: i32) -> (i32, i32) {
    %c0_i32 = arith.constant 0 : i32
    %c0_i32_0 = arith.constant 0 : i32
    %c0_i32_1 = arith.constant 0 : i32
    return %c0_i32, %c0_i32_0 : i32, i32
  }
  func.func @transform_11(%arg0: i32) -> (i32, i32) {
    %c0_i32 = arith.constant 0 : i32
    %c0_i32_0 = arith.constant 0 : i32
    %c0_i32_1 = arith.constant 0 : i32
    return %c0_i32, %c0_i32_0 : i32, i32
  }
  func.func @transform_12(%arg0: i32) -> (i32, i32) {
    %c0_i32 = arith.constant 0 : i32
    %c0_i32_0 = arith.constant 0 : i32
    %c0_i32_1 = arith.constant 0 : i32
    return %c0_i32, %c0_i32_0 : i32, i32
  }
  func.func @transform_13(%arg0: i32) -> (i32, i32) {
    %c0_i32 = arith.constant 0 : i32
    %c0_i32_0 = arith.constant 0 : i32
    %c0_i32_1 = arith.constant 0 : i32
    return %c0_i32, %c0_i32_0 : i32, i32
  }
  func.func @transform_14(%arg0: i32) -> (i32, i32) {
    %c0_i32 = arith.constant 0 : i32
    %c0_i32_0 = arith.constant 0 : i32
    %c0_i32_1 = arith.constant 0 : i32
    return %c0_i32, %c0_i32_0 : i32, i32
  }
  func.func @transform_15(%arg0: i32) -> (i32, i32) {
    %c0_i32 = arith.constant 0 : i32
    %c0_i32_0 = arith.constant 0 : i32
    %c0_i32_1 = arith.constant 0 : i32
    return %c0_i32, %c0_i32_0 : i32, i32
  }
  func.func @transform_16(%arg0: i32) -> (i32, i32) {
    %c0_i32 = arith.constant 0 : i32
    %c0_i32_0 = arith.constant 0 : i32
    %c0_i32_1 = arith.constant 0 : i32
    return %c0_i32, %c0_i32_0 : i32, i32
  }
  func.func @transform_17(%arg0: i32) -> (i32, i32) {
    %c0_i32 = arith.constant 0 : i32
    %c0_i32_0 = arith.constant 0 : i32
    %c0_i32_1 = arith.constant 0 : i32
    return %c0_i32, %c0_i32_0 : i32, i32
  }
  func.func @transform_18(%arg0: i32) -> (i32, i32) {
    %c0_i32 = arith.constant 0 : i32
    %c0_i32_0 = arith.constant 0 : i32
    %c0_i32_1 = arith.constant 0 : i32
    return %c0_i32, %c0_i32_0 : i32, i32
  }
  func.func @transform_19(%arg0: i32) -> (i32, i32) {
    %c0_i32 = arith.constant 0 : i32
    %c0_i32_0 = arith.constant 0 : i32
    %c0_i32_1 = arith.constant 0 : i32
    return %c0_i32, %c0_i32_0 : i32, i32
  }
  func.func @transform_20(%arg0: i32) -> (i32, i32) {
    %c0_i32 = arith.constant 0 : i32
    %c0_i32_0 = arith.constant 0 : i32
    %c0_i32_1 = arith.constant 0 : i32
    return %c0_i32, %c0_i32_0 : i32, i32
  }
  func.func @transform_21(%arg0: i32) -> (i32, i32) {
    %c0_i32 = arith.constant 0 : i32
    %c0_i32_0 = arith.constant 0 : i32
    %c0_i32_1 = arith.constant 0 : i32
    return %c0_i32, %c0_i32_0 : i32, i32
  }
  func.func @transform_22(%arg0: i32) -> (i32, i32) {
    %c0_i32 = arith.constant 0 : i32
    %c0_i32_0 = arith.constant 0 : i32
    %c0_i32_1 = arith.constant 0 : i32
    return %c0_i32, %c0_i32_0 : i32, i32
  }
  func.func @transform_23(%arg0: i32) -> (i32, i32) {
    %c0_i32 = arith.constant 0 : i32
    %c0_i32_0 = arith.constant 0 : i32
    %c0_i32_1 = arith.constant 0 : i32
    return %c0_i32, %c0_i32_0 : i32, i32
  }
  func.func @transform_24(%arg0: i32) -> (i32, i32) {
    %c0_i32 = arith.constant 0 : i32
    %c0_i32_0 = arith.constant 0 : i32
    %c0_i32_1 = arith.constant 0 : i32
    return %c0_i32, %c0_i32_0 : i32, i32
  }
  func.func @transform_25(%arg0: i32) -> (i32, i32) {
    %c0_i32 = arith.constant 0 : i32
    %c0_i32_0 = arith.constant 0 : i32
    %c0_i32_1 = arith.constant 0 : i32
    return %c0_i32, %c0_i32_0 : i32, i32
  }
  func.func @transform_26(%arg0: i32) -> (i32, i32) {
    %c0_i32 = arith.constant 0 : i32
    %c0_i32_0 = arith.constant 0 : i32
    %c0_i32_1 = arith.constant 0 : i32
    return %c0_i32, %c0_i32_0 : i32, i32
  }
  func.func @transform_27(%arg0: i32) -> (i32, i32) {
    %c0_i32 = arith.constant 0 : i32
    %c0_i32_0 = arith.constant 0 : i32
    %c0_i32_1 = arith.constant 0 : i32
    return %c0_i32, %c0_i32_0 : i32, i32
  }
  func.func @transform_28(%arg0: i32) -> (i32, i32) {
    %c0_i32 = arith.constant 0 : i32
    %c0_i32_0 = arith.constant 0 : i32
    %c0_i32_1 = arith.constant 0 : i32
    return %c0_i32, %c0_i32_0 : i32, i32
  }
  func.func @transform_29(%arg0: i32) -> (i32, i32) {
    %c0_i32 = arith.constant 0 : i32
    %c0_i32_0 = arith.constant 0 : i32
    %c0_i32_1 = arith.constant 0 : i32
    return %c0_i32, %c0_i32_0 : i32, i32
  }
  func.func @transform_30(%arg0: i32) -> (i32, i32) {
    %c0_i32 = arith.constant 0 : i32
    %c0_i32_0 = arith.constant 0 : i32
    %c0_i32_1 = arith.constant 0 : i32
    return %c0_i32, %c0_i32_0 : i32, i32
  }
  func.func @transform_31(%arg0: i32) -> (i32, i32) {
    %c0_i32 = arith.constant 0 : i32
    %c0_i32_0 = arith.constant 0 : i32
    %c0_i32_1 = arith.constant 0 : i32
    return %c0_i32, %c0_i32_0 : i32, i32
  }
  func.func @transform_32(%arg0: i32) -> (i32, i32) {
    %c0_i32 = arith.constant 0 : i32
    %c0_i32_0 = arith.constant 0 : i32
    %c0_i32_1 = arith.constant 0 : i32
    return %c0_i32, %c0_i32_0 : i32, i32
  }
  func.func @transform_33(%arg0: i32) -> (i32, i32) {
    %c0_i32 = arith.constant 0 : i32
    %c0_i32_0 = arith.constant 0 : i32
    %c0_i32_1 = arith.constant 0 : i32
    return %c0_i32, %c0_i32_0 : i32, i32
  }
  func.func @transform_34(%arg0: i32) -> (i32, i32) {
    %c0_i32 = arith.constant 0 : i32
    %c0_i32_0 = arith.constant 0 : i32
    %c0_i32_1 = arith.constant 0 : i32
    return %c0_i32, %c0_i32_0 : i32, i32
  }
  func.func @transform_35(%arg0: i32) -> (i32, i32) {
    %c0_i32 = arith.constant 0 : i32
    %c0_i32_0 = arith.constant 0 : i32
    %c0_i32_1 = arith.constant 0 : i32
    return %c0_i32, %c0_i32_0 : i32, i32
  }
  func.func @transform_36(%arg0: i32) -> (i32, i32) {
    %c0_i32 = arith.constant 0 : i32
    %c0_i32_0 = arith.constant 0 : i32
    %c0_i32_1 = arith.constant 0 : i32
    return %c0_i32, %c0_i32_0 : i32, i32
  }
  func.func @transform_37(%arg0: i32) -> (i32, i32) {
    %c0_i32 = arith.constant 0 : i32
    %c0_i32_0 = arith.constant 0 : i32
    %c0_i32_1 = arith.constant 0 : i32
    return %c0_i32, %c0_i32_0 : i32, i32
  }
  func.func @transform_38(%arg0: i32) -> (i32, i32) {
    %c0_i32 = arith.constant 0 : i32
    %c0_i32_0 = arith.constant 0 : i32
    %c0_i32_1 = arith.constant 0 : i32
    return %c0_i32, %c0_i32_0 : i32, i32
  }
  func.func @transform_39(%arg0: i32) -> (i32, i32) {
    %c0_i32 = arith.constant 0 : i32
    %c0_i32_0 = arith.constant 0 : i32
    %c0_i32_1 = arith.constant 0 : i32
    return %c0_i32, %c0_i32_0 : i32, i32
  }
  func.func @transform_40(%arg0: i32) -> (i32, i32) {
    %c0_i32 = arith.constant 0 : i32
    %c0_i32_0 = arith.constant 0 : i32
    %c0_i32_1 = arith.constant 0 : i32
    return %c0_i32, %c0_i32_0 : i32, i32
  }
  func.func @transform_41(%arg0: i32) -> (i32, i32) {
    %c0_i32 = arith.constant 0 : i32
    %c0_i32_0 = arith.constant 0 : i32
    %c0_i32_1 = arith.constant 0 : i32
    return %c0_i32, %c0_i32_0 : i32, i32
  }
  func.func @transform_42(%arg0: i32) -> (i32, i32) {
    %c0_i32 = arith.constant 0 : i32
    %c0_i32_0 = arith.constant 0 : i32
    %c0_i32_1 = arith.constant 0 : i32
    return %c0_i32, %c0_i32_0 : i32, i32
  }
  func.func @transform_43(%arg0: i32) -> (i32, i32) {
    %c0_i32 = arith.constant 0 : i32
    %c0_i32_0 = arith.constant 0 : i32
    %c0_i32_1 = arith.constant 0 : i32
    return %c0_i32, %c0_i32_0 : i32, i32
  }
  func.func @transform_44(%arg0: i32) -> (i32, i32) {
    %c0_i32 = arith.constant 0 : i32
    %c0_i32_0 = arith.constant 0 : i32
    %c0_i32_1 = arith.constant 0 : i32
    return %c0_i32, %c0_i32_0 : i32, i32
  }
  func.func @transform_45(%arg0: i32) -> (i32, i32) {
    %c0_i32 = arith.constant 0 : i32
    %c0_i32_0 = arith.constant 0 : i32
    %c0_i32_1 = arith.constant 0 : i32
    return %c0_i32, %c0_i32_0 : i32, i32
  }
  func.func @transform_46(%arg0: i32) -> (i32, i32) {
    %c0_i32 = arith.constant 0 : i32
    %c0_i32_0 = arith.constant 0 : i32
    %c0_i32_1 = arith.constant 0 : i32
    return %c0_i32, %c0_i32_0 : i32, i32
  }
  func.func @transform_47(%arg0: i32) -> (i32, i32) {
    %c0_i32 = arith.constant 0 : i32
    %c0_i32_0 = arith.constant 0 : i32
    %c0_i32_1 = arith.constant 0 : i32
    return %c0_i32, %c0_i32_0 : i32, i32
  }
  func.func @transform_48(%arg0: i32) -> (i32, i32) {
    %c0_i32 = arith.constant 0 : i32
    %c0_i32_0 = arith.constant 0 : i32
    %c0_i32_1 = arith.constant 0 : i32
    return %c0_i32, %c0_i32_0 : i32, i32
  }
  func.func @transform_49(%arg0: i32) -> (i32, i32) {
    %c0_i32 = arith.constant 0 : i32
    %c0_i32_0 = arith.constant 0 : i32
    %c0_i32_1 = arith.constant 0 : i32
    return %c0_i32, %c0_i32_0 : i32, i32
  }
  func.func @transform_50(%arg0: i32) -> (i32, i32) {
    %c0_i32 = arith.constant 0 : i32
    %c0_i32_0 = arith.constant 0 : i32
    %c0_i32_1 = arith.constant 0 : i32
    return %c0_i32, %c0_i32_0 : i32, i32
  }
  func.func @transform_51(%arg0: i32) -> (i32, i32) {
    %c0_i32 = arith.constant 0 : i32
    %c0_i32_0 = arith.constant 0 : i32
    %c0_i32_1 = arith.constant 0 : i32
    return %c0_i32, %c0_i32_0 : i32, i32
  }
  func.func @transform_52(%arg0: i32) -> (i32, i32) {
    %c0_i32 = arith.constant 0 : i32
    %c0_i32_0 = arith.constant 0 : i32
    %c0_i32_1 = arith.constant 0 : i32
    return %c0_i32, %c0_i32_0 : i32, i32
  }
  func.func @transform_53(%arg0: i32) -> (i32, i32) {
    %c0_i32 = arith.constant 0 : i32
    %c0_i32_0 = arith.constant 0 : i32
    %c0_i32_1 = arith.constant 0 : i32
    return %c0_i32, %c0_i32_0 : i32, i32
  }
  func.func @transform_54(%arg0: i32) -> (i32, i32) {
    %c0_i32 = arith.constant 0 : i32
    %c0_i32_0 = arith.constant 0 : i32
    %c0_i32_1 = arith.constant 0 : i32
    return %c0_i32, %c0_i32_0 : i32, i32
  }
  func.func @transform_55(%arg0: i32) -> (i32, i32) {
    %c0_i32 = arith.constant 0 : i32
    %c0_i32_0 = arith.constant 0 : i32
    %c0_i32_1 = arith.constant 0 : i32
    return %c0_i32, %c0_i32_0 : i32, i32
  }
  func.func @transform_56(%arg0: i32) -> (i32, i32) {
    %c0_i32 = arith.constant 0 : i32
    %c0_i32_0 = arith.constant 0 : i32
    %c0_i32_1 = arith.constant 0 : i32
    return %c0_i32, %c0_i32_0 : i32, i32
  }
  func.func @transform_57(%arg0: i32) -> (i32, i32) {
    %c0_i32 = arith.constant 0 : i32
    %c0_i32_0 = arith.constant 0 : i32
    %c0_i32_1 = arith.constant 0 : i32
    return %c0_i32, %c0_i32_0 : i32, i32
  }
  func.func @transform_58(%arg0: i32) -> (i32, i32) {
    %c0_i32 = arith.constant 0 : i32
    %c0_i32_0 = arith.constant 0 : i32
    %c0_i32_1 = arith.constant 0 : i32
    return %c0_i32, %c0_i32_0 : i32, i32
  }
  func.func @transform_59(%arg0: i32) -> (i32, i32) {
    %c0_i32 = arith.constant 0 : i32
    %c0_i32_0 = arith.constant 0 : i32
    %c0_i32_1 = arith.constant 0 : i32
    return %c0_i32, %c0_i32_0 : i32, i32
  }
  func.func @transform_60(%arg0: i32) -> (i32, i32) {
    %c0_i32 = arith.constant 0 : i32
    %c0_i32_0 = arith.constant 0 : i32
    %c0_i32_1 = arith.constant 0 : i32
    return %c0_i32, %c0_i32_0 : i32, i32
  }
  func.func @transform_61(%arg0: i32) -> (i32, i32) {
    %c0_i32 = arith.constant 0 : i32
    %c0_i32_0 = arith.constant 0 : i32
    %c0_i32_1 = arith.constant 0 : i32
    return %c0_i32, %c0_i32_0 : i32, i32
  }
  func.func @transform_62(%arg0: i32) -> (i32, i32) {
    %c0_i32 = arith.constant 0 : i32
    %c0_i32_0 = arith.constant 0 : i32
    %c0_i32_1 = arith.constant 0 : i32
    return %c0_i32, %c0_i32_0 : i32, i32
  }
  func.func @transform_63(%arg0: i32) -> (i32, i32) {
    %c0_i32 = arith.constant 0 : i32
    %c0_i32_0 = arith.constant 0 : i32
    %c0_i32_1 = arith.constant 0 : i32
    return %c0_i32, %c0_i32_0 : i32, i32
  }
  func.func @transform_64(%arg0: i32) -> (i32, i32) {
    %c0_i32 = arith.constant 0 : i32
    %c0_i32_0 = arith.constant 0 : i32
    %c0_i32_1 = arith.constant 0 : i32
    return %c0_i32, %c0_i32_0 : i32, i32
  }
  func.func @transform_65(%arg0: i32) -> (i32, i32) {
    %c0_i32 = arith.constant 0 : i32
    %c0_i32_0 = arith.constant 0 : i32
    %c0_i32_1 = arith.constant 0 : i32
    return %c0_i32, %c0_i32_0 : i32, i32
  }
  func.func @transform_66(%arg0: i32) -> (i32, i32) {
    %c0_i32 = arith.constant 0 : i32
    %c0_i32_0 = arith.constant 0 : i32
    %c0_i32_1 = arith.constant 0 : i32
    return %c0_i32, %c0_i32_0 : i32, i32
  }
  func.func @transform_67(%arg0: i32) -> (i32, i32) {
    %c0_i32 = arith.constant 0 : i32
    %c0_i32_0 = arith.constant 0 : i32
    %c0_i32_1 = arith.constant 0 : i32
    return %c0_i32, %c0_i32_0 : i32, i32
  }
  func.func @transform_68(%arg0: i32) -> (i32, i32) {
    %c0_i32 = arith.constant 0 : i32
    %c0_i32_0 = arith.constant 0 : i32
    %c0_i32_1 = arith.constant 0 : i32
    return %c0_i32, %c0_i32_0 : i32, i32
  }
  func.func @transform_69(%arg0: i32) -> (i32, i32) {
    %c0_i32 = arith.constant 0 : i32
    %c0_i32_0 = arith.constant 0 : i32
    %c0_i32_1 = arith.constant 0 : i32
    return %c0_i32, %c0_i32_0 : i32, i32
  }
  func.func @transform_70(%arg0: i32) -> (i32, i32) {
    %c0_i32 = arith.constant 0 : i32
    %c0_i32_0 = arith.constant 0 : i32
    %c0_i32_1 = arith.constant 0 : i32
    return %c0_i32, %c0_i32_0 : i32, i32
  }
  func.func @transform_71(%arg0: i32) -> (i32, i32) {
    %c0_i32 = arith.constant 0 : i32
    %c0_i32_0 = arith.constant 0 : i32
    %c0_i32_1 = arith.constant 0 : i32
    return %c0_i32, %c0_i32_0 : i32, i32
  }
  func.func @transform_72(%arg0: i32) -> (i32, i32) {
    %c0_i32 = arith.constant 0 : i32
    %c0_i32_0 = arith.constant 0 : i32
    %c0_i32_1 = arith.constant 0 : i32
    return %c0_i32, %c0_i32_0 : i32, i32
  }
  func.func @transform_73(%arg0: i32) -> (i32, i32) {
    %c0_i32 = arith.constant 0 : i32
    %c0_i32_0 = arith.constant 0 : i32
    %c0_i32_1 = arith.constant 0 : i32
    return %c0_i32, %c0_i32_0 : i32, i32
  }
  func.func @transform_74(%arg0: i32) -> (i32, i32) {
    %c0_i32 = arith.constant 0 : i32
    %c0_i32_0 = arith.constant 0 : i32
    %c0_i32_1 = arith.constant 0 : i32
    return %c0_i32, %c0_i32_0 : i32, i32
  }
  func.func @transform_75(%arg0: i32) -> (i32, i32) {
    %c0_i32 = arith.constant 0 : i32
    %c0_i32_0 = arith.constant 0 : i32
    %c0_i32_1 = arith.constant 0 : i32
    return %c0_i32, %c0_i32_0 : i32, i32
  }
  func.func @transform_76(%arg0: i32) -> (i32, i32) {
    %c0_i32 = arith.constant 0 : i32
    %c0_i32_0 = arith.constant 0 : i32
    %c0_i32_1 = arith.constant 0 : i32
    return %c0_i32, %c0_i32_0 : i32, i32
  }
  func.func @transform_77(%arg0: i32) -> (i32, i32) {
    %c0_i32 = arith.constant 0 : i32
    %c0_i32_0 = arith.constant 0 : i32
    %c0_i32_1 = arith.constant 0 : i32
    return %c0_i32, %c0_i32_0 : i32, i32
  }
  func.func @transform_78(%arg0: i32) -> (i32, i32) {
    %c0_i32 = arith.constant 0 : i32
    %c0_i32_0 = arith.constant 0 : i32
    %c0_i32_1 = arith.constant 0 : i32
    return %c0_i32, %c0_i32_0 : i32, i32
  }
  func.func @transform_79(%arg0: i32) -> (i32, i32) {
    %c0_i32 = arith.constant 0 : i32
    %c0_i32_0 = arith.constant 0 : i32
    %c0_i32_1 = arith.constant 0 : i32
    return %c0_i32, %c0_i32_0 : i32, i32
  }
  func.func @transform_80(%arg0: i32) -> (i32, i32) {
    %c0_i32 = arith.constant 0 : i32
    %c0_i32_0 = arith.constant 0 : i32
    %c0_i32_1 = arith.constant 0 : i32
    return %c0_i32, %c0_i32_0 : i32, i32
  }
  func.func @transform_81(%arg0: i32) -> (i32, i32) {
    %c0_i32 = arith.constant 0 : i32
    %c0_i32_0 = arith.constant 0 : i32
    %c0_i32_1 = arith.constant 0 : i32
    return %c0_i32, %c0_i32_0 : i32, i32
  }
  func.func @transform_82(%arg0: i32) -> (i32, i32, i32) {
    %c0_i32 = arith.constant 0 : i32
    %c0_i32_0 = arith.constant 0 : i32
    %c0_i32_1 = arith.constant 0 : i32
    return %arg0, %c0_i32, %c0_i32_0 : i32, i32, i32
  }
}

</mosaic_0001>

<bundles_post_ra>
// kernel: fastspeech2_forward.1
= control target key start
LH: loop header
LB: loop body
LE: loop exit
PB: predicated region body
PF: predicated region fallthrough
CT: control target
= control target key end

     0   :  { %s15271_s6 = smov 1   ;;  %s15272_s10 = smov 2   ;;  %s17639_s0 = inlined_call_operand.smem [shape: u32[83], index: -1, kind: input, shape index: {}] }
   0x1   :  { %s15439_s5 = sld [smem:[%s17639_s0]]   ;;  %s15273_s14 = smov 3  }
   0x2   :  { %s15444_s9 = sld [smem:[%s17639_s0 + %s15271_s6]]   ;;  %s15274_s18 = smov 4  }
   0x3   :  { %s15449_s13 = sld [smem:[%s17639_s0 + %s15272_s10]]   ;;  %s15275_s22 = smov 5  }
   0x4   :  { %s15454_s17 = sld [smem:[%s17639_s0 + %s15273_s14]]   ;;  %s15276_s26 = smov 6  }
   0x5   :  { %s15459_s21 = sld [smem:[%s17639_s0 + %s15274_s18]]   ;;  %s15277_s30 = smov 7  }
   0x6   :  { %s15464_s25 = sld [smem:[%s17639_s0 + %s15275_s22]]   ;;  %s15278_s4 = smov 8  }
   0x7   :  { %17757 = sst [smem:[#allocation139_spill]] %s15439_s5  ;;  %s15279_s10 = smov 9  }
   0x8   :  { %17758 = sst [smem:[#allocation140_spill]] %s15444_s9  ;;  %s15280_s15 = smov 10  }
   0x9   :  { %17759 = sst [smem:[#allocation141_spill]] %s15449_s13  ;;  %s15281_s20 = smov 11  }
   0xa   :  { %17760 = sst [smem:[#allocation142_spill]] %s15454_s17  ;;  %s15283_s1 = smov 13  }
   0xb   :  { %s15469_s29 = sld [smem:[%s17639_s0 + %s15276_s26]]   ;;  %s15282_s26 = smov 12  }
   0xc   :  { %17761 = sst [smem:[#allocation143_spill]] %s15464_s25  ;;  %s15284_s7 = smov 14  }
   0xd   :  { %s15474_s3 = sld [smem:[%s17639_s0 + %s15277_s30]]   ;;  %s15286_s22 = smov 16  }
   0xe   :  { %s15479_s8 = sld [smem:[%s17639_s0 + %s15278_s4]]   ;;  %s15287_s28 = smov 17  }
   0xf   :  { %s15484_s14 = sld [smem:[%s17639_s0 + %s15279_s10]]   ;;  %s15328_s10 = smov 58  }
  0x10   :  { %s15489_s19 = sld [smem:[%s17639_s0 + %s15280_s15]]   ;;  %s15285_s15 = smov 15  }
  0x11   :  { %17762 = sst [smem:[#allocation144_spill]] %s15469_s29  ;;  %s15329_s16 = smov 59  }
  0x12   :  { %s15494_s24 = sld [smem:[%s17639_s0 + %s15281_s20]]   ;;  %s15330_s23 = smov 60  }
  0x13   :  { %17763 = sst [smem:[#allocation145_spill]] %s15474_s3 }
  0x14   :  { %17764 = sst [smem:[#allocation146_spill]] %s15479_s8 }
  0x15   :  { %17765 = sst [smem:[#allocation147_spill]] %s15484_s14 }
  0x16   :  { %17766 = sst [smem:[#allocation148_spill]] %s15489_s19 }
  0x17   :  { %s15499_s30 = sld [smem:[%s17639_s0 + %s15282_s26]]  }
  0x18   :  { %17767 = sst [smem:[#allocation149_spill]] %s15494_s24 }
  0x19   :  { %s15504_s6 = sld [smem:[%s17639_s0 + %s15283_s1]]   ;;  %s15327_s1 = smov 57  }
  0x1a   :  { %s15509_s12 = sld [smem:[%s17639_s0 + %s15284_s7]]   ;;  %s15288_s7 = smov 18  }
  0x1b   :  { %s15514_s20 = sld [smem:[%s17639_s0 + %s15285_s15]]   ;;  %s15289_s15 = smov 19  }
  0x1c   :  { %s15519_s27 = sld [smem:[%s17639_s0 + %s15286_s22]]   ;;  %s15290_s22 = smov 20  }
  0x1d   :  { %s15524_s4 = sld [smem:[%s17639_s0 + %s15287_s28]]   ;;  %s15291_s28 = smov 21  }
  0x1e   :  { %s15529_s19 = sld [smem:[%s17639_s0 + %s15288_s7]]   ;;  %s15292_s7 = smov 22  }
  0x1f   :  { %17768 = sst [smem:[#allocation150_spill]] %s15504_s6 }
  0x20   :  { %17769 = sst [smem:[#allocation151_spill]] %s15509_s12 }
  0x21   :  { %17770 = sst [smem:[#allocation152_spill]] %s15514_s20 }
  0x22   :  { %s15534_s25 = sld [smem:[%s17639_s0 + %s15289_s15]]   ;;  %s15293_s15 = smov 23  }
  0x23   :  { %17771 = sst [smem:[#allocation153_spill]] %s15524_s4 }
  0x24   :  { %17772 = sst [smem:[#allocation154_spill]] %s15529_s19 }
  0x25   :  { %s15539_s5 = sld [smem:[%s17639_s0 + %s15290_s22]]   ;;  %s15294_s22 = smov 24  }
  0x26   :  { %s15544_s4 = sld [smem:[%s17639_s0 + %s15291_s28]]   ;;  %s15295_s28 = smov 25  }
  0x27   :  { %s15549_s19 = sld [smem:[%s17639_s0 + %s15292_s7]]   ;;  %s15296_s7 = smov 26  }
  0x28   :  { %s15554_s20 = sld [smem:[%s17639_s0 + %s15293_s15]]   ;;  %s15297_s15 = smov 27  }
  0x29   :  { %s15564_s6 = sld [smem:[%s17639_s0 + %s15295_s28]]   ;;  %s15299_s28 = smov 29  }
  0x2a   :  { %s15574_s24 = sld [smem:[%s17639_s0 + %s15297_s15]]   ;;  %s15301_s15 = smov 31  }
  0x2b   :  { %17773 = sst [smem:[#allocation155_spill]] %s15539_s5 }
  0x2c   :  { %17774 = sst [smem:[#allocation156_spill]] %s15544_s4 }
  0x2d   :  { %17775 = sst [smem:[#allocation157_spill]] %s15549_s19 }
  0x2e   :  { %s15559_s5 = sld [smem:[%s17639_s0 + %s15294_s22]]   ;;  %s15298_s22 = smov 28  }
  0x2f   :  { %17777 = sst [smem:[#allocation159_spill]] %s15564_s6 }
  0x30   :  { %s15569_s19 = sld [smem:[%s17639_s0 + %s15296_s7]]   ;;  %s15300_s7 = smov 30  }
  0x31   :  { %s15584_s8 = sld [smem:[%s17639_s0 + %s15299_s28]]   ;;  %s15303_s28 = smov 33  }
  0x32   :  { %s15594_s29 = sld [smem:[%s17639_s0 + %s15301_s15]]   ;;  %s15305_s15 = smov 35  }
  0x33   :  { %s15604_s17 = sld [smem:[%s17639_s0 + %s15303_s28]]   ;;  %s15307_s28 = smov 37  }
  0x34   :  { %17776 = sst [smem:[#allocation158_spill]] %s15559_s5 }
  0x35   :  { %s15579_s5 = sld [smem:[%s17639_s0 + %s15298_s22]]   ;;  %s15302_s22 = smov 32  }
  0x36   :  { %17778 = sst [smem:[#allocation160_spill]] %s15569_s19 }
  0x37   :  { %17780 = sst [smem:[#allocation162_spill]] %s15584_s8 }
  0x38   :  { %s15589_s19 = sld [smem:[%s17639_s0 + %s15300_s7]]   ;;  %s15304_s7 = smov 34  }
  0x39   :  { %17782 = sst [smem:[#allocation164_spill]] %s15594_s29 }
  0x3a   :  { %17784 = sst [smem:[#allocation166_spill]] %s15604_s17 }
  0x3b   :  { %17779 = sst [smem:[#allocation161_spill]] %s15579_s5 }
  0x3c   :  { %s15599_s5 = sld [smem:[%s17639_s0 + %s15302_s22]]   ;;  %s15306_s22 = smov 36  }
  0x3d   :  { %s15614_s29 = sld [smem:[%s17639_s0 + %s15305_s15]]   ;;  %s15309_s15 = smov 39  }
  0x3e   :  { %17781 = sst [smem:[#allocation163_spill]] %s15589_s19 }
  0x3f   :  { %s15609_s19 = sld [smem:[%s17639_s0 + %s15304_s7]]   ;;  %s15308_s7 = smov 38  }
  0x40   :  { %s15619_s9 = sld [smem:[%s17639_s0 + %s15306_s22]]   ;;  %s15310_s22 = smov 40  }
  0x41   :  { %s15624_s17 = sld [smem:[%s17639_s0 + %s15307_s28]]   ;;  %s15311_s28 = smov 41  }
  0x42   :  { %17783 = sst [smem:[#allocation165_spill]] %s15599_s5 }
  0x43   :  { %17786 = sst [smem:[#allocation168_spill]] %s15614_s29 }
  0x44   :  { %s15634_s29 = sld [smem:[%s17639_s0 + %s15309_s15]]   ;;  %s15313_s15 = smov 43  }
  0x45   :  { %17785 = sst [smem:[#allocation167_spill]] %s15609_s19 }
  0x46   :  { %17787 = sst [smem:[#allocation169_spill]] %s15619_s9 }
  0x47   :  { %17788 = sst [smem:[#allocation170_spill]] %s15624_s17 }
  0x48   :  { %s15629_s19 = sld [smem:[%s17639_s0 + %s15308_s7]]   ;;  %s15312_s7 = smov 42  }
  0x49   :  { %s15639_s9 = sld [smem:[%s17639_s0 + %s15310_s22]]   ;;  %s15314_s22 = smov 44  }
  0x4a   :  { %17790 = sst [smem:[#allocation172_spill]] %s15634_s29 }
  0x4b   :  { %s15644_s17 = sld [smem:[%s17639_s0 + %s15311_s28]]   ;;  %s15315_s28 = smov 45  }
  0x4c   :  { %s15654_s29 = sld [smem:[%s17639_s0 + %s15313_s15]]   ;;  %s15317_s15 = smov 47  }
  0x4d   :  { %s15737_s5 = sld [smem:[%s17639_s0 + %s15330_s23]]   ;;  %s15334_s23 = smov 65  }
  0x4e   :  { %17789 = sst [smem:[#allocation171_spill]] %s15629_s19 }
  0x4f   :  { %17791 = sst [smem:[#allocation173_spill]] %s15639_s9 }
  0x50   :  { %s15649_s19 = sld [smem:[%s17639_s0 + %s15312_s7]]   ;;  %s15316_s7 = smov 46  }
  0x51   :  { %17792 = sst [smem:[#allocation174_spill]] %s15644_s17 }
  0x52   :  { %17794 = sst [smem:[#allocation176_spill]] %s15654_s29 }
  0x53   :  { %s15659_s9 = sld [smem:[%s17639_s0 + %s15314_s22]]   ;;  %s15318_s22 = smov 48  }
  0x54   :  { %s15664_s17 = sld [smem:[%s17639_s0 + %s15315_s28]]   ;;  %s15319_s28 = smov 49  }
  0x55   :  { %s15674_s29 = sld [smem:[%s17639_s0 + %s15317_s15]]   ;;  %s15321_s15 = smov 51  }
  0x56   :  { %17793 = sst [smem:[#allocation175_spill]] %s15649_s19 }
  0x57   :  { %s15669_s19 = sld [smem:[%s17639_s0 + %s15316_s7]]   ;;  %s15320_s7 = smov 50  }
  0x58   :  { %17810 = sst [smem:[#allocation192_spill]] %s15737_s5 }
  0x59   :  { %17795 = sst [smem:[#allocation177_spill]] %s15659_s9 }
  0x5a   :  { %17796 = sst [smem:[#allocation178_spill]] %s15664_s17 }
  0x5b   :  { %17798 = sst [smem:[#allocation180_spill]] %s15674_s29 }
  0x5c   :  { %s15679_s9 = sld [smem:[%s17639_s0 + %s15318_s22]]   ;;  %s15322_s22 = smov 52  }
  0x5d   :  { %17797 = sst [smem:[#allocation179_spill]] %s15669_s19 }
  0x5e   :  { %s15684_s17 = sld [smem:[%s17639_s0 + %s15319_s28]]   ;;  %s15323_s28 = smov 53  }
  0x5f   :  { %s15689_s19 = sld [smem:[%s17639_s0 + %s15320_s7]]   ;;  %s15324_s7 = smov 54  }
  0x60   :  { %s15694_s29 = sld [smem:[%s17639_s0 + %s15321_s15]]   ;;  %s15325_s15 = smov 55  }
  0x62   :  { %17799 = sst [smem:[#allocation181_spill]] %s15679_s9 }
  0x63   :  { %s15699_s9 = sld [smem:[%s17639_s0 + %s15322_s22]]   ;;  %s15326_s22 = smov 56  }
  0x64   :  { %17800 = sst [smem:[#allocation182_spill]] %s15684_s17 }
  0x65   :  { %17801 = sst [smem:[#allocation183_spill]] %s15689_s19 }
  0x66   :  { %17802 = sst [smem:[#allocation184_spill]] %s15694_s29 }
  0x67   :  { %s15704_s17 = sld [smem:[%s17639_s0 + %s15323_s28]]   ;;  %s15335_s28 = smov 66  }
  0x68   :  { %s15709_s19 = sld [smem:[%s17639_s0 + %s15324_s7]]   ;;  %s15352_s7 = smov 72  }
  0x69   :  { %17803 = sst [smem:[#allocation185_spill]] %s15699_s9 }
  0x6a   :  { %s15714_s29 = sld [smem:[%s17639_s0 + %s15325_s15]]  }
  0x6b   :  { %s10332_s9 = sld [smem:[%s17639_s0 + %s15326_s22]]  }
  0x6d   :  { %17804 = sst [smem:[#allocation186_spill]] %s15704_s17 }
  0x6e   :  { %17805 = sst [smem:[#allocation187_spill]] %s15709_s19 }
  0x6f   :  { %s15722_s17 = sld [smem:[%s17639_s0 + %s15327_s1]]   ;;  %s15331_s1 = smov 61  }
  0x70   :  { %17806 = sst [smem:[#allocation188_spill]] %s15714_s29 }
  0x71   :  { %s15727_s19 = sld [smem:[%s17639_s0 + %s15328_s10]]   ;;  %s15332_s10 = smov 62   ;;  %v170_v0 = vstv %s10332_s9 }
  0x72   :  { %s15732_s29 = sld [smem:[%s17639_s0 + %s15329_s16]]   ;;  %s15333_s16 = smov 63   ;;  %171 = vst [vmem:[#allocation2] sm:$0x1] %v170_v0 }
  0x73   :  { %s15752_s22 = sld [smem:[%s17639_s0 + %s15333_s16]]   ;;  %s15336_s9 = smov 67  }
  0x74   :  { %s15767_s15 = sld [smem:[%s17639_s0 + %s15336_s9]]   ;;  %s15337_s16 = smov 68  }
  0x75   :  { %17807 = sst [smem:[#allocation189_spill]] %s15722_s17  ;;  %s15340_s9 = smov 71  }
  0x76   :  { %s15742_s17 = sld [smem:[%s17639_s0 + %s15331_s1]]  }
  0x77   :  { %17808 = sst [smem:[#allocation190_spill]] %s15727_s19 }
  0x78   :  { %17809 = sst [smem:[#allocation191_spill]] %s15732_s29  ;;  %s15338_s29 = smov 69  }
  0x79   :  { %s15747_s19 = sld [smem:[%s17639_s0 + %s15332_s10]]  }
  0x7a   :  { %17813 = sst [smem:[#allocation195_spill]] %s15752_s22 }
  0x7b   :  { %s15757_s1 = sld [smem:[%s17639_s0 + %s15334_s23]]  }
  0x7c   :  { %17811 = sst [smem:[#allocation193_spill]] %s15742_s17  ;;  %s15339_s17 = smov 70  }
  0x7d   :  { %s15762_s10 = sld [smem:[%s17639_s0 + %s15335_s28]]  }
  0x7e   :  { %17816 = sst [smem:[#allocation198_spill]] %s15767_s15 }
  0x7f   :  { %17812 = sst [smem:[#allocation194_spill]] %s15747_s19  ;;  %s15341_s19 = smov 73  }
  0x80   :  { %s15772_s22 = sld [smem:[%s17639_s0 + %s15337_s16]]  }
  0x81   :  { %17814 = sst [smem:[#allocation196_spill]] %s15757_s1 }
  0x82   :  { %s15777_s1 = sld [smem:[%s17639_s0 + %s15338_s29]]   ;;  %s15342_s29 = smov 74  }
  0x83   :  { %17815 = sst [smem:[#allocation197_spill]] %s15762_s10 }
  0x84   :  { %s15782_s10 = sld [smem:[%s17639_s0 + %s15339_s17]]   ;;  %s15343_s17 = smov 75  }
  0x85   :  { %s15787_s15 = sld [smem:[%s17639_s0 + %s15340_s9]]   ;;  %s15344_s9 = smov 76  }
  0x86   :  { %17817 = sst [smem:[#allocation199_spill]] %s15772_s22 }
  0x87   :  { %s15792_s22 = sld [smem:[%s17639_s0 + %s15341_s19]]   ;;  %s15345_s19 = smov 77  }
  0x88   :  { %17818 = sst [smem:[#allocation200_spill]] %s15777_s1 }
  0x89   :  { %s15797_s1 = sld [smem:[%s17639_s0 + %s15342_s29]]   ;;  %s15346_s29 = smov 78  }
  0x8a   :  { %17819 = sst [smem:[#allocation201_spill]] %s15782_s10 }
  0x8b   :  { %17820 = sst [smem:[#allocation202_spill]] %s15787_s15 }
  0x8c   :  { %s15802_s10 = sld [smem:[%s17639_s0 + %s15343_s17]]   ;;  %s15347_s17 = smov 79  }
  0x8d   :  { %17821 = sst [smem:[#allocation203_spill]] %s15792_s22 }
  0x8e   :  { %s15807_s15 = sld [smem:[%s17639_s0 + %s15344_s9]]   ;;  %s15348_s9 = smov 80  }
  0x8f   :  { %17822 = sst [smem:[#allocation204_spill]] %s15797_s1 }
  0x90   :  { %s15812_s22 = sld [smem:[%s17639_s0 + %s15345_s19]]   ;;  %s15349_s19 = smov 81  }
  0x91   :  { %s15817_s1 = sld [smem:[%s17639_s0 + %s15346_s29]]   ;;  %s15350_s29 = smov 82  }
  0x92   :  { %17823 = sst [smem:[#allocation205_spill]] %s15802_s10 }
  0x93   :  { %s15822_s10 = sld [smem:[%s17639_s0 + %s15347_s17]]   ;;  %s15351_s17 = smov 64  }
  0x94   :  { %17824 = sst [smem:[#allocation206_spill]] %s15807_s15 }
  0x95   :  { %s15827_s15 = sld [smem:[%s17639_s0 + %s15348_s9]]  }
  0x96   :  { %17825 = sst [smem:[#allocation207_spill]] %s15812_s22 }
  0x97   :  { %17826 = sst [smem:[#allocation208_spill]] %s15817_s1 }
  0x98   :  { %s15832_s22 = sld [smem:[%s17639_s0 + %s15349_s19]]  }
  0x99   :  { %17827 = sst [smem:[#allocation209_spill]] %s15822_s10 }
  0x9a   :  { %s15837_s1 = sld [smem:[%s17639_s0 + %s15350_s29]]  }
  0x9b   :  { %17828 = sst [smem:[#allocation210_spill]] %s15827_s15 }
  0x9c   :  { %s10340_s10 = sld [smem:[%s17639_s0 + %s15351_s17]]  }
  0x9d   :  { %s10348_s15 = sld [smem:[%s17639_s0 + %s15352_s7]]  }
  0xa2   :  { %v172_v1 = vstv %s10340_s10 }
  0xa3   :  { %173 = vst [vmem:[#allocation3] sm:$0x1] %v172_v1  ;;  %v174_v2 = vstv %s10348_s15 }
  0xa4   :  { %175 = vst [vmem:[#allocation4] sm:$0x1] %v174_v2 }
  0xa5   :  { %176 = vsyncpa [#allocation6], 0 }
  0xa6   :  { %177 = vsyncpa [#allocation8], 0 }
  0xa7   :  { %178 = vsyncpa [#allocation11], 0 }
  0xa8   :  { %179 = vsyncpa [#allocation14], 0 }
  0xa9   :  { %180 = vsyncpa [#allocation17], 0 }
  0xaa   :  { %181 = vsyncpa [#allocation20], 0 }
  0xab   :  { %182 = vsyncpa [#allocation23], 0 }
  0xac   :  { %183 = vsyncpa [#allocation26], 0 }
  0xad   :  { %184 = vsyncpa [#allocation29], 0 }
  0xae   :  { %185 = vsyncpa [#allocation32], 0 }
  0xaf   :  { %186 = vsyncpa [#allocation35], 0 }
  0xb0   :  { %187 = vsyncpa [#allocation38], 0 }
  0xb1   :  { %188 = vsyncpa [#allocation41], 0 }
  0xb2   :  { %189 = vsyncpa [#allocation44], 0 }
  0xb3   :  { %190 = vsyncpa [#allocation47], 0 }
  0xb4   :  { %191 = vsyncpa [#allocation50], 0 }
  0xb5   :  { %192 = vsyncpa [#allocation53], 0 }
  0xb6   :  { %193 = vsyncpa [#allocation56], 0 }
  0xb7   :  { %194 = vsyncpa [#allocation59], 0 }
  0xb8   :  { %195 = vsyncpa [#allocation62], 0 }
  0xb9   :  { %196 = vsyncpa [#allocation65], 0 }
  0xba   :  { %197 = vsyncpa [#allocation68], 0 }
  0xbb   :  { %198 = vsyncpa [#allocation71], 0 }
  0xbc   :  { %199 = vsyncpa [#allocation74], 0 }
  0xbd   :  { %200 = vsyncpa [#allocation77], 0 }
  0xbe   :  { %201 = vsyncpa [#allocation80], 0 }
  0xbf   :  { %202 = vsyncpa [#allocation83], 0 }
  0xc0   :  { %203 = vsyncpa [#allocation86], 0 }
  0xc1   :  { %204 = vsyncpa [#allocation89], 0 }
  0xc2   :  { %205 = vsyncpa [#allocation92], 0 }
  0xc3   :  { %206 = vsyncpa [#allocation95], 0 }
  0xc4   :  { %207 = vsyncpa [#allocation98], 0 }
  0xc5   :  { %208 = vsyncpa [#allocation101], 0 }
  0xc6   :  { %209 = vsyncpa [#allocation104], 0  ;;  %s15845_s0 = smov 0  }
  0xc7 LB: > { %s17829_s5 = sld [smem:[#allocation192_spill]]  ;;  %s17830_s14 = sld [smem:[#allocation147_spill]]  ;;  %s15269_s0 = sphi %s15845_s0, %s215_s0  }
  0xc8   : > { %s17831_s13 = sld [smem:[#allocation141_spill]]  ;;  %s17832_s12 = sld [smem:[#allocation151_spill]] }
  0xc9   : > { %s17833_s8 = sld [smem:[#allocation162_spill]]  ;;  %s17834_s6 = sld [smem:[#allocation159_spill]] }
  0xca   : > { %s17835_s4 = sld [smem:[#allocation156_spill]]  ;;  %s17836_s3 = sld [smem:[#allocation145_spill]] }
  0xcb   : > { %s15851_s10 = sadd.s32 4294967295, %s15269_s0   ;;  %p10361_p0 = scmp.ge.s32.totalorder %s15269_s0, 1 }
  0xcc   : > { %p1973_p1 = scmp.lt.s32.totalorder %s15269_s0, 3 }
  0xce   : > { %p15855_p2 = pnand %p10361_p0, %p1973_p1 }
  0xcf   : > { %p12975_p3 = scmp.eq.s32.totalorder (!%p15855_p2), %s15851_s10, 0  ;;  %s15353_s19 = smov (!%p15855_p2), [#allocation7]  }
  0xd0   : > { %1977 = sbr.rel (%p15855_p2) target bundleno = 1867 (0x74b), region = 12  ;;  %s1997_s16 = sshll.u32 (!%p15855_p2), %s15353_s19, 4  ;;  %s1998_s16 = int_to_ptr.vmem [resolvable:$true] %s1997_s16 }
  0xd1   : > { %s15354_s18 = smov (!%p15855_p2), [#allocation10]   ;;  %s13411_s23 = scalar_lea.hbm (!%p15855_p2), %s17831_s13, 32 }
  0xd2   : > { %s2019_s29 = sshll.u32 (!%p15855_p2), %s15354_s18, 4  ;;  %p13412_p4 = scmp.ne.s32.totalorder (!%p15855_p2), %s17831_s13, %s13411_s23  ;;  %s2020_s29 = int_to_ptr.vmem [resolvable:$true] %s2019_s29 }
  0xd3   : > { %p13417_p7 = scmp.lt.u32.totalorder (!%p15855_p2), %s13411_s23, %s17831_s13 }
  0xd4   : > { %p13413_p5 = pnand (!%p15855_p2), %p13412_p4, %p12975_p3 }
  0xd6   : > { %p13414_p6 = pneg (!%p15855_p2), %p13413_p5 }
  0xd8   : > { %p13419_p8 = pnand %p13417_p7, %p13414_p6 }
  0xda   : > { %13422 = shalt.err (!%p13419_p8)
}
  0xdb   : > { %s13423_s26 = scalar_lea.vmem %s1998_s16, 32  ;;  %p13430_p12 = scmp.lt.s32.totalorder %s1998_s16, %s1998_s16 }
  0xdc   : > { %p13424_p9 = scmp.ne.s32.totalorder %s1998_s16, %s13423_s26  ;;  %p13431_p13 = scmp.lt.s32.totalorder %s13423_s26, %s13423_s26 }
  0xde   : > { %p13425_p10 = pnand %p13424_p9, %p12975_p3  ;;  %p13432_p0 = por %p13431_p13, %p13430_p12 }
  0xe0   : > { %p13426_p11 = pneg %p13425_p10 }
  0xe2   : > { %p13433_p1 = pnand %p13432_p0, %p13426_p11 }
  0xe4   : > { %13436 = shalt.err (!%p13433_p1)
}
  0xe5   : > { %12714 = dma.hbm_to_vmem [thread:$0]  (%p12975_p3), %s17831_s13, 32, %s1998_s16, [#allocation8]  }
  0xe6   : > { %s13437_s17 = scalar_lea.hbm %s15459_s21, 16 }
  0xe7   : > { %p13438_p4 = scmp.ne.s32.totalorder %s15459_s21, %s13437_s17  ;;  %p13443_p7 = scmp.lt.u32.totalorder %s13437_s17, %s15459_s21 }
  0xe9   : > { %p13439_p5 = pnand %p13438_p4, %p12975_p3 }
  0xeb   : > { %p13440_p6 = pneg %p13439_p5 }
  0xed   : > { %p13445_p8 = pnand %p13443_p7, %p13440_p6 }
  0xef   : > { %13448 = shalt.err (!%p13445_p8)
}
  0xf0   : > { %s13449_s28 = scalar_lea.vmem %s2020_s29, 16  ;;  %s13455_s2 = scalar_lea.vmem %s2020_s29, 32 }
  0xf1   : > { %p13450_p9 = scmp.ne.s32.totalorder %s2020_s29, %s13449_s28  ;;  %p13456_p12 = scmp.lt.s32.totalorder %s2020_s29, %s2020_s29 }
  0xf2   : > { %p13457_p13 = scmp.lt.s32.totalorder %s13455_s2, %s13449_s28 }
  0xf3   : > { %p13451_p10 = pnand %p13450_p9, %p12975_p3 }
  0xf4   : > { %p13458_p0 = por %p13457_p13, %p13456_p12 }
  0xf5   : > { %p13452_p11 = pneg %p13451_p10 }
  0xf7   : > { %p13459_p1 = pnand %p13458_p0, %p13452_p11 }
  0xf9   : > { %13462 = shalt.err (!%p13459_p1)
}
  0xfa   : > { %12718 = dma.hbm_to_vmem [thread:$0]  (%p12975_p3), %s15459_s21, 16, %s2020_s29, [#allocation11]  }
  0xfb   : > { %s15355_s7 = smov [#allocation13]   ;;  %s15356_s11 = smov [#allocation16]  }
  0xfc   : > { %s2044_s9 = sshll.u32 %s15355_s7, 4  ;;  %s2066_s19 = sshll.u32 %s15356_s11, 4  ;;  %s2045_s9 = int_to_ptr.vmem [resolvable:$true] %s2044_s9  ;;  %s2067_s19 = int_to_ptr.vmem [resolvable:$true] %s2066_s19 }
  0xfd   : > { %s13463_s16 = scalar_lea.hbm %s17836_s3, 16 }
  0xfe   : > { %p13464_p4 = scmp.ne.s32.totalorder %s17836_s3, %s13463_s16  ;;  %p13469_p7 = scmp.lt.u32.totalorder %s13463_s16, %s17836_s3 }
 0x100   : > { %p13465_p5 = pnand %p13464_p4, %p12975_p3 }
 0x102   : > { %p13466_p6 = pneg %p13465_p5 }
 0x104   : > { %p13471_p8 = pnand %p13469_p7, %p13466_p6 }
 0x106   : > { %13474 = shalt.err (!%p13471_p8)
}
 0x107   : > { %s13475_s18 = scalar_lea.vmem %s2045_s9, 16  ;;  %s13481_s29 = scalar_lea.vmem %s2045_s9, 32 }
 0x108   : > { %p13476_p9 = scmp.ne.s32.totalorder %s2045_s9, %s13475_s18  ;;  %p13482_p12 = scmp.lt.s32.totalorder %s2045_s9, %s2045_s9 }
 0x109   : > { %p13483_p13 = scmp.lt.s32.totalorder %s13481_s29, %s13475_s18 }
 0x10a   : > { %p13477_p10 = pnand %p13476_p9, %p12975_p3 }
 0x10b   : > { %p13484_p0 = por %p13483_p13, %p13482_p12 }
 0x10c   : > { %p13478_p11 = pneg %p13477_p10 }
 0x10e   : > { %p13485_p1 = pnand %p13484_p0, %p13478_p11 }
 0x110   : > { %13488 = shalt.err (!%p13485_p1)
}
 0x111   : > { %12722 = dma.hbm_to_vmem [thread:$0]  (%p12975_p3), %s17836_s3, 16, %s2045_s9, [#allocation14]  }
 0x112   : > { %s13489_s23 = scalar_lea.hbm %s17830_s14, 16 }
 0x113   : > { %p13490_p4 = scmp.ne.s32.totalorder %s17830_s14, %s13489_s23  ;;  %p13495_p7 = scmp.lt.u32.totalorder %s13489_s23, %s17830_s14 }
 0x115   : > { %p13491_p5 = pnand %p13490_p4, %p12975_p3 }
 0x117   : > { %p13492_p6 = pneg %p13491_p5 }
 0x119   : > { %p13497_p8 = pnand %p13495_p7, %p13492_p6 }
 0x11b   : > { %13500 = shalt.err (!%p13497_p8)
}
 0x11c   : > { %s13501_s26 = scalar_lea.vmem %s2067_s19, 16  ;;  %s13507_s17 = scalar_lea.vmem %s2067_s19, 32 }
 0x11d   : > { %p13502_p9 = scmp.ne.s32.totalorder %s2067_s19, %s13501_s26  ;;  %p13508_p12 = scmp.lt.s32.totalorder %s2067_s19, %s2067_s19 }
 0x11e   : > { %p13509_p13 = scmp.lt.s32.totalorder %s13507_s17, %s13501_s26 }
 0x11f   : > { %p13503_p10 = pnand %p13502_p9, %p12975_p3 }
 0x120   : > { %p13510_p0 = por %p13509_p13, %p13508_p12 }
 0x121   : > { %p13504_p11 = pneg %p13503_p10 }
 0x123   : > { %p13511_p1 = pnand %p13510_p0, %p13504_p11 }
 0x125   : > { %13514 = shalt.err (!%p13511_p1)
}
 0x126   : > { %12726 = dma.hbm_to_vmem [thread:$0]  (%p12975_p3), %s17830_s14, 16, %s2067_s19, [#allocation17]  }
 0x127   : > { %s15357_s28 = smov [#allocation19]   ;;  %s15358_s7 = smov [#allocation22]  }
 0x128   : > { %s2092_s2 = sshll.u32 %s15357_s28, 4  ;;  %s2119_s9 = sshll.u32 %s15358_s7, 4  ;;  %s2093_s2 = int_to_ptr.vmem [resolvable:$true] %s2092_s2  ;;  %s2120_s9 = int_to_ptr.vmem [resolvable:$true] %s2119_s9 }
 0x129   : > { %s13515_s11 = scalar_lea.hbm %s15499_s30, 4096 }
 0x12a   : > { %p13516_p4 = scmp.ne.s32.totalorder %s15499_s30, %s13515_s11  ;;  %p13521_p7 = scmp.lt.u32.totalorder %s13515_s11, %s15499_s30 }
 0x12c   : > { %p13517_p5 = pnand %p13516_p4, %p12975_p3 }
 0x12e   : > { %p13518_p6 = pneg %p13517_p5 }
 0x130   : > { %p13523_p8 = pnand %p13521_p7, %p13518_p6 }
 0x132   : > { %13526 = shalt.err (!%p13523_p8)
}
 0x133   : > { %s13527_s16 = scalar_lea.vmem %s2093_s2, 4096  ;;  %p13534_p12 = scmp.lt.s32.totalorder %s2093_s2, %s2093_s2 }
 0x134   : > { %p13528_p9 = scmp.ne.s32.totalorder %s2093_s2, %s13527_s16  ;;  %p13535_p13 = scmp.lt.s32.totalorder %s13527_s16, %s13527_s16 }
 0x136   : > { %p13529_p10 = pnand %p13528_p9, %p12975_p3  ;;  %p13536_p0 = por %p13535_p13, %p13534_p12 }
 0x138   : > { %p13530_p11 = pneg %p13529_p10 }
 0x13a   : > { %p13537_p1 = pnand %p13536_p0, %p13530_p11 }
 0x13c   : > { %13540 = shalt.err (!%p13537_p1)
}
 0x13d   : > { %s17702_s19 = smov 128   ;;  %s17704_s18 = smov 8  }
 0x13e   : > { %12730 = dma.hbm_to_vmem [thread:$0]  (%p12975_p3), %s15499_s30, 4096, %s2093_s2, [#allocation20], %s17702_s19, %s17702_s19, %s17704_s18  }
 0x13f   : > { %s13541_s29 = scalar_lea.hbm %s17832_s12, 32 }
 0x140   : > { %p13542_p4 = scmp.ne.s32.totalorder %s17832_s12, %s13541_s29  ;;  %p13547_p7 = scmp.lt.u32.totalorder %s13541_s29, %s17832_s12 }
 0x142   : > { %p13543_p5 = pnand %p13542_p4, %p12975_p3 }
 0x144   : > { %p13544_p6 = pneg %p13543_p5 }
 0x146   : > { %p13549_p8 = pnand %p13547_p7, %p13544_p6 }
 0x148   : > { %13552 = shalt.err (!%p13549_p8)
}
 0x149   : > { %s13553_s23 = scalar_lea.vmem %s2120_s9, 32  ;;  %p13560_p12 = scmp.lt.s32.totalorder %s2120_s9, %s2120_s9 }
 0x14a   : > { %p13554_p9 = scmp.ne.s32.totalorder %s2120_s9, %s13553_s23  ;;  %p13561_p13 = scmp.lt.s32.totalorder %s13553_s23, %s13553_s23 }
 0x14c   : > { %p13555_p10 = pnand %p13554_p9, %p12975_p3  ;;  %p13562_p0 = por %p13561_p13, %p13560_p12 }
 0x14e   : > { %p13556_p11 = pneg %p13555_p10 }
 0x150   : > { %p13563_p1 = pnand %p13562_p0, %p13556_p11 }
 0x152   : > { %13566 = shalt.err (!%p13563_p1)
}
 0x153   : > { %12734 = dma.hbm_to_vmem [thread:$0]  (%p12975_p3), %s17832_s12, 32, %s2120_s9, [#allocation23]  }
 0x154   : > { %s15361_s26 = smov [#allocation25]   ;;  %s15362_s28 = smov [#allocation28]  }
 0x155   : > { %s2141_s17 = sshll.u32 %s15361_s26, 4  ;;  %s2166_s2 = sshll.u32 %s15362_s28, 4  ;;  %s2142_s17 = int_to_ptr.vmem [resolvable:$true] %s2141_s17  ;;  %s2167_s2 = int_to_ptr.vmem [resolvable:$true] %s2166_s2 }
 0x156   : > { %s13567_s7 = scalar_lea.hbm %s15519_s27, 16 }
 0x157   : > { %p13568_p4 = scmp.ne.s32.totalorder %s15519_s27, %s13567_s7  ;;  %p13573_p7 = scmp.lt.u32.totalorder %s13567_s7, %s15519_s27 }
 0x159   : > { %p13569_p5 = pnand %p13568_p4, %p12975_p3 }
 0x15b   : > { %p13570_p6 = pneg %p13569_p5 }
 0x15d   : > { %p13575_p8 = pnand %p13573_p7, %p13570_p6 }
 0x15f   : > { %13578 = shalt.err (!%p13575_p8)
}
 0x160   : > { %s13579_s11 = scalar_lea.vmem %s2142_s17, 16  ;;  %s13585_s9 = scalar_lea.vmem %s2142_s17, 32 }
 0x161   : > { %p13580_p9 = scmp.ne.s32.totalorder %s2142_s17, %s13579_s11  ;;  %p13586_p12 = scmp.lt.s32.totalorder %s2142_s17, %s2142_s17 }
 0x162   : > { %p13587_p13 = scmp.lt.s32.totalorder %s13585_s9, %s13579_s11 }
 0x163   : > { %p13581_p10 = pnand %p13580_p9, %p12975_p3 }
 0x164   : > { %p13588_p0 = por %p13587_p13, %p13586_p12 }
 0x165   : > { %p13582_p11 = pneg %p13581_p10 }
 0x167   : > { %p13589_p1 = pnand %p13588_p0, %p13582_p11 }
 0x169   : > { %13592 = shalt.err (!%p13589_p1)
}
 0x16a   : > { %12738 = dma.hbm_to_vmem [thread:$0]  (%p12975_p3), %s15519_s27, 16, %s2142_s17, [#allocation26]  }
 0x16b   : > { %s13593_s16 = scalar_lea.hbm %s15534_s25, 16 }
 0x16c   : > { %p13594_p4 = scmp.ne.s32.totalorder %s15534_s25, %s13593_s16  ;;  %p13599_p7 = scmp.lt.u32.totalorder %s13593_s16, %s15534_s25 }
 0x16e   : > { %p13595_p5 = pnand %p13594_p4, %p12975_p3 }
 0x170   : > { %p13596_p6 = pneg %p13595_p5 }
 0x172   : > { %p13601_p8 = pnand %p13599_p7, %p13596_p6 }
 0x174   : > { %13604 = shalt.err (!%p13601_p8)
}
 0x175   : > { %s13605_s29 = scalar_lea.vmem %s2167_s2, 16  ;;  %s13611_s23 = scalar_lea.vmem %s2167_s2, 32 }
 0x176   : > { %p13606_p9 = scmp.ne.s32.totalorder %s2167_s2, %s13605_s29  ;;  %p13612_p12 = scmp.lt.s32.totalorder %s2167_s2, %s2167_s2 }
 0x177   : > { %p13613_p13 = scmp.lt.s32.totalorder %s13611_s23, %s13605_s29 }
 0x178   : > { %p13607_p10 = pnand %p13606_p9, %p12975_p3 }
 0x179   : > { %p13614_p0 = por %p13613_p13, %p13612_p12 }
 0x17a   : > { %p13608_p11 = pneg %p13607_p10 }
 0x17c   : > { %p13615_p1 = pnand %p13614_p0, %p13608_p11 }
 0x17e   : > { %13618 = shalt.err (!%p13615_p1)
}
 0x17f   : > { %12742 = dma.hbm_to_vmem [thread:$0]  (%p12975_p3), %s15534_s25, 16, %s2167_s2, [#allocation29]  }
 0x180   : > { %s15363_s26 = smov [#allocation31]   ;;  %s15364_s28 = smov [#allocation34]  }
 0x181   : > { %s2188_s17 = sshll.u32 %s15363_s26, 4  ;;  %s2211_s7 = sshll.u32 %s15364_s28, 4  ;;  %s2189_s17 = int_to_ptr.vmem [resolvable:$true] %s2188_s17  ;;  %s2212_s7 = int_to_ptr.vmem [resolvable:$true] %s2211_s7 }
 0x182   : > { %s13619_s11 = scalar_lea.hbm %s17835_s4, 16 }
 0x183   : > { %p13620_p4 = scmp.ne.s32.totalorder %s17835_s4, %s13619_s11  ;;  %p13625_p7 = scmp.lt.u32.totalorder %s13619_s11, %s17835_s4 }
 0x185   : > { %p13621_p5 = pnand %p13620_p4, %p12975_p3 }
 0x187   : > { %p13622_p6 = pneg %p13621_p5 }
 0x189   : > { %p13627_p8 = pnand %p13625_p7, %p13622_p6 }
 0x18b   : > { %13630 = shalt.err (!%p13627_p8)
}
 0x18c   : > { %s13631_s9 = scalar_lea.vmem %s2189_s17, 16  ;;  %s13637_s2 = scalar_lea.vmem %s2189_s17, 32 }
 0x18d   : > { %p13632_p9 = scmp.ne.s32.totalorder %s2189_s17, %s13631_s9  ;;  %p13638_p12 = scmp.lt.s32.totalorder %s2189_s17, %s2189_s17 }
 0x18e   : > { %p13639_p13 = scmp.lt.s32.totalorder %s13637_s2, %s13631_s9 }
 0x18f   : > { %p13633_p10 = pnand %p13632_p9, %p12975_p3 }
 0x190   : > { %p13640_p0 = por %p13639_p13, %p13638_p12 }
 0x191   : > { %p13634_p11 = pneg %p13633_p10 }
 0x193   : > { %p13641_p1 = pnand %p13640_p0, %p13634_p11 }
 0x195   : > { %13644 = shalt.err (!%p13641_p1)
}
 0x196   : > { %12746 = dma.hbm_to_vmem [thread:$0]  (%p12975_p3), %s17835_s4, 16, %s2189_s17, [#allocation32]  }
 0x197   : > { %s13645_s16 = scalar_lea.hbm %s15554_s20, 4096 }
 0x198   : > { %p13646_p4 = scmp.ne.s32.totalorder %s15554_s20, %s13645_s16  ;;  %p13651_p7 = scmp.lt.u32.totalorder %s13645_s16, %s15554_s20 }
 0x19a   : > { %p13647_p5 = pnand %p13646_p4, %p12975_p3 }
 0x19c   : > { %p13648_p6 = pneg %p13647_p5 }
 0x19e   : > { %p13653_p8 = pnand %p13651_p7, %p13648_p6 }
 0x1a0   : > { %13656 = shalt.err (!%p13653_p8)
}
 0x1a1   : > { %s13657_s29 = scalar_lea.vmem %s2212_s7, 4096  ;;  %p13664_p12 = scmp.lt.s32.totalorder %s2212_s7, %s2212_s7 }
 0x1a2   : > { %p13658_p9 = scmp.ne.s32.totalorder %s2212_s7, %s13657_s29  ;;  %p13665_p13 = scmp.lt.s32.totalorder %s13657_s29, %s13657_s29 }
 0x1a4   : > { %p13659_p10 = pnand %p13658_p9, %p12975_p3  ;;  %p13666_p0 = por %p13665_p13, %p13664_p12 }
 0x1a6   : > { %p13660_p11 = pneg %p13659_p10 }
 0x1a8   : > { %p13667_p1 = pnand %p13666_p0, %p13660_p11 }
 0x1aa   : > { %13670 = shalt.err (!%p13667_p1)
}
 0x1ab   : > { %12750 = dma.hbm_to_vmem [thread:$0]  (%p12975_p3), %s15554_s20, 4096, %s2212_s7, [#allocation35], %s17702_s19, %s17702_s19, %s17704_s18  }
 0x1ac   : > { %s15365_s23 = smov [#allocation37]   ;;  %s15366_s17 = smov [#allocation40]  }
 0x1ad   : > { %s2237_s26 = sshll.u32 %s15365_s23, 4  ;;  %s2264_s28 = sshll.u32 %s15366_s17, 4  ;;  %s2238_s26 = int_to_ptr.vmem [resolvable:$true] %s2237_s26  ;;  %s2265_s28 = int_to_ptr.vmem [resolvable:$true] %s2264_s28 }
 0x1ae   : > { %s13671_s11 = scalar_lea.hbm %s17834_s6, 12288 }
 0x1af   : > { %p13672_p4 = scmp.ne.s32.totalorder %s17834_s6, %s13671_s11  ;;  %p13677_p7 = scmp.lt.u32.totalorder %s13671_s11, %s17834_s6 }
 0x1b1   : > { %p13673_p5 = pnand %p13672_p4, %p12975_p3 }
 0x1b3   : > { %p13674_p6 = pneg %p13673_p5 }
 0x1b5   : > { %p13679_p8 = pnand %p13677_p7, %p13674_p6 }
 0x1b7   : > { %13682 = shalt.err (!%p13679_p8)
}
 0x1b8   : > { %s13683_s9 = scalar_lea.vmem %s2238_s26, 12288  ;;  %p13690_p12 = scmp.lt.s32.totalorder %s2238_s26, %s2238_s26 }
 0x1b9   : > { %p13684_p9 = scmp.ne.s32.totalorder %s2238_s26, %s13683_s9  ;;  %p13691_p13 = scmp.lt.s32.totalorder %s13683_s9, %s13683_s9 }
 0x1bb   : > { %p13685_p10 = pnand %p13684_p9, %p12975_p3  ;;  %p13692_p0 = por %p13691_p13, %p13690_p12 }
 0x1bd   : > { %p13686_p11 = pneg %p13685_p10 }
 0x1bf   : > { %p13693_p1 = pnand %p13692_p0, %p13686_p11 }
 0x1c1   : > { %13696 = shalt.err (!%p13693_p1)
}
 0x1c2   : > { %s17697_s7 = smov 768   ;;  %s17699_s2 = smov 48  }
 0x1c3   : > { %12754 = dma.hbm_to_vmem [thread:$0]  (%p12975_p3), %s17834_s6, 12288, %s2238_s26, [#allocation38], %s17697_s7, %s17697_s7, %s17699_s2  }
 0x1c4   : > { %s13697_s16 = scalar_lea.hbm %s15574_s24, 32 }
 0x1c5   : > { %p13698_p4 = scmp.ne.s32.totalorder %s15574_s24, %s13697_s16  ;;  %p13703_p7 = scmp.lt.u32.totalorder %s13697_s16, %s15574_s24 }
 0x1c7   : > { %p13699_p5 = pnand %p13698_p4, %p12975_p3 }
 0x1c9   : > { %p13700_p6 = pneg %p13699_p5 }
 0x1cb   : > { %p13705_p8 = pnand %p13703_p7, %p13700_p6 }
 0x1cd   : > { %13708 = shalt.err (!%p13705_p8)
}
 0x1ce   : > { %s13709_s29 = scalar_lea.vmem %s2265_s28, 32  ;;  %p13716_p12 = scmp.lt.s32.totalorder %s2265_s28, %s2265_s28 }
 0x1cf   : > { %p13710_p9 = scmp.ne.s32.totalorder %s2265_s28, %s13709_s29  ;;  %p13717_p13 = scmp.lt.s32.totalorder %s13709_s29, %s13709_s29 }
 0x1d1   : > { %p13711_p10 = pnand %p13710_p9, %p12975_p3  ;;  %p13718_p0 = por %p13717_p13, %p13716_p12 }
 0x1d3   : > { %p13712_p11 = pneg %p13711_p10 }
 0x1d5   : > { %p13719_p1 = pnand %p13718_p0, %p13712_p11 }
 0x1d7   : > { %13722 = shalt.err (!%p13719_p1)
}
 0x1d8   : > { %12758 = dma.hbm_to_vmem [thread:$0]  (%p12975_p3), %s15574_s24, 32, %s2265_s28, [#allocation41]  }
 0x1d9   : > { %s15369_s23 = smov [#allocation43]   ;;  %s15370_s17 = smov [#allocation46]  }
 0x1da   : > { %s2286_s26 = sshll.u32 %s15369_s23, 4  ;;  %s2311_s11 = sshll.u32 %s15370_s17, 4  ;;  %s2287_s26 = int_to_ptr.vmem [resolvable:$true] %s2286_s26  ;;  %s2312_s11 = int_to_ptr.vmem [resolvable:$true] %s2311_s11 }
 0x1db   : > { %s13723_s9 = scalar_lea.hbm %s17833_s8, 16 }
 0x1dc   : > { %p13724_p4 = scmp.ne.s32.totalorder %s17833_s8, %s13723_s9  ;;  %p13729_p7 = scmp.lt.u32.totalorder %s13723_s9, %s17833_s8 }
 0x1de   : > { %p13725_p5 = pnand %p13724_p4, %p12975_p3 }
 0x1e0   : > { %p13726_p6 = pneg %p13725_p5 }
 0x1e2   : > { %p13731_p8 = pnand %p13729_p7, %p13726_p6 }
 0x1e4   : > { %13734 = shalt.err (!%p13731_p8)
}
 0x1e5   : > { %s13735_s16 = scalar_lea.vmem %s2287_s26, 16  ;;  %s13741_s28 = scalar_lea.vmem %s2287_s26, 32 }
 0x1e6   : > { %p13736_p9 = scmp.ne.s32.totalorder %s2287_s26, %s13735_s16  ;;  %p13742_p12 = scmp.lt.s32.totalorder %s2287_s26, %s2287_s26 }
 0x1e7   : > { %p13743_p13 = scmp.lt.s32.totalorder %s13741_s28, %s13735_s16 }
 0x1e8   : > { %p13737_p10 = pnand %p13736_p9, %p12975_p3 }
 0x1e9   : > { %p13744_p0 = por %p13743_p13, %p13742_p12 }
 0x1ea   : > { %p13738_p11 = pneg %p13737_p10 }
 0x1ec   : > { %p13745_p1 = pnand %p13744_p0, %p13738_p11 }
 0x1ee   : > { %13748 = shalt.err (!%p13745_p1)
}
 0x1ef   : > { %s17838_s29 = sld [smem:[#allocation165_spill]] }
 0x1f0   : > { %12762 = dma.hbm_to_vmem [thread:$0]  (%p12975_p3), %s17833_s8, 16, %s2287_s26, [#allocation44]  }
 0x1f5   : > { %s13749_s23 = scalar_lea.hbm %s17838_s29, 16 }
 0x1f6   : > { %p13750_p4 = scmp.ne.s32.totalorder %s17838_s29, %s13749_s23  ;;  %p13755_p7 = scmp.lt.u32.totalorder %s13749_s23, %s17838_s29 }
 0x1f8   : > { %p13751_p5 = pnand %p13750_p4, %p12975_p3 }
 0x1fa   : > { %p13752_p6 = pneg %p13751_p5 }
 0x1fc   : > { %p13757_p8 = pnand %p13755_p7, %p13752_p6 }
 0x1fe   : > { %13760 = shalt.err (!%p13757_p8)
}
 0x1ff   : > { %s13761_s17 = scalar_lea.vmem %s2312_s11, 16  ;;  %s13767_s9 = scalar_lea.vmem %s2312_s11, 32 }
 0x200   : > { %p13762_p9 = scmp.ne.s32.totalorder %s2312_s11, %s13761_s17  ;;  %p13768_p12 = scmp.lt.s32.totalorder %s2312_s11, %s2312_s11 }
 0x201   : > { %p13769_p13 = scmp.lt.s32.totalorder %s13767_s9, %s13761_s17 }
 0x202   : > { %p13763_p10 = pnand %p13762_p9, %p12975_p3 }
 0x203   : > { %p13770_p0 = por %p13769_p13, %p13768_p12 }
 0x204   : > { %p13764_p11 = pneg %p13763_p10 }
 0x206   : > { %p13771_p1 = pnand %p13770_p0, %p13764_p11 }
 0x208   : > { %13774 = shalt.err (!%p13771_p1)
}
 0x209   : > { %s17839_s26 = sld [smem:[#allocation167_spill]]  ;;  %s15371_s16 = smov [#allocation49]  }
 0x20a   : > { %12766 = dma.hbm_to_vmem [thread:$0]  (%p12975_p3), %s17838_s29, 16, %s2312_s11, [#allocation47]  }
 0x20b   : > { %s2333_s28 = sshll.u32 %s15371_s16, 4  ;;  %s15372_s23 = smov [#allocation52]   ;;  %s2334_s28 = int_to_ptr.vmem [resolvable:$true] %s2333_s28 }
 0x20c   : > { %s2356_s7 = sshll.u32 %s15372_s23, 4  ;;  %s2357_s7 = int_to_ptr.vmem [resolvable:$true] %s2356_s7 }
 0x20f   : > { %s13775_s2 = scalar_lea.hbm %s17839_s26, 16 }
 0x210   : > { %p13776_p4 = scmp.ne.s32.totalorder %s17839_s26, %s13775_s2  ;;  %p13781_p7 = scmp.lt.u32.totalorder %s13775_s2, %s17839_s26 }
 0x212   : > { %p13777_p5 = pnand %p13776_p4, %p12975_p3 }
 0x214   : > { %p13778_p6 = pneg %p13777_p5 }
 0x216   : > { %p13783_p8 = pnand %p13781_p7, %p13778_p6 }
 0x218   : > { %13786 = shalt.err (!%p13783_p8)
}
 0x219   : > { %s13787_s17 = scalar_lea.vmem %s2334_s28, 16  ;;  %s13793_s11 = scalar_lea.vmem %s2334_s28, 32 }
 0x21a   : > { %p13788_p9 = scmp.ne.s32.totalorder %s2334_s28, %s13787_s17  ;;  %p13794_p12 = scmp.lt.s32.totalorder %s2334_s28, %s2334_s28 }
 0x21b   : > { %p13795_p13 = scmp.lt.s32.totalorder %s13793_s11, %s13787_s17 }
 0x21c   : > { %p13789_p10 = pnand %p13788_p9, %p12975_p3 }
 0x21d   : > { %p13796_p0 = por %p13795_p13, %p13794_p12 }
 0x21e   : > { %p13790_p11 = pneg %p13789_p10 }
 0x220   : > { %p13797_p1 = pnand %p13796_p0, %p13790_p11 }
 0x222   : > { %13800 = shalt.err (!%p13797_p1)
}
 0x223   : > { %s17840_s9 = sld [smem:[#allocation169_spill]] }
 0x224   : > { %12770 = dma.hbm_to_vmem [thread:$0]  (%p12975_p3), %s17839_s26, 16, %s2334_s28, [#allocation50]  }
 0x229   : > { %s13801_s2 = scalar_lea.hbm %s17840_s9, 4096 }
 0x22a   : > { %p13802_p4 = scmp.ne.s32.totalorder %s17840_s9, %s13801_s2  ;;  %p13807_p7 = scmp.lt.u32.totalorder %s13801_s2, %s17840_s9 }
 0x22c   : > { %p13803_p5 = pnand %p13802_p4, %p12975_p3 }
 0x22e   : > { %p13804_p6 = pneg %p13803_p5 }
 0x230   : > { %p13809_p8 = pnand %p13807_p7, %p13804_p6 }
 0x232   : > { %13812 = shalt.err (!%p13809_p8)
}
 0x233   : > { %s13813_s16 = scalar_lea.vmem %s2357_s7, 4096  ;;  %p13820_p12 = scmp.lt.s32.totalorder %s2357_s7, %s2357_s7 }
 0x234   : > { %p13814_p9 = scmp.ne.s32.totalorder %s2357_s7, %s13813_s16  ;;  %p13821_p13 = scmp.lt.s32.totalorder %s13813_s16, %s13813_s16 }
 0x236   : > { %p13815_p10 = pnand %p13814_p9, %p12975_p3  ;;  %p13822_p0 = por %p13821_p13, %p13820_p12 }
 0x238   : > { %p13816_p11 = pneg %p13815_p10 }
 0x23a   : > { %p13823_p1 = pnand %p13822_p0, %p13816_p11 }
 0x23c   : > { %13826 = shalt.err (!%p13823_p1)
}
 0x23d   : > { %s17841_s28 = sld [smem:[#allocation171_spill]]  ;;  %s15373_s23 = smov [#allocation55]  }
 0x23e   : > { %12774 = dma.hbm_to_vmem [thread:$0]  (%p12975_p3), %s17840_s9, 4096, %s2357_s7, [#allocation53], %s17702_s19, %s17702_s19, %s17704_s18  }
 0x23f   : > { %s2382_s17 = sshll.u32 %s15373_s23, 4  ;;  %s15374_s11 = smov [#allocation58]   ;;  %s2383_s17 = int_to_ptr.vmem [resolvable:$true] %s2382_s17 }
 0x240   : > { %s2407_s2 = sshll.u32 %s15374_s11, 4  ;;  %s2408_s2 = int_to_ptr.vmem [resolvable:$true] %s2407_s2 }
 0x243   : > { %s13827_s16 = scalar_lea.hbm %s17841_s28, 12288 }
 0x244   : > { %p13828_p4 = scmp.ne.s32.totalorder %s17841_s28, %s13827_s16  ;;  %p13833_p7 = scmp.lt.u32.totalorder %s13827_s16, %s17841_s28 }
 0x246   : > { %p13829_p5 = pnand %p13828_p4, %p12975_p3 }
 0x248   : > { %p13830_p6 = pneg %p13829_p5 }
 0x24a   : > { %p13835_p8 = pnand %p13833_p7, %p13830_p6 }
 0x24c   : > { %13838 = shalt.err (!%p13835_p8)
}
 0x24d   : > { %s13839_s3 = scalar_lea.vmem %s2383_s17, 12288  ;;  %p13846_p12 = scmp.lt.s32.totalorder %s2383_s17, %s2383_s17 }
 0x24e   : > { %p13840_p9 = scmp.ne.s32.totalorder %s2383_s17, %s13839_s3  ;;  %p13847_p13 = scmp.lt.s32.totalorder %s13839_s3, %s13839_s3 }
 0x250   : > { %p13841_p10 = pnand %p13840_p9, %p12975_p3  ;;  %p13848_p0 = por %p13847_p13, %p13846_p12 }
 0x252   : > { %p13842_p11 = pneg %p13841_p10 }
 0x254   : > { %p13849_p1 = pnand %p13848_p0, %p13842_p11 }
 0x256   : > { %13852 = shalt.err (!%p13849_p1)
}
 0x257   : > { %s17842_s7 = smov 48   ;;  %s17843_s23 = smov 768  }
 0x258   : > { %s17844_s11 = sld [smem:[#allocation173_spill]] }
 0x259   : > { %12778 = dma.hbm_to_vmem [thread:$0]  (%p12975_p3), %s17841_s28, 12288, %s2383_s17, [#allocation56], %s17843_s23, %s17843_s23, %s17842_s7  }
 0x25e   : > { %s13853_s16 = scalar_lea.hbm %s17844_s11, 16 }
 0x25f   : > { %p13854_p4 = scmp.ne.s32.totalorder %s17844_s11, %s13853_s16  ;;  %p13859_p7 = scmp.lt.u32.totalorder %s13853_s16, %s17844_s11 }
 0x261   : > { %p13855_p5 = pnand %p13854_p4, %p12975_p3 }
 0x263   : > { %p13856_p6 = pneg %p13855_p5 }
 0x265   : > { %p13861_p8 = pnand %p13859_p7, %p13856_p6 }
 0x267   : > { %13864 = shalt.err (!%p13861_p8)
}
 0x268   : > { %s13865_s3 = scalar_lea.vmem %s2408_s2, 16  ;;  %s13871_s19 = scalar_lea.vmem %s2408_s2, 32 }
 0x269   : > { %p13866_p9 = scmp.ne.s32.totalorder %s2408_s2, %s13865_s3  ;;  %p13872_p12 = scmp.lt.s32.totalorder %s2408_s2, %s2408_s2 }
 0x26a   : > { %p13873_p13 = scmp.lt.s32.totalorder %s13871_s19, %s13865_s3 }
 0x26b   : > { %p13867_p10 = pnand %p13866_p9, %p12975_p3 }
 0x26c   : > { %p13874_p0 = por %p13873_p13, %p13872_p12 }
 0x26d   : > { %p13868_p11 = pneg %p13867_p10 }
 0x26f   : > { %p13875_p1 = pnand %p13874_p0, %p13868_p11 }
 0x271   : > { %13878 = shalt.err (!%p13875_p1)
}
 0x272   : > { %s17845_s17 = sld [smem:[#allocation176_spill]]  ;;  %s15375_s16 = smov [#allocation61]  }
 0x273   : > { %12782 = dma.hbm_to_vmem [thread:$0]  (%p12975_p3), %s17844_s11, 16, %s2408_s2, [#allocation59]  }
 0x274   : > { %s2432_s18 = sshll.u32 %s15375_s16, 4  ;;  %s15376_s4 = smov [#allocation64]   ;;  %s2433_s18 = int_to_ptr.vmem [resolvable:$true] %s2432_s18 }
 0x275   : > { %s2454_s6 = sshll.u32 %s15376_s4, 4  ;;  %s2455_s6 = int_to_ptr.vmem [resolvable:$true] %s2454_s6 }
 0x278   : > { %s13879_s8 = scalar_lea.hbm %s17845_s17, 16 }
 0x279   : > { %p13880_p4 = scmp.ne.s32.totalorder %s17845_s17, %s13879_s8  ;;  %p13885_p7 = scmp.lt.u32.totalorder %s13879_s8, %s17845_s17 }
 0x27b   : > { %p13881_p5 = pnand %p13880_p4, %p12975_p3 }
 0x27d   : > { %p13882_p6 = pneg %p13881_p5 }
 0x27f   : > { %p13887_p8 = pnand %p13885_p7, %p13882_p6 }
 0x281   : > { %13890 = shalt.err (!%p13887_p8)
}
 0x282   : > { %s13891_s19 = scalar_lea.vmem %s2433_s18, 16  ;;  %s13897_s2 = scalar_lea.vmem %s2433_s18, 32 }
 0x283   : > { %p13892_p9 = scmp.ne.s32.totalorder %s2433_s18, %s13891_s19  ;;  %p13898_p12 = scmp.lt.s32.totalorder %s2433_s18, %s2433_s18 }
 0x284   : > { %p13899_p13 = scmp.lt.s32.totalorder %s13897_s2, %s13891_s19 }
 0x285   : > { %p13893_p10 = pnand %p13892_p9, %p12975_p3 }
 0x286   : > { %p13900_p0 = por %p13899_p13, %p13898_p12 }
 0x287   : > { %p13894_p11 = pneg %p13893_p10 }
 0x289   : > { %p13901_p1 = pnand %p13900_p0, %p13894_p11 }
 0x28b   : > { %13904 = shalt.err (!%p13901_p1)
}
 0x28c   : > { %s17846_s4 = sld [smem:[#allocation178_spill]] }
 0x28d   : > { %12786 = dma.hbm_to_vmem [thread:$0]  (%p12975_p3), %s17845_s17, 16, %s2433_s18, [#allocation62]  }
 0x292   : > { %s13905_s8 = scalar_lea.hbm %s17846_s4, 16 }
 0x293   : > { %p13906_p4 = scmp.ne.s32.totalorder %s17846_s4, %s13905_s8  ;;  %p13911_p7 = scmp.lt.u32.totalorder %s13905_s8, %s17846_s4 }
 0x295   : > { %p13907_p5 = pnand %p13906_p4, %p12975_p3 }
 0x297   : > { %p13908_p6 = pneg %p13907_p5 }
 0x299   : > { %p13913_p8 = pnand %p13911_p7, %p13908_p6 }
 0x29b   : > { %13916 = shalt.err (!%p13913_p8)
}
 0x29c   : > { %s13917_s3 = scalar_lea.vmem %s2455_s6, 16  ;;  %s13923_s16 = scalar_lea.vmem %s2455_s6, 32 }
 0x29d   : > { %p13918_p9 = scmp.ne.s32.totalorder %s2455_s6, %s13917_s3  ;;  %p13924_p12 = scmp.lt.s32.totalorder %s2455_s6, %s2455_s6 }
 0x29e   : > { %p13925_p13 = scmp.lt.s32.totalorder %s13923_s16, %s13917_s3 }
 0x29f   : > { %p13919_p10 = pnand %p13918_p9, %p12975_p3 }
 0x2a0   : > { %p13926_p0 = por %p13925_p13, %p13924_p12 }
 0x2a1   : > { %p13920_p11 = pneg %p13919_p10 }
 0x2a3   : > { %p13927_p1 = pnand %p13926_p0, %p13920_p11 }
 0x2a5   : > { %13930 = shalt.err (!%p13927_p1)
}
 0x2a6   : > { %s17847_s18 = sld [smem:[#allocation180_spill]]  ;;  %s15377_s19 = smov [#allocation67]  }
 0x2a7   : > { %12790 = dma.hbm_to_vmem [thread:$0]  (%p12975_p3), %s17846_s4, 16, %s2455_s6, [#allocation65]  }
 0x2a8   : > { %s2475_s2 = sshll.u32 %s15377_s19, 4  ;;  %s15378_s8 = smov [#allocation70]   ;;  %s2476_s2 = int_to_ptr.vmem [resolvable:$true] %s2475_s2 }
 0x2a9   : > { %s2501_s9 = sshll.u32 %s15378_s8, 4  ;;  %s2502_s9 = int_to_ptr.vmem [resolvable:$true] %s2501_s9 }
 0x2ac   : > { %s13931_s11 = scalar_lea.hbm %s17847_s18, 4096 }
 0x2ad   : > { %p13932_p4 = scmp.ne.s32.totalorder %s17847_s18, %s13931_s11  ;;  %p13937_p7 = scmp.lt.u32.totalorder %s13931_s11, %s17847_s18 }
 0x2af   : > { %p13933_p5 = pnand %p13932_p4, %p12975_p3 }
 0x2b1   : > { %p13934_p6 = pneg %p13933_p5 }
 0x2b3   : > { %p13939_p8 = pnand %p13937_p7, %p13934_p6 }
 0x2b5   : > { %13942 = shalt.err (!%p13939_p8)
}
 0x2b6   : > { %s13943_s3 = scalar_lea.vmem %s2476_s2, 4096  ;;  %p13950_p12 = scmp.lt.s32.totalorder %s2476_s2, %s2476_s2 }
 0x2b7   : > { %p13944_p9 = scmp.ne.s32.totalorder %s2476_s2, %s13943_s3  ;;  %p13951_p13 = scmp.lt.s32.totalorder %s13943_s3, %s13943_s3 }
 0x2b9   : > { %p13945_p10 = pnand %p13944_p9, %p12975_p3  ;;  %p13952_p0 = por %p13951_p13, %p13950_p12 }
 0x2bb   : > { %p13946_p11 = pneg %p13945_p10 }
 0x2bd   : > { %p13953_p1 = pnand %p13952_p0, %p13946_p11 }
 0x2bf   : > { %13956 = shalt.err (!%p13953_p1)
}
 0x2c0   : > { %s17711_s6 = smov 256   ;;  %s17848_s16 = sld [smem:[#allocation182_spill]] }
 0x2c1   : > { %s17713_s11 = smov 16  }
 0x2c2   : > { %12794 = dma.hbm_to_vmem [thread:$0]  (%p12975_p3), %s17847_s18, 4096, %s2476_s2, [#allocation68], %s17711_s6, %s17711_s6, %s17713_s11  }
 0x2c6   : > { %s13957_s19 = scalar_lea.hbm %s17848_s16, 4096 }
 0x2c7   : > { %p13958_p4 = scmp.ne.s32.totalorder %s17848_s16, %s13957_s19  ;;  %p13963_p7 = scmp.lt.u32.totalorder %s13957_s19, %s17848_s16 }
 0x2c9   : > { %p13959_p5 = pnand %p13958_p4, %p12975_p3 }
 0x2cb   : > { %p13960_p6 = pneg %p13959_p5 }
 0x2cd   : > { %p13965_p8 = pnand %p13963_p7, %p13960_p6 }
 0x2cf   : > { %13968 = shalt.err (!%p13965_p8)
}
 0x2d0   : > { %s13969_s8 = scalar_lea.vmem %s2502_s9, 4096  ;;  %p13976_p12 = scmp.lt.s32.totalorder %s2502_s9, %s2502_s9 }
 0x2d1   : > { %p13970_p9 = scmp.ne.s32.totalorder %s2502_s9, %s13969_s8  ;;  %p13977_p13 = scmp.lt.s32.totalorder %s13969_s8, %s13969_s8 }
 0x2d3   : > { %p13971_p10 = pnand %p13970_p9, %p12975_p3  ;;  %p13978_p0 = por %p13977_p13, %p13976_p12 }
 0x2d5   : > { %p13972_p11 = pneg %p13971_p10 }
 0x2d7   : > { %p13979_p1 = pnand %p13978_p0, %p13972_p11 }
 0x2d9   : > { %13982 = shalt.err (!%p13979_p1)
}
 0x2da   : > { %s17849_s2 = smov 8   ;;  %s17850_s3 = smov 128  }
 0x2db   : > { %s17851_s19 = sld [smem:[#allocation184_spill]]  ;;  %s15381_s6 = smov [#allocation73]  }
 0x2dc   : > { %12798 = dma.hbm_to_vmem [thread:$0]  (%p12975_p3), %s17848_s16, 4096, %s2502_s9, [#allocation71], %s17850_s3, %s17850_s3, %s17849_s2  }
 0x2dd   : > { %s2528_s11 = sshll.u32 %s15381_s6, 4  ;;  %s15382_s4 = smov [#allocation76]   ;;  %s2529_s11 = int_to_ptr.vmem [resolvable:$true] %s2528_s11 }
 0x2de   : > { %s2556_s12 = sshll.u32 %s15382_s4, 4  ;;  %s2557_s12 = int_to_ptr.vmem [resolvable:$true] %s2556_s12 }
 0x2e1   : > { %s13983_s8 = scalar_lea.hbm %s17851_s19, 16 }
 0x2e2   : > { %p13984_p4 = scmp.ne.s32.totalorder %s17851_s19, %s13983_s8  ;;  %p13989_p7 = scmp.lt.u32.totalorder %s13983_s8, %s17851_s19 }
 0x2e4   : > { %p13985_p5 = pnand %p13984_p4, %p12975_p3 }
 0x2e6   : > { %p13986_p6 = pneg %p13985_p5 }
 0x2e8   : > { %p13991_p8 = pnand %p13989_p7, %p13986_p6 }
 0x2ea   : > { %13994 = shalt.err (!%p13991_p8)
}
 0x2eb   : > { %s13995_s13 = scalar_lea.vmem %s2529_s11, 16  ;;  %s14001_s9 = scalar_lea.vmem %s2529_s11, 32 }
 0x2ec   : > { %p13996_p9 = scmp.ne.s32.totalorder %s2529_s11, %s13995_s13  ;;  %p14002_p12 = scmp.lt.s32.totalorder %s2529_s11, %s2529_s11 }
 0x2ed   : > { %p14003_p13 = scmp.lt.s32.totalorder %s14001_s9, %s13995_s13 }
 0x2ee   : > { %p13997_p10 = pnand %p13996_p9, %p12975_p3 }
 0x2ef   : > { %p14004_p0 = por %p14003_p13, %p14002_p12 }
 0x2f0   : > { %p13998_p11 = pneg %p13997_p10 }
 0x2f2   : > { %p14005_p1 = pnand %p14004_p0, %p13998_p11 }
 0x2f4   : > { %14008 = shalt.err (!%p14005_p1)
}
 0x2f5   : > { %s17852_s4 = sld [smem:[#allocation188_spill]] }
 0x2f6   : > { %12802 = dma.hbm_to_vmem [thread:$0]  (%p12975_p3), %s17851_s19, 16, %s2529_s11, [#allocation74]  }
 0x2fb   : > { %s14009_s6 = scalar_lea.hbm %s17852_s4, 16 }
 0x2fc   : > { %p14010_p4 = scmp.ne.s32.totalorder %s17852_s4, %s14009_s6  ;;  %p14015_p7 = scmp.lt.u32.totalorder %s14009_s6, %s17852_s4 }
 0x2fe   : > { %p14011_p5 = pnand %p14010_p4, %p12975_p3 }
 0x300   : > { %p14012_p6 = pneg %p14011_p5 }
 0x302   : > { %p14017_p8 = pnand %p14015_p7, %p14012_p6 }
 0x304   : > { %14020 = shalt.err (!%p14017_p8)
}
 0x305   : > { %s14021_s13 = scalar_lea.vmem %s2557_s12, 16  ;;  %s14027_s8 = scalar_lea.vmem %s2557_s12, 32 }
 0x306   : > { %p14022_p9 = scmp.ne.s32.totalorder %s2557_s12, %s14021_s13  ;;  %p14028_p12 = scmp.lt.s32.totalorder %s2557_s12, %s2557_s12 }
 0x307   : > { %p14029_p13 = scmp.lt.s32.totalorder %s14027_s8, %s14021_s13 }
 0x308   : > { %p14023_p10 = pnand %p14022_p9, %p12975_p3 }
 0x309   : > { %p14030_p0 = por %p14029_p13, %p14028_p12 }
 0x30a   : > { %p14024_p11 = pneg %p14023_p10 }
 0x30c   : > { %p14031_p1 = pnand %p14030_p0, %p14024_p11 }
 0x30e   : > { %14034 = shalt.err (!%p14031_p1)
}
 0x30f   : > { %s17853_s11 = sld [smem:[#allocation190_spill]]  ;;  %s15383_s9 = smov [#allocation79]  }
 0x310   : > { %12806 = dma.hbm_to_vmem [thread:$0]  (%p12975_p3), %s17852_s4, 16, %s2557_s12, [#allocation77]  }
 0x311   : > { %s2581_s6 = sshll.u32 %s15383_s9, 4  ;;  %s15384_s14 = smov [#allocation82]   ;;  %s2582_s6 = int_to_ptr.vmem [resolvable:$true] %s2581_s6 }
 0x312   : > { %s2603_s16 = sshll.u32 %s15384_s14, 4  ;;  %s2604_s16 = int_to_ptr.vmem [resolvable:$true] %s2603_s16 }
 0x315   : > { %s14035_s17 = scalar_lea.hbm %s17853_s11, 16 }
 0x316   : > { %p14036_p4 = scmp.ne.s32.totalorder %s17853_s11, %s14035_s17  ;;  %p14041_p7 = scmp.lt.u32.totalorder %s14035_s17, %s17853_s11 }
 0x318   : > { %p14037_p5 = pnand %p14036_p4, %p12975_p3 }
 0x31a   : > { %p14038_p6 = pneg %p14037_p5 }
 0x31c   : > { %p14043_p8 = pnand %p14041_p7, %p14038_p6 }
 0x31e   : > { %14046 = shalt.err (!%p14043_p8)
}
 0x31f   : > { %s14047_s13 = scalar_lea.vmem %s2582_s6, 16  ;;  %s14053_s12 = scalar_lea.vmem %s2582_s6, 32 }
 0x320   : > { %p14048_p9 = scmp.ne.s32.totalorder %s2582_s6, %s14047_s13  ;;  %p14054_p12 = scmp.lt.s32.totalorder %s2582_s6, %s2582_s6 }
 0x321   : > { %p14055_p13 = scmp.lt.s32.totalorder %s14053_s12, %s14047_s13 }
 0x322   : > { %p14049_p10 = pnand %p14048_p9, %p12975_p3 }
 0x323   : > { %p14056_p0 = por %p14055_p13, %p14054_p12 }
 0x324   : > { %p14050_p11 = pneg %p14049_p10 }
 0x326   : > { %p14057_p1 = pnand %p14056_p0, %p14050_p11 }
 0x328   : > { %14060 = shalt.err (!%p14057_p1)
}
 0x329   : > { %12810 = dma.hbm_to_vmem [thread:$0]  (%p12975_p3), %s17853_s11, 16, %s2582_s6, [#allocation80]  }
 0x32a   : > { %s14061_s14 = scalar_lea.hbm %s17829_s5, 16 }
 0x32b   : > { %p14062_p4 = scmp.ne.s32.totalorder %s17829_s5, %s14061_s14  ;;  %p14067_p7 = scmp.lt.u32.totalorder %s14061_s14, %s17829_s5 }
 0x32d   : > { %p14063_p5 = pnand %p14062_p4, %p12975_p3 }
 0x32f   : > { %p14064_p6 = pneg %p14063_p5 }
 0x331   : > { %p14069_p8 = pnand %p14067_p7, %p14064_p6 }
 0x333   : > { %14072 = shalt.err (!%p14069_p8)
}
 0x334   : > { %s14073_s17 = scalar_lea.vmem %s2604_s16, 16  ;;  %s14079_s8 = scalar_lea.vmem %s2604_s16, 32 }
 0x335   : > { %p14074_p9 = scmp.ne.s32.totalorder %s2604_s16, %s14073_s17  ;;  %p14080_p12 = scmp.lt.s32.totalorder %s2604_s16, %s2604_s16 }
 0x336   : > { %p14081_p13 = scmp.lt.s32.totalorder %s14079_s8, %s14073_s17 }
 0x337   : > { %p14075_p10 = pnand %p14074_p9, %p12975_p3 }
 0x338   : > { %p14082_p0 = por %p14081_p13, %p14080_p12 }
 0x339   : > { %p14076_p11 = pneg %p14075_p10 }
 0x33b   : > { %p14083_p1 = pnand %p14082_p0, %p14076_p11 }
 0x33d   : > { %14086 = shalt.err (!%p14083_p1)
}
 0x33e   : > { %s17854_s9 = sld [smem:[#allocation195_spill]]  ;;  %s15385_s6 = smov [#allocation85]  }
 0x33f   : > { %12814 = dma.hbm_to_vmem [thread:$0]  (%p12975_p3), %s17829_s5, 16, %s2604_s16, [#allocation83]  }
 0x340   : > { %s2630_s13 = sshll.u32 %s15385_s6, 4  ;;  %s15386_s12 = smov [#allocation88]   ;;  %s2631_s13 = int_to_ptr.vmem [resolvable:$true] %s2630_s13 }
 0x341   : > { %s2655_s14 = sshll.u32 %s15386_s12, 4  ;;  %s2656_s14 = int_to_ptr.vmem [resolvable:$true] %s2655_s14 }
 0x344   : > { %s14087_s4 = scalar_lea.hbm %s17854_s9, 16 }
 0x345   : > { %p14088_p4 = scmp.ne.s32.totalorder %s17854_s9, %s14087_s4  ;;  %p14093_p7 = scmp.lt.u32.totalorder %s14087_s4, %s17854_s9 }
 0x347   : > { %p14089_p5 = pnand %p14088_p4, %p12975_p3 }
 0x349   : > { %p14090_p6 = pneg %p14089_p5 }
 0x34b   : > { %p14095_p8 = pnand %p14093_p7, %p14090_p6 }
 0x34d   : > { %14098 = shalt.err (!%p14095_p8)
}
 0x34e   : > { %s14099_s17 = scalar_lea.vmem %s2631_s13, 16  ;;  %s14105_s16 = scalar_lea.vmem %s2631_s13, 32 }
 0x34f   : > { %p14100_p9 = scmp.ne.s32.totalorder %s2631_s13, %s14099_s17  ;;  %p14106_p12 = scmp.lt.s32.totalorder %s2631_s13, %s2631_s13 }
 0x350   : > { %p14107_p13 = scmp.lt.s32.totalorder %s14105_s16, %s14099_s17 }
 0x351   : > { %p14101_p10 = pnand %p14100_p9, %p12975_p3 }
 0x352   : > { %p14108_p0 = por %p14107_p13, %p14106_p12 }
 0x353   : > { %p14102_p11 = pneg %p14101_p10 }
 0x355   : > { %p14109_p1 = pnand %p14108_p0, %p14102_p11 }
 0x357   : > { %14112 = shalt.err (!%p14109_p1)
}
 0x358   : > { %s17855_s8 = sld [smem:[#allocation197_spill]] }
 0x359   : > { %12818 = dma.hbm_to_vmem [thread:$0]  (%p12975_p3), %s17854_s9, 16, %s2631_s13, [#allocation86]  }
 0x35e   : > { %s14113_s4 = scalar_lea.hbm %s17855_s8, 16 }
 0x35f   : > { %p14114_p4 = scmp.ne.s32.totalorder %s17855_s8, %s14113_s4  ;;  %p14119_p7 = scmp.lt.u32.totalorder %s14113_s4, %s17855_s8 }
 0x361   : > { %p14115_p5 = pnand %p14114_p4, %p12975_p3 }
 0x363   : > { %p14116_p6 = pneg %p14115_p5 }
 0x365   : > { %p14121_p8 = pnand %p14119_p7, %p14116_p6 }
 0x367   : > { %14124 = shalt.err (!%p14121_p8)
}
 0x368   : > { %s14125_s6 = scalar_lea.vmem %s2656_s14, 16  ;;  %s14131_s12 = scalar_lea.vmem %s2656_s14, 32 }
 0x369   : > { %p14126_p9 = scmp.ne.s32.totalorder %s2656_s14, %s14125_s6  ;;  %p14132_p12 = scmp.lt.s32.totalorder %s2656_s14, %s2656_s14 }
 0x36a   : > { %p14133_p13 = scmp.lt.s32.totalorder %s14131_s12, %s14125_s6 }
 0x36b   : > { %p14127_p10 = pnand %p14126_p9, %p12975_p3 }
 0x36c   : > { %p14134_p0 = por %p14133_p13, %p14132_p12 }
 0x36d   : > { %p14128_p11 = pneg %p14127_p10 }
 0x36f   : > { %p14135_p1 = pnand %p14134_p0, %p14128_p11 }
 0x371   : > { %14138 = shalt.err (!%p14135_p1)
}
 0x372   : > { %s17856_s13 = sld [smem:[#allocation199_spill]]  ;;  %s15387_s17 = smov [#allocation91]  }
 0x373   : > { %12822 = dma.hbm_to_vmem [thread:$0]  (%p12975_p3), %s17855_s8, 16, %s2656_s14, [#allocation89]  }
 0x374   : > { %s2677_s16 = sshll.u32 %s15387_s17, 4  ;;  %s15388_s4 = smov [#allocation94]   ;;  %s2678_s16 = int_to_ptr.vmem [resolvable:$true] %s2677_s16 }
 0x375   : > { %s2704_s5 = sshll.u32 %s15388_s4, 4  ;;  %s2705_s5 = int_to_ptr.vmem [resolvable:$true] %s2704_s5 }
 0x378   : > { %s14139_s9 = scalar_lea.hbm %s17856_s13, 16 }
 0x379   : > { %p14140_p4 = scmp.ne.s32.totalorder %s17856_s13, %s14139_s9  ;;  %p14145_p7 = scmp.lt.u32.totalorder %s14139_s9, %s17856_s13 }
 0x37b   : > { %p14141_p5 = pnand %p14140_p4, %p12975_p3 }
 0x37d   : > { %p14142_p6 = pneg %p14141_p5 }
 0x37f   : > { %p14147_p8 = pnand %p14145_p7, %p14142_p6 }
 0x381   : > { %14150 = shalt.err (!%p14147_p8)
}
 0x382   : > { %s14151_s6 = scalar_lea.vmem %s2678_s16, 16  ;;  %s14157_s14 = scalar_lea.vmem %s2678_s16, 32 }
 0x383   : > { %p14152_p9 = scmp.ne.s32.totalorder %s2678_s16, %s14151_s6  ;;  %p14158_p12 = scmp.lt.s32.totalorder %s2678_s16, %s2678_s16 }
 0x384   : > { %p14159_p13 = scmp.lt.s32.totalorder %s14157_s14, %s14151_s6 }
 0x385   : > { %p14153_p10 = pnand %p14152_p9, %p12975_p3 }
 0x386   : > { %p14160_p0 = por %p14159_p13, %p14158_p12 }
 0x387   : > { %p14154_p11 = pneg %p14153_p10 }
 0x389   : > { %p14161_p1 = pnand %p14160_p0, %p14154_p11 }
 0x38b   : > { %14164 = shalt.err (!%p14161_p1)
}
 0x38c   : > { %s17857_s12 = sld [smem:[#allocation202_spill]] }
 0x38d   : > { %12826 = dma.hbm_to_vmem [thread:$0]  (%p12975_p3), %s17856_s13, 16, %s2678_s16, [#allocation92]  }
 0x392   : > { %s14165_s9 = scalar_lea.hbm %s17857_s12, 16 }
 0x393   : > { %p14166_p4 = scmp.ne.s32.totalorder %s17857_s12, %s14165_s9  ;;  %p14171_p7 = scmp.lt.u32.totalorder %s14165_s9, %s17857_s12 }
 0x395   : > { %p14167_p5 = pnand %p14166_p4, %p12975_p3 }
 0x397   : > { %p14168_p6 = pneg %p14167_p5 }
 0x399   : > { %p14173_p8 = pnand %p14171_p7, %p14168_p6 }
 0x39b   : > { %14176 = shalt.err (!%p14173_p8)
}
 0x39c   : > { %s14177_s17 = scalar_lea.vmem %s2705_s5, 16  ;;  %s14183_s4 = scalar_lea.vmem %s2705_s5, 32 }
 0x39d   : > { %p14178_p9 = scmp.ne.s32.totalorder %s2705_s5, %s14177_s17  ;;  %p14184_p12 = scmp.lt.s32.totalorder %s2705_s5, %s2705_s5 }
 0x39e   : > { %p14185_p13 = scmp.lt.s32.totalorder %s14183_s4, %s14177_s17 }
 0x39f   : > { %p14179_p10 = pnand %p14178_p9, %p12975_p3 }
 0x3a0   : > { %p14186_p0 = por %p14185_p13, %p14184_p12 }
 0x3a1   : > { %p14180_p11 = pneg %p14179_p10 }
 0x3a3   : > { %p14187_p1 = pnand %p14186_p0, %p14180_p11 }
 0x3a5   : > { %14190 = shalt.err (!%p14187_p1)
}
 0x3a6   : > { %s17858_s16 = sld [smem:[#allocation204_spill]]  ;;  %s15389_s6 = smov [#allocation97]  }
 0x3a7   : > { %12830 = dma.hbm_to_vmem [thread:$0]  (%p12975_p3), %s17857_s12, 16, %s2705_s5, [#allocation95]  }
 0x3a8   : > { %s2729_s14 = sshll.u32 %s15389_s6, 4  ;;  %s15390_s9 = smov [#allocation100]   ;;  %s2730_s14 = int_to_ptr.vmem [resolvable:$true] %s2729_s14 }
 0x3a9   : > { %s2751_s8 = sshll.u32 %s15390_s9, 4  ;;  %s2752_s8 = int_to_ptr.vmem [resolvable:$true] %s2751_s8 }
 0x3ac   : > { %s14191_s11 = scalar_lea.hbm %s17858_s16, 16 }
 0x3ad   : > { %p14192_p4 = scmp.ne.s32.totalorder %s17858_s16, %s14191_s11  ;;  %p14197_p7 = scmp.lt.u32.totalorder %s14191_s11, %s17858_s16 }
 0x3af   : > { %p14193_p5 = pnand %p14192_p4, %p12975_p3 }
 0x3b1   : > { %p14194_p6 = pneg %p14193_p5 }
 0x3b3   : > { %p14199_p8 = pnand %p14197_p7, %p14194_p6 }
 0x3b5   : > { %14202 = shalt.err (!%p14199_p8)
}
 0x3b6   : > { %s14203_s17 = scalar_lea.vmem %s2730_s14, 16  ;;  %s14209_s5 = scalar_lea.vmem %s2730_s14, 32 }
 0x3b7   : > { %p14204_p9 = scmp.ne.s32.totalorder %s2730_s14, %s14203_s17  ;;  %p14210_p12 = scmp.lt.s32.totalorder %s2730_s14, %s2730_s14 }
 0x3b8   : > { %p14211_p13 = scmp.lt.s32.totalorder %s14209_s5, %s14203_s17 }
 0x3b9   : > { %p14205_p10 = pnand %p14204_p9, %p12975_p3 }
 0x3ba   : > { %p14212_p0 = por %p14211_p13, %p14210_p12 }
 0x3bb   : > { %p14206_p11 = pneg %p14205_p10 }
 0x3bd   : > { %p14213_p1 = pnand %p14212_p0, %p14206_p11 }
 0x3bf   : > { %14216 = shalt.err (!%p14213_p1)
}
 0x3c0   : > { %s17859_s4 = sld [smem:[#allocation206_spill]] }
 0x3c1   : > { %12834 = dma.hbm_to_vmem [thread:$0]  (%p12975_p3), %s17858_s16, 16, %s2730_s14, [#allocation98]  }
 0x3c6   : > { %s14217_s11 = scalar_lea.hbm %s17859_s4, 16 }
 0x3c7   : > { %p14218_p4 = scmp.ne.s32.totalorder %s17859_s4, %s14217_s11  ;;  %p14223_p7 = scmp.lt.u32.totalorder %s14217_s11, %s17859_s4 }
 0x3c9   : > { %p14219_p5 = pnand %p14218_p4, %p12975_p3 }
 0x3cb   : > { %p14220_p6 = pneg %p14219_p5 }
 0x3cd   : > { %p14225_p8 = pnand %p14223_p7, %p14220_p6 }
 0x3cf   : > { %14228 = shalt.err (!%p14225_p8)
}
 0x3d0   : > { %s14229_s6 = scalar_lea.vmem %s2752_s8, 16  ;;  %s14235_s9 = scalar_lea.vmem %s2752_s8, 32 }
 0x3d1   : > { %p14230_p9 = scmp.ne.s32.totalorder %s2752_s8, %s14229_s6  ;;  %p14236_p12 = scmp.lt.s32.totalorder %s2752_s8, %s2752_s8 }
 0x3d2   : > { %p14237_p13 = scmp.lt.s32.totalorder %s14235_s9, %s14229_s6 }
 0x3d3   : > { %p14231_p10 = pnand %p14230_p9, %p12975_p3 }
 0x3d4   : > { %p14238_p0 = por %p14237_p13, %p14236_p12 }
 0x3d5   : > { %p14232_p11 = pneg %p14231_p10 }
 0x3d7   : > { %p14239_p1 = pnand %p14238_p0, %p14232_p11 }
 0x3d9   : > { %14242 = shalt.err (!%p14239_p1)
}
 0x3da   : > { %s17860_s14 = sld [smem:[#allocation140_spill]]  ;;  %s15391_s17 = smov [#allocation5]  }
 0x3db   : > { %12838 = dma.hbm_to_vmem [thread:$0]  (%p12975_p3), %s17859_s4, 16, %s2752_s8, [#allocation101]  }
 0x3dc   : > { %s1986_s5 = sshll.u32 %s15391_s17, 4  ;;  %s15392_s11 = smov [#allocation9]   ;;  %s1987_s5 = int_to_ptr.vmem [resolvable:$true] %s1986_s5 }
 0x3dd   : > { %s2008_s12 = sshll.u32 %s15392_s11, 4  ;;  %s16203_s12 = int_to_ptr.vmem [resolvable:$true] %s2008_s12 }
 0x3e0   : > { %s14243_s13 = scalar_lea.hbm %s17860_s14, 16 }
 0x3e1   : > { %p14244_p4 = scmp.ne.s32.totalorder %s17860_s14, %s14243_s13  ;;  %p14249_p7 = scmp.lt.u32.totalorder %s14243_s13, %s17860_s14 }
 0x3e3   : > { %p14245_p5 = pnand %p14244_p4, %p12975_p3 }
 0x3e5   : > { %p14246_p6 = pneg %p14245_p5 }
 0x3e7   : > { %p14251_p8 = pnand %p14249_p7, %p14246_p6 }
 0x3e9   : > { %14254 = shalt.err (!%p14251_p8)
}
 0x3ea   : > { %s14255_s6 = scalar_lea.vmem %s1987_s5, 16  ;;  %s14261_s8 = scalar_lea.vmem %s1987_s5, 32 }
 0x3eb   : > { %p14256_p9 = scmp.ne.s32.totalorder %s1987_s5, %s14255_s6  ;;  %p14262_p12 = scmp.lt.s32.totalorder %s1987_s5, %s1987_s5 }
 0x3ec   : > { %p14263_p13 = scmp.lt.s32.totalorder %s14261_s8, %s14255_s6 }
 0x3ed   : > { %p14257_p10 = pnand %p14256_p9, %p12975_p3 }
 0x3ee   : > { %p14264_p0 = por %p14263_p13, %p14262_p12 }
 0x3ef   : > { %p14258_p11 = pneg %p14257_p10 }
 0x3f1   : > { %p14265_p1 = pnand %p14264_p0, %p14258_p11 }
 0x3f3   : > { %14268 = shalt.err (!%p14265_p1)
}
 0x3f4   : > { %s17861_s9 = sld [smem:[#allocation142_spill]] }
 0x3f5   : > { %12712 = dma.hbm_to_vmem [thread:$0]  (%p12975_p3), %s17860_s14, 16, %s1987_s5, [#allocation6]  }
 0x3fa   : > { %s14269_s13 = scalar_lea.hbm %s17861_s9, 16 }
 0x3fb   : > { %p14270_p4 = scmp.ne.s32.totalorder %s17861_s9, %s14269_s13  ;;  %p14275_p7 = scmp.lt.u32.totalorder %s14269_s13, %s17861_s9 }
 0x3fd   : > { %p14271_p5 = pnand %p14270_p4, %p12975_p3 }
 0x3ff   : > { %p14272_p6 = pneg %p14271_p5 }
 0x401   : > { %p14277_p8 = pnand %p14275_p7, %p14272_p6 }
 0x403   : > { %14280 = shalt.err (!%p14277_p8)
}
 0x404   : > { %s14281_s17 = scalar_lea.vmem %s16203_s12, 16  ;;  %s14287_s11 = scalar_lea.vmem %s16203_s12, 32 }
 0x405   : > { %p14282_p9 = scmp.ne.s32.totalorder %s16203_s12, %s14281_s17  ;;  %p14288_p12 = scmp.lt.s32.totalorder %s16203_s12, %s16203_s12 }
 0x406   : > { %p14289_p13 = scmp.lt.s32.totalorder %s14287_s11, %s14281_s17 }
 0x407   : > { %p14283_p10 = pnand %p14282_p9, %p12975_p3 }
 0x408   : > { %p14290_p0 = por %p14289_p13, %p14288_p12 }
 0x409   : > { %p14284_p11 = pneg %p14283_p10 }
 0x40b   : > { %p14291_p1 = pnand %p14290_p0, %p14284_p11 }
 0x40d   : > { %14294 = shalt.err (!%p14291_p1)
}
 0x40e   : > { %s17862_s5 = sld [smem:[#allocation144_spill]]  ;;  %s15393_s6 = smov [#allocation12]  }
 0x40f   : > { %12716 = dma.hbm_to_vmem [thread:$0]  (%p12975_p3), %s17861_s9, 16, %s16203_s12, [#allocation8]  }
 0x410   : > { %s2033_s8 = sshll.u32 %s15393_s6, 4  ;;  %s15394_s13 = smov [#allocation15]   ;;  %s2034_s8 = int_to_ptr.vmem [resolvable:$true] %s2033_s8 }
 0x411   : > { %s2055_s4 = sshll.u32 %s15394_s13, 4  ;;  %s16231_s4 = int_to_ptr.vmem [resolvable:$true] %s2055_s4 }
 0x414   : > { %s14295_s17 = scalar_lea.hbm %s17862_s5, 16 }
 0x415   : > { %p14296_p4 = scmp.ne.s32.totalorder %s17862_s5, %s14295_s17  ;;  %p14301_p7 = scmp.lt.u32.totalorder %s14295_s17, %s17862_s5 }
 0x417   : > { %p14297_p5 = pnand %p14296_p4, %p12975_p3 }
 0x419   : > { %p14298_p6 = pneg %p14297_p5 }
 0x41b   : > { %p14303_p8 = pnand %p14301_p7, %p14298_p6 }
 0x41d   : > { %14306 = shalt.err (!%p14303_p8)
}
 0x41e   : > { %s14307_s11 = scalar_lea.vmem %s2034_s8, 16  ;;  %s14313_s12 = scalar_lea.vmem %s2034_s8, 32 }
 0x41f   : > { %p14308_p9 = scmp.ne.s32.totalorder %s2034_s8, %s14307_s11  ;;  %p14314_p12 = scmp.lt.s32.totalorder %s2034_s8, %s2034_s8 }
 0x420   : > { %p14315_p13 = scmp.lt.s32.totalorder %s14313_s12, %s14307_s11 }
 0x421   : > { %p14309_p10 = pnand %p14308_p9, %p12975_p3 }
 0x422   : > { %p14316_p0 = por %p14315_p13, %p14314_p12 }
 0x423   : > { %p14310_p11 = pneg %p14309_p10 }
 0x425   : > { %p14317_p1 = pnand %p14316_p0, %p14310_p11 }
 0x427   : > { %14320 = shalt.err (!%p14317_p1)
}
 0x428   : > { %s17863_s6 = sld [smem:[#allocation146_spill]] }
 0x429   : > { %12720 = dma.hbm_to_vmem [thread:$0]  (%p12975_p3), %s17862_s5, 16, %s2034_s8, [#allocation11]  }
 0x42e   : > { %s14321_s13 = scalar_lea.hbm %s17863_s6, 16 }
 0x42f   : > { %p14322_p4 = scmp.ne.s32.totalorder %s17863_s6, %s14321_s13  ;;  %p14327_p7 = scmp.lt.u32.totalorder %s14321_s13, %s17863_s6 }
 0x431   : > { %p14323_p5 = pnand %p14322_p4, %p12975_p3 }
 0x433   : > { %p14324_p6 = pneg %p14323_p5 }
 0x435   : > { %p14329_p8 = pnand %p14327_p7, %p14324_p6 }
 0x437   : > { %14332 = shalt.err (!%p14329_p8)
}
 0x438   : > { %s14333_s17 = scalar_lea.vmem %s16231_s4, 16  ;;  %s14339_s11 = scalar_lea.vmem %s16231_s4, 32 }
 0x439   : > { %p14334_p9 = scmp.ne.s32.totalorder %s16231_s4, %s14333_s17  ;;  %p14340_p12 = scmp.lt.s32.totalorder %s16231_s4, %s16231_s4 }
 0x43a   : > { %p14341_p13 = scmp.lt.s32.totalorder %s14339_s11, %s14333_s17 }
 0x43b   : > { %p14335_p10 = pnand %p14334_p9, %p12975_p3 }
 0x43c   : > { %p14342_p0 = por %p14341_p13, %p14340_p12 }
 0x43d   : > { %p14336_p11 = pneg %p14335_p10 }
 0x43f   : > { %p14343_p1 = pnand %p14342_p0, %p14336_p11 }
 0x441   : > { %14346 = shalt.err (!%p14343_p1)
}
 0x442   : > { %s17864_s8 = sld [smem:[#allocation149_spill]]  ;;  %s15395_s12 = smov [#allocation18]  }
 0x443   : > { %12724 = dma.hbm_to_vmem [thread:$0]  (%p12975_p3), %s17863_s6, 16, %s16231_s4, [#allocation14]  }
 0x444   : > { %s2079_s13 = sshll.u32 %s15395_s12, 4  ;;  %s15396_s5 = smov [#allocation21]   ;;  %s2080_s13 = int_to_ptr.vmem [resolvable:$true] %s2079_s13 }
 0x445   : > { %s2105_s9 = sshll.u32 %s15396_s5, 4  ;;  %s16259_s9 = int_to_ptr.vmem [resolvable:$true] %s2105_s9 }
 0x448   : > { %s14347_s17 = scalar_lea.hbm %s17864_s8, 4096 }
 0x449   : > { %p14348_p4 = scmp.ne.s32.totalorder %s17864_s8, %s14347_s17  ;;  %p14353_p7 = scmp.lt.u32.totalorder %s14347_s17, %s17864_s8 }
 0x44b   : > { %p14349_p5 = pnand %p14348_p4, %p12975_p3 }
 0x44d   : > { %p14350_p6 = pneg %p14349_p5 }
 0x44f   : > { %p14355_p8 = pnand %p14353_p7, %p14350_p6 }
 0x451   : > { %14358 = shalt.err (!%p14355_p8)
}
 0x452   : > { %s14359_s11 = scalar_lea.vmem %s2080_s13, 4096  ;;  %p14366_p12 = scmp.lt.s32.totalorder %s2080_s13, %s2080_s13 }
 0x453   : > { %p14360_p9 = scmp.ne.s32.totalorder %s2080_s13, %s14359_s11  ;;  %p14367_p13 = scmp.lt.s32.totalorder %s14359_s11, %s14359_s11 }
 0x455   : > { %p14361_p10 = pnand %p14360_p9, %p12975_p3  ;;  %p14368_p0 = por %p14367_p13, %p14366_p12 }
 0x457   : > { %p14362_p11 = pneg %p14361_p10 }
 0x459   : > { %p14369_p1 = pnand %p14368_p0, %p14362_p11 }
 0x45b   : > { %14372 = shalt.err (!%p14369_p1)
}
 0x45c   : > { %s17865_s4 = sld [smem:[#allocation150_spill]] }
 0x45d   : > { %12728 = dma.hbm_to_vmem [thread:$0]  (%p12975_p3), %s17864_s8, 4096, %s2080_s13, [#allocation17], %s17850_s3, %s17850_s3, %s17849_s2  }
 0x462   : > { %s14373_s5 = scalar_lea.hbm %s17865_s4, 12288 }
 0x463   : > { %p14374_p4 = scmp.ne.s32.totalorder %s17865_s4, %s14373_s5  ;;  %p14379_p7 = scmp.lt.u32.totalorder %s14373_s5, %s17865_s4 }
 0x465   : > { %p14375_p5 = pnand %p14374_p4, %p12975_p3 }
 0x467   : > { %p14376_p6 = pneg %p14375_p5 }
 0x469   : > { %p14381_p8 = pnand %p14379_p7, %p14376_p6 }
 0x46b   : > { %14384 = shalt.err (!%p14381_p8)
}
 0x46c   : > { %s14385_s12 = scalar_lea.vmem %s16259_s9, 12288  ;;  %p14392_p12 = scmp.lt.s32.totalorder %s16259_s9, %s16259_s9 }
 0x46d   : > { %p14386_p9 = scmp.ne.s32.totalorder %s16259_s9, %s14385_s12  ;;  %p14393_p13 = scmp.lt.s32.totalorder %s14385_s12, %s14385_s12 }
 0x46f   : > { %p14387_p10 = pnand %p14386_p9, %p12975_p3  ;;  %p14394_p0 = por %p14393_p13, %p14392_p12 }
 0x471   : > { %p14388_p11 = pneg %p14387_p10 }
 0x473   : > { %p14395_p1 = pnand %p14394_p0, %p14388_p11 }
 0x475   : > { %14398 = shalt.err (!%p14395_p1)
}
 0x476   : > { %s17866_s13 = sld [smem:[#allocation152_spill]]  ;;  %s15397_s17 = smov [#allocation24]  }
 0x477   : > { %12732 = dma.hbm_to_vmem [thread:$0]  (%p12975_p3), %s17865_s4, 12288, %s16259_s9, [#allocation20], %s17843_s23, %s17843_s23, %s17842_s7  }
 0x478   : > { %s2130_s11 = sshll.u32 %s15397_s17, 4  ;;  %s15398_s5 = smov [#allocation27]   ;;  %s2131_s11 = int_to_ptr.vmem [resolvable:$true] %s2130_s11 }
 0x479   : > { %s2155_s6 = sshll.u32 %s15398_s5, 4  ;;  %s16292_s6 = int_to_ptr.vmem [resolvable:$true] %s2155_s6 }
 0x47c   : > { %s14399_s12 = scalar_lea.hbm %s17866_s13, 16 }
 0x47d   : > { %p14400_p4 = scmp.ne.s32.totalorder %s17866_s13, %s14399_s12  ;;  %p14405_p7 = scmp.lt.u32.totalorder %s14399_s12, %s17866_s13 }
 0x47f   : > { %p14401_p5 = pnand %p14400_p4, %p12975_p3 }
 0x481   : > { %p14402_p6 = pneg %p14401_p5 }
 0x483   : > { %p14407_p8 = pnand %p14405_p7, %p14402_p6 }
 0x485   : > { %14410 = shalt.err (!%p14407_p8)
}
 0x486   : > { %s14411_s8 = scalar_lea.vmem %s2131_s11, 16  ;;  %s14417_s9 = scalar_lea.vmem %s2131_s11, 32 }
 0x487   : > { %p14412_p9 = scmp.ne.s32.totalorder %s2131_s11, %s14411_s8  ;;  %p14418_p12 = scmp.lt.s32.totalorder %s2131_s11, %s2131_s11 }
 0x488   : > { %p14419_p13 = scmp.lt.s32.totalorder %s14417_s9, %s14411_s8 }
 0x489   : > { %p14413_p10 = pnand %p14412_p9, %p12975_p3 }
 0x48a   : > { %p14420_p0 = por %p14419_p13, %p14418_p12 }
 0x48b   : > { %p14414_p11 = pneg %p14413_p10 }
 0x48d   : > { %p14421_p1 = pnand %p14420_p0, %p14414_p11 }
 0x48f   : > { %14424 = shalt.err (!%p14421_p1)
}
 0x490   : > { %s17867_s17 = sld [smem:[#allocation154_spill]] }
 0x491   : > { %12736 = dma.hbm_to_vmem [thread:$0]  (%p12975_p3), %s17866_s13, 16, %s2131_s11, [#allocation23]  }
 0x496   : > { %s14425_s5 = scalar_lea.hbm %s17867_s17, 16 }
 0x497   : > { %p14426_p4 = scmp.ne.s32.totalorder %s17867_s17, %s14425_s5  ;;  %p14431_p7 = scmp.lt.u32.totalorder %s14425_s5, %s17867_s17 }
 0x499   : > { %p14427_p5 = pnand %p14426_p4, %p12975_p3 }
 0x49b   : > { %p14428_p6 = pneg %p14427_p5 }
 0x49d   : > { %p14433_p8 = pnand %p14431_p7, %p14428_p6 }
 0x49f   : > { %14436 = shalt.err (!%p14433_p8)
}
 0x4a0   : > { %s14437_s8 = scalar_lea.vmem %s16292_s6, 16  ;;  %s14443_s12 = scalar_lea.vmem %s16292_s6, 32 }
 0x4a1   : > { %p14438_p9 = scmp.ne.s32.totalorder %s16292_s6, %s14437_s8  ;;  %p14444_p12 = scmp.lt.s32.totalorder %s16292_s6, %s16292_s6 }
 0x4a2   : > { %p14445_p13 = scmp.lt.s32.totalorder %s14443_s12, %s14437_s8 }
 0x4a3   : > { %p14439_p10 = pnand %p14438_p9, %p12975_p3 }
 0x4a4   : > { %p14446_p0 = por %p14445_p13, %p14444_p12 }
 0x4a5   : > { %p14440_p11 = pneg %p14439_p10 }
 0x4a7   : > { %p14447_p1 = pnand %p14446_p0, %p14440_p11 }
 0x4a9   : > { %14450 = shalt.err (!%p14447_p1)
}
 0x4aa   : > { %s17868_s11 = sld [smem:[#allocation155_spill]]  ;;  %s15399_s9 = smov [#allocation30]  }
 0x4ab   : > { %12740 = dma.hbm_to_vmem [thread:$0]  (%p12975_p3), %s17867_s17, 16, %s16292_s6, [#allocation26]  }
 0x4ac   : > { %s2177_s5 = sshll.u32 %s15399_s9, 4  ;;  %s15400_s4 = smov [#allocation33]   ;;  %s2178_s5 = int_to_ptr.vmem [resolvable:$true] %s2177_s5 }
 0x4ad   : > { %s2198_s13 = sshll.u32 %s15400_s4, 4  ;;  %s16320_s13 = int_to_ptr.vmem [resolvable:$true] %s2198_s13 }
 0x4b0   : > { %s14451_s8 = scalar_lea.hbm %s17868_s11, 16 }
 0x4b1   : > { %p14452_p4 = scmp.ne.s32.totalorder %s17868_s11, %s14451_s8  ;;  %p14457_p7 = scmp.lt.u32.totalorder %s14451_s8, %s17868_s11 }
 0x4b3   : > { %p14453_p5 = pnand %p14452_p4, %p12975_p3 }
 0x4b5   : > { %p14454_p6 = pneg %p14453_p5 }
 0x4b7   : > { %p14459_p8 = pnand %p14457_p7, %p14454_p6 }
 0x4b9   : > { %14462 = shalt.err (!%p14459_p8)
}
 0x4ba   : > { %s14463_s12 = scalar_lea.vmem %s2178_s5, 16  ;;  %s14469_s6 = scalar_lea.vmem %s2178_s5, 32 }
 0x4bb   : > { %p14464_p9 = scmp.ne.s32.totalorder %s2178_s5, %s14463_s12  ;;  %p14470_p12 = scmp.lt.s32.totalorder %s2178_s5, %s2178_s5 }
 0x4bc   : > { %p14471_p13 = scmp.lt.s32.totalorder %s14469_s6, %s14463_s12 }
 0x4bd   : > { %p14465_p10 = pnand %p14464_p9, %p12975_p3 }
 0x4be   : > { %p14472_p0 = por %p14471_p13, %p14470_p12 }
 0x4bf   : > { %p14466_p11 = pneg %p14465_p10 }
 0x4c1   : > { %p14473_p1 = pnand %p14472_p0, %p14466_p11 }
 0x4c3   : > { %14476 = shalt.err (!%p14473_p1)
}
 0x4c4   : > { %s17869_s4 = sld [smem:[#allocation157_spill]] }
 0x4c5   : > { %12744 = dma.hbm_to_vmem [thread:$0]  (%p12975_p3), %s17868_s11, 16, %s2178_s5, [#allocation29]  }
 0x4ca   : > { %s14477_s9 = scalar_lea.hbm %s17869_s4, 4096 }
 0x4cb   : > { %p14478_p4 = scmp.ne.s32.totalorder %s17869_s4, %s14477_s9  ;;  %p14483_p7 = scmp.lt.u32.totalorder %s14477_s9, %s17869_s4 }
 0x4cd   : > { %p14479_p5 = pnand %p14478_p4, %p12975_p3 }
 0x4cf   : > { %p14480_p6 = pneg %p14479_p5 }
 0x4d1   : > { %p14485_p8 = pnand %p14483_p7, %p14480_p6 }
 0x4d3   : > { %14488 = shalt.err (!%p14485_p8)
}
 0x4d4   : > { %s14489_s8 = scalar_lea.vmem %s16320_s13, 4096  ;;  %p14496_p12 = scmp.lt.s32.totalorder %s16320_s13, %s16320_s13 }
 0x4d5   : > { %p14490_p9 = scmp.ne.s32.totalorder %s16320_s13, %s14489_s8  ;;  %p14497_p13 = scmp.lt.s32.totalorder %s14489_s8, %s14489_s8 }
 0x4d7   : > { %p14491_p10 = pnand %p14490_p9, %p12975_p3  ;;  %p14498_p0 = por %p14497_p13, %p14496_p12 }
 0x4d9   : > { %p14492_p11 = pneg %p14491_p10 }
 0x4db   : > { %p14499_p1 = pnand %p14498_p0, %p14492_p11 }
 0x4dd   : > { %14502 = shalt.err (!%p14499_p1)
}
 0x4de   : > { %s17870_s5 = smov 16   ;;  %s17871_s12 = smov 256  }
 0x4df   : > { %s17872_s6 = sld [smem:[#allocation158_spill]]  ;;  %s15401_s9 = smov [#allocation36]  }
 0x4e0   : > { %12748 = dma.hbm_to_vmem [thread:$0]  (%p12975_p3), %s17869_s4, 4096, %s16320_s13, [#allocation32], %s17871_s12, %s17871_s12, %s17870_s5  }
 0x4e1   : > { %s2224_s11 = sshll.u32 %s15401_s9, 4  ;;  %s15402_s14 = smov [#allocation39]   ;;  %s2225_s11 = int_to_ptr.vmem [resolvable:$true] %s2224_s11 }
 0x4e2   : > { %s2250_s16 = sshll.u32 %s15402_s14, 4  ;;  %s16350_s16 = int_to_ptr.vmem [resolvable:$true] %s2250_s16 }
 0x4e5   : > { %s14503_s8 = scalar_lea.hbm %s17872_s6, 4096 }
 0x4e6   : > { %p14504_p4 = scmp.ne.s32.totalorder %s17872_s6, %s14503_s8  ;;  %p14509_p7 = scmp.lt.u32.totalorder %s14503_s8, %s17872_s6 }
 0x4e8   : > { %p14505_p5 = pnand %p14504_p4, %p12975_p3 }
 0x4ea   : > { %p14506_p6 = pneg %p14505_p5 }
 0x4ec   : > { %p14511_p8 = pnand %p14509_p7, %p14506_p6 }
 0x4ee   : > { %14514 = shalt.err (!%p14511_p8)
}
 0x4ef   : > { %s14515_s17 = scalar_lea.vmem %s2225_s11, 4096  ;;  %p14522_p12 = scmp.lt.s32.totalorder %s2225_s11, %s2225_s11 }
 0x4f0   : > { %p14516_p9 = scmp.ne.s32.totalorder %s2225_s11, %s14515_s17  ;;  %p14523_p13 = scmp.lt.s32.totalorder %s14515_s17, %s14515_s17 }
 0x4f2   : > { %p14517_p10 = pnand %p14516_p9, %p12975_p3  ;;  %p14524_p0 = por %p14523_p13, %p14522_p12 }
 0x4f4   : > { %p14518_p11 = pneg %p14517_p10 }
 0x4f6   : > { %p14525_p1 = pnand %p14524_p0, %p14518_p11 }
 0x4f8   : > { %14528 = shalt.err (!%p14525_p1)
}
 0x4f9   : > { %s17873_s14 = sld [smem:[#allocation160_spill]] }
 0x4fa   : > { %12752 = dma.hbm_to_vmem [thread:$0]  (%p12975_p3), %s17872_s6, 4096, %s2225_s11, [#allocation35], %s17850_s3, %s17850_s3, %s17849_s2  }
 0x4ff   : > { %s14529_s13 = scalar_lea.hbm %s17873_s14, 2048 }
 0x500   : > { %p14530_p4 = scmp.ne.s32.totalorder %s17873_s14, %s14529_s13  ;;  %p14535_p7 = scmp.lt.u32.totalorder %s14529_s13, %s17873_s14 }
 0x502   : > { %p14531_p5 = pnand %p14530_p4, %p12975_p3 }
 0x504   : > { %p14532_p6 = pneg %p14531_p5 }
 0x506   : > { %p14537_p8 = pnand %p14535_p7, %p14532_p6 }
 0x508   : > { %14540 = shalt.err (!%p14537_p8)
}
 0x509   : > { %s14541_s17 = scalar_lea.vmem %s16350_s16, 2048  ;;  %p14548_p12 = scmp.lt.s32.totalorder %s16350_s16, %s16350_s16 }
 0x50a   : > { %p14542_p9 = scmp.ne.s32.totalorder %s16350_s16, %s14541_s17  ;;  %p14549_p13 = scmp.lt.s32.totalorder %s14541_s17, %s14541_s17 }
 0x50c   : > { %p14543_p10 = pnand %p14542_p9, %p12975_p3  ;;  %p14550_p0 = por %p14549_p13, %p14548_p12 }
 0x50e   : > { %p14544_p11 = pneg %p14543_p10 }
 0x510   : > { %p14551_p1 = pnand %p14550_p0, %p14544_p11 }
 0x512   : > { %14554 = shalt.err (!%p14551_p1)
}
 0x513   : > { %s17874_s11 = sld [smem:[#allocation161_spill]]  ;;  %s15403_s9 = smov [#allocation42]  }
 0x514   : > { %12756 = dma.hbm_to_vmem [thread:$0]  (%p12975_p3), %s17873_s14, 2048, %s16350_s16, [#allocation38], %s17850_s3, %s17850_s3, %s17849_s2  }
 0x515   : > { %s2275_s8 = sshll.u32 %s15403_s9, 4  ;;  %s15404_s13 = smov [#allocation45]   ;;  %s2276_s8 = int_to_ptr.vmem [resolvable:$true] %s2275_s8 }
 0x516   : > { %s2300_s4 = sshll.u32 %s15404_s13, 4  ;;  %s16383_s4 = int_to_ptr.vmem [resolvable:$true] %s2300_s4 }
 0x519   : > { %s14555_s17 = scalar_lea.hbm %s17874_s11, 16 }
 0x51a   : > { %p14556_p4 = scmp.ne.s32.totalorder %s17874_s11, %s14555_s17  ;;  %p14561_p7 = scmp.lt.u32.totalorder %s14555_s17, %s17874_s11 }
 0x51c   : > { %p14557_p5 = pnand %p14556_p4, %p12975_p3 }
 0x51e   : > { %p14558_p6 = pneg %p14557_p5 }
 0x520   : > { %p14563_p8 = pnand %p14561_p7, %p14558_p6 }
 0x522   : > { %14566 = shalt.err (!%p14563_p8)
}
 0x523   : > { %s14567_s6 = scalar_lea.vmem %s2276_s8, 16  ;;  %s14573_s16 = scalar_lea.vmem %s2276_s8, 32 }
 0x524   : > { %p14568_p9 = scmp.ne.s32.totalorder %s2276_s8, %s14567_s6  ;;  %p14574_p12 = scmp.lt.s32.totalorder %s2276_s8, %s2276_s8 }
 0x525   : > { %p14575_p13 = scmp.lt.s32.totalorder %s14573_s16, %s14567_s6 }
 0x526   : > { %p14569_p10 = pnand %p14568_p9, %p12975_p3 }
 0x527   : > { %p14576_p0 = por %p14575_p13, %p14574_p12 }
 0x528   : > { %p14570_p11 = pneg %p14569_p10 }
 0x52a   : > { %p14577_p1 = pnand %p14576_p0, %p14570_p11 }
 0x52c   : > { %14580 = shalt.err (!%p14577_p1)
}
 0x52d   : > { %s17875_s9 = sld [smem:[#allocation164_spill]] }
 0x52e   : > { %12760 = dma.hbm_to_vmem [thread:$0]  (%p12975_p3), %s17874_s11, 16, %s2276_s8, [#allocation41]  }
 0x533   : > { %s14581_s13 = scalar_lea.hbm %s17875_s9, 16 }
 0x534   : > { %p14582_p4 = scmp.ne.s32.totalorder %s17875_s9, %s14581_s13  ;;  %p14587_p7 = scmp.lt.u32.totalorder %s14581_s13, %s17875_s9 }
 0x536   : > { %p14583_p5 = pnand %p14582_p4, %p12975_p3 }
 0x538   : > { %p14584_p6 = pneg %p14583_p5 }
 0x53a   : > { %p14589_p8 = pnand %p14587_p7, %p14584_p6 }
 0x53c   : > { %14592 = shalt.err (!%p14589_p8)
}
 0x53d   : > { %s14593_s6 = scalar_lea.vmem %s16383_s4, 16  ;;  %s14599_s17 = scalar_lea.vmem %s16383_s4, 32 }
 0x53e   : > { %p14594_p9 = scmp.ne.s32.totalorder %s16383_s4, %s14593_s6  ;;  %p14600_p12 = scmp.lt.s32.totalorder %s16383_s4, %s16383_s4 }
 0x53f   : > { %p14601_p13 = scmp.lt.s32.totalorder %s14599_s17, %s14593_s6 }
 0x540   : > { %p14595_p10 = pnand %p14594_p9, %p12975_p3 }
 0x541   : > { %p14602_p0 = por %p14601_p13, %p14600_p12 }
 0x542   : > { %p14596_p11 = pneg %p14595_p10 }
 0x544   : > { %p14603_p1 = pnand %p14602_p0, %p14596_p11 }
 0x546   : > { %14606 = shalt.err (!%p14603_p1)
}
 0x547   : > { %s17876_s8 = sld [smem:[#allocation166_spill]]  ;;  %s15405_s16 = smov [#allocation48]  }
 0x548   : > { %12764 = dma.hbm_to_vmem [thread:$0]  (%p12975_p3), %s17875_s9, 16, %s16383_s4, [#allocation44]  }
 0x549   : > { %s2322_s13 = sshll.u32 %s15405_s16, 4  ;;  %s15406_s11 = smov [#allocation51]   ;;  %s2323_s13 = int_to_ptr.vmem [resolvable:$true] %s2322_s13 }
 0x54a   : > { %s2343_s14 = sshll.u32 %s15406_s11, 4  ;;  %s16411_s14 = int_to_ptr.vmem [resolvable:$true] %s2343_s14 }
 0x54d   : > { %s14607_s6 = scalar_lea.hbm %s17876_s8, 16 }
 0x54e   : > { %p14608_p4 = scmp.ne.s32.totalorder %s17876_s8, %s14607_s6  ;;  %p14613_p7 = scmp.lt.u32.totalorder %s14607_s6, %s17876_s8 }
 0x550   : > { %p14609_p5 = pnand %p14608_p4, %p12975_p3 }
 0x552   : > { %p14610_p6 = pneg %p14609_p5 }
 0x554   : > { %p14615_p8 = pnand %p14613_p7, %p14610_p6 }
 0x556   : > { %14618 = shalt.err (!%p14615_p8)
}
 0x557   : > { %s14619_s17 = scalar_lea.vmem %s2323_s13, 16  ;;  %s14625_s4 = scalar_lea.vmem %s2323_s13, 32 }
 0x558   : > { %p14620_p9 = scmp.ne.s32.totalorder %s2323_s13, %s14619_s17  ;;  %p14626_p12 = scmp.lt.s32.totalorder %s2323_s13, %s2323_s13 }
 0x559   : > { %p14627_p13 = scmp.lt.s32.totalorder %s14625_s4, %s14619_s17 }
 0x55a   : > { %p14621_p10 = pnand %p14620_p9, %p12975_p3 }
 0x55b   : > { %p14628_p0 = por %p14627_p13, %p14626_p12 }
 0x55c   : > { %p14622_p11 = pneg %p14621_p10 }
 0x55e   : > { %p14629_p1 = pnand %p14628_p0, %p14622_p11 }
 0x560   : > { %14632 = shalt.err (!%p14629_p1)
}
 0x561   : > { %s17877_s11 = sld [smem:[#allocation168_spill]] }
 0x562   : > { %12768 = dma.hbm_to_vmem [thread:$0]  (%p12975_p3), %s17876_s8, 16, %s2323_s13, [#allocation47]  }
 0x567   : > { %s14633_s16 = scalar_lea.hbm %s17877_s11, 4096 }
 0x568   : > { %p14634_p4 = scmp.ne.s32.totalorder %s17877_s11, %s14633_s16  ;;  %p14639_p7 = scmp.lt.u32.totalorder %s14633_s16, %s17877_s11 }
 0x56a   : > { %p14635_p5 = pnand %p14634_p4, %p12975_p3 }
 0x56c   : > { %p14636_p6 = pneg %p14635_p5 }
 0x56e   : > { %p14641_p8 = pnand %p14639_p7, %p14636_p6 }
 0x570   : > { %14644 = shalt.err (!%p14641_p8)
}
 0x571   : > { %s14645_s6 = scalar_lea.vmem %s16411_s14, 4096  ;;  %p14652_p12 = scmp.lt.s32.totalorder %s16411_s14, %s16411_s14 }
 0x572   : > { %p14646_p9 = scmp.ne.s32.totalorder %s16411_s14, %s14645_s6  ;;  %p14653_p13 = scmp.lt.s32.totalorder %s14645_s6, %s14645_s6 }
 0x574   : > { %p14647_p10 = pnand %p14646_p9, %p12975_p3  ;;  %p14654_p0 = por %p14653_p13, %p14652_p12 }
 0x576   : > { %p14648_p11 = pneg %p14647_p10 }
 0x578   : > { %p14655_p1 = pnand %p14654_p0, %p14648_p11 }
 0x57a   : > { %14658 = shalt.err (!%p14655_p1)
}
 0x57b   : > { %s17878_s13 = sld [smem:[#allocation170_spill]]  ;;  %s15407_s17 = smov [#allocation54]  }
 0x57c   : > { %12772 = dma.hbm_to_vmem [thread:$0]  (%p12975_p3), %s17877_s11, 4096, %s16411_s14, [#allocation50], %s17871_s12, %s17871_s12, %s17870_s5  }
 0x57d   : > { %s2369_s4 = sshll.u32 %s15407_s17, 4  ;;  %s15408_s16 = smov [#allocation57]   ;;  %s2370_s4 = int_to_ptr.vmem [resolvable:$true] %s2369_s4 }
 0x57e   : > { %s2396_s8 = sshll.u32 %s15408_s16, 4  ;;  %s16441_s8 = int_to_ptr.vmem [resolvable:$true] %s2396_s8 }
 0x581   : > { %s14659_s6 = scalar_lea.hbm %s17878_s13, 4096 }
 0x582   : > { %p14660_p4 = scmp.ne.s32.totalorder %s17878_s13, %s14659_s6  ;;  %p14665_p7 = scmp.lt.u32.totalorder %s14659_s6, %s17878_s13 }
 0x584   : > { %p14661_p5 = pnand %p14660_p4, %p12975_p3 }
 0x586   : > { %p14662_p6 = pneg %p14661_p5 }
 0x588   : > { %p14667_p8 = pnand %p14665_p7, %p14662_p6 }
 0x58a   : > { %14670 = shalt.err (!%p14667_p8)
}
 0x58b   : > { %s14671_s9 = scalar_lea.vmem %s2370_s4, 4096  ;;  %p14678_p12 = scmp.lt.s32.totalorder %s2370_s4, %s2370_s4 }
 0x58c   : > { %p14672_p9 = scmp.ne.s32.totalorder %s2370_s4, %s14671_s9  ;;  %p14679_p13 = scmp.lt.s32.totalorder %s14671_s9, %s14671_s9 }
 0x58e   : > { %p14673_p10 = pnand %p14672_p9, %p12975_p3  ;;  %p14680_p0 = por %p14679_p13, %p14678_p12 }
 0x590   : > { %p14674_p11 = pneg %p14673_p10 }
 0x592   : > { %p14681_p1 = pnand %p14680_p0, %p14674_p11 }
 0x594   : > { %14684 = shalt.err (!%p14681_p1)
}
 0x595   : > { %s17879_s5 = sld [smem:[#allocation172_spill]] }
 0x596   : > { %12776 = dma.hbm_to_vmem [thread:$0]  (%p12975_p3), %s17878_s13, 4096, %s2370_s4, [#allocation53], %s17850_s3, %s17850_s3, %s17849_s2  }
 0x59b   : > { %s14685_s12 = scalar_lea.hbm %s17879_s5, 32 }
 0x59c   : > { %p14686_p4 = scmp.ne.s32.totalorder %s17879_s5, %s14685_s12  ;;  %p14691_p7 = scmp.lt.u32.totalorder %s14685_s12, %s17879_s5 }
 0x59e   : > { %p14687_p5 = pnand %p14686_p4, %p12975_p3 }
 0x5a0   : > { %p14688_p6 = pneg %p14687_p5 }
 0x5a2   : > { %p14693_p8 = pnand %p14691_p7, %p14688_p6 }
 0x5a4   : > { %14696 = shalt.err (!%p14693_p8)
}
 0x5a5   : > { %s14697_s14 = scalar_lea.vmem %s16441_s8, 32  ;;  %p14704_p12 = scmp.lt.s32.totalorder %s16441_s8, %s16441_s8 }
 0x5a6   : > { %p14698_p9 = scmp.ne.s32.totalorder %s16441_s8, %s14697_s14  ;;  %p14705_p13 = scmp.lt.s32.totalorder %s14697_s14, %s14697_s14 }
 0x5a8   : > { %p14699_p10 = pnand %p14698_p9, %p12975_p3  ;;  %p14706_p0 = por %p14705_p13, %p14704_p12 }
 0x5aa   : > { %p14700_p11 = pneg %p14699_p10 }
 0x5ac   : > { %p14707_p1 = pnand %p14706_p0, %p14700_p11 }
 0x5ae   : > { %14710 = shalt.err (!%p14707_p1)
}
 0x5af   : > { %s17880_s9 = sld [smem:[#allocation174_spill]]  ;;  %s15409_s17 = smov [#allocation60]  }
 0x5b0   : > { %12780 = dma.hbm_to_vmem [thread:$0]  (%p12975_p3), %s17879_s5, 32, %s16441_s8, [#allocation56]  }
 0x5b1   : > { %s2418_s4 = sshll.u32 %s15409_s17, 4  ;;  %s15410_s16 = smov [#allocation63]   ;;  %s2419_s4 = int_to_ptr.vmem [resolvable:$true] %s2418_s4 }
 0x5b2   : > { %s2443_s6 = sshll.u32 %s15410_s16, 4  ;;  %s16471_s6 = int_to_ptr.vmem [resolvable:$true] %s2443_s6 }
 0x5b5   : > { %s14711_s12 = scalar_lea.hbm %s17880_s9, 16 }
 0x5b6   : > { %p14712_p4 = scmp.ne.s32.totalorder %s17880_s9, %s14711_s12  ;;  %p14717_p7 = scmp.lt.u32.totalorder %s14711_s12, %s17880_s9 }
 0x5b8   : > { %p14713_p5 = pnand %p14712_p4, %p12975_p3 }
 0x5ba   : > { %p14714_p6 = pneg %p14713_p5 }
 0x5bc   : > { %p14719_p8 = pnand %p14717_p7, %p14714_p6 }
 0x5be   : > { %14722 = shalt.err (!%p14719_p8)
}
 0x5bf   : > { %s14723_s14 = scalar_lea.vmem %s2419_s4, 16  ;;  %s14729_s8 = scalar_lea.vmem %s2419_s4, 32 }
 0x5c0   : > { %p14724_p9 = scmp.ne.s32.totalorder %s2419_s4, %s14723_s14  ;;  %p14730_p12 = scmp.lt.s32.totalorder %s2419_s4, %s2419_s4 }
 0x5c1   : > { %p14731_p13 = scmp.lt.s32.totalorder %s14729_s8, %s14723_s14 }
 0x5c2   : > { %p14725_p10 = pnand %p14724_p9, %p12975_p3 }
 0x5c3   : > { %p14732_p0 = por %p14731_p13, %p14730_p12 }
 0x5c4   : > { %p14726_p11 = pneg %p14725_p10 }
 0x5c6   : > { %p14733_p1 = pnand %p14732_p0, %p14726_p11 }
 0x5c8   : > { %14736 = shalt.err (!%p14733_p1)
}
 0x5c9   : > { %s17881_s17 = sld [smem:[#allocation177_spill]] }
 0x5ca   : > { %12784 = dma.hbm_to_vmem [thread:$0]  (%p12975_p3), %s17880_s9, 16, %s2419_s4, [#allocation59]  }
 0x5cf   : > { %s14737_s16 = scalar_lea.hbm %s17881_s17, 16 }
 0x5d0   : > { %p14738_p4 = scmp.ne.s32.totalorder %s17881_s17, %s14737_s16  ;;  %p14743_p7 = scmp.lt.u32.totalorder %s14737_s16, %s17881_s17 }
 0x5d2   : > { %p14739_p5 = pnand %p14738_p4, %p12975_p3 }
 0x5d4   : > { %p14740_p6 = pneg %p14739_p5 }
 0x5d6   : > { %p14745_p8 = pnand %p14743_p7, %p14740_p6 }
 0x5d8   : > { %14748 = shalt.err (!%p14745_p8)
}
 0x5d9   : > { %s14749_s12 = scalar_lea.vmem %s16471_s6, 16  ;;  %s14755_s14 = scalar_lea.vmem %s16471_s6, 32 }
 0x5da   : > { %p14750_p9 = scmp.ne.s32.totalorder %s16471_s6, %s14749_s12  ;;  %p14756_p12 = scmp.lt.s32.totalorder %s16471_s6, %s16471_s6 }
 0x5db   : > { %p14757_p13 = scmp.lt.s32.totalorder %s14755_s14, %s14749_s12 }
 0x5dc   : > { %p14751_p10 = pnand %p14750_p9, %p12975_p3 }
 0x5dd   : > { %p14758_p0 = por %p14757_p13, %p14756_p12 }
 0x5de   : > { %p14752_p11 = pneg %p14751_p10 }
 0x5e0   : > { %p14759_p1 = pnand %p14758_p0, %p14752_p11 }
 0x5e2   : > { %14762 = shalt.err (!%p14759_p1)
}
 0x5e3   : > { %s17882_s4 = sld [smem:[#allocation179_spill]]  ;;  %s15411_s8 = smov [#allocation66]  }
 0x5e4   : > { %12788 = dma.hbm_to_vmem [thread:$0]  (%p12975_p3), %s17881_s17, 16, %s16471_s6, [#allocation62]  }
 0x5e5   : > { %s2465_s16 = sshll.u32 %s15411_s8, 4  ;;  %s15412_s5 = smov [#allocation69]   ;;  %s2466_s16 = int_to_ptr.vmem [resolvable:$true] %s2465_s16 }
 0x5e6   : > { %s2488_s9 = sshll.u32 %s15412_s5, 4  ;;  %s16499_s9 = int_to_ptr.vmem [resolvable:$true] %s2488_s9 }
 0x5e9   : > { %s14763_s12 = scalar_lea.hbm %s17882_s4, 16 }
 0x5ea   : > { %p14764_p4 = scmp.ne.s32.totalorder %s17882_s4, %s14763_s12  ;;  %p14769_p7 = scmp.lt.u32.totalorder %s14763_s12, %s17882_s4 }
 0x5ec   : > { %p14765_p5 = pnand %p14764_p4, %p12975_p3 }
 0x5ee   : > { %p14766_p6 = pneg %p14765_p5 }
 0x5f0   : > { %p14771_p8 = pnand %p14769_p7, %p14766_p6 }
 0x5f2   : > { %14774 = shalt.err (!%p14771_p8)
}
 0x5f3   : > { %s14775_s14 = scalar_lea.vmem %s2466_s16, 16  ;;  %s14781_s6 = scalar_lea.vmem %s2466_s16, 32 }
 0x5f4   : > { %p14776_p9 = scmp.ne.s32.totalorder %s2466_s16, %s14775_s14  ;;  %p14782_p12 = scmp.lt.s32.totalorder %s2466_s16, %s2466_s16 }
 0x5f5   : > { %p14783_p13 = scmp.lt.s32.totalorder %s14781_s6, %s14775_s14 }
 0x5f6   : > { %p14777_p10 = pnand %p14776_p9, %p12975_p3 }
 0x5f7   : > { %p14784_p0 = por %p14783_p13, %p14782_p12 }
 0x5f8   : > { %p14778_p11 = pneg %p14777_p10 }
 0x5fa   : > { %p14785_p1 = pnand %p14784_p0, %p14778_p11 }
 0x5fc   : > { %14788 = shalt.err (!%p14785_p1)
}
 0x5fd   : > { %s17883_s5 = sld [smem:[#allocation181_spill]] }
 0x5fe   : > { %12792 = dma.hbm_to_vmem [thread:$0]  (%p12975_p3), %s17882_s4, 16, %s2466_s16, [#allocation65]  }
 0x603   : > { %s14789_s8 = scalar_lea.hbm %s17883_s5, 4096 }
 0x604   : > { %p14790_p4 = scmp.ne.s32.totalorder %s17883_s5, %s14789_s8  ;;  %p14795_p7 = scmp.lt.u32.totalorder %s14789_s8, %s17883_s5 }
 0x606   : > { %p14791_p5 = pnand %p14790_p4, %p12975_p3 }
 0x608   : > { %p14792_p6 = pneg %p14791_p5 }
 0x60a   : > { %p14797_p8 = pnand %p14795_p7, %p14792_p6 }
 0x60c   : > { %14800 = shalt.err (!%p14797_p8)
}
 0x60d   : > { %s14801_s12 = scalar_lea.vmem %s16499_s9, 4096  ;;  %p14808_p12 = scmp.lt.s32.totalorder %s16499_s9, %s16499_s9 }
 0x60e   : > { %p14802_p9 = scmp.ne.s32.totalorder %s16499_s9, %s14801_s12  ;;  %p14809_p13 = scmp.lt.s32.totalorder %s14801_s12, %s14801_s12 }
 0x610   : > { %p14803_p10 = pnand %p14802_p9, %p12975_p3  ;;  %p14810_p0 = por %p14809_p13, %p14808_p12 }
 0x612   : > { %p14804_p11 = pneg %p14803_p10 }
 0x614   : > { %p14811_p1 = pnand %p14810_p0, %p14804_p11 }
 0x616   : > { %14814 = shalt.err (!%p14811_p1)
}
 0x617   : > { %s17884_s16 = sld [smem:[#allocation183_spill]]  ;;  %s15413_s14 = smov [#allocation72]  }
 0x618   : > { %12796 = dma.hbm_to_vmem [thread:$0]  (%p12975_p3), %s17883_s5, 4096, %s16499_s9, [#allocation68], %s17850_s3, %s17850_s3, %s17849_s2  }
 0x619   : > { %s2514_s6 = sshll.u32 %s15413_s14, 4  ;;  %s15414_s8 = smov [#allocation75]   ;;  %s2515_s6 = int_to_ptr.vmem [resolvable:$true] %s2514_s6 }
 0x61a   : > { %s2539_s4 = sshll.u32 %s15414_s8, 4  ;;  %s16529_s4 = int_to_ptr.vmem [resolvable:$true] %s2539_s4 }
 0x61d   : > { %s14815_s12 = scalar_lea.hbm %s17884_s16, 12288 }
 0x61e   : > { %p14816_p4 = scmp.ne.s32.totalorder %s17884_s16, %s14815_s12  ;;  %p14821_p7 = scmp.lt.u32.totalorder %s14815_s12, %s17884_s16 }
 0x620   : > { %p14817_p5 = pnand %p14816_p4, %p12975_p3 }
 0x622   : > { %p14818_p6 = pneg %p14817_p5 }
 0x624   : > { %p14823_p8 = pnand %p14821_p7, %p14818_p6 }
 0x626   : > { %14826 = shalt.err (!%p14823_p8)
}
 0x627   : > { %s14827_s11 = scalar_lea.vmem %s2515_s6, 12288  ;;  %p14834_p12 = scmp.lt.s32.totalorder %s2515_s6, %s2515_s6 }
 0x628   : > { %p14828_p9 = scmp.ne.s32.totalorder %s2515_s6, %s14827_s11  ;;  %p14835_p13 = scmp.lt.s32.totalorder %s14827_s11, %s14827_s11 }
 0x62a   : > { %p14829_p10 = pnand %p14828_p9, %p12975_p3  ;;  %p14836_p0 = por %p14835_p13, %p14834_p12 }
 0x62c   : > { %p14830_p11 = pneg %p14829_p10 }
 0x62e   : > { %p14837_p1 = pnand %p14836_p0, %p14830_p11 }
 0x630   : > { %14840 = shalt.err (!%p14837_p1)
}
 0x631   : > { %s17885_s9 = sld [smem:[#allocation185_spill]] }
 0x632   : > { %12800 = dma.hbm_to_vmem [thread:$0]  (%p12975_p3), %s17884_s16, 12288, %s2515_s6, [#allocation71], %s17843_s23, %s17843_s23, %s17842_s7  }
 0x637   : > { %s14841_s14 = scalar_lea.hbm %s17885_s9, 16 }
 0x638   : > { %p14842_p4 = scmp.ne.s32.totalorder %s17885_s9, %s14841_s14  ;;  %p14847_p7 = scmp.lt.u32.totalorder %s14841_s14, %s17885_s9 }
 0x63a   : > { %p14843_p5 = pnand %p14842_p4, %p12975_p3 }
 0x63c   : > { %p14844_p6 = pneg %p14843_p5 }
 0x63e   : > { %p14849_p8 = pnand %p14847_p7, %p14844_p6 }
 0x640   : > { %14852 = shalt.err (!%p14849_p8)
}
 0x641   : > { %s14853_s11 = scalar_lea.vmem %s16529_s4, 16  ;;  %s14859_s8 = scalar_lea.vmem %s16529_s4, 32 }
 0x642   : > { %p14854_p9 = scmp.ne.s32.totalorder %s16529_s4, %s14853_s11  ;;  %p14860_p12 = scmp.lt.s32.totalorder %s16529_s4, %s16529_s4 }
 0x643   : > { %p14861_p13 = scmp.lt.s32.totalorder %s14859_s8, %s14853_s11 }
 0x644   : > { %p14855_p10 = pnand %p14854_p9, %p12975_p3 }
 0x645   : > { %p14862_p0 = por %p14861_p13, %p14860_p12 }
 0x646   : > { %p14856_p11 = pneg %p14855_p10 }
 0x648   : > { %p14863_p1 = pnand %p14862_p0, %p14856_p11 }
 0x64a   : > { %14866 = shalt.err (!%p14863_p1)
}
 0x64b   : > { %s17886_s7 = sld [smem:[#allocation189_spill]]  ;;  %s15415_s23 = smov [#allocation78]  }
 0x64c   : > { %12804 = dma.hbm_to_vmem [thread:$0]  (%p12975_p3), %s17885_s9, 16, %s16529_s4, [#allocation74]  }
 0x64d   : > { %s2570_s6 = sshll.u32 %s15415_s23, 4  ;;  %s15416_s12 = smov [#allocation81]   ;;  %s2571_s6 = int_to_ptr.vmem [resolvable:$true] %s2570_s6 }
 0x64e   : > { %s2592_s14 = sshll.u32 %s15416_s12, 4  ;;  %s16560_s14 = int_to_ptr.vmem [resolvable:$true] %s2592_s14 }
 0x651   : > { %s14867_s11 = scalar_lea.hbm %s17886_s7, 16 }
 0x652   : > { %p14868_p4 = scmp.ne.s32.totalorder %s17886_s7, %s14867_s11  ;;  %p14873_p7 = scmp.lt.u32.totalorder %s14867_s11, %s17886_s7 }
 0x654   : > { %p14869_p5 = pnand %p14868_p4, %p12975_p3 }
 0x656   : > { %p14870_p6 = pneg %p14869_p5 }
 0x658   : > { %p14875_p8 = pnand %p14873_p7, %p14870_p6 }
 0x65a   : > { %14878 = shalt.err (!%p14875_p8)
}
 0x65b   : > { %s14879_s8 = scalar_lea.vmem %s2571_s6, 16  ;;  %s14885_s4 = scalar_lea.vmem %s2571_s6, 32 }
 0x65c   : > { %p14880_p9 = scmp.ne.s32.totalorder %s2571_s6, %s14879_s8  ;;  %p14886_p12 = scmp.lt.s32.totalorder %s2571_s6, %s2571_s6 }
 0x65d   : > { %p14887_p13 = scmp.lt.s32.totalorder %s14885_s4, %s14879_s8 }
 0x65e   : > { %p14881_p10 = pnand %p14880_p9, %p12975_p3 }
 0x65f   : > { %p14888_p0 = por %p14887_p13, %p14886_p12 }
 0x660   : > { %p14882_p11 = pneg %p14881_p10 }
 0x662   : > { %p14889_p1 = pnand %p14888_p0, %p14882_p11 }
 0x664   : > { %14892 = shalt.err (!%p14889_p1)
}
 0x665   : > { %s17887_s23 = sld [smem:[#allocation191_spill]] }
 0x666   : > { %12808 = dma.hbm_to_vmem [thread:$0]  (%p12975_p3), %s17886_s7, 16, %s2571_s6, [#allocation77]  }
 0x66b   : > { %s14893_s12 = scalar_lea.hbm %s17887_s23, 16 }
 0x66c   : > { %p14894_p4 = scmp.ne.s32.totalorder %s17887_s23, %s14893_s12  ;;  %p14899_p7 = scmp.lt.u32.totalorder %s14893_s12, %s17887_s23 }
 0x66e   : > { %p14895_p5 = pnand %p14894_p4, %p12975_p3 }
 0x670   : > { %p14896_p6 = pneg %p14895_p5 }
 0x672   : > { %p14901_p8 = pnand %p14899_p7, %p14896_p6 }
 0x674   : > { %14904 = shalt.err (!%p14901_p8)
}
 0x675   : > { %s14905_s11 = scalar_lea.vmem %s16560_s14, 16  ;;  %s14911_s8 = scalar_lea.vmem %s16560_s14, 32 }
 0x676   : > { %p14906_p9 = scmp.ne.s32.totalorder %s16560_s14, %s14905_s11  ;;  %p14912_p12 = scmp.lt.s32.totalorder %s16560_s14, %s16560_s14 }
 0x677   : > { %p14913_p13 = scmp.lt.s32.totalorder %s14911_s8, %s14905_s11 }
 0x678   : > { %p14907_p10 = pnand %p14906_p9, %p12975_p3 }
 0x679   : > { %p14914_p0 = por %p14913_p13, %p14912_p12 }
 0x67a   : > { %p14908_p11 = pneg %p14907_p10 }
 0x67c   : > { %p14915_p1 = pnand %p14914_p0, %p14908_p11 }
 0x67e   : > { %14918 = shalt.err (!%p14915_p1)
}
 0x67f   : > { %s17888_s6 = sld [smem:[#allocation193_spill]]  ;;  %s15417_s4 = smov [#allocation84]  }
 0x680   : > { %12812 = dma.hbm_to_vmem [thread:$0]  (%p12975_p3), %s17887_s23, 16, %s16560_s14, [#allocation80]  }
 0x681   : > { %s2613_s12 = sshll.u32 %s15417_s4, 4  ;;  %s15418_s5 = smov [#allocation87]   ;;  %s2614_s12 = int_to_ptr.vmem [resolvable:$true] %s2613_s12 }
 0x682   : > { %s2644_s7 = sshll.u32 %s15418_s5, 4  ;;  %s16588_s7 = int_to_ptr.vmem [resolvable:$true] %s2644_s7 }
 0x685   : > { %s14919_s11 = scalar_lea.hbm %s17888_s6, 2048 }
 0x686   : > { %p14920_p4 = scmp.ne.s32.totalorder %s17888_s6, %s14919_s11  ;;  %p14925_p7 = scmp.lt.u32.totalorder %s14919_s11, %s17888_s6 }
 0x688   : > { %p14921_p5 = pnand %p14920_p4, %p12975_p3 }
 0x68a   : > { %p14922_p6 = pneg %p14921_p5 }
 0x68c   : > { %p14927_p8 = pnand %p14925_p7, %p14922_p6 }
 0x68e   : > { %14930 = shalt.err (!%p14927_p8)
}
 0x68f   : > { %s14931_s8 = scalar_lea.vmem %s2614_s12, 2048  ;;  %p14938_p12 = scmp.lt.s32.totalorder %s2614_s12, %s2614_s12 }
 0x690   : > { %p14932_p9 = scmp.ne.s32.totalorder %s2614_s12, %s14931_s8  ;;  %p14939_p13 = scmp.lt.s32.totalorder %s14931_s8, %s14931_s8 }
 0x692   : > { %p14933_p10 = pnand %p14932_p9, %p12975_p3  ;;  %p14940_p0 = por %p14939_p13, %p14938_p12 }
 0x694   : > { %p14934_p11 = pneg %p14933_p10 }
 0x696   : > { %p14941_p1 = pnand %p14940_p0, %p14934_p11 }
 0x698   : > { %14944 = shalt.err (!%p14941_p1)
}
 0x699   : > { %s17889_s5 = sld [smem:[#allocation196_spill]] }
 0x69a   : > { %12816 = dma.hbm_to_vmem [thread:$0]  (%p12975_p3), %s17888_s6, 2048, %s2614_s12, [#allocation83], %s17850_s3, %s17850_s3, %s17849_s2  }
 0x69f   : > { %s14945_s14 = scalar_lea.hbm %s17889_s5, 16 }
 0x6a0   : > { %p14946_p4 = scmp.ne.s32.totalorder %s17889_s5, %s14945_s14  ;;  %p14951_p7 = scmp.lt.u32.totalorder %s14945_s14, %s17889_s5 }
 0x6a2   : > { %p14947_p5 = pnand %p14946_p4, %p12975_p3 }
 0x6a4   : > { %p14948_p6 = pneg %p14947_p5 }
 0x6a6   : > { %p14953_p8 = pnand %p14951_p7, %p14948_p6 }
 0x6a8   : > { %14956 = shalt.err (!%p14953_p8)
}
 0x6a9   : > { %s14957_s4 = scalar_lea.vmem %s16588_s7, 16  ;;  %s14963_s11 = scalar_lea.vmem %s16588_s7, 32 }
 0x6aa   : > { %p14958_p9 = scmp.ne.s32.totalorder %s16588_s7, %s14957_s4  ;;  %p14964_p12 = scmp.lt.s32.totalorder %s16588_s7, %s16588_s7 }
 0x6ab   : > { %p14965_p13 = scmp.lt.s32.totalorder %s14963_s11, %s14957_s4 }
 0x6ac   : > { %p14959_p10 = pnand %p14958_p9, %p12975_p3 }
 0x6ad   : > { %p14966_p0 = por %p14965_p13, %p14964_p12 }
 0x6ae   : > { %p14960_p11 = pneg %p14959_p10 }
 0x6b0   : > { %p14967_p1 = pnand %p14966_p0, %p14960_p11 }
 0x6b2   : > { %14970 = shalt.err (!%p14967_p1)
}
 0x6b3   : > { %s17890_s12 = sld [smem:[#allocation198_spill]]  ;;  %s15419_s8 = smov [#allocation90]  }
 0x6b4   : > { %12820 = dma.hbm_to_vmem [thread:$0]  (%p12975_p3), %s17889_s5, 16, %s16588_s7, [#allocation86]  }
 0x6b5   : > { %s2666_s14 = sshll.u32 %s15419_s8, 4  ;;  %s15420_s6 = smov [#allocation93]   ;;  %s2667_s14 = int_to_ptr.vmem [resolvable:$true] %s2666_s14 }
 0x6b6   : > { %s2687_s9 = sshll.u32 %s15420_s6, 4  ;;  %s16619_s9 = int_to_ptr.vmem [resolvable:$true] %s2687_s9 }
 0x6b9   : > { %s14971_s4 = scalar_lea.hbm %s17890_s12, 16 }
 0x6ba   : > { %p14972_p4 = scmp.ne.s32.totalorder %s17890_s12, %s14971_s4  ;;  %p14977_p7 = scmp.lt.u32.totalorder %s14971_s4, %s17890_s12 }
 0x6bc   : > { %p14973_p5 = pnand %p14972_p4, %p12975_p3 }
 0x6be   : > { %p14974_p6 = pneg %p14973_p5 }
 0x6c0   : > { %p14979_p8 = pnand %p14977_p7, %p14974_p6 }
 0x6c2   : > { %14982 = shalt.err (!%p14979_p8)
}
 0x6c3   : > { %s14983_s11 = scalar_lea.vmem %s2667_s14, 16  ;;  %s14989_s7 = scalar_lea.vmem %s2667_s14, 32 }
 0x6c4   : > { %p14984_p9 = scmp.ne.s32.totalorder %s2667_s14, %s14983_s11  ;;  %p14990_p12 = scmp.lt.s32.totalorder %s2667_s14, %s2667_s14 }
 0x6c5   : > { %p14991_p13 = scmp.lt.s32.totalorder %s14989_s7, %s14983_s11 }
 0x6c6   : > { %p14985_p10 = pnand %p14984_p9, %p12975_p3 }
 0x6c7   : > { %p14992_p0 = por %p14991_p13, %p14990_p12 }
 0x6c8   : > { %p14986_p11 = pneg %p14985_p10 }
 0x6ca   : > { %p14993_p1 = pnand %p14992_p0, %p14986_p11 }
 0x6cc   : > { %14996 = shalt.err (!%p14993_p1)
}
 0x6cd   : > { %s17891_s6 = sld [smem:[#allocation200_spill]] }
 0x6ce   : > { %12824 = dma.hbm_to_vmem [thread:$0]  (%p12975_p3), %s17890_s12, 16, %s2667_s14, [#allocation89]  }
 0x6d3   : > { %s14997_s8 = scalar_lea.hbm %s17891_s6, 2048 }
 0x6d4   : > { %p14998_p4 = scmp.ne.s32.totalorder %s17891_s6, %s14997_s8  ;;  %p15003_p7 = scmp.lt.u32.totalorder %s14997_s8, %s17891_s6 }
 0x6d6   : > { %p14999_p5 = pnand %p14998_p4, %p12975_p3 }
 0x6d8   : > { %p15000_p6 = pneg %p14999_p5 }
 0x6da   : > { %p15005_p8 = pnand %p15003_p7, %p15000_p6 }
 0x6dc   : > { %15008 = shalt.err (!%p15005_p8)
}
 0x6dd   : > { %s15009_s4 = scalar_lea.vmem %s16619_s9, 2048  ;;  %p15016_p12 = scmp.lt.s32.totalorder %s16619_s9, %s16619_s9 }
 0x6de   : > { %p15010_p9 = scmp.ne.s32.totalorder %s16619_s9, %s15009_s4  ;;  %p15017_p13 = scmp.lt.s32.totalorder %s15009_s4, %s15009_s4 }
 0x6e0   : > { %p15011_p10 = pnand %p15010_p9, %p12975_p3  ;;  %p15018_p0 = por %p15017_p13, %p15016_p12 }
 0x6e2   : > { %p15012_p11 = pneg %p15011_p10 }
 0x6e4   : > { %p15019_p1 = pnand %p15018_p0, %p15012_p11 }
 0x6e6   : > { %15022 = shalt.err (!%p15019_p1)
}
 0x6e7   : > { %s17892_s14 = sld [smem:[#allocation203_spill]]  ;;  %s15421_s11 = smov [#allocation96]  }
 0x6e8   : > { %12828 = dma.hbm_to_vmem [thread:$0]  (%p12975_p3), %s17891_s6, 2048, %s16619_s9, [#allocation92], %s17850_s3, %s17850_s3, %s17849_s2  }
 0x6e9   : > { %s2718_s7 = sshll.u32 %s15421_s11, 4  ;;  %s15422_s8 = smov [#allocation99]   ;;  %s2719_s7 = int_to_ptr.vmem [resolvable:$true] %s2718_s7 }
 0x6ea   : > { %s2740_s5 = sshll.u32 %s15422_s8, 4  ;;  %s16649_s5 = int_to_ptr.vmem [resolvable:$true] %s2740_s5 }
 0x6ed   : > { %s15023_s4 = scalar_lea.hbm %s17892_s14, 16 }
 0x6ee   : > { %p15024_p4 = scmp.ne.s32.totalorder %s17892_s14, %s15023_s4  ;;  %p15029_p7 = scmp.lt.u32.totalorder %s15023_s4, %s17892_s14 }
 0x6f0   : > { %p15025_p5 = pnand %p15024_p4, %p12975_p3 }
 0x6f2   : > { %p15026_p6 = pneg %p15025_p5 }
 0x6f4   : > { %p15031_p8 = pnand %p15029_p7, %p15026_p6 }
 0x6f6   : > { %15034 = shalt.err (!%p15031_p8)
}
 0x6f7   : > { %s15035_s12 = scalar_lea.vmem %s2719_s7, 16  ;;  %s15041_s9 = scalar_lea.vmem %s2719_s7, 32 }
 0x6f8   : > { %p15036_p9 = scmp.ne.s32.totalorder %s2719_s7, %s15035_s12  ;;  %p15042_p12 = scmp.lt.s32.totalorder %s2719_s7, %s2719_s7 }
 0x6f9   : > { %p15043_p13 = scmp.lt.s32.totalorder %s15041_s9, %s15035_s12 }
 0x6fa   : > { %p15037_p10 = pnand %p15036_p9, %p12975_p3 }
 0x6fb   : > { %p15044_p0 = por %p15043_p13, %p15042_p12 }
 0x6fc   : > { %p15038_p11 = pneg %p15037_p10 }
 0x6fe   : > { %p15045_p1 = pnand %p15044_p0, %p15038_p11 }
 0x700   : > { %15048 = shalt.err (!%p15045_p1)
}
 0x701   : > { %s17893_s11 = sld [smem:[#allocation205_spill]] }
 0x702   : > { %12832 = dma.hbm_to_vmem [thread:$0]  (%p12975_p3), %s17892_s14, 16, %s2719_s7, [#allocation95]  }
 0x707   : > { %s15049_s8 = scalar_lea.hbm %s17893_s11, 16 }
 0x708   : > { %p15050_p4 = scmp.ne.s32.totalorder %s17893_s11, %s15049_s8  ;;  %p15055_p7 = scmp.lt.u32.totalorder %s15049_s8, %s17893_s11 }
 0x70a   : > { %p15051_p5 = pnand %p15050_p4, %p12975_p3 }
 0x70c   : > { %p15052_p6 = pneg %p15051_p5 }
 0x70e   : > { %p15057_p8 = pnand %p15055_p7, %p15052_p6 }
 0x710   : > { %15060 = shalt.err (!%p15057_p8)
}
 0x711   : > { %s15061_s12 = scalar_lea.vmem %s16649_s5, 16  ;;  %s15067_s4 = scalar_lea.vmem %s16649_s5, 32 }
 0x712   : > { %p15062_p9 = scmp.ne.s32.totalorder %s16649_s5, %s15061_s12  ;;  %p15068_p12 = scmp.lt.s32.totalorder %s16649_s5, %s16649_s5 }
 0x713   : > { %p15069_p13 = scmp.lt.s32.totalorder %s15067_s4, %s15061_s12 }
 0x714   : > { %p15063_p10 = pnand %p15062_p9, %p12975_p3 }
 0x715   : > { %p15070_p0 = por %p15069_p13, %p15068_p12 }
 0x716   : > { %p15064_p11 = pneg %p15063_p10 }
 0x718   : > { %p15071_p1 = pnand %p15070_p0, %p15064_p11 }
 0x71a   : > { %15074 = shalt.err (!%p15071_p1)
}
 0x71b   : > { %s17894_s7 = sld [smem:[#allocation207_spill]]  ;;  %s15423_s9 = smov [#allocation102]  }
 0x71c   : > { %12836 = dma.hbm_to_vmem [thread:$0]  (%p12975_p3), %s17893_s11, 16, %s16649_s5, [#allocation98]  }
 0x71d   : > { %s2761_s8 = sshll.u32 %s15423_s9, 4  ;;  %s15424_s6 = smov [#allocation103]   ;;  %s2762_s8 = int_to_ptr.vmem [resolvable:$true] %s2761_s8 }
 0x71e   : > { %s2783_s13 = sshll.u32 %s15424_s6, 4  ;;  %s16677_s13 = int_to_ptr.vmem [resolvable:$true] %s2783_s13 }
 0x721   : > { %s15075_s12 = scalar_lea.hbm %s17894_s7, 2048 }
 0x722   : > { %p15076_p4 = scmp.ne.s32.totalorder %s17894_s7, %s15075_s12  ;;  %p15081_p7 = scmp.lt.u32.totalorder %s15075_s12, %s17894_s7 }
 0x724   : > { %p15077_p5 = pnand %p15076_p4, %p12975_p3 }
 0x726   : > { %p15078_p6 = pneg %p15077_p5 }
 0x728   : > { %p15083_p8 = pnand %p15081_p7, %p15078_p6 }
 0x72a   : > { %15086 = shalt.err (!%p15083_p8)
}
 0x72b   : > { %s15087_s4 = scalar_lea.vmem %s2762_s8, 2048  ;;  %p15094_p12 = scmp.lt.s32.totalorder %s2762_s8, %s2762_s8 }
 0x72c   : > { %p15088_p9 = scmp.ne.s32.totalorder %s2762_s8, %s15087_s4  ;;  %p15095_p13 = scmp.lt.s32.totalorder %s15087_s4, %s15087_s4 }
 0x72e   : > { %p15089_p10 = pnand %p15088_p9, %p12975_p3  ;;  %p15096_p0 = por %p15095_p13, %p15094_p12 }
 0x730   : > { %p15090_p11 = pneg %p15089_p10 }
 0x732   : > { %p15097_p1 = pnand %p15096_p0, %p15090_p11 }
 0x734   : > { %15100 = shalt.err (!%p15097_p1)
}
 0x735   : > { %12840 = dma.hbm_to_vmem [thread:$0]  (%p12975_p3), %s17894_s7, 2048, %s2762_s8, [#allocation101], %s17850_s3, %s17850_s3, %s17849_s2  }
 0x736   : > { %s15101_s5 = scalar_lea.hbm %s15832_s22, 2048 }
 0x737   : > { %p15102_p4 = scmp.ne.s32.totalorder %s15832_s22, %s15101_s5  ;;  %p15107_p7 = scmp.lt.u32.totalorder %s15101_s5, %s15832_s22 }
 0x739   : > { %p15103_p5 = pnand %p15102_p4, %p12975_p3 }
 0x73b   : > { %p15104_p6 = pneg %p15103_p5 }
 0x73d   : > { %p15109_p8 = pnand %p15107_p7, %p15104_p6 }
 0x73f   : > { %15112 = shalt.err (!%p15109_p8)
}
 0x740   : > { %s15113_s6 = scalar_lea.vmem %s16677_s13, 2048  ;;  %p15120_p12 = scmp.lt.s32.totalorder %s16677_s13, %s16677_s13 }
 0x741   : > { %p15114_p9 = scmp.ne.s32.totalorder %s16677_s13, %s15113_s6  ;;  %p15121_p13 = scmp.lt.s32.totalorder %s15113_s6, %s15113_s6 }
 0x743   : > { %p15115_p10 = pnand %p15114_p9, %p12975_p3  ;;  %p15122_p0 = por %p15121_p13, %p15120_p12 }
 0x745   : > { %p15116_p11 = pneg %p15115_p10 }
 0x747   : > { %p15123_p1 = pnand %p15122_p0, %p15116_p11 }
 0x749   : > { %15126 = shalt.err (!%p15123_p1)
}
 0x74a   : > { %12842 = dma.hbm_to_vmem [thread:$0]  (%p12975_p3), %s15832_s22, 2048, %s16677_s13, [#allocation104], %s17850_s3, %s17850_s3, %s17849_s2  }
 0x74b PF: > { %2806 = sbr.rel (%p15855_p2) target bundleno = 13540 (0x34e4), region = 348  ;;  %p13041_p4 = scmp.eq.s32.totalorder (!%p15855_p2), %s15851_s10, 0 }
 0x752   : > { %15132 = dma.done.wait (%p13041_p4), [#allocation6], 16  }
 0x753   : > { %15134 = vsyncadd (%p13041_p4), [#allocation6], 4294967280 }
 0x754   : > { %15136 = dma.done.wait (%p13041_p4), [#allocation8], 48  }
 0x755   : > { %15138 = vsyncadd (%p13041_p4), [#allocation8], 4294967248 }
 0x756   : > { %15140 = dma.done.wait (%p13041_p4), [#allocation11], 32  }
 0x757   : > { %15142 = vsyncadd (%p13041_p4), [#allocation11], 4294967264 }
 0x758   : > { %15144 = dma.done.wait (%p13041_p4), [#allocation14], 32  }
 0x759   : > { %15146 = vsyncadd (%p13041_p4), [#allocation14], 4294967264 }
 0x75a   : > { %15148 = dma.done.wait (%p13041_p4), [#allocation17], 4112  }
 0x75b   : > { %15150 = vsyncadd (%p13041_p4), [#allocation17], 4294963184 }
 0x75c   : > { %15152 = dma.done.wait (%p13041_p4), [#allocation20], 16384  }
 0x75d   : > { %15154 = vsyncadd (%p13041_p4), [#allocation20], 4294950912 }
 0x75e   : > { %15156 = dma.done.wait (%p13041_p4), [#allocation23], 48  }
 0x75f   : > { %15158 = vsyncadd (%p13041_p4), [#allocation23], 4294967248 }
 0x760   : > { %15160 = dma.done.wait (%p13041_p4), [#allocation26], 32  }
 0x761   : > { %15162 = vsyncadd (%p13041_p4), [#allocation26], 4294967264 }
 0x762   : > { %15164 = dma.done.wait (%p13041_p4), [#allocation29], 32  }
 0x763   : > { %15166 = vsyncadd (%p13041_p4), [#allocation29], 4294967264 }
 0x764   : > { %15168 = dma.done.wait (%p13041_p4), [#allocation32], 4112  }
 0x765   : > { %15170 = vsyncadd (%p13041_p4), [#allocation32], 4294963184 }
 0x766   : > { %15172 = dma.done.wait (%p13041_p4), [#allocation35], 8192  }
 0x767   : > { %15174 = vsyncadd (%p13041_p4), [#allocation35], 4294959104 }
 0x768   : > { %15176 = dma.done.wait (%p13041_p4), [#allocation38], 14336  }
 0x769   : > { %15178 = vsyncadd (%p13041_p4), [#allocation38], 4294952960 }
 0x76a   : > { %15180 = dma.done.wait (%p13041_p4), [#allocation41], 48  }
 0x76b   : > { %15182 = vsyncadd (%p13041_p4), [#allocation41], 4294967248 }
 0x76c   : > { %15184 = dma.done.wait (%p13041_p4), [#allocation44], 32  }
 0x76d   : > { %15186 = vsyncadd (%p13041_p4), [#allocation44], 4294967264 }
 0x76e   : > { %15188 = dma.done.wait (%p13041_p4), [#allocation47], 32  }
 0x76f   : > { %15190 = vsyncadd (%p13041_p4), [#allocation47], 4294967264 }
 0x770   : > { %15192 = dma.done.wait (%p13041_p4), [#allocation50], 4112  }
 0x771   : > { %15194 = vsyncadd (%p13041_p4), [#allocation50], 4294963184 }
 0x772   : > { %15196 = dma.done.wait (%p13041_p4), [#allocation53], 8192  }
 0x773   : > { %15198 = vsyncadd (%p13041_p4), [#allocation53], 4294959104 }
 0x774   : > { %15200 = dma.done.wait (%p13041_p4), [#allocation56], 12320  }
 0x775   : > { %15202 = vsyncadd (%p13041_p4), [#allocation56], 4294954976 }
 0x776   : > { %15204 = dma.done.wait (%p13041_p4), [#allocation59], 32  }
 0x777   : > { %15206 = vsyncadd (%p13041_p4), [#allocation59], 4294967264 }
 0x778   : > { %15208 = dma.done.wait (%p13041_p4), [#allocation62], 32  }
 0x779   : > { %15210 = vsyncadd (%p13041_p4), [#allocation62], 4294967264 }
 0x77a   : > { %15212 = dma.done.wait (%p13041_p4), [#allocation65], 32  }
 0x77b   : > { %15214 = vsyncadd (%p13041_p4), [#allocation65], 4294967264 }
 0x77c   : > { %15216 = dma.done.wait (%p13041_p4), [#allocation68], 8192  }
 0x77d   : > { %15218 = vsyncadd (%p13041_p4), [#allocation68], 4294959104 }
 0x77e   : > { %15220 = dma.done.wait (%p13041_p4), [#allocation71], 16384  }
 0x77f   : > { %15222 = vsyncadd (%p13041_p4), [#allocation71], 4294950912 }
 0x780   : > { %15224 = dma.done.wait (%p13041_p4), [#allocation74], 32  }
 0x781   : > { %15226 = vsyncadd (%p13041_p4), [#allocation74], 4294967264 }
 0x782   : > { %15228 = dma.done.wait (%p13041_p4), [#allocation77], 32  }
 0x783   : > { %15230 = vsyncadd (%p13041_p4), [#allocation77], 4294967264 }
 0x784   : > { %15232 = dma.done.wait (%p13041_p4), [#allocation80], 32  }
 0x785   : > { %15234 = vsyncadd (%p13041_p4), [#allocation80], 4294967264 }
 0x786   : > { %15236 = dma.done.wait (%p13041_p4), [#allocation83], 2064  }
 0x787   : > { %15238 = vsyncadd (%p13041_p4), [#allocation83], 4294965232 }
 0x788   : > { %15240 = dma.done.wait (%p13041_p4), [#allocation86], 32  }
 0x789   : > { %15242 = vsyncadd (%p13041_p4), [#allocation86], 4294967264 }
 0x78a   : > { %15244 = dma.done.wait (%p13041_p4), [#allocation89], 32  }
 0x78b   : > { %15246 = vsyncadd (%p13041_p4), [#allocation89], 4294967264 }
 0x78c   : > { %15248 = dma.done.wait (%p13041_p4), [#allocation92], 2064  }
 0x78d   : > { %15250 = vsyncadd (%p13041_p4), [#allocation92], 4294965232 }
 0x78e   : > { %15252 = dma.done.wait (%p13041_p4), [#allocation95], 32  }
 0x78f   : > { %15254 = vsyncadd (%p13041_p4), [#allocation95], 4294967264 }
 0x790   : > { %15256 = dma.done.wait (%p13041_p4), [#allocation98], 32  }
 0x791   : > { %15258 = vsyncadd (%p13041_p4), [#allocation98], 4294967264 }
 0x792   : > { %15260 = dma.done.wait (%p13041_p4), [#allocation101], 2064  }
 0x793   : > { %15262 = vsyncadd (%p13041_p4), [#allocation101], 4294965232 }
 0x794   : > { %15264 = dma.done.wait (%p13041_p4), [#allocation104], 2048  }
 0x795   : > { %15266 = vsyncadd (%p13041_p4), [#allocation104], 4294965248  ;;  %s17895_s15 = sld [smem:[#allocation139_spill]]  ;;  %p3247_p2 = scmp.lt.s32.totalorder %s15851_s10, 1  ;;  %v15425_v3 = vmov 0   ;;  %v15426_v4 = vmov 0.0|0.0  }
 0x796   : > { %13275 = vset.pattern.permute.xlu0 %v15425_v3  ;;  %11623 = vmatprep.subr.bf16.mxu0 %v15426_v4  ;;  %v3265_v6 = vld [vmem:[#allocation39] sm:$0xff]  ;;  %v3266_v7 = vld [vmem:[#allocation39 + $0x8] sm:$0xff]  ;;  %v3267_v9 = vld [vmem:[#allocation39 + $0x10] sm:$0xff]  ;;  %vm15427_vm0 = vmmov 0   ;;  %v15428_v11 = vmov 0.0   ;;  %s17896_s13 = sld [smem:[#allocation187_spill]] }
 0x797   : > { %s17909_s10 = smov (!%p3247_p2, %s15851_s10), 1  ;;  %13276 = vset.pattern.permute.xlu1 %v15425_v3  ;;  %v11624_v8 = vpack.c.bf16 %v3266_v7, %v3265_v6  ;;  %v3268_v10 = vld [vmem:[#allocation39 + $0x18] sm:$0xff]  ;;  %11172 = vmatprep.mubr.msk.f32.mxu0 %vm15427_vm0, %v15428_v11  ;;  %v3269_v13 = vld [vmem:[#allocation39 + $0x20] sm:$0xff]  ;;  %v3270_v14 = vld [vmem:[#allocation39 + $0x28] sm:$0xff]  ;;  %s17897_s9 = sld [smem:[#allocation163_spill]]  ;;  %vm3764_vm2 = vcmask 64512  }
 0x798   : > { %s10496_s2 = sshll.u32 %s17909_s10, 3  ;;  %3544 = vmatprep.mubr.f32.mxu1 %v15428_v11  ;;  %v11627_v12 = vpack.c.bf16 %v3268_v10, %v3267_v9  ;;  %v3353_v15 = vld [vmem:[#allocation55 + $0x8] sm:$0xff]  ;;  %v3359_v16 = vld [vmem:[#allocation55 + $0x38] sm:$0xff]  ;;  %v3352_v17 = vld [vmem:[#allocation55] sm:$0xff]  ;;  %v11630_v19 = vpack.c.bf16 %v3270_v14, %v3269_v13  ;;  %s17898_s8 = sld [smem:[#allocation175_spill]]  ;;  %vm6633_vm4 = vcmask 7168  }
 0x799   : > { %11625 = vmatpush3.bf16.msra.mxu0 %v11624_v8  ;;  %v3358_v18 = vld [vmem:[#allocation55 + $0x30] sm:$0xff]  ;;  %v3271_v20 = vld [vmem:[#allocation39 + $0x30] sm:$0xff]  ;;  %v11647_v21 = vpack.c.bf16 %v3359_v16, %v3353_v15  ;;  %v3371_v25 = vld [vmem:[#allocation55 + $0x98] sm:$0xff]  ;;  %s17899_s12 = sld [smem:[#allocation210_spill]]  ;;  %s17900_s4 = sld [smem:[#allocation209_spill]]  ;;  %vm7155_vm9 = vcmask 261120  }
 0x79a   : > { %11626 = vmatprep.subr.bf16.mxu0 %v15426_v4  ;;  %v11649_v22 = vpack.c.bf16 %v3358_v18, %v3352_v17  ;;  %v3272_v23 = vld [vmem:[#allocation39 + $0x38] sm:$0xff]  ;;  %v3364_v27 = vld [vmem:[#allocation55 + $0x60] sm:$0xff]  ;;  %v3383_v32 = vld [vmem:[#allocation55 + $0xf8] sm:$0xff]  ;;  %s17901_s5 = sld [smem:[#allocation194_spill]]  ;;  %s17902_s6 = sld [smem:[#allocation201_spill]] }
 0x79b   : > { %s3250_s3 = scalar_lea.vmem %s17895_s15, %s10496_s2  ;;  %v3365_v24 = vld [vmem:[#allocation55 + $0x68] sm:$0xff]  ;;  %11648 = vmatprep.subr.bf16.mxu1 %v11647_v21  ;;  %v3370_v28 = vld [vmem:[#allocation55 + $0x90] sm:$0xff]  ;;  %v11633_v30 = vpack.c.bf16 %v3272_v23, %v3271_v20  ;;  %v3376_v33 = vld [vmem:[#allocation55 + $0xc0] sm:$0xff]  ;;  %v3257_v21 = vlaneseq  ;;  %s17903_s15 = sld [smem:[#allocation208_spill]] }
 0x79c   : > { %v3256_v5 = vld [vmem:[%s3250_s3] sm:$0xff]  ;;  %v11651_v26 = vpack.c.bf16 %v3371_v25, %v3365_v24  ;;  %11650 = vmatpush1.bf16.msra.mxu1 %v11649_v22  ;;  %v11653_v29 = vpack.c.bf16 %v3370_v28, %v3364_v27  ;;  %v3377_v31 = vld [vmem:[#allocation55 + $0xc8] sm:$0xff]  ;;  %v3274_v35 = vld [vmem:[#allocation39 + $0x48] sm:$0xff]  ;;  %s17904_s2 = sld [smem:[#allocation186_spill]]  ;;  %s17905_s3 = sld [smem:[#allocation143_spill]] }
 0x79d   : > { %3260 = vperm.xlu0 %13275, %v3256_v5   ;;  %11628 = vmatpush3.bf16.msra.mxu0 %v11627_v12  ;;  %v3273_v34 = vld [vmem:[#allocation39 + $0x40] sm:$0xff]  ;;  %v11655_v36 = vpack.c.bf16 %v3383_v32, %v3377_v31  ;;  %v3389_v38 = vld [vmem:[#allocation55 + $0x128] sm:$0xff]  ;;  %v3388_v44 = vld [vmem:[#allocation55 + $0x120] sm:$0xff]  ;;  %v16869_v24 = vand.u32 127, %v3257_v21 }
 0x79e   : > { %11629 = vmatprep.subr.bf16.mxu0 %v15426_v4  ;;  %11652 = vmatprep.subr.bf16.mxu1 %v11651_v26  ;;  %v3382_v37 = vld [vmem:[#allocation55 + $0xf0] sm:$0xff]  ;;  %v3395_v40 = vld [vmem:[#allocation55 + $0x158] sm:$0xff]  ;;  %v11636_v41 = vpack.c.bf16 %v3274_v35, %v3273_v34  ;;  %v3275_v42 = vld [vmem:[#allocation39 + $0x50] sm:$0xff]  ;;  %v15429_v34 = vmov 1.0  }
 0x79f   : > { %v11657_v39 = vpack.c.bf16 %v3382_v37, %v3376_v33  ;;  %v11659_v43 = vpack.c.bf16 %v3395_v40, %v3389_v38  ;;  %v3394_v45 = vld [vmem:[#allocation55 + $0x150] sm:$0xff]  ;;  %v3401_v47 = vld [vmem:[#allocation55 + $0x188] sm:$0xff]  ;;  %v3407_v48 = vld [vmem:[#allocation55 + $0x1b8] sm:$0xff] }
 0x7a0   : > { %11654 = vmatpush1.bf16.msra.mxu1 %v11653_v29  ;;  %v3276_v46 = vld [vmem:[#allocation39 + $0x58] sm:$0xff]  ;;  %v11661_v49 = vpack.c.bf16 %v3394_v45, %v3388_v44  ;;  %v3277_v51 = vld [vmem:[#allocation39 + $0x60] sm:$0xff]  ;;  %v11663_v52 = vpack.c.bf16 %v3407_v48, %v3401_v47  ;;  %v3400_v53 = vld [vmem:[#allocation55 + $0x180] sm:$0xff] }
 0x7a1   : > { %11631 = vmatpush3.bf16.msra.mxu0 %v11630_v19  ;;  %11656 = vmatprep.subr.bf16.mxu1 %v11655_v36  ;;  %v11639_v50 = vpack.c.bf16 %v3276_v46, %v3275_v42  ;;  %v3406_v54 = vld [vmem:[#allocation55 + $0x1b0] sm:$0xff]  ;;  %v3278_v55 = vld [vmem:[#allocation39 + $0x68] sm:$0xff]  ;;  %v3413_v56 = vld [vmem:[#allocation55 + $0x1e8] sm:$0xff] }
 0x7a2   : > { %11632 = vmatprep.subr.bf16.mxu0 %v15426_v4  ;;  %v3419_v57 = vld [vmem:[#allocation55 + $0x218] sm:$0xff]  ;;  %v11665_v58 = vpack.c.bf16 %v3406_v54, %v3400_v53  ;;  %v11642_v59 = vpack.c.bf16 %v3278_v55, %v3277_v51  ;;  %v3279_v60 = vld [vmem:[#allocation39 + $0x70] sm:$0xff]  ;;  %v3418_v63 = vld [vmem:[#allocation55 + $0x210] sm:$0xff] }
 0x7a3   : > { %v11667_v61 = vpack.c.bf16 %v3419_v57, %v3413_v56  ;;  %v3412_v62 = vld [vmem:[#allocation55 + $0x1e0] sm:$0xff]  ;;  %v3280_v0 = vld [vmem:[#allocation39 + $0x78] sm:$0xff]  ;;  %v3431_v2 = vld [vmem:[#allocation55 + $0x278] sm:$0xff] }
 0x7a4   : > { %11658 = vmatpush1.bf16.msra.mxu1 %v11657_v39  ;;  %v3425_v1 = vld [vmem:[#allocation55 + $0x248] sm:$0xff]  ;;  %v3355_v5 = vld [vmem:[#allocation55 + $0x18] sm:$0xff]  ;;  %v11669_v7 = vpack.c.bf16 %v3418_v63, %v3412_v62  ;;  %v11645_v8 = vpack.c.bf16 %v3280_v0, %v3279_v60  ;;  %v3424_v10 = vld [vmem:[#allocation55 + $0x240] sm:$0xff] }
 0x7a5   : > { %11634 = vmatpush3.bf16.msra.mxu0 %v11633_v30  ;;  %11660 = vmatprep.subr.bf16.mxu1 %v11659_v43  ;;  %v3361_v6 = vld [vmem:[#allocation55 + $0x48] sm:$0xff]  ;;  %v11671_v9 = vpack.c.bf16 %v3431_v2, %v3425_v1  ;;  %v3430_v12 = vld [vmem:[#allocation55 + $0x270] sm:$0xff]  ;;  %v3443_v15 = vld [vmem:[#allocation55 + $0x2d8] sm:$0xff] }
 0x7a6   : > { %11635 = vmatprep.subr.bf16.mxu0 %v15426_v4  ;;  %v11679_v13 = vpack.c.bf16 %v3361_v6, %v3355_v5  ;;  %v3437_v14 = vld [vmem:[#allocation55 + $0x2a8] sm:$0xff]  ;;  %v11673_v16 = vpack.c.bf16 %v3430_v12, %v3424_v10  ;;  %v3436_v18 = vld [vmem:[#allocation55 + $0x2a0] sm:$0xff]  ;;  %v3442_v19 = vld [vmem:[#allocation55 + $0x2d0] sm:$0xff] }
 0x7a7   : > { %v11675_v17 = vpack.c.bf16 %v3443_v15, %v3437_v14  ;;  %v11677_v20 = vpack.c.bf16 %v3442_v19, %v3436_v18  ;;  %v3354_v22 = vld [vmem:[#allocation55 + $0x10] sm:$0xff]  ;;  %v3360_v23 = vld [vmem:[#allocation55 + $0x40] sm:$0xff]  ;;  %v3367_v25 = vld [vmem:[#allocation55 + $0x78] sm:$0xff] }
 0x7a8   : > { %11662 = vmatpush1.bf16.msra.mxu1 %v11661_v49  ;;  %v3373_v26 = vld [vmem:[#allocation55 + $0xa8] sm:$0xff]  ;;  %v11681_v27 = vpack.c.bf16 %v3360_v23, %v3354_v22  ;;  %v3366_v30 = vld [vmem:[#allocation55 + $0x70] sm:$0xff]  ;;  %v3372_v31 = vld [vmem:[#allocation55 + $0xa0] sm:$0xff] }
 0x7a9   : > { %11637 = vmatpush3.bf16.msra.mxu0 %v11636_v41  ;;  %11664 = vmatprep.subr.bf16.mxu1 %v11663_v52  ;;  %v11683_v29 = vpack.c.bf16 %v3373_v26, %v3367_v25  ;;  %v3379_v32 = vld [vmem:[#allocation55 + $0xd8] sm:$0xff]  ;;  %v3385_v33 = vld [vmem:[#allocation55 + $0x108] sm:$0xff]  ;;  %v11685_v35 = vpack.c.bf16 %v3372_v31, %v3366_v30  ;;  %v3378_v37 = vld [vmem:[#allocation55 + $0xd0] sm:$0xff] }
 0x7aa   : > { %11638 = vmatprep.subr.bf16.mxu0 %v15426_v4  ;;  %v11687_v36 = vpack.c.bf16 %v3385_v33, %v3379_v32  ;;  %v3384_v38 = vld [vmem:[#allocation55 + $0x100] sm:$0xff]  ;;  %v3391_v39 = vld [vmem:[#allocation55 + $0x138] sm:$0xff]  ;;  %v3397_v40 = vld [vmem:[#allocation55 + $0x168] sm:$0xff] }
 0x7ab   : > { %v11689_v41 = vpack.c.bf16 %v3384_v38, %v3378_v37  ;;  %v11691_v42 = vpack.c.bf16 %v3397_v40, %v3391_v39  ;;  %v3390_v43 = vld [vmem:[#allocation55 + $0x130] sm:$0xff]  ;;  %v3396_v44 = vld [vmem:[#allocation55 + $0x160] sm:$0xff]  ;;  %v3403_v45 = vld [vmem:[#allocation55 + $0x198] sm:$0xff] }
 0x7ac   : > { %11666 = vmatpush1.bf16.msra.mxu1 %v11665_v58  ;;  %v3409_v46 = vld [vmem:[#allocation55 + $0x1c8] sm:$0xff]  ;;  %v11693_v47 = vpack.c.bf16 %v3396_v44, %v3390_v43  ;;  %v3402_v49 = vld [vmem:[#allocation55 + $0x190] sm:$0xff]  ;;  %v3415_v51 = vld [vmem:[#allocation55 + $0x1f8] sm:$0xff] }
 0x7ad   : > { %11640 = vmatpush3.bf16.msra.mxu0 %v11639_v50  ;;  %11668 = vmatprep.subr.bf16.mxu1 %v11667_v61  ;;  %v11695_v48 = vpack.c.bf16 %v3409_v46, %v3403_v45  ;;  %v3408_v50 = vld [vmem:[#allocation55 + $0x1c0] sm:$0xff]  ;;  %v3421_v52 = vld [vmem:[#allocation55 + $0x228] sm:$0xff]  ;;  %v3414_v55 = vld [vmem:[#allocation55 + $0x1f0] sm:$0xff] }
 0x7ae   : > { %11641 = vmatprep.subr.bf16.mxu0 %v15426_v4  ;;  %v11697_v53 = vpack.c.bf16 %v3408_v50, %v3402_v49  ;;  %v11699_v54 = vpack.c.bf16 %v3421_v52, %v3415_v51  ;;  %v3420_v56 = vld [vmem:[#allocation55 + $0x220] sm:$0xff]  ;;  %v3427_v57 = vld [vmem:[#allocation55 + $0x258] sm:$0xff]  ;;  %v3433_v58 = vld [vmem:[#allocation55 + $0x288] sm:$0xff] }
 0x7af   : > { %v11703_v60 = vpack.c.bf16 %v3433_v58, %v3427_v57  ;;  %v3426_v61 = vld [vmem:[#allocation55 + $0x250] sm:$0xff]  ;;  %v3432_v62 = vld [vmem:[#allocation55 + $0x280] sm:$0xff]  ;;  %v3439_v63 = vld [vmem:[#allocation55 + $0x2b8] sm:$0xff] }
 0x7b0   : > { %11670 = vmatpush1.bf16.msra.mxu1 %v11669_v7  ;;  %v3445_v0 = vld [vmem:[#allocation55 + $0x2e8] sm:$0xff]  ;;  %v11705_v1 = vpack.c.bf16 %v3432_v62, %v3426_v61  ;;  %v3438_v5 = vld [vmem:[#allocation55 + $0x2b0] sm:$0xff]  ;;  %v3444_v6 = vld [vmem:[#allocation55 + $0x2e0] sm:$0xff] }
 0x7b1   : > { %11643 = vmatpush3.bf16.msra.mxu0 %v11642_v59  ;;  %11672 = vmatprep.subr.bf16.mxu1 %v11671_v9  ;;  %v11701_v59 = vpack.c.bf16 %v3420_v56, %v3414_v55  ;;  %v11707_v2 = vpack.c.bf16 %v3445_v0, %v3439_v63  ;;  %v11709_v7 = vpack.c.bf16 %v3444_v6, %v3438_v5  ;;  %v3363_v9 = vld [vmem:[#allocation55 + $0x58] sm:$0xff]  ;;  %v3356_v12 = vld [vmem:[#allocation55 + $0x20] sm:$0xff]  ;;  %v3369_v15 = vld [vmem:[#allocation55 + $0x88] sm:$0xff]  ;;  %v16887_v63 = vshrl.u32 %v3257_v21, 7 }
 0x7b2   : > { %11644 = vmatprep.subr.bf16.mxu0 %v15426_v4  ;;  %v3281_v14 = vld [vmem:[%s17896_s13] sm:$0xff]  ;;  %v3368_v23 = vld [vmem:[#allocation55 + $0x80] sm:$0xff]  ;;  %v3381_v26 = vld [vmem:[#allocation55 + $0xe8] sm:$0xff]  ;;  %s17906_s13 = sld [smem:[#allocation148_spill]] }
 0x7b3   : > { %v3374_v25 = vld [vmem:[#allocation55 + $0xb0] sm:$0xff]  ;;  %v3380_v30 = vld [vmem:[#allocation55 + $0xe0] sm:$0xff]  ;;  %v3393_v32 = vld [vmem:[#allocation55 + $0x148] sm:$0xff]  ;;  %v16890_v0 = vsub.s32 2, %v16887_v63  ;;  %v16899_v5 = vsub.s32 0, %v16887_v63  ;;  %vm6407_vm3 = vcmp.le.s32.totalorder %v16869_v24, %v16887_v63 }
 0x7b4   : > { %11674 = vmatpush1.bf16.msra.mxu1 %v11673_v16  ;;  %v3375_v16 = vld [vmem:[#allocation55 + $0xb8] sm:$0xff]  ;;  %v3386_v31 = vld [vmem:[#allocation55 + $0x110] sm:$0xff]  ;;  %v3405_v38 = vld [vmem:[#allocation55 + $0x1a8] sm:$0xff] }
 0x7b5   : > { %11646 = vmatpush3.bf16.msra.mxu0 %v11645_v8  ;;  %11676 = vmatprep.subr.bf16.mxu1 %v11675_v17  ;;  %v3357_v8 = vld [vmem:[#allocation55 + $0x28] sm:$0xff]  ;;  %v11715_v22 = vpack.c.bf16 %v3375_v16, %v3369_v15  ;;  %v3399_v33 = vld [vmem:[#allocation55 + $0x178] sm:$0xff]  ;;  %v3398_v37 = vld [vmem:[#allocation55 + $0x170] sm:$0xff] }
 0x7b6   : > { %11680 = vmatprep.subr.bf16.mxu0 %v11679_v13  ;;  %v11711_v10 = vpack.c.bf16 %v3363_v9, %v3357_v8  ;;  %v3362_v13 = vld [vmem:[#allocation55 + $0x50] sm:$0xff]  ;;  %v3411_v39 = vld [vmem:[#allocation55 + $0x1d8] sm:$0xff]  ;;  %v3417_v44 = vld [vmem:[#allocation55 + $0x208] sm:$0xff] }
 0x7b7   : > { %v11713_v18 = vpack.c.bf16 %v3362_v13, %v3356_v12  ;;  %v3410_v43 = vld [vmem:[#allocation55 + $0x1d0] sm:$0xff]  ;;  %v3423_v45 = vld [vmem:[#allocation55 + $0x238] sm:$0xff]  ;;  %v3429_v50 = vld [vmem:[#allocation55 + $0x268] sm:$0xff] }
 0x7b8   : > { %11678 = vmatpush1.bf16.msra.mxu1 %v11677_v20  ;;  %v3422_v49 = vld [vmem:[#allocation55 + $0x230] sm:$0xff]  ;;  %v3435_v51 = vld [vmem:[#allocation55 + $0x298] sm:$0xff]  ;;  %v3441_v56 = vld [vmem:[#allocation55 + $0x2c8] sm:$0xff] }
 0x7b9   : > { %11712 = vmatprep.subr.bf16.mxu1 %v11711_v10  ;;  %v3434_v55 = vld [vmem:[#allocation55 + $0x290] sm:$0xff]  ;;  %v3447_v57 = vld [vmem:[#allocation55 + $0x2f8] sm:$0xff] }
 0x7ba   : > { %v3446_v61 = vld [vmem:[#allocation55 + $0x2f0] sm:$0xff] }
 0x81c   : > { %v3261_v28 = vpop.permute.xlu0 %3260 }
 0x81d   : > { %vm3262_vm1 = vcmp.eq.s32.totalorder %v16869_v24, %v3261_v28  ;;  %v11717_v28 = vpack.c.bf16 %v3374_v25, %v3368_v23 }
 0x81e   : > { %11173 = vmatmul.mubr.msk.f32.vlgmr.msra.gmra.mrb[0].mxu0 %vm3262_vm1, %v15429_v34  ;;  %v11721_v34 = vpack.c.bf16 %v3386_v31, %v3380_v30 }
 0x81f   : > { %11682 = vmatpush1.bf16.msra.mxu0 %v11681_v27  ;;  %3615 = vmatprep.mubr.f32.mxu0 %v15428_v11  ;;  %v3387_v27 = vld [vmem:[#allocation55 + $0x118] sm:$0xff] }
 0x820   : > { %11684 = vmatprep.subr.bf16.mxu0 %v11683_v29  ;;  %v11719_v29 = vpack.c.bf16 %v3387_v27, %v3381_v26 }
 0x823   : > { %11686 = vmatpush1.bf16.msra.mxu0 %v11685_v35  ;;  %v11723_v35 = vpack.c.bf16 %v3399_v33, %v3393_v32 }
 0x824   : > { %11688 = vmatprep.subr.bf16.mxu0 %v11687_v36  ;;  %v3392_v36 = vld [vmem:[#allocation55 + $0x140] sm:$0xff] }
 0x825   : > { %v11725_v40 = vpack.c.bf16 %v3398_v37, %v3392_v36 }
 0x827   : > { %11690 = vmatpush1.bf16.msra.mxu0 %v11689_v41  ;;  %v11727_v41 = vpack.c.bf16 %v3411_v39, %v3405_v38 }
 0x828   : > { %11692 = vmatprep.subr.bf16.mxu0 %v11691_v42  ;;  %v3404_v42 = vld [vmem:[#allocation55 + $0x1a0] sm:$0xff] }
 0x829   : > { %v11729_v46 = vpack.c.bf16 %v3410_v43, %v3404_v42 }
 0x82b   : > { %11694 = vmatpush1.bf16.msra.mxu0 %v11693_v47  ;;  %v11731_v47 = vpack.c.bf16 %v3423_v45, %v3417_v44  ;;  %v4020_v45 = vld [vmem:[#allocation54 + $0x80] sm:$0xff] }
 0x82c   : > { %11696 = vmatprep.subr.bf16.mxu0 %v11695_v48  ;;  %v3416_v48 = vld [vmem:[#allocation55 + $0x200] sm:$0xff] }
 0x82d   : > { %v11733_v52 = vpack.c.bf16 %v3422_v49, %v3416_v48  ;;  %v4005_v49 = vld [vmem:[#allocation54 + $0x8] sm:$0xff] }
 0x82f   : > { %11698 = vmatpush1.bf16.msra.mxu0 %v11697_v53  ;;  %v11735_v53 = vpack.c.bf16 %v3435_v51, %v3429_v50  ;;  %v4022_v50 = vld [vmem:[#allocation54 + $0x90] sm:$0xff]  ;;  %v4023_v51 = vld [vmem:[#allocation54 + $0x98] sm:$0xff] }
 0x830   : > { %11700 = vmatprep.subr.bf16.mxu0 %v11699_v54  ;;  %v3428_v54 = vld [vmem:[#allocation55 + $0x260] sm:$0xff] }
 0x831   : > { %v11737_v58 = vpack.c.bf16 %v3434_v55, %v3428_v54  ;;  %v4006_v54 = vld [vmem:[#allocation54 + $0x10] sm:$0xff]  ;;  %v4007_v55 = vld [vmem:[#allocation54 + $0x18] sm:$0xff] }
 0x833   : > { %11702 = vmatpush1.bf16.msra.mxu0 %v11701_v59  ;;  %v11739_v59 = vpack.c.bf16 %v3447_v57, %v3441_v56  ;;  %v4024_v56 = vld [vmem:[#allocation54 + $0xa0] sm:$0xff]  ;;  %v4025_v57 = vld [vmem:[#allocation54 + $0xa8] sm:$0xff] }
 0x834   : > { %11704 = vmatprep.subr.bf16.mxu0 %v11703_v60  ;;  %v3440_v60 = vld [vmem:[#allocation55 + $0x2c0] sm:$0xff] }
 0x835   : > { %v11741_v62 = vpack.c.bf16 %v3446_v61, %v3440_v60  ;;  %v4008_v60 = vld [vmem:[#allocation54 + $0x20] sm:$0xff]  ;;  %v4009_v61 = vld [vmem:[#allocation54 + $0x28] sm:$0xff] }
 0x837   : > { %11706 = vmatpush1.bf16.msra.mxu0 %v11705_v1  ;;  %v16893_v1 = vld [vmem:[%s17897_s9] sm:$0x3f]  ;;  %s17907_s9 = sld [smem:[#allocation153_spill]] }
 0x838   : > { %11708 = vmatprep.subr.bf16.mxu0 %v11707_v2  ;;  %v16896_v2 = vsub.s32 3, %v16887_v63  ;;  %v3461_v6 = vrot.slane %v16893_v1, %v16890_v0  ;;  %v3453_v8 = vrot.slane %v16893_v1, %v16899_v5 }
 0x83a   : > { %v3465_v21 = vrot.slane %v16893_v1, %v16896_v2 }
 0x83b   : > { %11710 = vmatpush1.bf16.msra.mxu0 %v11709_v7  ;;  %v16904_v7 = vsub.s32 1, %v16887_v63 }
 0x83c   : > { %11185 = vmatprep.subr.mxu0 %v15428_v11 }
 0x83d   : > { %v3457_v13 = vrot.slane %v16893_v1, %v16904_v7 }
 0x8f1   : > { %v3348_v17 = vpop.f32.mrb[0].mxu0 }
 0x8f2   : > { %v16875_v19 = vadd.f32 %v3348_v17, %v3281_v14  ;;  %v11174_v20 = vpop.f32.mrb[1].mxu0 }
 0x8f3   : > { %v16916_v20 = vsub.s32 4, %v16887_v63 }
 0x8f4   : > { %3545 = vmatmul.mubr.f32.vlgmr.msra.gmra.mrb[0].mxu1 %v16875_v19  ;;  %3616 = vmatmul.mubr.f32.vlgmr.msra.gmra.mrb[2].mxu0 %v16875_v19 }
 0x8f5   : > { %11714 = vmatpush1.bf16.msra.mxu1 %v11713_v18  ;;  %3686 = vmatprep.mubr.f32.mxu1 %v15428_v11 }
 0x8f6   : > { %11716 = vmatprep.subr.bf16.mxu1 %v11715_v22  ;;  %11187 = vmatprep.mubr.msk.f32.mxu0 %vm15427_vm0, %v15428_v11  ;;  %v3469_v22 = vrot.slane %v16893_v1, %v16916_v20 }
 0x8f9   : > { %11718 = vmatpush1.bf16.msra.mxu1 %v11717_v28 }
 0x8fa   : > { %11720 = vmatprep.subr.bf16.mxu1 %v11719_v29 }
 0x8fd   : > { %11722 = vmatpush1.bf16.msra.mxu1 %v11721_v34 }
 0x8fe   : > { %11724 = vmatprep.subr.bf16.mxu1 %v11723_v35 }
 0x901   : > { %11726 = vmatpush1.bf16.msra.mxu1 %v11725_v40 }
 0x902   : > { %11728 = vmatprep.subr.bf16.mxu1 %v11727_v41 }
 0x905   : > { %11730 = vmatpush1.bf16.msra.mxu1 %v11729_v46  ;;  %v4021_v46 = vld [vmem:[#allocation54 + $0x88] sm:$0xff] }
 0x906   : > { %11732 = vmatprep.subr.bf16.mxu1 %v11731_v47  ;;  %v4004_v47 = vld [vmem:[#allocation54] sm:$0xff]  ;;  %v11743_v48 = vpack.c.bf16 %v4021_v46, %v4020_v45 }
 0x909   : > { %11734 = vmatpush1.bf16.msra.mxu1 %v11733_v52  ;;  %v11745_v52 = vpack.c.bf16 %v4005_v49, %v4004_v47  ;;  %v4034_v47 = vld [vmem:[#allocation54 + $0xf0] sm:$0xff] }
 0x90a   : > { %11736 = vmatprep.subr.bf16.mxu1 %v11735_v53  ;;  %v11747_v53 = vpack.c.bf16 %v4023_v51, %v4022_v50  ;;  %v4018_v49 = vld [vmem:[#allocation54 + $0x70] sm:$0xff] }
 0x90d   : > { %11738 = vmatpush1.bf16.msra.mxu1 %v11737_v58  ;;  %v11749_v58 = vpack.c.bf16 %v4007_v55, %v4006_v54 }
 0x90e   : > { %11740 = vmatprep.subr.bf16.mxu1 %v11739_v59  ;;  %v11751_v59 = vpack.c.bf16 %v4025_v57, %v4024_v56 }
 0x911   : > { %11742 = vmatpush1.bf16.msra.mxu1 %v11741_v62  ;;  %v4026_v62 = vld [vmem:[#allocation54 + $0xb0] sm:$0xff] }
 0x912   : > { %11175 = vmatprep.subr.mxu1 %v15428_v11 }
 0x914   : > { %3687 = vmatmul.mubr.f32.vlgmr.msra.gmra.mrb[2].mxu1 %v16875_v19 }
 0x915   : > { %11177 = vmatprep.mubr.msk.f32.mxu1 %vm15427_vm0, %v15428_v11 }
 0x9c7   : > { %v3546_v9 = vpop.f32.mrb[0].mxu1  ;;  %v3617_v10 = vpop.f32.mrb[2].mxu0 }
 0x9c8   : > { %v3618_v12 = vadd.f32 %v3617_v10, %v3461_v6  ;;  %v3548_v14 = vpop.f32.mrb[1].mxu1  ;;  %v3619_v15 = vpop.f32.mrb[3].mxu0  ;;  %v3547_v17 = vadd.f32 %v3546_v9, %v3453_v8  ;;  %v4027_v6 = vld [vmem:[#allocation54 + $0xb8] sm:$0xff]  ;;  %v4010_v9 = vld [vmem:[#allocation54 + $0x30] sm:$0xff] }
 0x9c9   : > { %v3620_v16 = vadd.f32 %v3619_v15, %v3465_v21  ;;  %v3549_v18 = vadd.f32 %v3548_v14, %v3457_v13  ;;  %v11753_v21 = vpack.c.bf16 %v4009_v61, %v4008_v60  ;;  %v11755_v8 = vpack.c.bf16 %v4027_v6, %v4026_v62  ;;  %v4011_v10 = vld [vmem:[#allocation54 + $0x38] sm:$0xff]  ;;  %v4029_v13 = vld [vmem:[#allocation54 + $0xc8] sm:$0xff]  ;;  %v4142_v61 = vld [vmem:[#allocation51] sm:$0xff] }
 0x9ca   : > { %11176 = vmatpush3.xpose.msra.mxu1 %v3618_v12  ;;  %v4028_v12 = vld [vmem:[#allocation54 + $0xc0] sm:$0xff]  ;;  %v11757_v14 = vpack.c.bf16 %v4011_v10, %v4010_v9  ;;  %v4145_v60 = vld [vmem:[#allocation51 + $0x18] sm:$0xff]  ;;  %v4144_v6 = vld [vmem:[#allocation51 + $0x10] sm:$0xff] }
 0x9cb   : > { %11186 = vmatpush3.xpose.msra.mxu0 %v3620_v16  ;;  %11180 = vmatprep.subr.mxu1 %v15428_v11  ;;  %v11759_v15 = vpack.c.bf16 %v4029_v13, %v4028_v12  ;;  %v4012_v16 = vld [vmem:[#allocation54 + $0x40] sm:$0xff]  ;;  %v11777_v9 = vpack.c.bf16 %v4144_v6, %v4142_v61  ;;  %v4148_v13 = vld [vmem:[#allocation51 + $0x30] sm:$0xff] }
 0x9cc   : > { %11744 = vmatprep.subr.bf16.mxu0 %v11743_v48  ;;  %v4146_v12 = vld [vmem:[#allocation51 + $0x20] sm:$0xff]  ;;  %v4277_v6 = vld [vmem:[#allocation52 + $0x90] sm:$0xff] }
 0x9cd   : > { %11178 = vmatmul.mubr.f32.vlgmr.msra.gmra.mrb[4].mxu1 %v3547_v17  ;;  %v4013_v17 = vld [vmem:[#allocation54 + $0x48] sm:$0xff] }
 0x9ce   : > { %11188 = vmatmul.mubr.f32.vlgmr.msra.gmra.mrb[4].mxu0 %v3549_v18  ;;  %11182 = vmatprep.mubr.msk.f32.mxu1 %vm15427_vm0, %v15428_v11  ;;  %v4030_v18 = vld [vmem:[#allocation54 + $0xd0] sm:$0xff] }
 0x9cf   : > { %11746 = vmatpush3.bf16.msra.mxu0 %v11745_v52 }
 0x9d0   : > { %11748 = vmatprep.subr.bf16.mxu0 %v11747_v53 }
 0x9d3   : > { %11750 = vmatpush3.bf16.msra.mxu0 %v11749_v58 }
 0x9d4   : > { %11752 = vmatprep.subr.bf16.mxu0 %v11751_v59  ;;  %v4143_v59 = vld [vmem:[#allocation51 + $0x8] sm:$0xff] }
 0x9d5   : > { %v11775_v62 = vpack.c.bf16 %v4145_v60, %v4143_v59  ;;  %v4276_v59 = vld [vmem:[#allocation52 + $0x88] sm:$0xff]  ;;  %v4259_v60 = vld [vmem:[#allocation52] sm:$0xff] }
 0x9d7   : > { %11754 = vmatpush3.bf16.msra.mxu0 %v11753_v21  ;;  %v4147_v21 = vld [vmem:[#allocation51 + $0x28] sm:$0xff] }
 0x9d8   : > { %11756 = vmatprep.subr.bf16.mxu0 %v11755_v8  ;;  %v4149_v8 = vld [vmem:[#allocation51 + $0x38] sm:$0xff] }
 0x9d9   : > { %v11779_v10 = vpack.c.bf16 %v4149_v8, %v4147_v21  ;;  %v4278_v21 = vld [vmem:[#allocation52 + $0x98] sm:$0xff] }
 0x9db   : > { %11758 = vmatpush3.bf16.msra.mxu0 %v11757_v14  ;;  %v4151_v14 = vld [vmem:[#allocation51 + $0x48] sm:$0xff] }
 0x9dc   : > { %11760 = vmatprep.subr.bf16.mxu0 %v11759_v15  ;;  %v4153_v15 = vld [vmem:[#allocation51 + $0x58] sm:$0xff] }
 0x9e7   : > { %v3688_v23 = vpop.f32.mrb[2].mxu1 }
 0x9e8   : > { %v3689_v25 = vadd.f32 %v3688_v23, %v3469_v22  ;;  %v16920_v26 = vpop.f32.mrb[3].mxu1  ;;  %v4031_v22 = vld [vmem:[#allocation54 + $0xd8] sm:$0xff]  ;;  %v11761_v23 = vpack.c.bf16 %v4013_v17, %v4012_v16  ;;  %v11781_v16 = vpack.c.bf16 %v4148_v13, %v4146_v12  ;;  %v11783_v17 = vpack.c.bf16 %v4153_v15, %v4151_v14  ;;  %v4279_v13 = vld [vmem:[#allocation52 + $0xa0] sm:$0xff]  ;;  %v4280_v14 = vld [vmem:[#allocation52 + $0xa8] sm:$0xff] }
 0x9e9   : > { %v4262_v12 = vld [vmem:[#allocation52 + $0x18] sm:$0xff] }
 0x9ea   : > { %11181 = vmatpush3.msra.mxu1 %v3689_v25  ;;  %v11763_v25 = vpack.c.bf16 %v4031_v22, %v4030_v18  ;;  %11762 = vmatpush3.bf16.msra.mxu0 %v11761_v23  ;;  %v4152_v18 = vld [vmem:[#allocation51 + $0x50] sm:$0xff] }
 0x9eb   : > { %11190 = vmatprep.subr.mxu1 %v15428_v11 }
 0x9ec   : > { %11764 = vmatprep.subr.bf16.mxu0 %v11763_v25 }
 0xaa0   : > { %v3759_v27 = vpop.f32.mrb[4].mxu1 }
 0xaa1   : > { %v3763_v28 = vmul.f32 0.125, %v3759_v27  ;;  %v11179_v29 = vpop.f32.mrb[5].mxu1  ;;  %v3915_v30 = vpop.f32.mrb[4].mxu0  ;;  %v4014_v27 = vld [vmem:[#allocation54 + $0x50] sm:$0xff] }
 0xaa2   : > { %v3919_v31 = vmul.f32 0.125, %v3915_v30  ;;  %v11189_v32 = vpop.f32.mrb[5].mxu0  ;;  %v4032_v29 = vld [vmem:[#allocation54 + $0xe0] sm:$0xff]  ;;  %v4033_v30 = vld [vmem:[#allocation54 + $0xe8] sm:$0xff] }
 0xaa3   : > { %v3765_v33 = vsel %vm3764_vm2, %v3763_v28, -inf  ;;  %v11767_v32 = vpack.c.bf16 %v4033_v30, %v4032_v29  ;;  %v4155_v29 = vld [vmem:[#allocation51 + $0x68] sm:$0xff]  ;;  %v4157_v30 = vld [vmem:[#allocation51 + $0x78] sm:$0xff] }
 0xaa4   : > { %3766 = vmax.xlane.f32.xlu0 %v3765_v33  ;;  %v3920_v34 = vsel %vm3764_vm2, %v3919_v31, -inf  ;;  %v4016_v33 = vld [vmem:[#allocation54 + $0x60] sm:$0xff] }
 0xaa5   : > { %3921 = vmax.xlane.f32.xlu1 %v3920_v34  ;;  %v4017_v34 = vld [vmem:[#allocation54 + $0x68] sm:$0xff] }
 0xb31   : > { %v3767_v35 = vpop.xlane.xlu0 %3766 }
 0xb32   : > { %v3768_v36 = vsub.f32 %v3763_v28, %v3767_v35  ;;  %v3922_v37 = vpop.xlane.xlu1 %3921  ;;  %v4015_v28 = vld [vmem:[#allocation54 + $0x58] sm:$0xff]  ;;  %v11769_v35 = vpack.c.bf16 %v4017_v34, %v4016_v33  ;;  %v4156_v33 = vld [vmem:[#allocation51 + $0x70] sm:$0xff] }
 0xb33   : > { %v3923_v38 = vsub.f32 %v3919_v31, %v3922_v37  ;;  %v11765_v31 = vpack.c.bf16 %v4015_v28, %v4014_v27 }
 0xb34   : > { %v3769_v39 = vmul.f32 1.442695, %v3768_v36 }
 0xb35   : > { %v3924_v40 = vmul.f32 1.442695, %v3923_v38  ;;  %11766 = vmatpush3.bf16.msra.mxu0 %v11765_v31  ;;  %v16934_v38 = vsub.s32 5, %v16887_v63  ;;  %v11787_v31 = vpack.c.bf16 %v4157_v30, %v4155_v29  ;;  %v4266_v29 = vld [vmem:[#allocation52 + $0x38] sm:$0xff]  ;;  %v4283_v30 = vld [vmem:[#allocation52 + $0xc0] sm:$0xff] }
 0xb36   : > { %13277 = vpow2.f32 %v3769_v39  ;;  %11768 = vmatprep.subr.bf16.mxu0 %v11767_v32  ;;  %v4154_v32 = vld [vmem:[#allocation51 + $0x60] sm:$0xff] }
 0xb37   : > { %13279 = vpow2.f32 %v3924_v40  ;;  %v3473_v39 = vrot.slane %v16893_v1, %v16934_v38  ;;  %v4035_v1 = vld [vmem:[#allocation54 + $0xf8] sm:$0xff]  ;;  %v11789_v34 = vpack.c.bf16 %v4156_v33, %v4154_v32 }
 0xb38   : > { %v11771_v48 = vpack.c.bf16 %v4035_v1, %v4034_v47  ;;  %v4164_v47 = vld [vmem:[#allocation51 + $0xb0] sm:$0xff] }
 0xb39   : > { %11770 = vmatpush3.bf16.msra.mxu0 %v11769_v35  ;;  %v4159_v35 = vld [vmem:[#allocation51 + $0x88] sm:$0xff] }
 0xb3a   : > { %11772 = vmatprep.subr.bf16.mxu0 %v11771_v48  ;;  %v4167_v48 = vld [vmem:[#allocation51 + $0xc8] sm:$0xff] }
 0xb40   : > { %v16925_v41 = vpop.eup %13277 }
 0xb41   : > { %v3771_v42 = vsel %vm3764_vm2, %v16925_v41, 0.0  ;;  %v16929_v43 = vpop.eup %13279 }
 0xb42   : > { %3772 = vadd.xlane.f32.xlu1 %v3771_v42  ;;  %v3926_v44 = vsel %vm3764_vm2, %v16929_v43, 0.0 }
 0xb46   : > { %3927 = vadd.xlane.f32.xlu1 %v3926_v44  ;;  %v3691_v44 = vadd.f32 %v16920_v26, %v3473_v39  ;;  %v4158_v39 = vld [vmem:[#allocation51 + $0x80] sm:$0xff] }
 0xbcf   : > { %v3773_v36 = vpop.xlane.xlu1 %3772 }
 0xbd0   : > { %13281 = vrcp.f32 %v3773_v36  ;;  %v4161_v36 = vld [vmem:[#allocation51 + $0x98] sm:$0xff] }
 0xbd3   : > { %v3928_v37 = vpop.xlane.xlu1 %3927 }
 0xbd4   : > { %13283 = vrcp.f32 %v3928_v37  ;;  %v11791_v37 = vpack.c.bf16 %v4161_v36, %v4159_v35  ;;  %v4268_v35 = vld [vmem:[#allocation52 + $0x48] sm:$0xff]  ;;  %v4285_v36 = vld [vmem:[#allocation52 + $0xd0] sm:$0xff] }
 0xbda   : > { %v13282_v40 = vpop.eup %13281 }
 0xbdb   : > { %v3775_v42 = vmul.f32 %v13282_v40, %v16925_v41  ;;  %v4019_v41 = vld [vmem:[#allocation54 + $0x78] sm:$0xff]  ;;  %v4160_v40 = vld [vmem:[#allocation51 + $0x90] sm:$0xff] }
 0xbdc   : > { %v11773_v50 = vpack.c.bf16 %v4019_v41, %v4018_v49  ;;  %v4169_v49 = vld [vmem:[#allocation51 + $0xd8] sm:$0xff] }
 0xbdd   : > { %11183 = vmatmul.mubr.msk.f32.vlgmr.msra.gmra.mrb[6].mxu1 %vm3764_vm2, %v3775_v42  ;;  %v4163_v42 = vld [vmem:[#allocation51 + $0xa8] sm:$0xff] }
 0xbde   : > { %v13284_v45 = vpop.eup %13283  ;;  %11191 = vmatpush3.msra.mxu1 %v3691_v44  ;;  %11192 = vmatprep.mubr.msk.f32.mxu1 %vm15427_vm0, %v15428_v11  ;;  %v11793_v44 = vpack.c.bf16 %v4160_v40, %v4158_v39 }
 0xbdf   : > { %v3930_v46 = vmul.f32 %v13284_v45, %v16929_v43  ;;  %11774 = vmatpush3.bf16.msra.mxu0 %v11773_v50  ;;  %v10503_v43 = vld [vmem:[#allocation43] ss:$0 sm:$0xff]  ;;  %11776 = vmatprep.subr.bf16.mxu1 %v11775_v62  ;;  %v4165_v45 = vld [vmem:[#allocation51 + $0xb8] sm:$0xff]  ;;  %v11799_v50 = vpack.c.bf16 %v4169_v49, %v4167_v48  ;;  %v4260_v62 = vld [vmem:[#allocation52 + $0x8] sm:$0xff] }
 0xbe0   : > { %v11795_v1 = vpack.c.bf16 %v4165_v45, %v4163_v42  ;;  %v11809_v8 = vpack.c.bf16 %v4260_v62, %v4259_v60  ;;  %v4269_v42 = vld [vmem:[#allocation52 + $0x50] sm:$0xff]  ;;  %v4287_v45 = vld [vmem:[#allocation52 + $0xe0] sm:$0xff] }
 0xbe1   : > { %11193 = vmatmul.mubr.msk.f32.vlgmr.msra.gmra.mrb[8].mxu1 %vm3764_vm2, %v3930_v46  ;;  %v4162_v46 = vld [vmem:[#allocation51 + $0xa0] sm:$0xff]  ;;  %v4273_v60 = vld [vmem:[#allocation52 + $0x70] sm:$0xff] }
 0xbe2   : > { %4250 = vmatprep.mubr.f32.mxu1 %v15428_v11  ;;  %11778 = vmatpush1.bf16.msra.mxu1 %v11777_v9  ;;  %v11797_v41 = vpack.c.bf16 %v4164_v47, %v4162_v46  ;;  %v11811_v9 = vpack.c.bf16 %v4278_v21, %v4277_v6  ;;  %v4288_v46 = vld [vmem:[#allocation52 + $0xe8] sm:$0xff]  ;;  %v4174_v6 = vld [vmem:[#allocation40] sm:$0x3] }
 0xbe3   : > { %11780 = vmatprep.subr.bf16.mxu1 %v11779_v10  ;;  %v4261_v10 = vld [vmem:[#allocation52 + $0x10] sm:$0xff]  ;;  %v4183_v21 = vrot.slane %v4174_v6, %v16904_v7 }
 0xbe4   : > { %v11813_v15 = vpack.c.bf16 %v4262_v12, %v4261_v10 }
 0xbe6   : > { %11782 = vmatpush1.bf16.msra.mxu1 %v11781_v16  ;;  %v11815_v16 = vpack.c.bf16 %v4280_v14, %v4279_v13 }
 0xbe7   : > { %11784 = vmatprep.subr.bf16.mxu1 %v11783_v17  ;;  %v4263_v17 = vld [vmem:[#allocation52 + $0x20] sm:$0xff] }
 0xcb0   : > { %v3845_v26 = vpop.f32.mrb[6].mxu1 }
 0xcb1   : > { %v11184_v51 = vpop.f32.mrb[7].mxu1 }
 0xcb2   : > { %v4168_v51 = vld [vmem:[#allocation51 + $0xd0] sm:$0xff] }
 0xcb4   : > { %v4000_v52 = vpop.f32.mrb[8].mxu1 }
 0xcb5   : > { %v11194_v53 = vpop.f32.mrb[9].mxu1  ;;  %4107 = vmatprep.mubr.f32.mxu0 %v4000_v52  ;;  %v4171_v52 = vld [vmem:[#allocation51 + $0xe8] sm:$0xff] }
 0xcb6   : > { %4108 = vmatmul.mubr.f32.vlgmr.msra.gmra.mrb[6].mxu0 %v3845_v26  ;;  %v4166_v26 = vld [vmem:[#allocation51 + $0xc0] sm:$0xff]  ;;  %v4173_v53 = vld [vmem:[#allocation51 + $0xf8] sm:$0xff] }
 0xd89   : > { %v10638_v54 = vpop.f32.mrb[6].mxu0 }
 0xd8a   : > { %v10639_v55 = vpop.f32.mrb[7].mxu0 }
 0xd8b   : > { %v10640_v56 = vadd.f32 %v10639_v55, %v10638_v54  ;;  %v11801_v54 = vpack.c.bf16 %v4168_v51, %v4166_v26  ;;  %v4170_v55 = vld [vmem:[#allocation51 + $0xe0] sm:$0xff]  ;;  %v10504_v26 = vld [vmem:[#allocation46] ss:$0 sm:$0xff] }
 0xd8d   : > { %v4110_v57 = vadd.f32 %v10640_v56, %v10503_v43  ;;  %v11803_v43 = vpack.c.bf16 %v4173_v53, %v4171_v52  ;;  %v4172_v56 = vld [vmem:[#allocation51 + $0xf0] sm:$0xff]  ;;  %v10505_v52 = vld [vmem:[#allocation45] ss:$0 sm:$0xff] }
 0xd8f   : > { %v4113_v58 = vadd.f32 %v4110_v57, %v16875_v19  ;;  %v4150_v19 = vld [vmem:[#allocation51 + $0x40] sm:$0xff]  ;;  %v11805_v57 = vpack.c.bf16 %v4172_v56, %v4170_v55  ;;  %v4272_v55 = vld [vmem:[#allocation52 + $0x68] sm:$0xff] }
 0xd90   : > { %v11785_v22 = vpack.c.bf16 %v4152_v18, %v4150_v19  ;;  %v4264_v19 = vld [vmem:[#allocation52 + $0x28] sm:$0xff]  ;;  %v4281_v18 = vld [vmem:[#allocation52 + $0xb0] sm:$0xff] }
 0xd91   : > { %4114 = vadd.xlane.f32.xlu1 %v4113_v58 }
 0xd92   : > { %11786 = vmatpush1.bf16.msra.mxu1 %v11785_v22  ;;  %v4282_v22 = vld [vmem:[#allocation52 + $0xb8] sm:$0xff] }
 0xd93   : > { %11788 = vmatprep.subr.bf16.mxu1 %v11787_v31  ;;  %v4284_v31 = vld [vmem:[#allocation52 + $0xc8] sm:$0xff] }
 0xd94   : > { %v11823_v33 = vpack.c.bf16 %v4284_v31, %v4283_v30  ;;  %v4402_v30 = vld [vmem:[#allocation72 + $0x30] sm:$0xff]  ;;  %v4399_v31 = vld [vmem:[#allocation72 + $0x18] sm:$0xff] }
 0xd96   : > { %11790 = vmatpush1.bf16.msra.mxu1 %v11789_v34  ;;  %v4267_v34 = vld [vmem:[#allocation52 + $0x40] sm:$0xff] }
 0xd97   : > { %11792 = vmatprep.subr.bf16.mxu1 %v11791_v37  ;;  %v4286_v37 = vld [vmem:[#allocation52 + $0xd8] sm:$0xff]  ;;  %v11825_v39 = vpack.c.bf16 %v4268_v35, %v4267_v34 }
 0xd98   : > { %v11827_v40 = vpack.c.bf16 %v4286_v37, %v4285_v36  ;;  %v4398_v35 = vld [vmem:[#allocation72 + $0x10] sm:$0xff]  ;;  %v4404_v36 = vld [vmem:[#allocation72 + $0x40] sm:$0xff]  ;;  %v4409_v37 = vld [vmem:[#allocation72 + $0x68] sm:$0xff] }
 0xd9a   : > { %11794 = vmatpush1.bf16.msra.mxu1 %v11793_v44  ;;  %v4270_v44 = vld [vmem:[#allocation52 + $0x58] sm:$0xff] }
 0xd9b   : > { %11796 = vmatprep.subr.bf16.mxu1 %v11795_v1  ;;  %v11829_v47 = vpack.c.bf16 %v4270_v44, %v4269_v42  ;;  %v11831_v1 = vpack.c.bf16 %v4288_v46, %v4287_v45  ;;  %v4408_v42 = vld [vmem:[#allocation72 + $0x60] sm:$0xff]  ;;  %v4414_v44 = vld [vmem:[#allocation72 + $0x90] sm:$0xff] }
 0xd9c   : > { %v11845_v46 = vpack.c.bf16 %v4414_v44, %v4408_v42  ;;  %v4462_v44 = vld [vmem:[#allocation72 + $0x210] sm:$0xff] }
 0xd9e   : > { %11798 = vmatpush1.bf16.msra.mxu1 %v11797_v41 }
 0xd9f   : > { %11800 = vmatprep.subr.bf16.mxu1 %v11799_v50 }
 0xda2   : > { %11802 = vmatpush1.bf16.msra.mxu1 %v11801_v54 }
 0xda3   : > { %11804 = vmatprep.subr.bf16.mxu1 %v11803_v43  ;;  %v4271_v43 = vld [vmem:[#allocation52 + $0x60] sm:$0xff] }
 0xda4   : > { %v11833_v56 = vpack.c.bf16 %v4272_v55, %v4271_v43  ;;  %v4423_v43 = vld [vmem:[#allocation72 + $0xd8] sm:$0xff]  ;;  %v4429_v55 = vld [vmem:[#allocation72 + $0x108] sm:$0xff] }
 0xda6   : > { %11806 = vmatpush1.bf16.msra.mxu1 %v11805_v57  ;;  %v4289_v57 = vld [vmem:[#allocation52 + $0xf0] sm:$0xff] }
 0xe1e   : > { %v4115_v23 = vpop.xlane.xlu1 %4114 }
 0xe1f   : > { %v4117_v25 = vmul.f32 0.0078125, %v4115_v23  ;;  %v11817_v23 = vpack.c.bf16 %v4264_v19, %v4263_v17 }
 0xe21   : > { %v16947_v27 = vsub.f32 %v4113_v58, %v4117_v25  ;;  %v4275_v58 = vld [vmem:[#allocation52 + $0x80] sm:$0xff]  ;;  %v11819_v25 = vpack.c.bf16 %v4282_v22, %v4281_v18 }
 0xe22   : > { %v11807_v61 = vpack.c.bf16 %v4276_v59, %v4275_v58  ;;  %v4290_v58 = vld [vmem:[#allocation52 + $0xf8] sm:$0xff] }
 0xe23   : > { %v4119_v28 = vmul.f32 %v16947_v27, %v16947_v27  ;;  %v11835_v59 = vpack.c.bf16 %v4290_v58, %v4289_v57  ;;  %v4428_v57 = vld [vmem:[#allocation72 + $0x100] sm:$0xff] }
 0xe24   : > { %11808 = vmatprep.subr.bf16.mxu0 %v11807_v61  ;;  %v4274_v61 = vld [vmem:[#allocation52 + $0x78] sm:$0xff] }
 0xe25   : > { %4120 = vadd.xlane.f32.xlu1 %v4119_v28  ;;  %11810 = vmatpush3.bf16.msra.mxu0 %v11809_v8  ;;  %v4265_v28 = vld [vmem:[#allocation52 + $0x30] sm:$0xff]  ;;  %v11837_v62 = vpack.c.bf16 %v4274_v61, %v4273_v60 }
 0xe26   : > { %11812 = vmatprep.subr.bf16.mxu0 %v11811_v9  ;;  %v11821_v32 = vpack.c.bf16 %v4266_v29, %v4265_v28  ;;  %v4396_v28 = vld [vmem:[#allocation72] sm:$0xff] }
 0xe29   : > { %11814 = vmatpush3.bf16.msra.mxu0 %v11813_v15 }
 0xe2a   : > { %11816 = vmatprep.subr.bf16.mxu0 %v11815_v16  ;;  %v10506_v16 = vld [vmem:[#allocation42] ss:$0 sm:$0xff] }
 0xe2d   : > { %11818 = vmatpush3.bf16.msra.mxu0 %v11817_v23  ;;  %v4397_v23 = vld [vmem:[#allocation72 + $0x8] sm:$0xff] }
 0xe2e   : > { %11820 = vmatprep.subr.bf16.mxu0 %v11819_v25  ;;  %v4403_v25 = vld [vmem:[#allocation72 + $0x38] sm:$0xff] }
 0xe2f   : > { %v11839_v29 = vpack.c.bf16 %v4403_v25, %v4397_v23  ;;  %v4451_v23 = vld [vmem:[#allocation72 + $0x1b8] sm:$0xff] }
 0xe31   : > { %11822 = vmatpush3.bf16.msra.mxu0 %v11821_v32  ;;  %v4405_v32 = vld [vmem:[#allocation72 + $0x48] sm:$0xff]  ;;  %11840 = vmatprep.subr.bf16.mxu1 %v11839_v29  ;;  %v4450_v29 = vld [vmem:[#allocation72 + $0x1b0] sm:$0xff] }
 0xe32   : > { %11824 = vmatprep.subr.bf16.mxu0 %v11823_v33  ;;  %v11841_v33 = vpack.c.bf16 %v4402_v30, %v4396_v28  ;;  %v11871_v34 = vpack.c.bf16 %v4405_v32, %v4399_v31  ;;  %v4444_v28 = vld [vmem:[#allocation72 + $0x180] sm:$0xff]  ;;  %v4447_v30 = vld [vmem:[#allocation72 + $0x198] sm:$0xff]  ;;  %v4453_v32 = vld [vmem:[#allocation72 + $0x1c8] sm:$0xff] }
 0xe33   : > { %v11857_v31 = vpack.c.bf16 %v4450_v29, %v4444_v28  ;;  %v10507_v28 = vld [vmem:[#allocation49] ss:$0 sm:$0xff] }
 0xe35   : > { %11826 = vmatpush3.bf16.msra.mxu0 %v11825_v39  ;;  %v11873_v39 = vpack.c.bf16 %v4404_v36, %v4398_v35  ;;  %v11887_v35 = vpack.c.bf16 %v4453_v32, %v4447_v30  ;;  %v4400_v30 = vld [vmem:[#allocation72 + $0x20] sm:$0xff]  ;;  %v10508_v32 = vld [vmem:[#allocation48] ss:$0 sm:$0xff] }
 0xe36   : > { %11828 = vmatprep.subr.bf16.mxu0 %v11827_v40  ;;  %v4415_v40 = vld [vmem:[#allocation72 + $0x98] sm:$0xff] }
 0xe37   : > { %v11843_v45 = vpack.c.bf16 %v4415_v40, %v4409_v37  ;;  %v4457_v37 = vld [vmem:[#allocation72 + $0x1e8] sm:$0xff]  ;;  %v4456_v40 = vld [vmem:[#allocation72 + $0x1e0] sm:$0xff] }
 0xe39   : > { %11830 = vmatpush3.bf16.msra.mxu0 %v11829_v47  ;;  %v4411_v47 = vld [vmem:[#allocation72 + $0x78] sm:$0xff] }
 0xe3a   : > { %11832 = vmatprep.subr.bf16.mxu0 %v11831_v1  ;;  %v4417_v1 = vld [vmem:[#allocation72 + $0xa8] sm:$0xff] }
 0xe3d   : > { %11834 = vmatpush3.bf16.msra.mxu0 %v11833_v56  ;;  %v4422_v56 = vld [vmem:[#allocation72 + $0xd0] sm:$0xff] }
 0xe3e   : > { %11836 = vmatprep.subr.bf16.mxu0 %v11835_v59  ;;  %v11879_v59 = vpack.c.bf16 %v4429_v55, %v4423_v43  ;;  %v11881_v60 = vpack.c.bf16 %v4428_v57, %v4422_v56  ;;  %v4477_v43 = vld [vmem:[#allocation72 + $0x288] sm:$0xff]  ;;  %v4470_v55 = vld [vmem:[#allocation72 + $0x250] sm:$0xff] }
 0xe41   : > { %11838 = vmatpush3.bf16.msra.mxu0 %v11837_v62 }
 0xe42   : > { %11872 = vmatprep.subr.bf16.mxu0 %v11871_v34  ;;  %v4452_v34 = vld [vmem:[#allocation72 + $0x1c0] sm:$0xff] }
 0xeb2   : > { %v4121_v48 = vpop.xlane.xlu1 %4120 }
 0xeb3   : > { %v4122_v49 = vmul.f32 0.0078125, %v4121_v48  ;;  %v4410_v48 = vld [vmem:[#allocation72 + $0x70] sm:$0xff] }
 0xeb5   : > { %v4123_v41 = vadd.f32 1e-05, %v4122_v49  ;;  %v11875_v49 = vpack.c.bf16 %v4417_v1, %v4411_v47  ;;  %v11861_v47 = vpack.c.bf16 %v4462_v44, %v4456_v40  ;;  %v4412_v40 = vld [vmem:[#allocation72 + $0x80] sm:$0xff]  ;;  %v4425_v44 = vld [vmem:[#allocation72 + $0xe8] sm:$0xff] }
 0xeb7   : > { %13285 = vrsqrt.f32 %v4123_v41  ;;  %v4416_v41 = vld [vmem:[#allocation72 + $0xa0] sm:$0xff] }
 0xec1   : > { %v13286_v50 = vpop.eup %13285 }
 0xec2   : > { %v4125_v51 = vmul.f32 %v13286_v50, %v16947_v27  ;;  %v4179_v27 = vrot.slane %v4174_v6, %v16899_v5  ;;  %v4421_v50 = vld [vmem:[#allocation72 + $0xc8] sm:$0xff] }
 0xec4   : > { %v4133_v53 = vmul.f32 %v10504_v26, %v4125_v51  ;;  %v4427_v26 = vld [vmem:[#allocation72 + $0xf8] sm:$0xff]  ;;  %v11877_v51 = vpack.c.bf16 %v4416_v41, %v4410_v48  ;;  %v4458_v48 = vld [vmem:[#allocation72 + $0x1f0] sm:$0xff]  ;;  %v4469_v41 = vld [vmem:[#allocation72 + $0x248] sm:$0xff] }
 0xec6   : > { %v4141_v54 = vadd.f32 %v10505_v52, %v4133_v53  ;;  %v11847_v52 = vpack.c.bf16 %v4427_v26, %v4421_v50  ;;  %v4420_v53 = vld [vmem:[#allocation72 + $0xc0] sm:$0xff]  ;;  %v4475_v26 = vld [vmem:[#allocation72 + $0x278] sm:$0xff] }
 0xec8   : > { %4251 = vmatmul.mubr.f32.vlgmr.msra.gmra.mrb[10].mxu1 %v4141_v54 }
 0xec9   : > { %4588 = vmatprep.mubr.f32.mxu1 %v15428_v11  ;;  %11842 = vmatpush1.bf16.msra.mxu1 %v11841_v33  ;;  %v4446_v33 = vld [vmem:[#allocation72 + $0x190] sm:$0xff] }
 0xeca   : > { %11844 = vmatprep.subr.bf16.mxu1 %v11843_v45  ;;  %v11889_v36 = vpack.c.bf16 %v4452_v34, %v4446_v33  ;;  %v4459_v45 = vld [vmem:[#allocation72 + $0x1f8] sm:$0xff]  ;;  %v4413_v33 = vld [vmem:[#allocation72 + $0x88] sm:$0xff] }
 0xecb   : > { %v4419_v34 = vld [vmem:[#allocation72 + $0xb8] sm:$0xff] }
 0xecd   : > { %11846 = vmatpush1.bf16.msra.mxu1 %v11845_v46  ;;  %v4465_v46 = vld [vmem:[#allocation72 + $0x228] sm:$0xff] }
 0xece   : > { %11848 = vmatprep.subr.bf16.mxu1 %v11847_v52  ;;  %v11891_v1 = vpack.c.bf16 %v4465_v46, %v4459_v45  ;;  %v4474_v52 = vld [vmem:[#allocation72 + $0x270] sm:$0xff]  ;;  %v4431_v45 = vld [vmem:[#allocation72 + $0x118] sm:$0xff] }
 0xecf   : > { %v11911_v46 = vpack.c.bf16 %v4431_v45, %v4425_v44 }
 0xf9b   : > { %v4252_v8 = vpop.f32.mrb[10].mxu1 }
 0xf9c   : > { %v4253_v9 = vadd.f32 %v4252_v8, %v4179_v27  ;;  %v4254_v10 = vpop.f32.mrb[11].mxu1  ;;  %v4439_v8 = vld [vmem:[#allocation72 + $0x158] sm:$0xff] }
 0xf9d   : > { %v4255_v12 = vadd.f32 %v4254_v10, %v4183_v21  ;;  %v4433_v21 = vld [vmem:[#allocation72 + $0x128] sm:$0xff]  ;;  %v4432_v10 = vld [vmem:[#allocation72 + $0x120] sm:$0xff] }
 0xf9e   : > { %v4257_v14 = vmax.f32 %v4253_v9, 0.0  ;;  %v11851_v9 = vpack.c.bf16 %v4439_v8, %v4433_v21  ;;  %v4483_v21 = vld [vmem:[#allocation72 + $0x2b8] sm:$0xff] }
 0xf9f   : > { %v4258_v13 = vmax.f32 %v4255_v12, 0.0  ;;  %v4438_v12 = vld [vmem:[#allocation72 + $0x150] sm:$0xff] }
 0xfa1   : > { %4362 = vmatprep.mubr.f32.mxu0 %v4258_v13  ;;  %v4435_v13 = vld [vmem:[#allocation72 + $0x138] sm:$0xff] }
 0xfa2   : > { %4363 = vmatmul.mubr.f32.vlgmr.msra.gmra.mrb[8].mxu0 %v4257_v14  ;;  %v11853_v14 = vpack.c.bf16 %v4438_v12, %v4432_v10  ;;  %v4482_v10 = vld [vmem:[#allocation72 + $0x2b0] sm:$0xff] }
 0xfa3   : > { %4659 = vmatprep.mubr.f32.mxu0 %v15428_v11  ;;  %11874 = vmatpush1.bf16.msra.mxu0 %v11873_v39  ;;  %v4463_v39 = vld [vmem:[#allocation72 + $0x218] sm:$0xff] }
 0xfa4   : > { %11876 = vmatprep.subr.bf16.mxu0 %v11875_v49  ;;  %v11859_v42 = vpack.c.bf16 %v4463_v39, %v4457_v37  ;;  %v4464_v49 = vld [vmem:[#allocation72 + $0x220] sm:$0xff]  ;;  %v11907_v39 = vpack.c.bf16 %v4419_v34, %v4413_v33 }
 0xfa5   : > { %v11893_v50 = vpack.c.bf16 %v4464_v49, %v4458_v48  ;;  %v4437_v48 = vld [vmem:[#allocation72 + $0x148] sm:$0xff]  ;;  %v4443_v49 = vld [vmem:[#allocation72 + $0x178] sm:$0xff] }
 0xfa7   : > { %11878 = vmatpush1.bf16.msra.mxu0 %v11877_v51  ;;  %v4468_v51 = vld [vmem:[#allocation72 + $0x240] sm:$0xff] }
 0xfa8   : > { %11880 = vmatprep.subr.bf16.mxu0 %v11879_v59  ;;  %v11865_v56 = vpack.c.bf16 %v4474_v52, %v4468_v51  ;;  %v4481_v59 = vld [vmem:[#allocation72 + $0x2a8] sm:$0xff]  ;;  %v4442_v51 = vld [vmem:[#allocation72 + $0x170] sm:$0xff] }
 0xfa9   : > { %v4449_v52 = vld [vmem:[#allocation72 + $0x1a8] sm:$0xff] }
 0xfab   : > { %11882 = vmatpush1.bf16.msra.mxu0 %v11881_v60  ;;  %v4487_v60 = vld [vmem:[#allocation72 + $0x2d8] sm:$0xff] }
0x1075   : > { %v10673_v15 = vpop.f32.mrb[8].mxu0 }
0x1076   : > { %v10674_v17 = vpop.f32.mrb[9].mxu0 }
0x1077   : > { %v10675_v19 = vadd.f32 %v10674_v17, %v10673_v15  ;;  %v4441_v15 = vld [vmem:[#allocation72 + $0x168] sm:$0xff]  ;;  %v4440_v17 = vld [vmem:[#allocation72 + $0x160] sm:$0xff] }
0x1079   : > { %v4365_v18 = vadd.f32 %v10675_v19, %v10506_v16  ;;  %v4434_v16 = vld [vmem:[#allocation72 + $0x130] sm:$0xff]  ;;  %v11883_v19 = vpack.c.bf16 %v4441_v15, %v4435_v13  ;;  %v4488_v13 = vld [vmem:[#allocation72 + $0x2e0] sm:$0xff]  ;;  %v4407_v15 = vld [vmem:[#allocation72 + $0x58] sm:$0xff] }
0x107b   : > { %v4368_v22 = vadd.f32 %v4365_v18, %v4141_v54  ;;  %v4426_v54 = vld [vmem:[#allocation72 + $0xf0] sm:$0xff]  ;;  %v11885_v18 = vpack.c.bf16 %v4440_v17, %v4434_v16  ;;  %11884 = vmatprep.subr.bf16.mxu0 %v11883_v19  ;;  %v11901_v19 = vpack.c.bf16 %v4488_v13, %v4482_v10  ;;  %v4472_v10 = vld [vmem:[#allocation72 + $0x260] sm:$0xff]  ;;  %v4485_v13 = vld [vmem:[#allocation72 + $0x2c8] sm:$0xff] }
0x107c   : > { %v11849_v58 = vpack.c.bf16 %v4426_v54, %v4420_v53  ;;  %v11863_v53 = vpack.c.bf16 %v4475_v26, %v4469_v41  ;;  %v4471_v54 = vld [vmem:[#allocation72 + $0x258] sm:$0xff]  ;;  %v4436_v26 = vld [vmem:[#allocation72 + $0x140] sm:$0xff] }
0x107d   : > { %4369 = vadd.xlane.f32.xlu1 %v4368_v22  ;;  %11886 = vmatpush1.bf16.msra.mxu0 %v11885_v18  ;;  %v11895_v57 = vpack.c.bf16 %v4477_v43, %v4471_v54  ;;  %v11917_v54 = vpack.c.bf16 %v4442_v51, %v4436_v26 }
0x107e   : > { %11850 = vmatpush1.bf16.msra.mxu1 %v11849_v58  ;;  %11888 = vmatprep.subr.bf16.mxu0 %v11887_v35  ;;  %v4476_v58 = vld [vmem:[#allocation72 + $0x280] sm:$0xff] }
0x107f   : > { %11852 = vmatprep.subr.bf16.mxu1 %v11851_v9  ;;  %v11897_v8 = vpack.c.bf16 %v4476_v58, %v4470_v55  ;;  %v4489_v9 = vld [vmem:[#allocation72 + $0x2e8] sm:$0xff]  ;;  %v4448_v55 = vld [vmem:[#allocation72 + $0x1a0] sm:$0xff]  ;;  %v4467_v58 = vld [vmem:[#allocation72 + $0x238] sm:$0xff] }
0x1080   : > { %v11899_v12 = vpack.c.bf16 %v4489_v9, %v4483_v21  ;;  %v4479_v21 = vld [vmem:[#allocation72 + $0x298] sm:$0xff] }
0x1081   : > { %11890 = vmatpush1.bf16.msra.mxu0 %v11889_v36 }
0x1082   : > { %11854 = vmatpush1.bf16.msra.mxu1 %v11853_v14  ;;  %11892 = vmatprep.subr.bf16.mxu0 %v11891_v1  ;;  %v4401_v14 = vld [vmem:[#allocation72 + $0x28] sm:$0xff]  ;;  %v4430_v1 = vld [vmem:[#allocation72 + $0x110] sm:$0xff] }
0x1083   : > { %v11903_v17 = vpack.c.bf16 %v4407_v15, %v4401_v14  ;;  %v4491_v14 = vld [vmem:[#allocation72 + $0x2f8] sm:$0xff] }
0x1085   : > { %11894 = vmatpush1.bf16.msra.mxu0 %v11893_v50  ;;  %v11915_v50 = vpack.c.bf16 %v4443_v49, %v4437_v48 }
0x1086   : > { %11896 = vmatprep.subr.bf16.mxu0 %v11895_v57  ;;  %v4461_v57 = vld [vmem:[#allocation72 + $0x208] sm:$0xff] }
0x1089   : > { %11898 = vmatpush1.bf16.msra.mxu0 %v11897_v8 }
0x108a   : > { %11900 = vmatprep.subr.bf16.mxu0 %v11899_v12  ;;  %v4478_v12 = vld [vmem:[#allocation72 + $0x290] sm:$0xff] }
0x108b   : > { %v11929_v15 = vpack.c.bf16 %v4478_v12, %v4472_v10  ;;  %v5049_v12 = vld [vmem:[#allocation70 + $0x10] sm:$0xff] }
0x108d   : > { %11902 = vmatpush1.bf16.msra.mxu0 %v11901_v19  ;;  %v4490_v19 = vld [vmem:[#allocation72 + $0x2f0] sm:$0xff] }
0x108e   : > { %11195 = vmatprep.subr.mxu0 %v15428_v11 }
0x110a   : > { %v4370_v61 = vpop.xlane.xlu1 %4369 }
0x110b   : > { %v4371_v62 = vmul.f32 0.0078125, %v4370_v61  ;;  %v11867_v61 = vpack.c.bf16 %v4487_v60, %v4481_v59  ;;  %v11923_v60 = vpack.c.bf16 %v4467_v58, %v4461_v57 }
0x110d   : > { %v16956_v6 = vsub.f32 %v4368_v22, %v4371_v62  ;;  %v4445_v22 = vld [vmem:[#allocation72 + $0x188] sm:$0xff]  ;;  %v4480_v62 = vld [vmem:[#allocation72 + $0x2a0] sm:$0xff] }
0x110e   : > { %v11855_v25 = vpack.c.bf16 %v4451_v23, %v4445_v22 }
0x110f   : > { %v4373_v27 = vmul.f32 %v16956_v6, %v16956_v6 }
0x1110   : > { %11856 = vmatprep.subr.bf16.mxu1 %v11855_v25 }
0x1111   : > { %4374 = vadd.xlane.f32.xlu1 %v4373_v27  ;;  %11858 = vmatpush1.bf16.msra.mxu1 %v11857_v31  ;;  %v4486_v27 = vld [vmem:[#allocation72 + $0x2d0] sm:$0xff] }
0x1112   : > { %11860 = vmatprep.subr.bf16.mxu1 %v11859_v42  ;;  %v11869_v16 = vpack.c.bf16 %v4486_v27, %v4480_v62  ;;  %v4406_v31 = vld [vmem:[#allocation72 + $0x50] sm:$0xff]  ;;  %v4473_v27 = vld [vmem:[#allocation72 + $0x268] sm:$0xff] }
0x1113   : > { %v11905_v36 = vpack.c.bf16 %v4406_v31, %v4400_v30  ;;  %v4418_v42 = vld [vmem:[#allocation72 + $0xb0] sm:$0xff]  ;;  %v11927_v9 = vpack.c.bf16 %v4479_v21, %v4473_v27  ;;  %v5048_v27 = vld [vmem:[#allocation70 + $0x8] sm:$0xff] }
0x1114   : > { %v4466_v62 = vld [vmem:[#allocation72 + $0x230] sm:$0xff] }
0x1115   : > { %11862 = vmatpush1.bf16.msra.mxu1 %v11861_v47  ;;  %v4424_v47 = vld [vmem:[#allocation72 + $0xe0] sm:$0xff]  ;;  %v5065_v21 = vld [vmem:[#allocation70 + $0x90] sm:$0xff] }
0x1116   : > { %11864 = vmatprep.subr.bf16.mxu1 %v11863_v53  ;;  %v11913_v41 = vpack.c.bf16 %v4430_v1, %v4424_v47  ;;  %v4455_v53 = vld [vmem:[#allocation72 + $0x1d8] sm:$0xff] }
0x1117   : > { %v11919_v43 = vpack.c.bf16 %v4455_v53, %v4449_v52 }
0x1119   : > { %11866 = vmatpush1.bf16.msra.mxu1 %v11865_v56  ;;  %v4454_v56 = vld [vmem:[#allocation72 + $0x1d0] sm:$0xff] }
0x111a   : > { %11868 = vmatprep.subr.bf16.mxu1 %v11867_v61  ;;  %v11921_v59 = vpack.c.bf16 %v4454_v56, %v4448_v55  ;;  %v4460_v61 = vld [vmem:[#allocation72 + $0x200] sm:$0xff] }
0x111b   : > { %v11925_v8 = vpack.c.bf16 %v4466_v62, %v4460_v61  ;;  %v5047_v61 = vld [vmem:[#allocation70] sm:$0xff] }
0x111d   : > { %11870 = vmatpush1.bf16.msra.mxu1 %v11869_v16  ;;  %v11931_v16 = vpack.c.bf16 %v4491_v14, %v4485_v13  ;;  %v5050_v13 = vld [vmem:[#allocation70 + $0x18] sm:$0xff]  ;;  %v5067_v14 = vld [vmem:[#allocation70 + $0xa0] sm:$0xff] }
0x111e   : > { %11904 = vmatprep.subr.bf16.mxu1 %v11903_v17  ;;  %v4484_v17 = vld [vmem:[#allocation72 + $0x2c0] sm:$0xff] }
0x119e   : > { %v4375_v18 = vpop.xlane.xlu1 %4374 }
0x119f   : > { %v4376_v22 = vmul.f32 0.0078125, %v4375_v18  ;;  %v11933_v18 = vpack.c.bf16 %v4490_v19, %v4484_v17  ;;  %v5051_v19 = vld [vmem:[#allocation70 + $0x20] sm:$0xff] }
0x11a1   : > { %v4377_v23 = vadd.f32 1e-05, %v4376_v22  ;;  %v16974_v22 = vld [vmem:[%s17898_s8] sm:$0x3f]  ;;  %s10580_s8 = sshll.u32 %s17909_s10, 5 }
0x11a3   : > { %13287 = vrsqrt.f32 %v4377_v23  ;;  %v4505_v23 = vrot.slane %v16974_v22, %v16890_v0 }
0x11ad   : > { %v13288_v25 = vpop.eup %13287 }
0x11ae   : > { %v4379_v29 = vmul.f32 %v13288_v25, %v16956_v6  ;;  %v11909_v6 = vpack.c.bf16 %v4418_v42, %v4412_v40  ;;  %v4497_v25 = vrot.slane %v16974_v22, %v16899_v5  ;;  %v4513_v40 = vrot.slane %v16974_v22, %v16916_v20 }
0x11b0   : > { %v4387_v35 = vmul.f32 %v10507_v28, %v4379_v29 }
0x11b2   : > { %v16962_v37 = vadd.f32 %v10508_v32, %v4387_v35  ;;  %v4509_v32 = vrot.slane %v16974_v22, %v16896_v2  ;;  %v4501_v35 = vrot.slane %v16974_v22, %v16904_v7 }
0x11b4   : > { %4589 = vmatmul.mubr.f32.vlgmr.msra.gmra.mrb[12].mxu1 %v16962_v37  ;;  %4660 = vmatmul.mubr.f32.vlgmr.msra.gmra.mrb[10].mxu0 %v16962_v37 }
0x11b5   : > { %11906 = vmatpush1.bf16.msra.mxu1 %v11905_v36  ;;  %4730 = vmatprep.mubr.f32.mxu1 %v15428_v11 }
0x11b6   : > { %11908 = vmatprep.subr.bf16.mxu1 %v11907_v39  ;;  %11197 = vmatprep.mubr.msk.f32.mxu0 %vm15427_vm0, %v15428_v11 }
0x11b9   : > { %11910 = vmatpush1.bf16.msra.mxu1 %v11909_v6 }
0x11ba   : > { %11912 = vmatprep.subr.bf16.mxu1 %v11911_v46 }
0x11bd   : > { %11914 = vmatpush1.bf16.msra.mxu1 %v11913_v41 }
0x11be   : > { %11916 = vmatprep.subr.bf16.mxu1 %v11915_v50 }
0x11c1   : > { %11918 = vmatpush1.bf16.msra.mxu1 %v11917_v54 }
0x11c2   : > { %11920 = vmatprep.subr.bf16.mxu1 %v11919_v43 }
0x11c5   : > { %11922 = vmatpush1.bf16.msra.mxu1 %v11921_v59  ;;  %v5063_v59 = vld [vmem:[#allocation70 + $0x80] sm:$0xff] }
0x11c6   : > { %11924 = vmatprep.subr.bf16.mxu1 %v11923_v60  ;;  %v5064_v60 = vld [vmem:[#allocation70 + $0x88] sm:$0xff] }
0x11c7   : > { %v11935_v62 = vpack.c.bf16 %v5064_v60, %v5063_v59 }
0x11c9   : > { %11926 = vmatpush1.bf16.msra.mxu1 %v11925_v8  ;;  %v5066_v8 = vld [vmem:[#allocation70 + $0x98] sm:$0xff] }
0x11ca   : > { %11928 = vmatprep.subr.bf16.mxu1 %v11927_v9  ;;  %v11937_v9 = vpack.c.bf16 %v5048_v27, %v5047_v61  ;;  %v11939_v10 = vpack.c.bf16 %v5066_v8, %v5065_v21  ;;  %v5077_v61 = vld [vmem:[#allocation70 + $0xf0] sm:$0xff] }
0x11cb   : > { %v5061_v27 = vld [vmem:[#allocation70 + $0x70] sm:$0xff] }
0x11cd   : > { %11930 = vmatpush1.bf16.msra.mxu1 %v11929_v15  ;;  %v5068_v15 = vld [vmem:[#allocation70 + $0xa8] sm:$0xff] }
0x11ce   : > { %11932 = vmatprep.subr.bf16.mxu1 %v11931_v16  ;;  %v11941_v16 = vpack.c.bf16 %v5050_v13, %v5049_v12  ;;  %v11943_v17 = vpack.c.bf16 %v5068_v15, %v5067_v14 }
0x11d1   : > { %11934 = vmatpush1.bf16.msra.mxu1 %v11933_v18  ;;  %v5052_v18 = vld [vmem:[#allocation70 + $0x28] sm:$0xff] }
0x11d2   : > { %11200 = vmatprep.subr.mxu1 %v15428_v11 }
0x11d4   : > { %4731 = vmatmul.mubr.f32.vlgmr.msra.gmra.mrb[14].mxu1 %v16962_v37 }
0x11d5   : > { %11202 = vmatprep.mubr.msk.f32.mxu1 %vm15427_vm0, %v15428_v11 }
0x1287   : > { %v4590_v28 = vpop.f32.mrb[12].mxu1  ;;  %v4661_v29 = vpop.f32.mrb[10].mxu0 }
0x1288   : > { %v4662_v30 = vadd.f32 %v4661_v29, %v4505_v23  ;;  %v4592_v31 = vpop.f32.mrb[13].mxu1  ;;  %v4663_v33 = vpop.f32.mrb[11].mxu0  ;;  %v4591_v34 = vadd.f32 %v4590_v28, %v4497_v25  ;;  %v5069_v23 = vld [vmem:[#allocation70 + $0xb0] sm:$0xff]  ;;  %v5070_v25 = vld [vmem:[#allocation70 + $0xb8] sm:$0xff]  ;;  %v11945_v28 = vpack.c.bf16 %v5052_v18, %v5051_v19  ;;  %v5184_v18 = vld [vmem:[#allocation67] sm:$0xff] }
0x1289   : > { %v4664_v36 = vadd.f32 %v4663_v33, %v4509_v32  ;;  %v4593_v39 = vadd.f32 %v4592_v31, %v4501_v35  ;;  %v11947_v29 = vpack.c.bf16 %v5070_v25, %v5069_v23  ;;  %v5054_v31 = vld [vmem:[#allocation70 + $0x38] sm:$0xff]  ;;  %v5071_v32 = vld [vmem:[#allocation70 + $0xc0] sm:$0xff]  ;;  %v5072_v33 = vld [vmem:[#allocation70 + $0xc8] sm:$0xff] }
0x128a   : > { %11196 = vmatpush3.xpose.msra.mxu0 %v4662_v30  ;;  %v5053_v30 = vld [vmem:[#allocation70 + $0x30] sm:$0xff]  ;;  %v11951_v35 = vpack.c.bf16 %v5072_v33, %v5071_v32  ;;  %v5187_v19 = vld [vmem:[#allocation67 + $0x18] sm:$0xff]  ;;  %v5188_v32 = vld [vmem:[#allocation67 + $0x20] sm:$0xff] }
0x128b   : > { %11205 = vmatprep.subr.mxu0 %v15428_v11  ;;  %v5186_v25 = vld [vmem:[#allocation67 + $0x10] sm:$0xff] }
0x128c   : > { %v5190_v33 = vld [vmem:[#allocation67 + $0x30] sm:$0xff] }
0x128d   : > { %11198 = vmatmul.mubr.f32.vlgmr.msra.gmra.mrb[12].mxu0 %v4591_v34  ;;  %v11949_v34 = vpack.c.bf16 %v5054_v31, %v5053_v30  ;;  %v11969_v30 = vpack.c.bf16 %v5186_v25, %v5184_v18  ;;  %v5319_v25 = vld [vmem:[#allocation69 + $0x90] sm:$0xff] }
0x128e   : > { %11206 = vmatpush3.xpose.msra.mxu0 %v4664_v36  ;;  %11207 = vmatprep.mubr.msk.f32.mxu0 %vm15427_vm0, %v15428_v11  ;;  %v5055_v36 = vld [vmem:[#allocation70 + $0x40] sm:$0xff] }
0x128f   : > { %11936 = vmatprep.subr.bf16.mxu0 %v11935_v62 }
0x1291   : > { %11208 = vmatmul.mubr.f32.vlgmr.msra.gmra.mrb[14].mxu0 %v4593_v39  ;;  %v5056_v39 = vld [vmem:[#allocation70 + $0x48] sm:$0xff] }
0x1292   : > { %11938 = vmatpush3.bf16.msra.mxu0 %v11937_v9 }
0x1293   : > { %11940 = vmatprep.subr.bf16.mxu0 %v11939_v10 }
0x1296   : > { %11942 = vmatpush3.bf16.msra.mxu0 %v11941_v16 }
0x1297   : > { %11944 = vmatprep.subr.bf16.mxu0 %v11943_v17  ;;  %v5185_v17 = vld [vmem:[#allocation67 + $0x8] sm:$0xff] }
0x1298   : > { %v11967_v23 = vpack.c.bf16 %v5187_v19, %v5185_v17  ;;  %v5318_v17 = vld [vmem:[#allocation69 + $0x88] sm:$0xff]  ;;  %v5301_v19 = vld [vmem:[#allocation69] sm:$0xff] }
0x129a   : > { %11946 = vmatpush3.bf16.msra.mxu0 %v11945_v28  ;;  %v5189_v28 = vld [vmem:[#allocation67 + $0x28] sm:$0xff] }
0x129b   : > { %11948 = vmatprep.subr.bf16.mxu0 %v11947_v29  ;;  %v5191_v29 = vld [vmem:[#allocation67 + $0x38] sm:$0xff] }
0x129c   : > { %v11971_v31 = vpack.c.bf16 %v5191_v29, %v5189_v28  ;;  %v5320_v28 = vld [vmem:[#allocation69 + $0x98] sm:$0xff] }
0x129e   : > { %11950 = vmatpush3.bf16.msra.mxu0 %v11949_v34  ;;  %v5193_v34 = vld [vmem:[#allocation67 + $0x48] sm:$0xff] }
0x129f   : > { %11952 = vmatprep.subr.bf16.mxu0 %v11951_v35  ;;  %v5195_v35 = vld [vmem:[#allocation67 + $0x58] sm:$0xff] }
0x12a7   : > { %v4732_v42 = vpop.f32.mrb[14].mxu1 }
0x12a8   : > { %v4733_v44 = vadd.f32 %v4732_v42, %v4513_v40  ;;  %v16989_v45 = vpop.f32.mrb[15].mxu1  ;;  %v5073_v40 = vld [vmem:[#allocation70 + $0xd0] sm:$0xff]  ;;  %v5074_v42 = vld [vmem:[#allocation70 + $0xd8] sm:$0xff] }
0x12aa   : > { %11201 = vmatpush3.msra.mxu1 %v4733_v44  ;;  %v11953_v44 = vpack.c.bf16 %v5056_v39, %v5055_v36  ;;  %v11973_v36 = vpack.c.bf16 %v5190_v33, %v5188_v32  ;;  %v11975_v39 = vpack.c.bf16 %v5195_v35, %v5193_v34  ;;  %v5304_v32 = vld [vmem:[#allocation69 + $0x18] sm:$0xff]  ;;  %v5321_v33 = vld [vmem:[#allocation69 + $0xa0] sm:$0xff]  ;;  %v5322_v34 = vld [vmem:[#allocation69 + $0xa8] sm:$0xff] }
0x12ab   : > { %11210 = vmatprep.subr.mxu1 %v15428_v11 }
0x12ac   : > { %11954 = vmatpush3.bf16.msra.mxu0 %v11953_v44 }
0x1360   : > { %v4803_v6 = vpop.f32.mrb[12].mxu0 }
0x1361   : > { %v4807_v46 = vmul.f32 0.125, %v4803_v6  ;;  %v11199_v47 = vpop.f32.mrb[13].mxu0  ;;  %v11955_v6 = vpack.c.bf16 %v5074_v42, %v5073_v40  ;;  %v5194_v40 = vld [vmem:[#allocation67 + $0x50] sm:$0xff] }
0x1362   : > { %v5058_v47 = vld [vmem:[#allocation70 + $0x58] sm:$0xff] }
0x1363   : > { %v4808_v1 = vsel %vm3764_vm2, %v4807_v46, -inf  ;;  %11956 = vmatprep.subr.bf16.mxu0 %v11955_v6 }
0x1364   : > { %4809 = vmax.xlane.f32.xlu1 %v4808_v1  ;;  %v4958_v48 = vpop.f32.mrb[14].mxu0  ;;  %v5075_v1 = vld [vmem:[#allocation70 + $0xe0] sm:$0xff] }
0x1365   : > { %v4962_v49 = vmul.f32 0.125, %v4958_v48  ;;  %v11209_v41 = vpop.f32.mrb[15].mxu0  ;;  %v5076_v48 = vld [vmem:[#allocation70 + $0xe8] sm:$0xff] }
0x1366   : > { %v11959_v41 = vpack.c.bf16 %v5076_v48, %v5075_v1  ;;  %v5197_v1 = vld [vmem:[#allocation67 + $0x68] sm:$0xff]  ;;  %v5199_v48 = vld [vmem:[#allocation67 + $0x78] sm:$0xff] }
0x1367   : > { %v4963_v50 = vsel %vm3764_vm2, %v4962_v49, -inf }
0x1368   : > { %4964 = vmax.xlane.f32.xlu1 %v4963_v50  ;;  %v5059_v50 = vld [vmem:[#allocation70 + $0x60] sm:$0xff] }
0x13f1   : > { %v4810_v26 = vpop.xlane.xlu1 %4809 }
0x13f2   : > { %v4811_v51 = vsub.f32 %v4807_v46, %v4810_v26  ;;  %v5057_v46 = vld [vmem:[#allocation70 + $0x50] sm:$0xff]  ;;  %v5060_v26 = vld [vmem:[#allocation70 + $0x68] sm:$0xff] }
0x13f4   : > { %v4812_v52 = vmul.f32 1.442695, %v4811_v51  ;;  %v11961_v51 = vpack.c.bf16 %v5060_v26, %v5059_v50  ;;  %v5198_v50 = vld [vmem:[#allocation67 + $0x70] sm:$0xff] }
0x13f5   : > { %v4965_v53 = vpop.xlane.xlu1 %4964 }
0x13f6   : > { %13289 = vpow2.f32 %v4812_v52  ;;  %v4966_v54 = vsub.f32 %v4962_v49, %v4965_v53  ;;  %v11957_v49 = vpack.c.bf16 %v5058_v47, %v5057_v46 }
0x13f8   : > { %v4967_v43 = vmul.f32 1.442695, %v4966_v54  ;;  %11958 = vmatpush3.bf16.msra.mxu0 %v11957_v49  ;;  %v4517_v54 = vrot.slane %v16974_v22, %v16934_v38  ;;  %v5078_v22 = vld [vmem:[#allocation70 + $0xf8] sm:$0xff]  ;;  %v11979_v49 = vpack.c.bf16 %v5199_v48, %v5197_v1  ;;  %v5325_v48 = vld [vmem:[#allocation69 + $0xc0] sm:$0xff] }
0x13f9   : > { %11960 = vmatprep.subr.bf16.mxu0 %v11959_v41  ;;  %v11963_v62 = vpack.c.bf16 %v5078_v22, %v5077_v61  ;;  %v5196_v41 = vld [vmem:[#allocation67 + $0x60] sm:$0xff]  ;;  %v5206_v61 = vld [vmem:[#allocation67 + $0xb0] sm:$0xff]  ;;  %v5308_v1 = vld [vmem:[#allocation69 + $0x38] sm:$0xff] }
0x13fa   : > { %13291 = vpow2.f32 %v4967_v43  ;;  %v11981_v26 = vpack.c.bf16 %v5198_v50, %v5196_v41 }
0x13fc   : > { %11962 = vmatpush3.bf16.msra.mxu0 %v11961_v51  ;;  %v5201_v51 = vld [vmem:[#allocation67 + $0x88] sm:$0xff] }
0x13fd   : > { %11964 = vmatprep.subr.bf16.mxu0 %v11963_v62  ;;  %v5209_v62 = vld [vmem:[#allocation67 + $0xc8] sm:$0xff] }
0x1400   : > { %v16994_v55 = vpop.eup %13289 }
0x1401   : > { %v4814_v56 = vsel %vm3764_vm2, %v16994_v55, 0.0 }
0x1402   : > { %4815 = vadd.xlane.f32.xlu0 %v4814_v56 }
0x1404   : > { %v16998_v57 = vpop.eup %13291 }
0x1405   : > { %v4969_v58 = vsel %vm3764_vm2, %v16998_v57, 0.0 }
0x1406   : > { %4970 = vadd.xlane.f32.xlu1 %v4969_v58  ;;  %v4735_v58 = vadd.f32 %v16989_v45, %v4517_v54  ;;  %v5200_v54 = vld [vmem:[#allocation67 + $0x80] sm:$0xff] }
0x148f   : > { %v4816_v52 = vpop.xlane.xlu0 %4815 }
0x1490   : > { %13293 = vrcp.f32 %v4816_v52  ;;  %v5203_v52 = vld [vmem:[#allocation67 + $0x98] sm:$0xff] }
0x1493   : > { %v4971_v53 = vpop.xlane.xlu1 %4970 }
0x1494   : > { %13295 = vrcp.f32 %v4971_v53  ;;  %v11983_v53 = vpack.c.bf16 %v5203_v52, %v5201_v51  ;;  %v5310_v51 = vld [vmem:[#allocation69 + $0x48] sm:$0xff]  ;;  %v5327_v52 = vld [vmem:[#allocation69 + $0xd0] sm:$0xff] }
0x149a   : > { %v13294_v43 = vpop.eup %13293 }
0x149b   : > { %v4818_v56 = vmul.f32 %v13294_v43, %v16994_v55  ;;  %v5062_v55 = vld [vmem:[#allocation70 + $0x78] sm:$0xff]  ;;  %v5202_v43 = vld [vmem:[#allocation67 + $0x90] sm:$0xff] }
0x149c   : > { %v11965_v21 = vpack.c.bf16 %v5062_v55, %v5061_v27  ;;  %v5211_v27 = vld [vmem:[#allocation67 + $0xd8] sm:$0xff] }
0x149d   : > { %11203 = vmatmul.mubr.msk.f32.vlgmr.msra.gmra.mrb[16].mxu1 %vm3764_vm2, %v4818_v56  ;;  %v5205_v56 = vld [vmem:[#allocation67 + $0xa8] sm:$0xff] }
0x149e   : > { %v13296_v59 = vpop.eup %13295  ;;  %11211 = vmatpush3.msra.mxu1 %v4735_v58  ;;  %11212 = vmatprep.mubr.msk.f32.mxu1 %vm15427_vm0, %v15428_v11  ;;  %v11985_v58 = vpack.c.bf16 %v5202_v43, %v5200_v54 }
0x149f   : > { %v4973_v60 = vmul.f32 %v13296_v59, %v16998_v57  ;;  %11966 = vmatpush3.bf16.msra.mxu0 %v11965_v21  ;;  %v10511_v57 = vld [vmem:[#allocation60] ss:$0 sm:$0xff]  ;;  %11968 = vmatprep.subr.bf16.mxu1 %v11967_v23  ;;  %v5207_v59 = vld [vmem:[#allocation67 + $0xb8] sm:$0xff]  ;;  %v11991_v21 = vpack.c.bf16 %v5211_v27, %v5209_v62  ;;  %v5302_v23 = vld [vmem:[#allocation69 + $0x8] sm:$0xff] }
0x14a0   : > { %v11987_v22 = vpack.c.bf16 %v5207_v59, %v5205_v56  ;;  %v12001_v29 = vpack.c.bf16 %v5302_v23, %v5301_v19  ;;  %v5311_v56 = vld [vmem:[#allocation69 + $0x50] sm:$0xff]  ;;  %v5329_v59 = vld [vmem:[#allocation69 + $0xe0] sm:$0xff] }
0x14a1   : > { %11213 = vmatmul.mubr.msk.f32.vlgmr.msra.gmra.mrb[18].mxu1 %vm3764_vm2, %v4973_v60  ;;  %v5204_v60 = vld [vmem:[#allocation67 + $0xa0] sm:$0xff]  ;;  %v5315_v19 = vld [vmem:[#allocation69 + $0x70] sm:$0xff] }
0x14a2   : > { %5292 = vmatprep.mubr.f32.mxu1 %v15428_v11  ;;  %11970 = vmatpush1.bf16.msra.mxu1 %v11969_v30  ;;  %v11989_v55 = vpack.c.bf16 %v5206_v61, %v5204_v60  ;;  %v12003_v30 = vpack.c.bf16 %v5320_v28, %v5319_v25  ;;  %v5330_v60 = vld [vmem:[#allocation69 + $0xe8] sm:$0xff] }
0x14a3   : > { %11972 = vmatprep.subr.bf16.mxu1 %v11971_v31  ;;  %v5303_v31 = vld [vmem:[#allocation69 + $0x10] sm:$0xff] }
0x14a4   : > { %v12005_v35 = vpack.c.bf16 %v5304_v32, %v5303_v31 }
0x14a6   : > { %11974 = vmatpush1.bf16.msra.mxu1 %v11973_v36  ;;  %v12007_v36 = vpack.c.bf16 %v5322_v34, %v5321_v33 }
0x14a7   : > { %11976 = vmatprep.subr.bf16.mxu1 %v11975_v39  ;;  %v5305_v39 = vld [vmem:[#allocation69 + $0x20] sm:$0xff] }
0x1570   : > { %v4888_v45 = vpop.f32.mrb[16].mxu1 }
0x1571   : > { %v11204_v8 = vpop.f32.mrb[17].mxu1 }
0x1572   : > { %v5210_v8 = vld [vmem:[#allocation67 + $0xd0] sm:$0xff] }
0x1574   : > { %v5043_v9 = vpop.f32.mrb[18].mxu1 }
0x1575   : > { %v11214_v10 = vpop.f32.mrb[19].mxu1  ;;  %5150 = vmatprep.mubr.f32.mxu0 %v5043_v9  ;;  %v5213_v9 = vld [vmem:[#allocation67 + $0xe8] sm:$0xff] }
0x1576   : > { %5151 = vmatmul.mubr.f32.vlgmr.msra.gmra.mrb[16].mxu0 %v4888_v45  ;;  %v5208_v45 = vld [vmem:[#allocation67 + $0xc0] sm:$0xff]  ;;  %v5215_v10 = vld [vmem:[#allocation67 + $0xf8] sm:$0xff] }
0x1649   : > { %v10716_v12 = vpop.f32.mrb[16].mxu0 }
0x164a   : > { %v10717_v13 = vpop.f32.mrb[17].mxu0 }
0x164b   : > { %v10718_v14 = vadd.f32 %v10717_v13, %v10716_v12  ;;  %v11993_v12 = vpack.c.bf16 %v5210_v8, %v5208_v45  ;;  %v5212_v13 = vld [vmem:[#allocation67 + $0xe0] sm:$0xff]  ;;  %v10512_v45 = vld [vmem:[#allocation63] ss:$0 sm:$0xff] }
0x164d   : > { %v5153_v15 = vadd.f32 %v10718_v14, %v10511_v57  ;;  %v11995_v57 = vpack.c.bf16 %v5215_v10, %v5213_v9  ;;  %v5214_v14 = vld [vmem:[#allocation67 + $0xf0] sm:$0xff]  ;;  %v10513_v9 = vld [vmem:[#allocation61] ss:$0 sm:$0xff] }
0x164f   : > { %v5156_v16 = vadd.f32 %v5153_v15, %v16962_v37  ;;  %v5192_v37 = vld [vmem:[#allocation67 + $0x40] sm:$0xff]  ;;  %v11997_v15 = vpack.c.bf16 %v5214_v14, %v5212_v13  ;;  %v5314_v13 = vld [vmem:[#allocation69 + $0x68] sm:$0xff] }
0x1650   : > { %v11977_v42 = vpack.c.bf16 %v5194_v40, %v5192_v37  ;;  %v5306_v37 = vld [vmem:[#allocation69 + $0x28] sm:$0xff]  ;;  %v5323_v40 = vld [vmem:[#allocation69 + $0xb0] sm:$0xff] }
0x1651   : > { %5157 = vadd.xlane.f32.xlu0 %v5156_v16 }
0x1652   : > { %11978 = vmatpush1.bf16.msra.mxu1 %v11977_v42  ;;  %v5324_v42 = vld [vmem:[#allocation69 + $0xb8] sm:$0xff] }
0x1653   : > { %11980 = vmatprep.subr.bf16.mxu1 %v11979_v49  ;;  %v5326_v49 = vld [vmem:[#allocation69 + $0xc8] sm:$0xff] }
0x1654   : > { %v12015_v50 = vpack.c.bf16 %v5326_v49, %v5325_v48  ;;  %v5441_v48 = vld [vmem:[%s17899_s12 + $0x18] sm:$0xff]  ;;  %v5440_v49 = vld [vmem:[%s17899_s12 + $0x10] sm:$0xff] }
0x1656   : > { %11982 = vmatpush1.bf16.msra.mxu1 %v11981_v26  ;;  %v5309_v26 = vld [vmem:[#allocation69 + $0x40] sm:$0xff] }
0x1657   : > { %11984 = vmatprep.subr.bf16.mxu1 %v11983_v53  ;;  %v5328_v53 = vld [vmem:[#allocation69 + $0xd8] sm:$0xff]  ;;  %v12017_v54 = vpack.c.bf16 %v5310_v51, %v5309_v26 }
0x1658   : > { %v12019_v43 = vpack.c.bf16 %v5328_v53, %v5327_v52  ;;  %v5445_v51 = vld [vmem:[%s17899_s12 + $0x38] sm:$0xff]  ;;  %v5448_v52 = vld [vmem:[%s17899_s12 + $0x50] sm:$0xff] }
0x1659   : > { %v5444_v53 = vld [vmem:[%s17899_s12 + $0x30] sm:$0xff] }
0x165a   : > { %11986 = vmatpush1.bf16.msra.mxu1 %v11985_v58  ;;  %v5312_v58 = vld [vmem:[#allocation69 + $0x58] sm:$0xff] }
0x165b   : > { %11988 = vmatprep.subr.bf16.mxu1 %v11987_v22  ;;  %v12021_v61 = vpack.c.bf16 %v5312_v58, %v5311_v56  ;;  %v12023_v22 = vpack.c.bf16 %v5330_v60, %v5329_v59  ;;  %v5446_v56 = vld [vmem:[%s17899_s12 + $0x40] sm:$0xff]  ;;  %v5449_v58 = vld [vmem:[%s17899_s12 + $0x58] sm:$0xff] }
0x165c   : > { %v12067_v60 = vpack.c.bf16 %v5449_v58, %v5446_v56 }
0x165e   : > { %11990 = vmatpush1.bf16.msra.mxu1 %v11989_v55 }
0x165f   : > { %11992 = vmatprep.subr.bf16.mxu1 %v11991_v21 }
0x1662   : > { %11994 = vmatpush1.bf16.msra.mxu1 %v11993_v12 }
0x1663   : > { %11996 = vmatprep.subr.bf16.mxu1 %v11995_v57  ;;  %v5313_v57 = vld [vmem:[#allocation69 + $0x60] sm:$0xff] }
0x1664   : > { %v12025_v14 = vpack.c.bf16 %v5314_v13, %v5313_v57 }
0x1666   : > { %11998 = vmatpush1.bf16.msra.mxu1 %v11997_v15  ;;  %v5331_v15 = vld [vmem:[#allocation69 + $0xf0] sm:$0xff] }
0x16de   : > { %v5158_v44 = vpop.xlane.xlu0 %5157 }
0x16df   : > { %v5159_v6 = vmul.f32 0.0078125, %v5158_v44  ;;  %v12009_v44 = vpack.c.bf16 %v5306_v37, %v5305_v39 }
0x16e1   : > { %v17013_v46 = vsub.f32 %v5156_v16, %v5159_v6  ;;  %v5317_v16 = vld [vmem:[#allocation69 + $0x80] sm:$0xff]  ;;  %v12011_v6 = vpack.c.bf16 %v5324_v42, %v5323_v40 }
0x16e2   : > { %v11999_v18 = vpack.c.bf16 %v5318_v17, %v5317_v16  ;;  %v5332_v16 = vld [vmem:[#allocation69 + $0xf8] sm:$0xff] }
0x16e3   : > { %v5161_v47 = vmul.f32 %v17013_v46, %v17013_v46  ;;  %v12027_v17 = vpack.c.bf16 %v5332_v16, %v5331_v15  ;;  %v5460_v15 = vld [vmem:[%s17899_s12 + $0xb0] sm:$0xff] }
0x16e4   : > { %12000 = vmatprep.subr.bf16.mxu0 %v11999_v18  ;;  %v5316_v18 = vld [vmem:[#allocation69 + $0x78] sm:$0xff] }
0x16e5   : > { %5162 = vadd.xlane.f32.xlu1 %v5161_v47  ;;  %12002 = vmatpush3.bf16.msra.mxu0 %v12001_v29  ;;  %v5307_v47 = vld [vmem:[#allocation69 + $0x30] sm:$0xff]  ;;  %v12029_v23 = vpack.c.bf16 %v5316_v18, %v5315_v19  ;;  %v5458_v18 = vld [vmem:[%s17899_s12 + $0xa0] sm:$0xff] }
0x16e6   : > { %12004 = vmatprep.subr.bf16.mxu0 %v12003_v30  ;;  %v12013_v41 = vpack.c.bf16 %v5308_v1, %v5307_v47  ;;  %v5438_v47 = vld [vmem:[%s17899_s12] sm:$0xff]  ;;  %v5459_v19 = vld [vmem:[%s17899_s12 + $0xa8] sm:$0xff] }
0x16e9   : > { %12006 = vmatpush3.bf16.msra.mxu0 %v12005_v35 }
0x16ea   : > { %12008 = vmatprep.subr.bf16.mxu0 %v12007_v36  ;;  %v10514_v36 = vld [vmem:[#allocation58] ss:$0 sm:$0xff] }
0x16ed   : > { %12010 = vmatpush3.bf16.msra.mxu0 %v12009_v44  ;;  %v5439_v44 = vld [vmem:[%s17899_s12 + $0x8] sm:$0xff] }
0x16ee   : > { %12012 = vmatprep.subr.bf16.mxu0 %v12011_v6  ;;  %v5442_v6 = vld [vmem:[%s17899_s12 + $0x20] sm:$0xff] }
0x16ef   : > { %v12031_v1 = vpack.c.bf16 %v5442_v6, %v5439_v44  ;;  %v5471_v44 = vld [vmem:[%s17899_s12 + $0x108] sm:$0xff]  ;;  %v5470_v6 = vld [vmem:[%s17899_s12 + $0x100] sm:$0xff] }
0x16f1   : > { %12014 = vmatpush3.bf16.msra.mxu0 %v12013_v41  ;;  %v5443_v41 = vld [vmem:[%s17899_s12 + $0x28] sm:$0xff]  ;;  %12032 = vmatprep.subr.bf16.mxu1 %v12031_v1  ;;  %v5473_v1 = vld [vmem:[%s17899_s12 + $0x118] sm:$0xff] }
0x16f2   : > { %12016 = vmatprep.subr.bf16.mxu0 %v12015_v50  ;;  %v12033_v50 = vpack.c.bf16 %v5441_v48, %v5438_v47  ;;  %v12064_v26 = vpack.c.bf16 %v5443_v41, %v5440_v49  ;;  %v5475_v48 = vld [vmem:[%s17899_s12 + $0x128] sm:$0xff]  ;;  %v5478_v49 = vld [vmem:[%s17899_s12 + $0x140] sm:$0xff]  ;;  %v12079_v41 = vpack.c.bf16 %v5473_v1, %v5470_v6 }
0x16f5   : > { %12018 = vmatpush3.bf16.msra.mxu0 %v12017_v54  ;;  %v12035_v54 = vpack.c.bf16 %v5448_v52, %v5445_v51  ;;  %v5477_v51 = vld [vmem:[%s17899_s12 + $0x138] sm:$0xff]  ;;  %v5476_v52 = vld [vmem:[%s17899_s12 + $0x130] sm:$0xff] }
0x16f6   : > { %12020 = vmatprep.subr.bf16.mxu0 %v12019_v43  ;;  %v5447_v43 = vld [vmem:[%s17899_s12 + $0x48] sm:$0xff] }
0x16f7   : > { %v12037_v59 = vpack.c.bf16 %v5447_v43, %v5444_v53  ;;  %v5479_v53 = vld [vmem:[%s17899_s12 + $0x148] sm:$0xff]  ;;  %v5484_v43 = vld [vmem:[%s17899_s12 + $0x170] sm:$0xff] }
0x16f8   : > { %v12082_v58 = vpack.c.bf16 %v5479_v53, %v5476_v52  ;;  %v5680_v52 = vld [vmem:[#allocation84 + $0x30] sm:$0xff]  ;;  %v5681_v53 = vld [vmem:[#allocation84 + $0x38] sm:$0xff] }
0x16f9   : > { %12022 = vmatpush3.bf16.msra.mxu0 %v12021_v61  ;;  %v5451_v61 = vld [vmem:[%s17899_s12 + $0x68] sm:$0xff] }
0x16fa   : > { %12024 = vmatprep.subr.bf16.mxu0 %v12023_v22  ;;  %v5454_v22 = vld [vmem:[%s17899_s12 + $0x80] sm:$0xff] }
0x16fd   : > { %12026 = vmatpush3.bf16.msra.mxu0 %v12025_v14  ;;  %v5457_v14 = vld [vmem:[%s17899_s12 + $0x98] sm:$0xff] }
0x16fe   : > { %12028 = vmatprep.subr.bf16.mxu0 %v12027_v17  ;;  %v12043_v16 = vpack.c.bf16 %v5460_v15, %v5457_v14  ;;  %v5456_v17 = vld [vmem:[%s17899_s12 + $0x90] sm:$0xff] }
0x1701   : > { %12030 = vmatpush3.bf16.msra.mxu0 %v12029_v23  ;;  %v12045_v23 = vpack.c.bf16 %v5459_v19, %v5456_v17 }
0x1702   : > { %12063 = vmatprep.subr.bf16.mxu0 %v15426_v4 }
0x1772   : > { %v5163_v62 = vpop.xlane.xlu1 %5162 }
0x1773   : > { %v5164_v27 = vmul.f32 0.0078125, %v5163_v62  ;;  %v5450_v62 = vld [vmem:[%s17899_s12 + $0x60] sm:$0xff] }
0x1775   : > { %v5165_v55 = vadd.f32 1e-05, %v5164_v27  ;;  %v12039_v27 = vpack.c.bf16 %v5454_v22, %v5451_v61  ;;  %v5483_v61 = vld [vmem:[%s17899_s12 + $0x168] sm:$0xff]  ;;  %v5482_v22 = vld [vmem:[%s17899_s12 + $0x160] sm:$0xff] }
0x1777   : > { %13297 = vrsqrt.f32 %v5165_v55  ;;  %v5453_v55 = vld [vmem:[%s17899_s12 + $0x78] sm:$0xff] }
0x1781   : > { %v13298_v21 = vpop.eup %13297 }
0x1782   : > { %v5167_v8 = vmul.f32 %v13298_v21, %v17013_v46  ;;  %v5216_v46 = vld [vmem:[#allocation57] sm:$0x3] }
0x1783   : > { %v5221_v25 = vrot.slane %v5216_v46, %v16899_v5  ;;  %v5225_v28 = vrot.slane %v5216_v46, %v16904_v7  ;;  %v5452_v21 = vld [vmem:[%s17899_s12 + $0x70] sm:$0xff]  ;;  %v5461_v46 = vld [vmem:[%s17899_s12 + $0xb8] sm:$0xff] }
0x1784   : > { %v5175_v10 = vmul.f32 %v10512_v45, %v5167_v8  ;;  %v5455_v45 = vld [vmem:[%s17899_s12 + $0x88] sm:$0xff]  ;;  %v12041_v8 = vpack.c.bf16 %v5453_v55, %v5450_v62  ;;  %v5485_v62 = vld [vmem:[%s17899_s12 + $0x178] sm:$0xff] }
0x1785   : > { %v12085_v55 = vpack.c.bf16 %v5485_v62, %v5482_v22  ;;  %v5686_v22 = vld [vmem:[#allocation84 + $0x60] sm:$0xff]  ;;  %v5687_v62 = vld [vmem:[#allocation84 + $0x68] sm:$0xff] }
0x1786   : > { %v5183_v12 = vadd.f32 %v10513_v9, %v5175_v10  ;;  %v12070_v9 = vpack.c.bf16 %v5455_v45, %v5452_v21 }
0x1788   : > { %5293 = vmatmul.mubr.f32.vlgmr.msra.gmra.mrb[20].mxu1 %v5183_v12 }
0x1789   : > { %5567 = vmatprep.mubr.f32.mxu1 %v15428_v11  ;;  %12034 = vmatpush1.bf16.msra.mxu1 %v12033_v50  ;;  %v12055_v50 = vpack.c.bf16 %v5478_v49, %v5475_v48 }
0x178a   : > { %12036 = vmatprep.subr.bf16.mxu1 %v12035_v54  ;;  %v5481_v54 = vld [vmem:[%s17899_s12 + $0x158] sm:$0xff] }
0x178d   : > { %12038 = vmatpush1.bf16.msra.mxu1 %v12037_v59  ;;  %v12059_v59 = vpack.c.bf16 %v5484_v43, %v5481_v54  ;;  %v12097_v54 = vpack.c.bf16 %v5681_v53, %v5680_v52  ;;  %v5682_v43 = vld [vmem:[#allocation84 + $0x40] sm:$0xff] }
0x178e   : > { %12040 = vmatprep.subr.bf16.mxu1 %v12039_v27 }
0x1791   : > { %12042 = vmatpush1.bf16.msra.mxu1 %v12041_v8 }
0x1792   : > { %12044 = vmatprep.subr.bf16.mxu1 %v12043_v16  ;;  %v5486_v16 = vld [vmem:[%s17900_s4] sm:$0x7]  ;;  %s3255_s4 = scalar_lea.vmem %s15837_s1, %s10580_s8 }
0x1793   : > { %v5491_v17 = vrot.slane %v5486_v16, %v16899_v5  ;;  %v5495_v19 = vrot.slane %v5486_v16, %v16904_v7 }
0x1795   : > { %12046 = vmatpush1.bf16.msra.mxu1 %v12045_v23 }
0x185b   : > { %v5294_v29 = vpop.f32.mrb[20].mxu1 }
0x185c   : > { %v5295_v30 = vadd.f32 %v5294_v29, %v5221_v25  ;;  %v5296_v31 = vpop.f32.mrb[21].mxu1  ;;  %v12073_v25 = vpack.c.bf16 %v5461_v46, %v5458_v18  ;;  %v5466_v29 = vld [vmem:[%s17899_s12 + $0xe0] sm:$0xff] }
0x185d   : > { %v5297_v32 = vadd.f32 %v5296_v31, %v5225_v28  ;;  %v5463_v28 = vld [vmem:[%s17899_s12 + $0xc8] sm:$0xff]  ;;  %v5462_v31 = vld [vmem:[%s17899_s12 + $0xc0] sm:$0xff] }
0x185e   : > { %v5299_v34 = vmax.f32 %v5295_v30, 0.0  ;;  %v12047_v30 = vpack.c.bf16 %v5466_v29, %v5463_v28 }
0x185f   : > { %v5300_v33 = vmax.f32 %v5297_v32, 0.0  ;;  %v5465_v32 = vld [vmem:[%s17899_s12 + $0xd8] sm:$0xff] }
0x1860   : > { %12048 = vmatprep.subr.bf16.mxu1 %v12047_v30 }
0x1861   : > { %5404 = vmatprep.mubr.f32.mxu0 %v5300_v33  ;;  %v5464_v33 = vld [vmem:[%s17899_s12 + $0xd0] sm:$0xff] }
0x1862   : > { %5405 = vmatmul.mubr.f32.vlgmr.msra.gmra.mrb[18].mxu0 %v5299_v34  ;;  %v12049_v34 = vpack.c.bf16 %v5465_v32, %v5462_v31  ;;  %v5674_v31 = vld [vmem:[#allocation84] sm:$0xff]  ;;  %v5675_v32 = vld [vmem:[#allocation84 + $0x8] sm:$0xff] }
0x1863   : > { %11247 = vmatprep.mubr.msk.f32.mxu0 %vm15427_vm0, %v15428_v11  ;;  %12065 = vmatpush3.bf16.msra.mxu0 %v12064_v26  ;;  %v5474_v26 = vld [vmem:[%s17899_s12 + $0x120] sm:$0xff] }
0x1864   : > { %12066 = vmatprep.subr.bf16.mxu0 %v15426_v4  ;;  %12050 = vmatpush1.bf16.msra.mxu1 %v12049_v34  ;;  %v12057_v56 = vpack.c.bf16 %v5477_v51, %v5474_v26  ;;  %v12088_v34 = vpack.c.bf16 %v5675_v32, %v5674_v31  ;;  %v5917_v31 = vld [vmem:[#allocation93 + $0x10] sm:$0xff]  ;;  %v5918_v32 = vld [vmem:[#allocation93 + $0x18] sm:$0xff] }
0x1867   : > { %12068 = vmatpush3.bf16.msra.mxu0 %v12067_v60  ;;  %v5480_v60 = vld [vmem:[%s17899_s12 + $0x150] sm:$0xff] }
0x1868   : > { %12069 = vmatprep.subr.bf16.mxu0 %v15426_v4  ;;  %v12061_v27 = vpack.c.bf16 %v5483_v61, %v5480_v60  ;;  %v5685_v60 = vld [vmem:[#allocation84 + $0x58] sm:$0xff] }
0x186b   : > { %12071 = vmatpush3.bf16.msra.mxu0 %v12070_v9 }
0x186c   : > { %12072 = vmatprep.subr.bf16.mxu0 %v15426_v4 }
0x186f   : > { %12074 = vmatpush3.bf16.msra.mxu0 %v12073_v25 }
0x1870   : > { %12075 = vmatprep.subr.bf16.mxu0 %v15426_v4 }
0x1935   : > { %v10751_v35 = vpop.f32.mrb[18].mxu0 }
0x1936   : > { %v10752_v39 = vpop.f32.mrb[19].mxu0 }
0x1937   : > { %v10753_v37 = vadd.f32 %v10752_v39, %v10751_v35  ;;  %v5467_v35 = vld [vmem:[%s17899_s12 + $0xe8] sm:$0xff]  ;;  %v5472_v39 = vld [vmem:[%s17899_s12 + $0x110] sm:$0xff] }
0x1939   : > { %v5407_v40 = vadd.f32 %v10753_v37, %v10514_v36  ;;  %v5469_v36 = vld [vmem:[%s17899_s12 + $0xf8] sm:$0xff]  ;;  %v12076_v37 = vpack.c.bf16 %v5467_v35, %v5464_v33  ;;  %v5677_v35 = vld [vmem:[#allocation84 + $0x18] sm:$0xff] }
0x193a   : > { %v5676_v33 = vld [vmem:[#allocation84 + $0x10] sm:$0xff] }
0x193b   : > { %v5410_v42 = vadd.f32 %v5407_v40, %v5183_v12  ;;  %v12051_v40 = vpack.c.bf16 %v5472_v39, %v5469_v36  ;;  %12077 = vmatpush3.bf16.msra.mxu0 %v12076_v37  ;;  %v12091_v36 = vpack.c.bf16 %v5677_v35, %v5676_v33  ;;  %v5678_v39 = vld [vmem:[#allocation84 + $0x20] sm:$0xff]  ;;  %v5679_v37 = vld [vmem:[#allocation84 + $0x28] sm:$0xff] }
0x193c   : > { %12078 = vmatprep.subr.bf16.mxu0 %v15426_v4  ;;  %v5919_v35 = vld [vmem:[#allocation93 + $0x20] sm:$0xff] }
0x193d   : > { %5411 = vadd.xlane.f32.xlu0 %v5410_v42  ;;  %12052 = vmatprep.subr.bf16.mxu1 %v12051_v40  ;;  %v12094_v40 = vpack.c.bf16 %v5679_v37, %v5678_v39 }
0x193f   : > { %12080 = vmatpush3.bf16.msra.mxu0 %v12079_v41 }
0x1940   : > { %12081 = vmatprep.subr.bf16.mxu0 %v15426_v4 }
0x1943   : > { %12083 = vmatpush3.bf16.msra.mxu0 %v12082_v58 }
0x1944   : > { %12084 = vmatprep.subr.bf16.mxu0 %v15426_v4 }
0x1947   : > { %12086 = vmatpush3.bf16.msra.mxu0 %v12085_v55  ;;  %v5688_v55 = vld [vmem:[#allocation84 + $0x70] sm:$0xff] }
0x1948   : > { %12111 = vmatprep.subr.bf16.mxu0 %v15426_v4 }
0x19ca   : > { %v5412_v10 = vpop.xlane.xlu0 %5411 }
0x19cb   : > { %v5413_v12 = vmul.f32 0.0078125, %v5412_v10  ;;  %v10515_v10 = vld [vmem:[#allocation66] ss:$0 sm:$0xff] }
0x19cd   : > { %v17045_v57 = vsub.f32 %v5410_v42, %v5413_v12  ;;  %v5468_v42 = vld [vmem:[%s17899_s12 + $0xf0] sm:$0xff] }
0x19ce   : > { %v12053_v47 = vpack.c.bf16 %v5471_v44, %v5468_v42  ;;  %v5499_v44 = vrot.slane %v5486_v16, %v16890_v0 }
0x19cf   : > { %v5415_v13 = vmul.f32 %v17045_v57, %v17045_v57 }
0x19d0   : > { %12054 = vmatpush1.bf16.msra.mxu1 %v12053_v47 }
0x19d1   : > { %5416 = vadd.xlane.f32.xlu1 %v5415_v13  ;;  %12056 = vmatprep.subr.bf16.mxu1 %v12055_v50  ;;  %v10516_v13 = vld [vmem:[#allocation64] ss:$0 sm:$0xff] }
0x19d4   : > { %12058 = vmatpush1.bf16.msra.mxu1 %v12057_v56  ;;  %v5683_v56 = vld [vmem:[#allocation84 + $0x48] sm:$0xff] }
0x19d5   : > { %12060 = vmatprep.subr.bf16.mxu1 %v12059_v59  ;;  %v12100_v58 = vpack.c.bf16 %v5683_v56, %v5682_v43  ;;  %v5684_v59 = vld [vmem:[#allocation84 + $0x50] sm:$0xff]  ;;  %v5930_v43 = vld [vmem:[#allocation93 + $0x78] sm:$0xff] }
0x19d6   : > { %v12103_v61 = vpack.c.bf16 %v5685_v60, %v5684_v59 }
0x19d8   : > { %12062 = vmatpush1.bf16.msra.mxu1 %v12061_v27  ;;  %v12106_v27 = vpack.c.bf16 %v5687_v62, %v5686_v22  ;;  %v6157_v22 = vld [vmem:[#allocation102 + $0x8] sm:$0xff] }
0x19d9   : > { %12087 = vmatprep.subr.bf16.mxu1 %v15426_v4  ;;  %v10524_v62 = vld [vmem:[#allocation87] ss:$0 sm:$0xff] }
0x1a5e   : > { %v5417_v21 = vpop.xlane.xlu1 %5416 }
0x1a5f   : > { %v5418_v45 = vmul.f32 0.0078125, %v5417_v21  ;;  %v5689_v21 = vld [vmem:[#allocation84 + $0x78] sm:$0xff] }
0x1a61   : > { %v5419_v8 = vadd.f32 1e-05, %v5418_v45  ;;  %v12109_v45 = vpack.c.bf16 %v5689_v21, %v5688_v55  ;;  %v6158_v21 = vld [vmem:[#allocation102 + $0x10] sm:$0xff] }
0x1a63   : > { %13299 = vrsqrt.f32 %v5419_v8 }
0x1a6d   : > { %v13300_v9 = vpop.eup %13299 }
0x1a6e   : > { %v5421_v12 = vmul.f32 %v13300_v9, %v17045_v57 }
0x1a70   : > { %v5429_v14 = vmul.f32 %v10515_v10, %v5421_v12 }
0x1a72   : > { %v17086_v15 = vadd.f32 %v10516_v13, %v5429_v14 }
0x1a74   : > { %5568 = vmatmul.mubr.f32.vlgmr.msra.gmra.mrb[22].mxu1 %v17086_v15  ;;  %11248 = vmatmul.mubr.f32.vlgmr.msra.gmra.mrb[20].mxu0 %v17086_v15 }
0x1a75   : > { %11282 = vmatprep.mubr.msk.f32.mxu1 %vm15427_vm0, %v15428_v11  ;;  %11317 = vmatprep.mubr.msk.f32.mxu0 %vm15427_vm0, %v15428_v11 }
0x1a76   : > { %12089 = vmatpush3.bf16.msra.mxu1 %v12088_v34  ;;  %v12139_v34 = vpack.c.bf16 %v5918_v32, %v5917_v31  ;;  %v6171_v31 = vld [vmem:[#allocation102 + $0x78] sm:$0xff] }
0x1a77   : > { %12090 = vmatprep.subr.bf16.mxu1 %v15426_v4 }
0x1a7a   : > { %12092 = vmatpush3.bf16.msra.mxu1 %v12091_v36  ;;  %v5920_v36 = vld [vmem:[#allocation93 + $0x28] sm:$0xff] }
0x1a7b   : > { %12093 = vmatprep.subr.bf16.mxu1 %v15426_v4  ;;  %v12142_v37 = vpack.c.bf16 %v5920_v36, %v5919_v35 }
0x1a7e   : > { %12095 = vmatpush3.bf16.msra.mxu1 %v12094_v40  ;;  %v5921_v40 = vld [vmem:[#allocation93 + $0x30] sm:$0xff] }
0x1a7f   : > { %12096 = vmatprep.subr.bf16.mxu1 %v15426_v4 }
0x1a82   : > { %12098 = vmatpush3.bf16.msra.mxu1 %v12097_v54  ;;  %v5929_v54 = vld [vmem:[#allocation93 + $0x70] sm:$0xff] }
0x1a83   : > { %12099 = vmatprep.subr.bf16.mxu1 %v15426_v4  ;;  %v12157_v59 = vpack.c.bf16 %v5930_v43, %v5929_v54  ;;  %v5796_v54 = vld [vmem:[%s17901_s5 + $0x8] sm:$0xff]  ;;  %v5797_v43 = vld [vmem:[%s17901_s5 + $0x10] sm:$0xff] }
0x1a86   : > { %12101 = vmatpush3.bf16.msra.mxu1 %v12100_v58  ;;  %v10523_v58 = vld [vmem:[#allocation88] ss:$0 sm:$0xff] }
0x1a87   : > { %12102 = vmatprep.subr.bf16.mxu1 %v15426_v4 }
0x1a8a   : > { %12104 = vmatpush3.bf16.msra.mxu1 %v12103_v61  ;;  %v6156_v61 = vld [vmem:[#allocation102] sm:$0xff] }
0x1a8b   : > { %12105 = vmatprep.subr.bf16.mxu1 %v15426_v4 }
0x1a8e   : > { %12107 = vmatpush3.bf16.msra.mxu1 %v12106_v27  ;;  %v12184_v27 = vpack.c.bf16 %v6157_v22, %v6156_v61  ;;  %v5800_v61 = vld [vmem:[%s17901_s5 + $0x28] sm:$0xff] }
0x1a8f   : > { %12108 = vmatprep.subr.bf16.mxu1 %v15426_v4 }
0x1a92   : > { %12110 = vmatpush3.bf16.msra.mxu1 %v12109_v45  ;;  %v6159_v45 = vld [vmem:[#allocation102 + $0x18] sm:$0xff] }
0x1a93   : > { %12135 = vmatprep.subr.bf16.mxu1 %v15426_v4 }
0x1b47   : > { %v5569_v57 = vpop.f32.mrb[22].mxu1  ;;  %v5640_v18 = vpop.f32.mrb[20].mxu0 }
0x1b48   : > { %v5570_v23 = vadd.f32 %v5569_v57, %v5491_v17  ;;  %v5571_v46 = vpop.f32.mrb[23].mxu1  ;;  %v11249_v25 = vpop.f32.mrb[21].mxu0  ;;  %v5641_v48 = vadd.f32 %v5640_v18, %v5499_v44  ;;  %v5915_v18 = vld [vmem:[#allocation93] sm:$0xff] }
0x1b49   : > { %v5572_v29 = vadd.f32 %v5571_v46, %v5495_v19  ;;  %v10517_v19 = vld [vmem:[#allocation79] ss:$0 sm:$0xff]  ;;  %v10518_v46 = vld [vmem:[#allocation78] ss:$0 sm:$0xff] }
0x1b4a   : > { %v5644_v28 = vmax.f32 %v5570_v23, 0.0  ;;  %v5646_v26 = vmax.f32 %v5641_v48, 0.0  ;;  %v5916_v23 = vld [vmem:[#allocation93 + $0x8] sm:$0xff]  ;;  %v5925_v48 = vld [vmem:[#allocation93 + $0x50] sm:$0xff] }
0x1b4b   : > { %v5645_v30 = vmax.f32 %v5572_v29, 0.0 }
0x1b4c   : > { %5647 = vadd.xlane.f32.xlu0 %v5644_v28 }
0x1b50   : > { %5888 = vadd.xlane.f32.xlu0 %v5645_v30 }
0x1bd9   : > { %v5648_v42 = vpop.xlane.xlu0 %5647 }
0x1bda   : > { %v5649_v6 = vmul.f32 0.0078125, %v5648_v42  ;;  %v5922_v42 = vld [vmem:[#allocation93 + $0x38] sm:$0xff] }
0x1bdb   : > { %v12145_v44 = vpack.c.bf16 %v5922_v42, %v5921_v40  ;;  %v10530_v40 = vld [vmem:[#allocation96] ss:$0 sm:$0xff] }
0x1bdc   : > { %v5650_v47 = vsub.f32 %v5644_v28, %v5649_v6  ;;  %v12136_v28 = vpack.c.bf16 %v5916_v23, %v5915_v18  ;;  %v5923_v6 = vld [vmem:[#allocation93 + $0x40] sm:$0xff] }
0x1bdd   : > { %v5889_v1 = vpop.xlane.xlu0 %5888  ;;  %v6166_v18 = vld [vmem:[#allocation102 + $0x50] sm:$0xff]  ;;  %v6167_v23 = vld [vmem:[#allocation102 + $0x58] sm:$0xff] }
0x1bde   : > { %v5890_v49 = vmul.f32 0.0078125, %v5889_v1  ;;  %v5651_v41 = vmul.f32 %v5650_v47, %v5650_v47 }
0x1be0   : > { %v17101_v50 = vsub.f32 %v5645_v30, %v5890_v49  ;;  %5652 = vadd.xlane.f32.xlu1 %v5651_v41  ;;  %v5926_v49 = vld [vmem:[#allocation93 + $0x58] sm:$0xff] }
0x1be1   : > { %v12151_v41 = vpack.c.bf16 %v5926_v49, %v5925_v48 }
0x1be2   : > { %v5892_v51 = vmul.f32 %v17101_v50, %v17101_v50 }
0x1be4   : > { %6129 = vadd.xlane.f32.xlu1 %v5646_v26  ;;  %5893 = vadd.xlane.f32.xlu0 %v5892_v51  ;;  %v5928_v51 = vld [vmem:[#allocation93 + $0x68] sm:$0xff] }
0x1c6d   : > { %v5653_v8 = vpop.xlane.xlu1 %5652 }
0x1c6e   : > { %v5654_v9 = vmul.f32 0.0078125, %v5653_v8  ;;  %v12187_v8 = vpack.c.bf16 %v6159_v45, %v6158_v21  ;;  %v10531_v21 = vld [vmem:[#allocation94] ss:$0 sm:$0xff] }
0x1c70   : > { %v5655_v10 = vadd.f32 1e-05, %v5654_v9  ;;  %v6161_v9 = vld [vmem:[#allocation102 + $0x28] sm:$0xff] }
0x1c71   : > { %v6130_v12 = vpop.xlane.xlu1 %6129  ;;  %v5894_v29 = vpop.xlane.xlu0 %5893 }
0x1c72   : > { %13301 = vrsqrt.f32 %v5655_v10  ;;  %v6131_v13 = vmul.f32 0.0078125, %v6130_v12  ;;  %v5895_v33 = vmul.f32 0.0078125, %v5894_v29  ;;  %v6162_v12 = vld [vmem:[#allocation102 + $0x30] sm:$0xff] }
0x1c74   : > { %v17110_v14 = vsub.f32 %v5646_v26, %v6131_v13  ;;  %v5896_v39 = vadd.f32 1e-05, %v5895_v33  ;;  %v5927_v26 = vld [vmem:[#allocation93 + $0x60] sm:$0xff] }
0x1c75   : > { %v12154_v53 = vpack.c.bf16 %v5928_v51, %v5927_v26  ;;  %v6163_v13 = vld [vmem:[#allocation102 + $0x38] sm:$0xff] }
0x1c76   : > { %v6133_v16 = vmul.f32 %v17110_v14, %v17110_v14  ;;  %13303 = vrsqrt.f32 %v5896_v39  ;;  %v10529_v39 = vld [vmem:[#allocation97] ss:$0 sm:$0xff] }
0x1c78   : > { %6134 = vadd.xlane.f32.xlu1 %v6133_v16  ;;  %v12193_v16 = vpack.c.bf16 %v6163_v13, %v6162_v12  ;;  %v5801_v12 = vld [vmem:[%s17901_s5 + $0x30] sm:$0xff]  ;;  %v5802_v13 = vld [vmem:[%s17901_s5 + $0x38] sm:$0xff] }
0x1c7c   : > { %v13302_v17 = vpop.eup %13301 }
0x1c7d   : > { %v5657_v57 = vmul.f32 %v13302_v17, %v5650_v47  ;;  %v5924_v47 = vld [vmem:[#allocation93 + $0x48] sm:$0xff] }
0x1c7e   : > { %v12148_v1 = vpack.c.bf16 %v5924_v47, %v5923_v6  ;;  %v6164_v17 = vld [vmem:[#allocation102 + $0x40] sm:$0xff] }
0x1c7f   : > { %v5665_v25 = vmul.f32 %v10517_v19, %v5657_v57  ;;  %v6165_v19 = vld [vmem:[#allocation102 + $0x48] sm:$0xff]  ;;  %v10519_v6 = vld [vmem:[#allocation76] ss:$0 sm:$0xff] }
0x1c80   : > { %v13304_v52 = vpop.eup %13303  ;;  %v12196_v57 = vpack.c.bf16 %v6165_v19, %v6164_v17  ;;  %v5803_v17 = vld [vmem:[%s17901_s5 + $0x40] sm:$0xff]  ;;  %v5804_v19 = vld [vmem:[%s17901_s5 + $0x48] sm:$0xff] }
0x1c81   : > { %v5673_v30 = vadd.f32 %v10518_v46, %v5665_v25  ;;  %v5898_v56 = vmul.f32 %v13304_v52, %v17101_v50  ;;  %v6160_v50 = vld [vmem:[#allocation102 + $0x20] sm:$0xff]  ;;  %v12199_v46 = vpack.c.bf16 %v6167_v23, %v6166_v18  ;;  %v5805_v18 = vld [vmem:[%s17901_s5 + $0x50] sm:$0xff] }
0x1c82   : > { %v12190_v10 = vpack.c.bf16 %v6161_v9, %v6160_v50  ;;  %v6168_v25 = vld [vmem:[#allocation102 + $0x60] sm:$0xff] }
0x1c83   : > { %11283 = vmatmul.mubr.f32.vlgmr.msra.gmra.mrb[24].mxu1 %v5673_v30  ;;  %v5906_v60 = vmul.f32 %v10523_v58, %v5898_v56  ;;  %v6170_v30 = vld [vmem:[#allocation102 + $0x70] sm:$0xff]  ;;  %v5798_v58 = vld [vmem:[%s17901_s5 + $0x18] sm:$0xff] }
0x1c84   : > { %12137 = vmatpush3.bf16.msra.mxu1 %v12136_v28  ;;  %11352 = vmatprep.mubr.msk.f32.mxu1 %vm15427_vm0, %v15428_v11  ;;  %v6169_v28 = vld [vmem:[#allocation102 + $0x68] sm:$0xff]  ;;  %v12205_v32 = vpack.c.bf16 %v6171_v31, %v6170_v30  ;;  %v5806_v23 = vld [vmem:[%s17901_s5 + $0x58] sm:$0xff]  ;;  %v5809_v31 = vld [vmem:[%s17901_s5 + $0x70] sm:$0xff] }
0x1c85   : > { %12138 = vmatprep.subr.bf16.mxu1 %v15426_v4  ;;  %v5914_v55 = vadd.f32 %v10524_v62, %v5906_v60  ;;  %v12202_v29 = vpack.c.bf16 %v6169_v28, %v6168_v25  ;;  %v5799_v60 = vld [vmem:[%s17901_s5 + $0x20] sm:$0xff]  ;;  %v5808_v28 = vld [vmem:[%s17901_s5 + $0x68] sm:$0xff] }
0x1c86   : > { %v12118_v22 = vpack.c.bf16 %v5800_v61, %v5799_v60  ;;  %v5807_v25 = vld [vmem:[%s17901_s5 + $0x60] sm:$0xff]  ;;  %v6042_v61 = vld [vmem:[%s17902_s6 + $0x30] sm:$0xff] }
0x1c87   : > { %v12130_v30 = vpack.c.bf16 %v5808_v28, %v5807_v25  ;;  %v6277_v28 = vld [vmem:[%s17903_s15] sm:$0xff] }
0x1c88   : > { %12140 = vmatpush3.bf16.msra.mxu1 %v12139_v34 }
0x1c89   : > { %12141 = vmatprep.subr.bf16.mxu1 %v15426_v4 }
0x1c8c   : > { %12143 = vmatpush3.bf16.msra.mxu1 %v12142_v37 }
0x1c8d   : > { %12144 = vmatprep.subr.bf16.mxu1 %v15426_v4 }
0x1c90   : > { %12146 = vmatpush3.bf16.msra.mxu1 %v12145_v44 }
0x1c91   : > { %12147 = vmatprep.subr.bf16.mxu1 %v15426_v4 }
0x1c94   : > { %12149 = vmatpush3.bf16.msra.mxu1 %v12148_v1 }
0x1c95   : > { %12150 = vmatprep.subr.bf16.mxu1 %v15426_v4 }
0x1c98   : > { %12152 = vmatpush3.bf16.msra.mxu1 %v12151_v41 }
0x1c99   : > { %12153 = vmatprep.subr.bf16.mxu1 %v15426_v4 }
0x1c9c   : > { %12155 = vmatpush3.bf16.msra.mxu1 %v12154_v53  ;;  %v5795_v53 = vld [vmem:[%s17901_s5] sm:$0xff] }
0x1c9d   : > { %12156 = vmatprep.subr.bf16.mxu1 %v15426_v4  ;;  %v12112_v56 = vpack.c.bf16 %v5796_v54, %v5795_v53  ;;  %v6038_v54 = vld [vmem:[%s17902_s6 + $0x10] sm:$0xff] }
0x1c9f   : > { %12113 = vmatpush3.bf16.msra.mxu0 %v12112_v56 }
0x1ca0   : > { %12158 = vmatpush3.bf16.msra.mxu1 %v12157_v59  ;;  %v12115_v59 = vpack.c.bf16 %v5798_v58, %v5797_v43  ;;  %12114 = vmatprep.subr.bf16.mxu0 %v15426_v4  ;;  %v6039_v43 = vld [vmem:[%s17902_s6 + $0x18] sm:$0xff]  ;;  %v6040_v58 = vld [vmem:[%s17902_s6 + $0x20] sm:$0xff] }
0x1ca1   : > { %12183 = vmatprep.subr.bf16.mxu1 %v15426_v4  ;;  %v12163_v56 = vpack.c.bf16 %v6039_v43, %v6038_v54  ;;  %v6291_v54 = vld [vmem:[%s17903_s15 + $0x70] sm:$0xff]  ;;  %v6292_v43 = vld [vmem:[%s17903_s15 + $0x78] sm:$0xff] }
0x1ca3   : > { %11353 = vmatmul.mubr.f32.vlgmr.msra.gmra.mrb[26].mxu1 %v5914_v55  ;;  %12116 = vmatpush3.bf16.msra.mxu0 %v12115_v59  ;;  %v6041_v59 = vld [vmem:[%s17902_s6 + $0x28] sm:$0xff] }
0x1ca4   : > { %12185 = vmatpush3.bf16.msra.mxu1 %v12184_v27  ;;  %11422 = vmatprep.mubr.msk.f32.mxu1 %vm15427_vm0, %v15428_v11  ;;  %v12166_v60 = vpack.c.bf16 %v6041_v59, %v6040_v58 }
0x1ca5   : > { %12186 = vmatprep.subr.bf16.mxu1 %v15426_v4  ;;  %12117 = vmatprep.subr.bf16.mxu0 %v15426_v4 }
0x1ca7   : > { %12119 = vmatpush3.bf16.msra.mxu0 %v12118_v22  ;;  %v6043_v22 = vld [vmem:[%s17902_s6 + $0x38] sm:$0xff] }
0x1ca8   : > { %12188 = vmatpush3.bf16.msra.mxu1 %v12187_v8  ;;  %12120 = vmatprep.subr.bf16.mxu0 %v15426_v4 }
0x1ca9   : > { %12189 = vmatprep.subr.bf16.mxu1 %v15426_v4 }
0x1cac   : > { %12191 = vmatpush3.bf16.msra.mxu1 %v12190_v10 }
0x1cad   : > { %12192 = vmatprep.subr.bf16.mxu1 %v15426_v4 }
0x1cb0   : > { %12194 = vmatpush3.bf16.msra.mxu1 %v12193_v16  ;;  %v12121_v16 = vpack.c.bf16 %v5802_v13, %v5801_v12  ;;  %v6048_v13 = vld [vmem:[%s17902_s6 + $0x60] sm:$0xff] }
0x1cb1   : > { %12195 = vmatprep.subr.bf16.mxu1 %v15426_v4 }
0x1cb2   : > { %12122 = vmatpush3.bf16.msra.mxu0 %v12121_v16  ;;  %v6049_v16 = vld [vmem:[%s17902_s6 + $0x68] sm:$0xff] }
0x1cb3   : > { %12123 = vmatprep.subr.bf16.mxu0 %v15426_v4 }
0x1cb4   : > { %12197 = vmatpush3.bf16.msra.mxu1 %v12196_v57  ;;  %v12124_v57 = vpack.c.bf16 %v5804_v19, %v5803_v17  ;;  %v12178_v17 = vpack.c.bf16 %v6049_v16, %v6048_v13  ;;  %v6050_v19 = vld [vmem:[%s17902_s6 + $0x70] sm:$0xff] }
0x1cb5   : > { %12198 = vmatprep.subr.bf16.mxu1 %v15426_v4 }
0x1cb6   : > { %12125 = vmatpush3.bf16.msra.mxu0 %v12124_v57  ;;  %v6051_v57 = vld [vmem:[%s17902_s6 + $0x78] sm:$0xff] }
0x1cb7   : > { %12126 = vmatprep.subr.bf16.mxu0 %v15426_v4 }
0x1cb8   : > { %12200 = vmatpush3.bf16.msra.mxu1 %v12199_v46  ;;  %v12127_v46 = vpack.c.bf16 %v5806_v23, %v5805_v18  ;;  %v12181_v23 = vpack.c.bf16 %v6051_v57, %v6050_v19  ;;  %v10538_v19 = vsel %vm6407_vm3, 1.0, %v15428_v11 }
0x1cb9   : > { %12201 = vmatprep.subr.bf16.mxu1 %v15426_v4 }
0x1cba   : > { %12128 = vmatpush3.bf16.msra.mxu0 %v12127_v46  ;;  %v10526_v46 = vld [vmem:[#allocation91] ss:$0 sm:$0xff] }
0x1cbb   : > { %12129 = vmatprep.subr.bf16.mxu0 %v15426_v4 }
0x1cbc   : > { %12203 = vmatpush3.bf16.msra.mxu1 %v12202_v29 }
0x1cbd   : > { %12204 = vmatprep.subr.bf16.mxu1 %v15426_v4 }
0x1cbe   : > { %12131 = vmatpush3.bf16.msra.mxu0 %v12130_v30  ;;  %v10527_v30 = vld [vmem:[#allocation90] ss:$0 sm:$0xff] }
0x1cbf   : > { %12132 = vmatprep.subr.bf16.mxu0 %v15426_v4 }
0x1cc0   : > { %12206 = vmatpush3.bf16.msra.mxu1 %v12205_v32  ;;  %v5810_v32 = vld [vmem:[%s17901_s5 + $0x78] sm:$0xff] }
0x1cc1   : > { %11460 = vmatprep.subr.mxu1 %v15428_v11 }
0x1d05   : > { %v6135_v33 = vpop.xlane.xlu1 %6134 }
0x1d06   : > { %v6136_v34 = vmul.f32 0.0078125, %v6135_v33 }
0x1d08   : > { %v6137_v35 = vadd.f32 1e-05, %v6136_v34 }
0x1d0a   : > { %13305 = vrsqrt.f32 %v6137_v35  ;;  %v12133_v35 = vpack.c.bf16 %v5810_v32, %v5809_v31 }
0x1d0c   : > { %12134 = vmatpush3.bf16.msra.mxu0 %v12133_v35  ;;  %v6279_v35 = vld [vmem:[%s17903_s15 + $0x10] sm:$0xff] }
0x1d0d   : > { %12159 = vmatprep.subr.bf16.mxu0 %v15426_v4 }
0x1d14   : > { %v13306_v36 = vpop.eup %13305 }
0x1d15   : > { %v6139_v37 = vmul.f32 %v13306_v36, %v17110_v14  ;;  %v10525_v14 = vld [vmem:[#allocation85] ss:$0 sm:$0xff] }
0x1d17   : > { %v6147_v42 = vmul.f32 %v10529_v39, %v6139_v37 }
0x1d19   : > { %v6155_v44 = vadd.f32 %v10530_v40, %v6147_v42 }
0x1d1b   : > { %11423 = vmatmul.mubr.f32.vlgmr.msra.gmra.mrb[28].mxu1 %v6155_v44 }
0x1d1c   : > { %11462 = vmatprep.mubr.msk.f32.mxu1 %vm15427_vm0, %v15428_v11 }
0x1d56   : > { %v5763_v47 = vpop.f32.mrb[24].mxu1 }
0x1d57   : > { %v5764_v1 = vadd.f32 %v10519_v6, %v5763_v47  ;;  %v11284_v48 = vpop.f32.mrb[25].mxu1 }
0x1d58   : > { %v10520_v48 = vld [vmem:[#allocation82] ss:$0 sm:$0xff] }
0x1d59   : > { %v5767_v49 = vmax.f32 %v5764_v1, 0.0 }
0x1d5b   : > { %5768 = vadd.xlane.f32.xlu0 %v5767_v49 }
0x1d76   : > { %v6004_v41 = vpop.f32.mrb[26].mxu1 }
0x1d77   : > { %v6005_v26 = vadd.f32 %v10525_v14, %v6004_v41  ;;  %v11354_v51 = vpop.f32.mrb[27].mxu1  ;;  %v6036_v14 = vld [vmem:[%s17902_s6] sm:$0xff]  ;;  %v6037_v41 = vld [vmem:[%s17902_s6 + $0x8] sm:$0xff] }
0x1d79   : > { %v6008_v52 = vmax.f32 %v6005_v26, 0.0  ;;  %v10521_v26 = vld [vmem:[#allocation81] ss:$0 sm:$0xff] }
0x1d7b   : > { %6009 = vadd.xlane.f32.xlu0 %v6008_v52 }
0x1de8   : > { %v5769_v62 = vpop.xlane.xlu0 %5768 }
0x1de9   : > { %v5770_v27 = vmul.f32 0.0078125, %v5769_v62  ;;  %v12169_v62 = vpack.c.bf16 %v6043_v22, %v6042_v61  ;;  %v10532_v22 = vld [vmem:[#allocation100] ss:$0 sm:$0xff] }
0x1deb   : > { %v5771_v55 = vsub.f32 %v5767_v49, %v5770_v27 }
0x1ded   : > { %v5772_v45 = vmul.f32 %v5771_v55, %v5771_v55 }
0x1dee   : > { %v6245_v8 = vpop.f32.mrb[28].mxu1 }
0x1def   : > { %v6246_v50 = vadd.f32 %v10531_v21, %v6245_v8  ;;  %v11424_v9 = vpop.f32.mrb[29].mxu1  ;;  %5773 = vadd.xlane.f32.xlu1 %v5772_v45  ;;  %v6045_v21 = vld [vmem:[%s17902_s6 + $0x48] sm:$0xff] }
0x1df0   : > { %v6046_v9 = vld [vmem:[%s17902_s6 + $0x50] sm:$0xff] }
0x1df1   : > { %v6249_v10 = vmax.f32 %v6246_v50, 0.0 }
0x1df3   : > { %6250 = vadd.xlane.f32.xlu1 %v6249_v10 }
0x1e08   : > { %v6010_v29 = vpop.xlane.xlu0 %6009 }
0x1e09   : > { %v6011_v33 = vmul.f32 0.0078125, %v6010_v29  ;;  %v6278_v29 = vld [vmem:[%s17903_s15 + $0x8] sm:$0xff] }
0x1e0a   : > { %v12208_v32 = vpack.c.bf16 %v6278_v29, %v6277_v28 }
0x1e0b   : > { %v17160_v34 = vsub.f32 %v6008_v52, %v6011_v33  ;;  %v12160_v52 = vpack.c.bf16 %v6037_v41, %v6036_v14  ;;  %v6287_v14 = vld [vmem:[%s17903_s15 + $0x50] sm:$0xff]  ;;  %v6288_v41 = vld [vmem:[%s17903_s15 + $0x58] sm:$0xff] }
0x1e0d   : > { %v6013_v36 = vmul.f32 %v17160_v34, %v17160_v34 }
0x1e0f   : > { %6014 = vadd.xlane.f32.xlu0 %v6013_v36  ;;  %v6280_v36 = vld [vmem:[%s17903_s15 + $0x18] sm:$0xff] }
0x1e7c   : > { %v5774_v39 = vpop.xlane.xlu1 %5773 }
0x1e7d   : > { %v5775_v37 = vmul.f32 0.0078125, %v5774_v39  ;;  %v6281_v39 = vld [vmem:[%s17903_s15 + $0x20] sm:$0xff] }
0x1e7f   : > { %v5776_v40 = vadd.f32 1e-05, %v5775_v37  ;;  %v6282_v37 = vld [vmem:[%s17903_s15 + $0x28] sm:$0xff] }
0x1e80   : > { %v6251_v42 = vpop.xlane.xlu1 %6250 }
0x1e81   : > { %13307 = vrsqrt.f32 %v5776_v40  ;;  %v6252_v44 = vmul.f32 0.0078125, %v6251_v42  ;;  %v12214_v40 = vpack.c.bf16 %v6282_v37, %v6281_v39  ;;  %v6283_v42 = vld [vmem:[%s17903_s15 + $0x30] sm:$0xff] }
0x1e83   : > { %v17166_v6 = vsub.f32 %v6249_v10, %v6252_v44  ;;  %v6047_v10 = vld [vmem:[%s17902_s6 + $0x58] sm:$0xff] }
0x1e84   : > { %v12175_v12 = vpack.c.bf16 %v6047_v10, %v6046_v9  ;;  %v6284_v44 = vld [vmem:[%s17903_s15 + $0x38] sm:$0xff] }
0x1e85   : > { %v6254_v47 = vmul.f32 %v17166_v6, %v17166_v6 }
0x1e87   : > { %6255 = vadd.xlane.f32.xlu1 %v6254_v47  ;;  %v12217_v47 = vpack.c.bf16 %v6284_v44, %v6283_v42  ;;  %v17232_v44 = vcvt.s32.f32 %v16869_v24 }
0x1e8b   : > { %v13308_v1 = vpop.eup %13307 }
0x1e8c   : > { %v5778_v49 = vmul.f32 %v13308_v1, %v5771_v55  ;;  %v6044_v55 = vld [vmem:[%s17902_s6 + $0x40] sm:$0xff] }
0x1e8d   : > { %v12172_v50 = vpack.c.bf16 %v6045_v21, %v6044_v55  ;;  %v6285_v1 = vld [vmem:[%s17903_s15 + $0x40] sm:$0xff] }
0x1e8e   : > { %v5786_v51 = vmul.f32 %v10520_v48, %v5778_v49  ;;  %v6286_v48 = vld [vmem:[%s17903_s15 + $0x48] sm:$0xff] }
0x1e8f   : > { %v12220_v49 = vpack.c.bf16 %v6286_v48, %v6285_v1  ;;  %v10535_v48 = vld [vmem:[#allocation75] ss:$0 sm:$0xff] }
0x1e90   : > { %v5794_v53 = vadd.f32 %v10521_v26, %v5786_v51  ;;  %v12223_v26 = vpack.c.bf16 %v6288_v41, %v6287_v14  ;;  %v6289_v51 = vld [vmem:[%s17903_s15 + $0x60] sm:$0xff]  ;;  %v10536_v14 = vld [vmem:[#allocation73] ss:$0 sm:$0xff] }
0x1e92   : > { %11318 = vmatmul.mubr.f32.vlgmr.msra.gmra.mrb[22].mxu0 %v5794_v53 }
0x1e93   : > { %12161 = vmatpush3.bf16.msra.mxu0 %v12160_v52  ;;  %11387 = vmatprep.mubr.msk.f32.mxu0 %vm15427_vm0, %v15428_v11  ;;  %v6290_v52 = vld [vmem:[%s17903_s15 + $0x68] sm:$0xff] }
0x1e94   : > { %12162 = vmatprep.subr.bf16.mxu0 %v15426_v4  ;;  %v12226_v53 = vpack.c.bf16 %v6290_v52, %v6289_v51 }
0x1e97   : > { %12164 = vmatpush3.bf16.msra.mxu0 %v12163_v56  ;;  %v12229_v56 = vpack.c.bf16 %v6292_v43, %v6291_v54  ;;  %v6668_v54 = vld [vmem:[#allocation21 + $0x8] sm:$0xff]  ;;  %v6674_v43 = vld [vmem:[#allocation21 + $0x38] sm:$0xff] }
0x1e98   : > { %12165 = vmatprep.subr.bf16.mxu0 %v15426_v4 }
0x1e9b   : > { %12167 = vmatpush3.bf16.msra.mxu0 %v12166_v60 }
0x1e9c   : > { %v6015_v27 = vpop.xlane.xlu0 %6014  ;;  %12168 = vmatprep.subr.bf16.mxu0 %v15426_v4 }
0x1e9d   : > { %v6016_v45 = vmul.f32 0.0078125, %v6015_v27  ;;  %v10533_v27 = vld [vmem:[#allocation99] ss:$0 sm:$0xff] }
0x1e9f   : > { %v6017_v8 = vadd.f32 1e-05, %v6016_v45  ;;  %12170 = vmatpush3.bf16.msra.mxu0 %v12169_v62  ;;  %v10522_v45 = vld [vmem:[#allocation2] ss:$0 sm:$0xff] }
0x1ea0   : > { %12171 = vmatprep.subr.bf16.mxu0 %v15426_v4 }
0x1ea1   : > { %13309 = vrsqrt.f32 %v6017_v8 }
0x1ea3   : > { %12173 = vmatpush3.bf16.msra.mxu0 %v12172_v50 }
0x1ea4   : > { %12174 = vmatprep.subr.bf16.mxu0 %v15426_v4 }
0x1ea7   : > { %12176 = vmatpush3.bf16.msra.mxu0 %v12175_v12 }
0x1ea8   : > { %12177 = vmatprep.subr.bf16.mxu0 %v15426_v4 }
0x1eab   : > { %v13310_v18 = vpop.eup %13309  ;;  %12179 = vmatpush3.bf16.msra.mxu0 %v12178_v17 }
0x1eac   : > { %12180 = vmatprep.subr.bf16.mxu0 %v15426_v4  ;;  %v6019_v25 = vmul.f32 %v13310_v18, %v17160_v34  ;;  %v12211_v34 = vpack.c.bf16 %v6280_v36, %v6279_v35 }
0x1eae   : > { %v6027_v31 = vmul.f32 %v10526_v46, %v6019_v25 }
0x1eaf   : > { %12182 = vmatpush3.bf16.msra.mxu0 %v12181_v23 }
0x1eb0   : > { %v6035_v33 = vadd.f32 %v10527_v30, %v6027_v31  ;;  %12207 = vmatprep.subr.bf16.mxu0 %v15426_v4  ;;  %v10528_v31 = vld [vmem:[#allocation3] ss:$0 sm:$0xff] }
0x1eb2   : > { %11388 = vmatmul.mubr.f32.vlgmr.msra.gmra.mrb[24].mxu0 %v6035_v33 }
0x1eb3   : > { %12209 = vmatpush3.bf16.msra.mxu0 %v12208_v32  ;;  %11457 = vmatprep.mubr.msk.f32.mxu0 %vm15427_vm0, %v15428_v11 }
0x1eb4   : > { %12210 = vmatprep.subr.bf16.mxu0 %v15426_v4 }
0x1eb7   : > { %12212 = vmatpush3.bf16.msra.mxu0 %v12211_v34  ;;  %v10534_v34 = vld [vmem:[#allocation4] ss:$0 sm:$0xff] }
0x1eb8   : > { %12213 = vmatprep.subr.bf16.mxu0 %v15426_v4 }
0x1ebb   : > { %12215 = vmatpush3.bf16.msra.mxu0 %v12214_v40 }
0x1ebc   : > { %12216 = vmatprep.subr.bf16.mxu0 %v15426_v4 }
0x1ebf   : > { %12218 = vmatpush3.bf16.msra.mxu0 %v12217_v47 }
0x1ec0   : > { %12219 = vmatprep.subr.bf16.mxu0 %v15426_v4 }
0x1ec3   : > { %12221 = vmatpush3.bf16.msra.mxu0 %v12220_v49 }
0x1ec4   : > { %12222 = vmatprep.subr.bf16.mxu0 %v15426_v4 }
0x1ec7   : > { %12224 = vmatpush3.bf16.msra.mxu0 %v12223_v26 }
0x1ec8   : > { %12225 = vmatprep.subr.bf16.mxu0 %v15426_v4 }
0x1ecb   : > { %12227 = vmatpush3.bf16.msra.mxu0 %v12226_v53 }
0x1ecc   : > { %12228 = vmatprep.subr.bf16.mxu0 %v15426_v4 }
0x1ecf   : > { %12230 = vmatpush3.bf16.msra.mxu0 %v12229_v56  ;;  %v12231_v56 = vpack.c.bf16 %v6674_v43, %v6668_v54  ;;  %v6685_v54 = vld [vmem:[#allocation21 + $0x90] sm:$0xff] }
0x1f14   : > { %v6256_v58 = vpop.xlane.xlu1 %6255 }
0x1f15   : > { %v6257_v59 = vmul.f32 0.0078125, %v6256_v58  ;;  %v6670_v58 = vld [vmem:[#allocation21 + $0x18] sm:$0xff] }
0x1f17   : > { %v6258_v60 = vadd.f32 1e-05, %v6257_v59  ;;  %v6676_v59 = vld [vmem:[#allocation21 + $0x48] sm:$0xff] }
0x1f19   : > { %13311 = vrsqrt.f32 %v6258_v60  ;;  %v12263_v60 = vpack.c.bf16 %v6676_v59, %v6670_v58  ;;  %v6698_v58 = vld [vmem:[#allocation21 + $0xf8] sm:$0xff] }
0x1f1b   : > { %12264 = vmatprep.subr.bf16.mxu0 %v12263_v60 }
0x1f23   : > { %v13312_v61 = vpop.eup %13311 }
0x1f24   : > { %v6260_v62 = vmul.f32 %v13312_v61, %v17166_v6  ;;  %v6669_v61 = vld [vmem:[#allocation21 + $0x10] sm:$0xff] }
0x1f26   : > { %v6268_v55 = vmul.f32 %v10532_v22, %v6260_v62  ;;  %v6675_v22 = vld [vmem:[#allocation21 + $0x40] sm:$0xff] }
0x1f27   : > { %v12265_v62 = vpack.c.bf16 %v6675_v22, %v6669_v61  ;;  %v6691_v61 = vld [vmem:[#allocation21 + $0xc0] sm:$0xff]  ;;  %v6697_v22 = vld [vmem:[#allocation21 + $0xf0] sm:$0xff] }
0x1f28   : > { %v6276_v21 = vadd.f32 %v10533_v27, %v6268_v55  ;;  %v6682_v27 = vld [vmem:[#allocation21 + $0x78] sm:$0xff]  ;;  %v6688_v55 = vld [vmem:[#allocation21 + $0xa8] sm:$0xff] }
0x1f2a   : > { %11458 = vmatmul.mubr.f32.vlgmr.msra.gmra.mrb[26].mxu0 %v6276_v21  ;;  %v6681_v21 = vld [vmem:[#allocation21 + $0x70] sm:$0xff] }
0x1f2b   : > { %6948 = vmatprep.mubr.f32.mxu0 %v15428_v11  ;;  %12266 = vmatpush1.bf16.msra.mxu0 %v12265_v62 }
0x1f65   : > { %v5884_v8 = vpop.f32.mrb[22].mxu0 }
0x1f66   : > { %v5885_v50 = vadd.f32 %v10522_v45, %v5884_v8  ;;  %v11319_v9 = vpop.f32.mrb[23].mxu0  ;;  %v6687_v45 = vld [vmem:[#allocation21 + $0xa0] sm:$0xff] }
0x1f67   : > { %v12269_v8 = vpack.c.bf16 %v6687_v45, %v6681_v21  ;;  %v6700_v9 = vld [vmem:[#allocation21 + $0x108] sm:$0xff]  ;;  %v12241_v21 = vpack.c.bf16 %v6697_v22, %v6691_v61  ;;  %v6703_v45 = vld [vmem:[#allocation21 + $0x120] sm:$0xff] }
0x1f68   : > { %v6398_v4 = vmul.f32 1.442695, %v5885_v50  ;;  %v6694_v50 = vld [vmem:[#allocation21 + $0xd8] sm:$0xff]  ;;  %v6683_v22 = vld [vmem:[#allocation21 + $0x80] sm:$0xff] }
0x1f6a   : > { %13313 = vpow2.f32 %v6398_v4  ;;  %v6693_v4 = vld [vmem:[#allocation21 + $0xd0] sm:$0xff] }
0x1f74   : > { %v13314_v10 = vpop.eup %13313 }
0x1f75   : > { %v10537_v12 = vadd.f32 -1.0, %v13314_v10  ;;  %v6699_v10 = vld [vmem:[#allocation21 + $0x100] sm:$0xff] }
0x1f77   : > { %v6401_v13 = vadd.f32 0.5, %v10537_v12  ;;  %v12271_v12 = vpack.c.bf16 %v6700_v9, %v6694_v50  ;;  %v6716_v9 = vld [vmem:[#allocation21 + $0x188] sm:$0xff] }
0x1f79   : > { %v6402_v16 = vfloor.f32 %v6401_v13  ;;  %v12273_v13 = vpack.c.bf16 %v6699_v10, %v6693_v4  ;;  %v6722_v4 = vld [vmem:[#allocation21 + $0x1b8] sm:$0xff] }
0x1f7b   : > { %v6403_v6 = vmax.f32 %v6402_v16, 1.0  ;;  %v6706_v16 = vld [vmem:[#allocation21 + $0x138] sm:$0xff] }
0x1f7d   : > { %v6404_v17 = vmin.f32 %v6403_v6, 4.0  ;;  %v6712_v6 = vld [vmem:[#allocation21 + $0x168] sm:$0xff] }
0x1f7f   : > { %11461 = vmatpush3.msra.mxu1 %v6404_v17  ;;  %v6634_v25 = vsel %vm6633_vm4, %v6404_v17, 0.0 }
0x1f80   : > { %11463 = vmatmul.mubr.msk.f32.vlgmr.msra.gmra.mrb[30].mxu1 %vm3764_vm2, %v10538_v19  ;;  %v6635_v28 = vrot.slane %v6634_v25, 4  ;;  %v6705_v19 = vld [vmem:[#allocation21 + $0x130] sm:$0xff] }
0x1f82   : > { %v6636_v29 = vadd.f32 %v6635_v28, %v6634_v25  ;;  %v6717_v28 = vld [vmem:[#allocation21 + $0x190] sm:$0xff] }
0x1f84   : > { %v6637_v30 = vrot.slane %v6636_v29, 2 }
0x1f85   : > { %v6125_v57 = vpop.f32.mrb[24].mxu0 }
0x1f86   : > { %v11389_v18 = vpop.f32.mrb[25].mxu0  ;;  %v6638_v33 = vadd.f32 %v6637_v30, %v6636_v29  ;;  %v6126_v39 = vadd.f32 %v10528_v31, %v6125_v57  ;;  %v6711_v57 = vld [vmem:[#allocation21 + $0x160] sm:$0xff]  ;;  %v6730_v30 = vld [vmem:[#allocation21 + $0x1f8] sm:$0xff]  ;;  %v6736_v31 = vld [vmem:[#allocation21 + $0x228] sm:$0xff] }
0x1f87   : > { %v6718_v18 = vld [vmem:[#allocation21 + $0x198] sm:$0xff]  ;;  %v6723_v29 = vld [vmem:[#allocation21 + $0x1c0] sm:$0xff] }
0x1f88   : > { %v6639_v40 = vrot.slane %v6638_v33, 1 }
0x1f8a   : > { %v17228_v42 = vadd.f32 %v6639_v40, %v6638_v33  ;;  %v12283_v33 = vpack.c.bf16 %v6736_v31, %v6730_v30  ;;  %v6739_v30 = vld [vmem:[#allocation21 + $0x240] sm:$0xff]  ;;  %v6745_v31 = vld [vmem:[#allocation21 + $0x270] sm:$0xff] }
0x1ffd   : > { %v6366_v23 = vpop.f32.mrb[26].mxu0 }
0x1ffe   : > { %v11459_v46 = vpop.f32.mrb[27].mxu0  ;;  %v6367_v37 = vadd.f32 %v10534_v34, %v6366_v23  ;;  %v6724_v23 = vld [vmem:[#allocation21 + $0x1c8] sm:$0xff]  ;;  %v6742_v34 = vld [vmem:[#allocation21 + $0x258] sm:$0xff] }
0x1fff   : > { %v12277_v46 = vpack.c.bf16 %v6711_v57, %v6705_v19  ;;  %v12279_v25 = vpack.c.bf16 %v6724_v23, %v6718_v18  ;;  %v6727_v18 = vld [vmem:[#allocation21 + $0x1e0] sm:$0xff]  ;;  %v6733_v23 = vld [vmem:[#allocation21 + $0x210] sm:$0xff] }
0x2053   : > { %v6479_v32 = vpop.f32.mrb[30].mxu1 }
0x2054   : > { %v6483_v35 = vsub.f32 %v6479_v32, %v6404_v17  ;;  %6493 = vperm.xlu1 %13276, %v6479_v32   ;;  %v11464_v36 = vpop.f32.mrb[31].mxu1  ;;  %v12275_v17 = vpack.c.bf16 %v6712_v6, %v6706_v16  ;;  %v12281_v32 = vpack.c.bf16 %v6723_v29, %v6717_v28  ;;  %v6721_v16 = vld [vmem:[#allocation21 + $0x1b0] sm:$0xff]  ;;  %v6728_v6 = vld [vmem:[#allocation21 + $0x1e8] sm:$0xff]  ;;  %v12253_v28 = vpack.c.bf16 %v6733_v23, %v6727_v18 }
0x2055   : > { %v6735_v36 = vld [vmem:[#allocation21 + $0x220] sm:$0xff]  ;;  %v6713_v18 = vld [vmem:[#allocation21 + $0x170] sm:$0xff] }
0x2056   : > { %6487 = vperm.xlu0 %13275, %v6483_v35   ;;  %v6729_v35 = vld [vmem:[#allocation21 + $0x1f0] sm:$0xff]  ;;  %v6535_v23 = vld [vmem:[%s17904_s2 + $0x18] sm:$0xff] }
0x2058   : > { %6373 = vperm.xlu1 %13276, %v6126_v39   ;;  %v6748_v39 = vld [vmem:[#allocation21 + $0x288] sm:$0xff] }
0x2059   : > { %v12287_v40 = vpack.c.bf16 %v6748_v39, %v6742_v34  ;;  %v6751_v34 = vld [vmem:[#allocation21 + $0x2a0] sm:$0xff]  ;;  %v6757_v39 = vld [vmem:[#allocation21 + $0x2d0] sm:$0xff] }
0x205a   : > { %6387 = vperm.xlu0 %13275, %v6367_v37   ;;  %v12285_v37 = vpack.c.bf16 %v6735_v36, %v6729_v35  ;;  %v12257_v35 = vpack.c.bf16 %v6745_v31, %v6739_v30  ;;  %v6719_v31 = vld [vmem:[#allocation21 + $0x1a0] sm:$0xff] }
0x205e   : > { %6662 = vperm.xlu0 %13275, %v17228_v42  }
0x20d3   : > { %v6494_v47 = vpop.permute.xlu1 %6493 }
0x20d4   : > { %vm6496_vm5 = vcmp.lt.f32.partialorder %v17232_v44, %v6494_v47  ;;  %v6741_v47 = vld [vmem:[#allocation21 + $0x250] sm:$0xff] }
0x20d5   : > { %v6488_v1 = vpop.permute.xlu0 %6487 }
0x20d6   : > { %vm6490_vm6 = vcmp.ge.f32.partialorder %v17232_v44, %v6488_v1  ;;  %v6747_v1 = vld [vmem:[#allocation21 + $0x280] sm:$0xff] }
0x20d7   : > { %vm6497_vm7 = vmand %vm6490_vm6, %vm6496_vm5  ;;  %v6374_v49 = vpop.permute.xlu1 %6373 }
0x20d8   : > { %v6382_v41 = vmul.f32 %v10535_v48, %v6374_v49  ;;  %v10540_v26 = vsel %vm6497_vm7, 1.0, %v15428_v11  ;;  %v12289_v48 = vpack.c.bf16 %v6747_v1, %v6741_v47  ;;  %v6667_v49 = vld [vmem:[#allocation21] sm:$0xff]  ;;  %v6760_v47 = vld [vmem:[#allocation21 + $0x2e8] sm:$0xff]  ;;  %v6753_v1 = vld [vmem:[#allocation21 + $0x2b0] sm:$0xff] }
0x20d9   : > { %6500 = vxpose.xlu1.b32.start.end [1/1] (short) (narrow) %v10540_v26, 32  ;;  %v6388_v51 = vpop.permute.xlu0 %6387  ;;  %v6680_v26 = vld [vmem:[#allocation21 + $0x68] sm:$0xff] }
0x20da   : > { %v6383_v52 = vadd.f32 %v6382_v41, %v17086_v15  ;;  %v6396_v53 = vmul.f32 %v10536_v14, %v6388_v51  ;;  %v12267_v15 = vpack.c.bf16 %v6688_v55, %v6682_v27  ;;  %v6673_v14 = vld [vmem:[#allocation21 + $0x30] sm:$0xff]  ;;  %v6686_v51 = vld [vmem:[#allocation21 + $0x98] sm:$0xff]  ;;  %v6704_v27 = vld [vmem:[#allocation21 + $0x128] sm:$0xff] }
0x20db   : > { %v6710_v55 = vld [vmem:[#allocation21 + $0x158] sm:$0xff] }
0x20dc   : > { %v6397_v24 = vadd.f32 %v6396_v53, %v6383_v52  ;;  %12268 = vmatprep.subr.bf16.mxu0 %v12267_v15  ;;  %v12233_v52 = vpack.c.bf16 %v6673_v14, %v6667_v49  ;;  %v12235_v53 = vpack.c.bf16 %v6686_v51, %v6680_v26  ;;  %v12243_v15 = vpack.c.bf16 %v6710_v55, %v6704_v27  ;;  %v6678_v26 = vld [vmem:[#allocation21 + $0x58] sm:$0xff]  ;;  %v6696_v55 = vld [vmem:[#allocation21 + $0xe8] sm:$0xff] }
0x20dd   : > { %12270 = vmatpush1.bf16.msra.mxu0 %v12269_v8  ;;  %v6709_v8 = vld [vmem:[#allocation21 + $0x150] sm:$0xff] }
0x20de   : > { %11465 = vmatprep.subr.mxu1 %v6397_v24  ;;  %12272 = vmatprep.subr.bf16.mxu0 %v12271_v12  ;;  %v12245_v10 = vpack.c.bf16 %v6709_v8, %v6703_v45  ;;  %v12247_v12 = vpack.c.bf16 %v6722_v4, %v6716_v9  ;;  %v6533_v27 = vld [vmem:[%s17904_s2 + $0x8] sm:$0xff]  ;;  %v6534_v4 = vld [vmem:[%s17904_s2 + $0x10] sm:$0xff] }
0x20df   : > { %11466 = vmatpush3.msra.mxu1 %v6397_v24  ;;  %v6679_v24 = vld [vmem:[#allocation21 + $0x60] sm:$0xff]  ;;  %v6701_v9 = vld [vmem:[#allocation21 + $0x110] sm:$0xff] }
0x20e0   : > { %12232 = vmatprep.subr.bf16.mxu1 %v12231_v56  ;;  %v6692_v56 = vld [vmem:[#allocation21 + $0xc8] sm:$0xff]  ;;  %v12237_v59 = vpack.c.bf16 %v6685_v54, %v6679_v24 }
0x20e1   : > { %12274 = vmatpush1.bf16.msra.mxu0 %v12273_v13  ;;  %v12239_v60 = vpack.c.bf16 %v6698_v58, %v6692_v56  ;;  %v6715_v13 = vld [vmem:[#allocation21 + $0x180] sm:$0xff]  ;;  %v6532_v24 = vld [vmem:[%s17904_s2] sm:$0xff] }
0x20e2   : > { %12276 = vmatprep.subr.bf16.mxu0 %v12275_v17  ;;  %v6734_v17 = vld [vmem:[#allocation21 + $0x218] sm:$0xff]  ;;  %v12249_v19 = vpack.c.bf16 %v6721_v16, %v6715_v13  ;;  %v6684_v54 = vld [vmem:[#allocation21 + $0x88] sm:$0xff] }
0x20e3   : > { %v12251_v57 = vpack.c.bf16 %v6734_v17, %v6728_v6 }
0x20e5   : > { %12278 = vmatpush1.bf16.msra.mxu0 %v12277_v46  ;;  %v6740_v46 = vld [vmem:[#allocation21 + $0x248] sm:$0xff] }
0x20e6   : > { %12280 = vmatprep.subr.bf16.mxu0 %v12279_v25  ;;  %v6746_v25 = vld [vmem:[#allocation21 + $0x278] sm:$0xff] }
0x20e7   : > { %v12255_v29 = vpack.c.bf16 %v6746_v25, %v6740_v46  ;;  %v6720_v46 = vld [vmem:[#allocation21 + $0x1a8] sm:$0xff]  ;;  %v6726_v25 = vld [vmem:[#allocation21 + $0x1d8] sm:$0xff] }
0x20e8   : > { %v12311_v30 = vpack.c.bf16 %v6726_v25, %v6720_v46 }
0x20e9   : > { %12282 = vmatpush1.bf16.msra.mxu0 %v12281_v32  ;;  %v6752_v32 = vld [vmem:[#allocation21 + $0x2a8] sm:$0xff] }
0x20ea   : > { %12284 = vmatprep.subr.bf16.mxu0 %v12283_v33  ;;  %v6758_v33 = vld [vmem:[#allocation21 + $0x2d8] sm:$0xff] }
0x20eb   : > { %v12259_v36 = vpack.c.bf16 %v6758_v33, %v6752_v32  ;;  %v6725_v32 = vld [vmem:[#allocation21 + $0x1d0] sm:$0xff]  ;;  %v6732_v33 = vld [vmem:[#allocation21 + $0x208] sm:$0xff] }
0x20ed   : > { %12286 = vmatpush1.bf16.msra.mxu0 %v12285_v37  ;;  %v6754_v37 = vld [vmem:[#allocation21 + $0x2b8] sm:$0xff] }
0x20ee   : > { %12288 = vmatprep.subr.bf16.mxu0 %v12287_v40  ;;  %v12261_v40 = vpack.c.bf16 %v6757_v39, %v6751_v34  ;;  %v12291_v49 = vpack.c.bf16 %v6760_v47, %v6754_v37  ;;  %v6731_v39 = vld [vmem:[#allocation21 + $0x200] sm:$0xff]  ;;  %v6737_v37 = vld [vmem:[#allocation21 + $0x230] sm:$0xff]  ;;  %v6750_v47 = vld [vmem:[#allocation21 + $0x298] sm:$0xff] }
0x20f1   : > { %12290 = vmatpush1.bf16.msra.mxu0 %v12289_v48  ;;  %v6759_v48 = vld [vmem:[#allocation21 + $0x2e0] sm:$0xff] }
0x20f2   : > { %v12293_v14 = vpack.c.bf16 %v6759_v48, %v6753_v1  ;;  %12292 = vmatprep.subr.bf16.mxu0 %v12291_v49  ;;  %v12317_v1 = vpack.c.bf16 %v6737_v37, %v6731_v39  ;;  %v6743_v49 = vld [vmem:[#allocation21 + $0x260] sm:$0xff] }
0x20f5   : > { %12294 = vmatpush1.bf16.msra.mxu0 %v12293_v14  ;;  %v6749_v14 = vld [vmem:[#allocation21 + $0x290] sm:$0xff] }
0x2159   : > { %v6516_v41 = vpop.trf.xlu1 }
0x215a   : > { %11467 = vmatprep.mubr.msk.f32.mxu1 %vm3764_vm2, %v6516_v41  ;;  %v6672_v41 = vld [vmem:[#allocation21 + $0x28] sm:$0xff] }
0x215b   : > { %v12295_v51 = vpack.c.bf16 %v6678_v26, %v6672_v41  ;;  %v6756_v41 = vld [vmem:[#allocation21 + $0x2c8] sm:$0xff]  ;;  %v6762_v26 = vld [vmem:[#allocation21 + $0x2f8] sm:$0xff] }
0x215d   : > { %v6517_v43 = vpop.trf.xlu1 }
0x215e   : > { %11468 = vmatmul.mubr.msk.f32.vlgmr.msra.gmra.mrb[32].mxu1 %vm3764_vm2, %v6517_v43  ;;  %v6690_v43 = vld [vmem:[#allocation21 + $0xb8] sm:$0xff] }
0x215f   : > { %12234 = vmatpush1.bf16.msra.mxu1 %v12233_v52  ;;  %v6671_v52 = vld [vmem:[#allocation21 + $0x20] sm:$0xff]  ;;  %v12299_v61 = vpack.c.bf16 %v6690_v43, %v6684_v54  ;;  %v6763_v43 = vld [vmem:[%s17905_s3] sm:$0x3f] }
0x2160   : > { %12236 = vmatprep.subr.bf16.mxu1 %v12235_v53  ;;  %v6677_v53 = vld [vmem:[#allocation21 + $0x50] sm:$0xff] }
0x2161   : > { %v6518_v62 = vpop.trf.xlu1 }
0x2162   : > { %11470 = vmatprep.mubr.msk.f32.mxu1 %vm3764_vm2, %v6518_v62  ;;  %v6689_v62 = vld [vmem:[#allocation21 + $0xb0] sm:$0xff] }
0x2163   : > { %12238 = vmatpush1.bf16.msra.mxu1 %v12237_v59  ;;  %v12297_v59 = vpack.c.bf16 %v6677_v53, %v6671_v52  ;;  %v12323_v52 = vpack.c.bf16 %v6762_v26, %v6756_v41  ;;  %v6755_v53 = vld [vmem:[#allocation21 + $0x2c0] sm:$0xff]  ;;  %v6784_v41 = vrot.slane %v6763_v43, %v16916_v20 }
0x2164   : > { %12240 = vmatprep.subr.bf16.mxu1 %v12239_v60 }
0x2165   : > { %v6519_v50 = vpop.trf.xlu1 }
0x2166   : > { %11471 = vmatmul.mubr.msk.f32.gmra.mrb[34].mxu1 %vm3764_vm2, %v6519_v50  ;;  %v6695_v50 = vld [vmem:[#allocation21 + $0xe0] sm:$0xff] }
0x2167   : > { %12242 = vmatpush1.bf16.msra.mxu1 %v12241_v21  ;;  %6859 = vmatprep.mubr.f32.mxu1 %v15428_v11  ;;  %v6702_v21 = vld [vmem:[#allocation21 + $0x118] sm:$0xff]  ;;  %v12305_v6 = vpack.c.bf16 %v6701_v9, %v6695_v50 }
0x2168   : > { %12244 = vmatprep.subr.bf16.mxu1 %v12243_v15  ;;  %v12301_v15 = vpack.c.bf16 %v6689_v62, %v6683_v22  ;;  %v12303_v8 = vpack.c.bf16 %v6702_v21, %v6696_v55  ;;  %v6776_v62 = vrot.slane %v6763_v43, %v16890_v0 }
0x216b   : > { %12246 = vmatpush1.bf16.msra.mxu1 %v12245_v10  ;;  %v6708_v10 = vld [vmem:[#allocation21 + $0x148] sm:$0xff] }
0x216c   : > { %12248 = vmatprep.subr.bf16.mxu1 %v12247_v12  ;;  %v6714_v12 = vld [vmem:[#allocation21 + $0x178] sm:$0xff] }
0x216f   : > { %12250 = vmatpush1.bf16.msra.mxu1 %v12249_v19  ;;  %v12307_v19 = vpack.c.bf16 %v6714_v12, %v6708_v10 }
0x2170   : > { %12252 = vmatprep.subr.bf16.mxu1 %v12251_v57  ;;  %v6707_v57 = vld [vmem:[#allocation21 + $0x140] sm:$0xff] }
0x2173   : > { %12254 = vmatpush1.bf16.msra.mxu1 %v12253_v28  ;;  %v12309_v28 = vpack.c.bf16 %v6713_v18, %v6707_v57 }
0x2174   : > { %12256 = vmatprep.subr.bf16.mxu1 %v12255_v29 }
0x2177   : > { %12258 = vmatpush1.bf16.msra.mxu1 %v12257_v35  ;;  %v6738_v35 = vld [vmem:[#allocation21 + $0x238] sm:$0xff] }
0x2178   : > { %12260 = vmatprep.subr.bf16.mxu1 %v12259_v36  ;;  %v12313_v36 = vpack.c.bf16 %v6725_v32, %v6719_v31  ;;  %v12315_v34 = vpack.c.bf16 %v6738_v35, %v6732_v33 }
0x217b   : > { %12262 = vmatpush1.bf16.msra.mxu1 %v12261_v40  ;;  %v6744_v40 = vld [vmem:[#allocation21 + $0x268] sm:$0xff] }
0x217c   : > { %12296 = vmatprep.subr.bf16.mxu1 %v12295_v51  ;;  %v12319_v48 = vpack.c.bf16 %v6750_v47, %v6744_v40  ;;  %v12321_v51 = vpack.c.bf16 %v6749_v14, %v6743_v49 }
0x2231   : > { %v11469_v56 = vpop.f32.mrb[32].mxu1 }
0x2232   : > { %v6614_v58 = vpop.f32.mrb[33].mxu1  ;;  %v17250_v45 = vadd.f32 %v11469_v56, %v6533_v27  ;;  %v6768_v56 = vrot.slane %v6763_v43, %v16899_v5 }
0x2233   : > { %v17244_v60 = vadd.f32 %v6614_v58, %v6532_v24  ;;  %v6761_v24 = vld [vmem:[#allocation21 + $0x2f0] sm:$0xff]  ;;  %v6772_v58 = vrot.slane %v6763_v43, %v16904_v7 }
0x2234   : > { %v12325_v54 = vpack.c.bf16 %v6761_v24, %v6755_v53 }
0x2235   : > { %6860 = vmatmul.mubr.f32.vlgmr.msra.gmra.mrb[36].mxu1 %v17244_v60  ;;  %6949 = vmatmul.mubr.f32.vlgmr.msra.gmra.mrb[28].mxu0 %v17244_v60 }
0x2236   : > { %12298 = vmatpush1.bf16.msra.mxu1 %v12297_v59  ;;  %6865 = vmatprep.mubr.f32.mxu1 %v15428_v11 }
0x2237   : > { %6954 = vmatprep.mubr.f32.mxu0 %v15428_v11  ;;  %12300 = vmatprep.subr.bf16.mxu1 %v12299_v61 }
0x2239   : > { %v11472_v13 = vpop.f32.mrb[34].mxu1  ;;  %6866 = vmatmul.mubr.f32.gmra.mrb[38].mxu1 %v17250_v45  ;;  %6955 = vmatmul.mubr.f32.gmra.mrb[30].mxu0 %v17250_v45 }
0x223a   : > { %12302 = vmatpush1.bf16.msra.mxu1 %v12301_v15  ;;  %v6624_v16 = vpop.f32.mrb[35].mxu1  ;;  %6871 = vmatprep.mubr.f32.mxu1 %v15428_v11  ;;  %v17264_v29 = vadd.f32 %v11472_v13, %v6535_v23  ;;  %v6780_v15 = vrot.slane %v6763_v43, %v16896_v2 }
0x223b   : > { %v17257_v17 = vadd.f32 %v6624_v16, %v6534_v4  ;;  %6960 = vmatprep.mubr.f32.mxu0 %v15428_v11  ;;  %12304 = vmatprep.subr.bf16.mxu1 %v12303_v8 }
0x223d   : > { %6872 = vmatmul.mubr.f32.gmra.mrb[40].mxu1 %v17257_v17  ;;  %6961 = vmatmul.mubr.f32.gmra.mrb[32].mxu0 %v17257_v17 }
0x223e   : > { %12306 = vmatpush1.bf16.msra.mxu1 %v12305_v6  ;;  %6877 = vmatprep.mubr.f32.mxu1 %v15428_v11 }
0x223f   : > { %6966 = vmatprep.mubr.f32.mxu0 %v15428_v11  ;;  %12308 = vmatprep.subr.bf16.mxu1 %v12307_v19 }
0x2241   : > { %6878 = vmatmul.mubr.f32.gmra.mrb[42].mxu1 %v17264_v29  ;;  %6967 = vmatmul.mubr.f32.gmra.mrb[34].mxu0 %v17264_v29 }
0x2242   : > { %12310 = vmatpush1.bf16.msra.mxu1 %v12309_v28  ;;  %7037 = vmatprep.mubr.f32.mxu1 %v15428_v11 }
0x2243   : > { %12312 = vmatprep.subr.bf16.mxu1 %v12311_v30 }
0x2246   : > { %12314 = vmatpush1.bf16.msra.mxu1 %v12313_v36 }
0x2247   : > { %12316 = vmatprep.subr.bf16.mxu1 %v12315_v34 }
0x224a   : > { %12318 = vmatpush1.bf16.msra.mxu1 %v12317_v1 }
0x224b   : > { %12320 = vmatprep.subr.bf16.mxu1 %v12319_v48 }
0x224e   : > { %12322 = vmatpush1.bf16.msra.mxu1 %v12321_v51  ;;  %v6788_v51 = vrot.slane %v6763_v43, %v16934_v38 }
0x224f   : > { %12324 = vmatprep.subr.bf16.mxu1 %v12323_v52 }
0x2252   : > { %12326 = vmatpush1.bf16.msra.mxu1 %v12325_v54 }
0x2255   : > { %7038 = vmatmul.mubr.f32.vlgmr.msra.gmra.mrb[44].mxu1 %v17244_v60 }
0x2256   : > { %7043 = vmatprep.mubr.f32.mxu1 %v15428_v11 }
0x2259   : > { %7044 = vmatmul.mubr.f32.gmra.mrb[46].mxu1 %v17250_v45 }
0x225a   : > { %7049 = vmatprep.mubr.f32.mxu1 %v15428_v11 }
0x225d   : > { %7050 = vmatmul.mubr.f32.gmra.mrb[48].mxu1 %v17257_v17 }
0x225e   : > { %7055 = vmatprep.mubr.f32.mxu1 %v15428_v11 }
0x2261   : > { %7056 = vmatmul.mubr.f32.gmra.mrb[50].mxu1 %v17264_v29 }
0x2308   : > { %v6861_v59 = vpop.f32.mrb[36].mxu1  ;;  %v6950_v61 = vpop.f32.mrb[28].mxu0 }
0x2309   : > { %v6862_v22 = vadd.f32 %v6861_v59, %v6768_v56  ;;  %v6863_v27 = vpop.f32.mrb[37].mxu1  ;;  %v6952_v55 = vpop.f32.mrb[29].mxu0  ;;  %v6951_v9 = vadd.f32 %v6950_v61, %v6776_v62 }
0x230a   : > { %v6864_v21 = vadd.f32 %v6863_v27, %v6772_v58  ;;  %v6953_v13 = vadd.f32 %v6952_v55, %v6780_v15 }
0x230b   : > { %11481 = vmatprep.mubr.f32.mxu0 %v6862_v22 }
0x230c   : > { %v6867_v8 = vpop.f32.mrb[38].mxu1  ;;  %v6956_v50 = vpop.f32.mrb[30].mxu0  ;;  %11509 = vmatprep.mubr.f32.mxu1 %v6864_v21 }
0x230d   : > { %v6957_v4 = vadd.f32 %v6956_v50, %v6776_v62  ;;  %v6869_v10 = vpop.f32.mrb[39].mxu1  ;;  %v6958_v12 = vpop.f32.mrb[31].mxu0  ;;  %v6868_v37 = vadd.f32 %v6867_v8, %v6768_v56 }
0x230e   : > { %v6959_v16 = vadd.f32 %v6958_v12, %v6780_v15  ;;  %v6870_v40 = vadd.f32 %v6869_v10, %v6772_v58 }
0x230f   : > { %v12327_v6 = vpack.c.bf16 %v6957_v4, %v6951_v9  ;;  %v6663_v4 = vpop.permute.xlu0 %6662 }
0x2310   : > { %v12343_v19 = vpack.c.bf16 %v6959_v16, %v6953_v13  ;;  %v6873_v57 = vpop.f32.mrb[40].mxu1  ;;  %v6962_v18 = vpop.f32.mrb[32].mxu0  ;;  %vm6665_vm8 = vcmp.lt.f32.partialorder %v17232_v44, %v6663_v4 }
0x2311   : > { %v6875_v23 = vpop.f32.mrb[41].mxu1  ;;  %v6964_v46 = vpop.f32.mrb[33].mxu0  ;;  %12328 = vmatprep.subr.bf16.mxu0 %v12327_v6  ;;  %v6963_v30 = vadd.f32 %v6962_v18, %v6776_v62  ;;  %v6874_v47 = vadd.f32 %v6873_v57, %v6768_v56 }
0x2312   : > { %12330 = vmatpush3.bf16.xpose.msra.mxu0 %v12327_v6  ;;  %12344 = vmatprep.subr.bf16.mxu1 %v12343_v19  ;;  %v6965_v35 = vadd.f32 %v6964_v46, %v6780_v15  ;;  %v6876_v1 = vadd.f32 %v6875_v23, %v6772_v58  ;;  %v15430_v6 = vmov -1e+09  }
0x2313   : > { %12346 = vmatpush3.bf16.xpose.msra.mxu1 %v12343_v19  ;;  %v17290_v19 = vsel %vm6665_vm8, 0.0, %v15430_v6 }
0x2314   : > { %v6879_v25 = vpop.f32.mrb[42].mxu1  ;;  %v6968_v28 = vpop.f32.mrb[34].mxu0 }
0x2315   : > { %v6969_v31 = vadd.f32 %v6968_v28, %v6776_v62  ;;  %v6881_v32 = vpop.f32.mrb[43].mxu1  ;;  %v6970_v33 = vpop.f32.mrb[35].mxu0  ;;  %v6880_v48 = vadd.f32 %v6879_v25, %v6768_v56 }
0x2316   : > { %v6971_v36 = vadd.f32 %v6970_v33, %v6780_v15  ;;  %v6882_v49 = vadd.f32 %v6881_v32, %v6772_v58 }
0x2317   : > { %v12331_v34 = vpack.c.bf16 %v6969_v31, %v6963_v30 }
0x2318   : > { %v12347_v39 = vpack.c.bf16 %v6971_v36, %v6965_v35 }
0x2319   : > { %12332 = vmatprep.subr.bf16.mxu0 %v12331_v34 }
0x231a   : > { %12334 = vmatpush3.bf16.xpose.msra.mxu0 %v12331_v34  ;;  %12348 = vmatprep.subr.bf16.mxu1 %v12347_v39 }
0x231b   : > { %12350 = vmatpush3.bf16.xpose.msra.mxu1 %v12347_v39 }
0x2321   : > { %11482 = vmatmul.mubr.f32.vlgmr.msra.gmra.mrb[36].mxu0 %v6868_v37 }
0x2322   : > { %11484 = vmatprep.mubr.f32.mxu0 %v6874_v47  ;;  %11510 = vmatmul.mubr.f32.vlgmr.msra.gmra.mrb[52].mxu1 %v6870_v40 }
0x2323   : > { %11512 = vmatprep.mubr.f32.mxu1 %v6876_v1 }
0x2325   : > { %11485 = vmatmul.mubr.f32.gmra.mrb[38].mxu0 %v6880_v48 }
0x2326   : > { %11513 = vmatmul.mubr.f32.gmra.mrb[54].mxu1 %v6882_v49 }
0x2328   : > { %v7039_v14 = vpop.f32.mrb[44].mxu1 }
0x2329   : > { %v7041_v26 = vpop.f32.mrb[45].mxu1  ;;  %v7040_v53 = vadd.f32 %v7039_v14, %v6784_v41 }
0x232a   : > { %v7042_v59 = vadd.f32 %v7041_v26, %v6788_v51 }
0x232c   : > { %v7045_v52 = vpop.f32.mrb[46].mxu1 }
0x232d   : > { %v7046_v24 = vadd.f32 %v7045_v52, %v6784_v41  ;;  %v7047_v54 = vpop.f32.mrb[47].mxu1 }
0x232e   : > { %v7048_v61 = vadd.f32 %v7047_v54, %v6788_v51 }
0x232f   : > { %v12335_v22 = vpack.c.bf16 %v7046_v24, %v7040_v53 }
0x2330   : > { %v17284_v62 = vpack.c.bf16 %v7048_v61, %v7042_v59  ;;  %v7051_v56 = vpop.f32.mrb[48].mxu1 }
0x2331   : > { %v7053_v27 = vpop.f32.mrb[49].mxu1  ;;  %12336 = vmatprep.subr.bf16.mxu0 %v12335_v22  ;;  %v7052_v21 = vadd.f32 %v7051_v56, %v6784_v41 }
0x2332   : > { %v7054_v58 = vadd.f32 %v7053_v27, %v6788_v51  ;;  %12338 = vmatpush3.bf16.msra.mxu0 %v12335_v22 }
0x2334   : > { %v7057_v55 = vpop.f32.mrb[50].mxu1 }
0x2335   : > { %v7058_v15 = vadd.f32 %v7057_v55, %v6784_v41  ;;  %v7059_v8 = vpop.f32.mrb[51].mxu1 }
0x2336   : > { %v7060_v50 = vadd.f32 %v7059_v8, %v6788_v51 }
0x2337   : > { %v12339_v43 = vpack.c.bf16 %v7058_v15, %v7052_v21 }
0x2338   : > { %v17286_v9 = vpack.c.bf16 %v7060_v50, %v7054_v58 }
0x2339   : > { %12340 = vmatprep.subr.bf16.mxu0 %v12339_v43 }
0x233a   : > { %12342 = vmatpush3.bf16.msra.mxu0 %v12339_v43 }
0x233b   : > { %12352 = vmatprep.subr.bf16.mxu0 %v17284_v62 }
0x23f4   : > { %v11483_v10 = vpop.f32.mrb[36].mxu0 }
0x23f5   : > { %v7148_v12 = vmul.f32 0.125, %v11483_v10  ;;  %v7128_v13 = vpop.f32.mrb[37].mxu0  ;;  %v11511_v16 = vpop.f32.mrb[52].mxu1 }
0x23f6   : > { %v7147_v57 = vmul.f32 0.125, %v7128_v13  ;;  %v7363_v18 = vpop.f32.mrb[53].mxu1  ;;  %v7383_v40 = vmul.f32 0.125, %v11511_v16 }
0x23f7   : > { %v7152_v23 = vadd.f32 %v7148_v12, %v17290_v19  ;;  %v7382_v36 = vmul.f32 0.125, %v7363_v18 }
0x23f8   : > { %v11486_v46 = vpop.f32.mrb[38].mxu0  ;;  %v7151_v44 = vadd.f32 %v7147_v57, %v17290_v19  ;;  %v7387_v14 = vadd.f32 %v7383_v40, %v17290_v19 }
0x23f9   : > { %v7150_v25 = vmul.f32 0.125, %v11486_v46  ;;  %v7138_v28 = vpop.f32.mrb[39].mxu0  ;;  %v11514_v30 = vpop.f32.mrb[54].mxu1  ;;  %v7159_v31 = vsel %vm7155_vm9, %v7152_v23, -inf  ;;  %v7386_v1 = vadd.f32 %v7382_v36, %v17290_v19 }
0x23fa   : > { %v7149_v32 = vmul.f32 0.125, %v7138_v28  ;;  %v7373_v33 = vpop.f32.mrb[55].mxu1  ;;  %7160 = vmax.xlane.f32.xlu0 %v7159_v31  ;;  %v7156_v34 = vsel %vm7155_vm9, %v7151_v44, -inf  ;;  %v7385_v41 = vmul.f32 0.125, %v11514_v30  ;;  %v7393_v26 = vsel %vm7155_vm9, %v7387_v14, -inf }
0x23fb   : > { %v7154_v39 = vadd.f32 %v7150_v25, %v17290_v19  ;;  %v7384_v48 = vmul.f32 0.125, %v7373_v33  ;;  %v7390_v49 = vsel %vm7155_vm9, %v7386_v1, -inf }
0x23fc   : > { %v7153_v35 = vadd.f32 %v7149_v32, %v17290_v19  ;;  %v7389_v53 = vadd.f32 %v7385_v41, %v17290_v19  ;;  %v7548_v41 = vld [vmem:[#allocation19 + $0x88] sm:$0xff] }
0x23fd   : > { %v7165_v47 = vsel %vm7155_vm9, %v7154_v39, -inf  ;;  %v7388_v51 = vadd.f32 %v7384_v48, %v17290_v19 }
0x23fe   : > { %7157 = vmax.xlane.f32.xlu0 %v7156_v34  ;;  %v7162_v37 = vsel %vm7155_vm9, %v7153_v35, -inf  ;;  %v7399_v24 = vsel %vm7155_vm9, %v7389_v53, -inf }
0x23ff   : > { %7163 = vmax.xlane.f32.xlu1 %v7162_v37  ;;  %v7396_v52 = vsel %vm7155_vm9, %v7388_v51, -inf }
0x2402   : > { %7166 = vmax.xlane.f32.xlu0 %v7165_v47 }
0x2406   : > { %7391 = vmax.xlane.f32.xlu0 %v7390_v49 }
0x240a   : > { %7394 = vmax.xlane.f32.xlu0 %v7393_v26  ;;  %v7531_v26 = vld [vmem:[#allocation19] sm:$0xff] }
0x240e   : > { %7397 = vmax.xlane.f32.xlu0 %v7396_v52  ;;  %v7532_v52 = vld [vmem:[#allocation19 + $0x8] sm:$0xff] }
0x2412   : > { %7400 = vmax.xlane.f32.xlu0 %v7399_v24  ;;  %v7550_v24 = vld [vmem:[#allocation19 + $0x98] sm:$0xff] }
0x2487   : > { %v7161_v54 = vpop.xlane.xlu0 %7160 }
0x2488   : > { %v7169_v59 = vsub.f32 %v7152_v23, %v7161_v54  ;;  %v12361_v54 = vpack.c.bf16 %v7532_v52, %v7531_v26 }
0x248a   : > { %v7174_v61 = vmul.f32 1.442695, %v7169_v59 }
0x248b   : > { %v7158_v22 = vpop.xlane.xlu0 %7157 }
0x248c   : > { %13315 = vpow2.f32 %v7174_v61  ;;  %v7168_v56 = vsub.f32 %v7151_v44, %v7158_v22  ;;  %v7164_v27 = vpop.xlane.xlu1 %7163  ;;  %v7533_v61 = vld [vmem:[#allocation19 + $0x10] sm:$0xff]  ;;  %v7534_v22 = vld [vmem:[#allocation19 + $0x18] sm:$0xff] }
0x248d   : > { %v7170_v55 = vsub.f32 %v7153_v35, %v7164_v27  ;;  %v7552_v27 = vld [vmem:[#allocation19 + $0xa8] sm:$0xff] }
0x248e   : > { %v7172_v58 = vmul.f32 1.442695, %v7168_v56  ;;  %v7551_v56 = vld [vmem:[#allocation19 + $0xa0] sm:$0xff] }
0x248f   : > { %v7167_v21 = vpop.xlane.xlu0 %7166  ;;  %v7176_v8 = vmul.f32 1.442695, %v7170_v55  ;;  %v12367_v55 = vpack.c.bf16 %v7552_v27, %v7551_v56  ;;  %v7560_v27 = vld [vmem:[#allocation19 + $0xe8] sm:$0xff] }
0x2490   : > { %13317 = vpow2.f32 %v7172_v58  ;;  %v7171_v15 = vsub.f32 %v7154_v39, %v7167_v21  ;;  %v12365_v58 = vpack.c.bf16 %v7534_v22, %v7533_v61  ;;  %v7535_v21 = vld [vmem:[#allocation19 + $0x20] sm:$0xff]  ;;  %v7541_v61 = vld [vmem:[#allocation19 + $0x50] sm:$0xff]  ;;  %v7542_v22 = vld [vmem:[#allocation19 + $0x58] sm:$0xff] }
0x2491   : > { %v12381_v56 = vpack.c.bf16 %v7542_v22, %v7541_v61  ;;  %v7732_v61 = vld [vmem:[%s17906_s13 + $0x38] sm:$0xff] }
0x2492   : > { %v7178_v50 = vmul.f32 1.442695, %v7171_v15  ;;  %v7536_v15 = vld [vmem:[#allocation19 + $0x28] sm:$0xff] }
0x2493   : > { %v7392_v43 = vpop.xlane.xlu0 %7391 }
0x2494   : > { %13319 = vpow2.f32 %v7178_v50  ;;  %v7402_v4 = vsub.f32 %v7386_v1, %v7392_v43  ;;  %v7554_v50 = vld [vmem:[#allocation19 + $0xb8] sm:$0xff]  ;;  %v12369_v43 = vpack.c.bf16 %v7536_v15, %v7535_v21  ;;  %v7544_v21 = vld [vmem:[#allocation19 + $0x68] sm:$0xff]  ;;  %v7561_v15 = vld [vmem:[#allocation19 + $0xf0] sm:$0xff] }
0x2495   : > { %13321 = vpow2.f32 %v7176_v8  ;;  %v7553_v8 = vld [vmem:[#allocation19 + $0xb0] sm:$0xff] }
0x2496   : > { %v17308_v10 = vpop.eup %13315  ;;  %v7406_v12 = vmul.f32 1.442695, %v7402_v4  ;;  %v12371_v4 = vpack.c.bf16 %v7554_v50, %v7553_v8  ;;  %v7562_v50 = vld [vmem:[#allocation19 + $0xf8] sm:$0xff] }
0x2497   : > { %v7395_v13 = vpop.xlane.xlu0 %7394  ;;  %v7183_v16 = vsel %vm7155_vm9, %v17308_v10, 0.0 }
0x2498   : > { %v7403_v6 = vsub.f32 %v7387_v14, %v7395_v13  ;;  %7184 = vadd.xlane.f32.xlu0 %v7183_v16  ;;  %13323 = vpow2.f32 %v7406_v12  ;;  %v7547_v14 = vld [vmem:[#allocation19 + $0x80] sm:$0xff]  ;;  %v7537_v12 = vld [vmem:[#allocation19 + $0x30] sm:$0xff]  ;;  %v7538_v13 = vld [vmem:[#allocation19 + $0x38] sm:$0xff] }
0x2499   : > { %v12373_v16 = vpack.c.bf16 %v7538_v13, %v7537_v12  ;;  %v7546_v12 = vld [vmem:[#allocation19 + $0x78] sm:$0xff] }
0x249a   : > { %v17312_v57 = vpop.eup %13317  ;;  %v7408_v18 = vmul.f32 1.442695, %v7403_v6 }
0x249b   : > { %v7398_v23 = vpop.xlane.xlu0 %7397  ;;  %v7180_v46 = vsel %vm7155_vm9, %v17312_v57, 0.0 }
0x249c   : > { %v7404_v25 = vsub.f32 %v7388_v51, %v7398_v23  ;;  %7181 = vadd.xlane.f32.xlu0 %v7180_v46  ;;  %13325 = vpow2.f32 %v7408_v18  ;;  %v12359_v51 = vpack.c.bf16 %v7548_v41, %v7547_v14 }
0x249e   : > { %v17316_v28 = vpop.eup %13319  ;;  %v7410_v30 = vmul.f32 1.442695, %v7404_v25  ;;  %12360 = vmatprep.subr.bf16.mxu1 %v12359_v51  ;;  %v7556_v51 = vld [vmem:[#allocation19 + $0xc8] sm:$0xff] }
0x249f   : > { %v7401_v31 = vpop.xlane.xlu0 %7400  ;;  %v7189_v44 = vsel %vm7155_vm9, %v17316_v28, 0.0  ;;  %v17320_v32 = vpop.eup %13321  ;;  %12362 = vmatpush3.bf16.msra.mxu1 %v12361_v54 }
0x24a0   : > { %v7405_v33 = vsub.f32 %v7389_v53, %v7401_v31  ;;  %7190 = vadd.xlane.f32.xlu0 %v7189_v44  ;;  %13327 = vpow2.f32 %v7410_v30  ;;  %v7186_v36 = vsel %vm7155_vm9, %v17320_v32, 0.0  ;;  %v7549_v53 = vld [vmem:[#allocation19 + $0x90] sm:$0xff] }
0x24a1   : > { %v12363_v59 = vpack.c.bf16 %v7550_v24, %v7549_v53  ;;  %v7539_v53 = vld [vmem:[#allocation19 + $0x40] sm:$0xff]  ;;  %v7540_v24 = vld [vmem:[#allocation19 + $0x48] sm:$0xff] }
0x24a2   : > { %v7412_v35 = vmul.f32 1.442695, %v7405_v33  ;;  %v17324_v34 = vpop.eup %13323  ;;  %v12377_v54 = vpack.c.bf16 %v7540_v24, %v7539_v53  ;;  %v7726_v53 = vld [vmem:[%s17906_s13 + $0x8] sm:$0xff]  ;;  %v7725_v24 = vld [vmem:[%s17906_s13] sm:$0xff] }
0x24a3   : > { %v7414_v39 = vsel %vm7155_vm9, %v17324_v34, 0.0  ;;  %12364 = vmatprep.subr.bf16.mxu1 %v12363_v59  ;;  %v7558_v59 = vld [vmem:[#allocation19 + $0xd8] sm:$0xff] }
0x24a4   : > { %7187 = vadd.xlane.f32.xlu0 %v7186_v36  ;;  %13329 = vpow2.f32 %v7412_v35  ;;  %12366 = vmatpush3.bf16.msra.mxu1 %v12365_v58 }
0x24a5   : > { %12368 = vmatprep.subr.bf16.mxu1 %v12367_v55  ;;  %v7543_v55 = vld [vmem:[#allocation19 + $0x60] sm:$0xff] }
0x24a6   : > { %v17328_v37 = vpop.eup %13325  ;;  %v12385_v8 = vpack.c.bf16 %v7544_v21, %v7543_v55  ;;  %v7733_v55 = vld [vmem:[%s17906_s13 + $0x40] sm:$0xff]  ;;  %v7735_v21 = vld [vmem:[%s17906_s13 + $0x50] sm:$0xff] }
0x24a7   : > { %v7417_v40 = vsel %vm7155_vm9, %v17328_v37, 0.0 }
0x24a8   : > { %7415 = vadd.xlane.f32.xlu0 %v7414_v39  ;;  %12370 = vmatpush3.bf16.msra.mxu1 %v12369_v43  ;;  %v12387_v43 = vpack.c.bf16 %v7562_v50, %v7561_v15  ;;  %v12401_v15 = vpack.c.bf16 %v7735_v21, %v7733_v55  ;;  %v7867_v55 = vld [vmem:[#allocation18 + $0x8] sm:$0xff]  ;;  %v7884_v21 = vld [vmem:[#allocation18 + $0x90] sm:$0xff] }
0x24a9   : > { %12372 = vmatprep.subr.bf16.mxu1 %v12371_v4  ;;  %v7545_v4 = vld [vmem:[#allocation19 + $0x70] sm:$0xff] }
0x24aa   : > { %v17332_v47 = vpop.eup %13327  ;;  %v12389_v13 = vpack.c.bf16 %v7546_v12, %v7545_v4 }
0x24ab   : > { %v7420_v1 = vsel %vm7155_vm9, %v17332_v47, 0.0 }
0x24ac   : > { %7418 = vadd.xlane.f32.xlu0 %v7417_v40  ;;  %12374 = vmatpush3.bf16.msra.mxu1 %v12373_v16 }
0x24ae   : > { %v17336_v48 = vpop.eup %13329 }
0x24af   : > { %v7423_v49 = vsel %vm7155_vm9, %v17336_v48, 0.0 }
0x24b0   : > { %7421 = vadd.xlane.f32.xlu0 %v7420_v1 }
0x24b4   : > { %7424 = vadd.xlane.f32.xlu0 %v7423_v49 }
0x2525   : > { %v7185_v6 = vpop.xlane.xlu0 %7184 }
0x2526   : > { %13331 = vrcp.f32 %v7185_v6 }
0x2529   : > { %v7182_v18 = vpop.xlane.xlu0 %7181 }
0x252a   : > { %13333 = vrcp.f32 %v7182_v18 }
0x252d   : > { %v7191_v23 = vpop.xlane.xlu0 %7190 }
0x252e   : > { %13335 = vrcp.f32 %v7191_v23 }
0x2530   : > { %v13332_v25 = vpop.eup %13331 }
0x2531   : > { %v7188_v46 = vpop.xlane.xlu0 %7187  ;;  %v7197_v33 = vmul.f32 %v13332_v25, %v17308_v10 }
0x2532   : > { %13337 = vrcp.f32 %v7188_v46 }
0x2534   : > { %v13334_v30 = vpop.eup %13333 }
0x2535   : > { %v7416_v31 = vpop.xlane.xlu0 %7415  ;;  %v7196_v44 = vmul.f32 %v13334_v30, %v17312_v57 }
0x2536   : > { %13339 = vrcp.f32 %v7416_v31 }
0x2537   : > { %11495 = vmatprep.mubr.msk.f32.mxu0 %vm7155_vm9, %v7196_v44 }
0x2538   : > { %11496 = vmatmul.mubr.msk.f32.vlgmr.msra.gmra.mrb[40].mxu0 %vm7155_vm9, %v7197_v33  ;;  %v13336_v36 = vpop.eup %13335  ;;  %v10557_v33 = vld [vmem:[#allocation10] ss:$0 sm:$0xff] }
0x2539   : > { %12354 = vmatpush3.bf16.msra.mxu0 %v17284_v62  ;;  %v7419_v35 = vpop.xlane.xlu0 %7418  ;;  %v7199_v10 = vmul.f32 %v13336_v36, %v17316_v28 }
0x253a   : > { %12356 = vmatprep.subr.bf16.mxu0 %v17286_v9  ;;  %13341 = vrcp.f32 %v7419_v35 }
0x253c   : > { %v13338_v39 = vpop.eup %13337 }
0x253d   : > { %12358 = vmatpush3.bf16.msra.mxu0 %v17286_v9  ;;  %v7422_v40 = vpop.xlane.xlu0 %7421  ;;  %v7198_v57 = vmul.f32 %v13338_v39, %v17320_v32 }
0x253e   : > { %13343 = vrcp.f32 %v7422_v40 }
0x253f   : > { %11498 = vmatprep.mubr.msk.f32.mxu0 %vm7155_vm9, %v7198_v57 }
0x2540   : > { %v13340_v1 = vpop.eup %13339  ;;  %11499 = vmatmul.mubr.msk.f32.gmra.mrb[42].mxu0 %vm7155_vm9, %v7199_v10 }
0x2541   : > { %v7425_v62 = vpop.xlane.xlu0 %7424  ;;  %v7430_v49 = vmul.f32 %v13340_v1, %v17324_v34  ;;  %v7555_v34 = vld [vmem:[#allocation19 + $0xc0] sm:$0xff] }
0x2542   : > { %13345 = vrcp.f32 %v7425_v62  ;;  %v12375_v52 = vpack.c.bf16 %v7556_v51, %v7555_v34 }
0x2543   : > { %11523 = vmatprep.mubr.msk.f32.mxu0 %vm7155_vm9, %v7430_v49 }
0x2544   : > { %v13342_v14 = vpop.eup %13341  ;;  %12376 = vmatprep.subr.bf16.mxu1 %v12375_v52 }
0x2545   : > { %v7431_v9 = vmul.f32 %v13342_v14, %v17328_v37  ;;  %v7557_v37 = vld [vmem:[#allocation19 + $0xd0] sm:$0xff]  ;;  %12378 = vmatpush3.bf16.msra.mxu1 %v12377_v54  ;;  %v7727_v54 = vld [vmem:[%s17906_s13 + $0x10] sm:$0xff] }
0x2546   : > { %v12393_v22 = vpack.c.bf16 %v7727_v54, %v7725_v24  ;;  %v7749_v24 = vld [vmem:[%s17906_s13 + $0xc0] sm:$0xff] }
0x2547   : > { %11524 = vmatmul.mubr.msk.f32.vlgmr.msra.gmra.mrb[44].mxu0 %vm7155_vm9, %v7431_v9 }
0x2548   : > { %v13344_v32 = vpop.eup %13343 }
0x2549   : > { %v7432_v41 = vmul.f32 %v13344_v32, %v17332_v47  ;;  %v12379_v47 = vpack.c.bf16 %v7558_v59, %v7557_v37  ;;  %v7730_v59 = vld [vmem:[%s17906_s13 + $0x28] sm:$0xff] }
0x254b   : > { %11526 = vmatprep.mubr.msk.f32.mxu0 %vm7155_vm9, %v7432_v41  ;;  %12380 = vmatprep.subr.bf16.mxu1 %v12379_v47  ;;  %v12395_v47 = vpack.c.bf16 %v7732_v61, %v7730_v59  ;;  %v7754_v59 = vld [vmem:[%s17906_s13 + $0xe8] sm:$0xff]  ;;  %v7756_v61 = vld [vmem:[%s17906_s13 + $0xf8] sm:$0xff] }
0x254c   : > { %v13346_v28 = vpop.eup %13345  ;;  %12382 = vmatpush3.bf16.msra.mxu1 %v12381_v56  ;;  %v7729_v56 = vld [vmem:[%s17906_s13 + $0x20] sm:$0xff] }
0x254d   : > { %v7433_v26 = vmul.f32 %v13346_v28, %v17336_v48  ;;  %v7559_v48 = vld [vmem:[#allocation19 + $0xe0] sm:$0xff] }
0x254e   : > { %v12383_v58 = vpack.c.bf16 %v7560_v27, %v7559_v48  ;;  %v7734_v48 = vld [vmem:[%s17906_s13 + $0x48] sm:$0xff]  ;;  %v7736_v27 = vld [vmem:[%s17906_s13 + $0x58] sm:$0xff] }
0x254f   : > { %11527 = vmatmul.mubr.msk.f32.gmra.mrb[46].mxu0 %vm7155_vm9, %v7433_v26 }
0x2550   : > { %7833 = vmatprep.mubr.f32.mxu0 %v15428_v11  ;;  %12384 = vmatprep.subr.bf16.mxu1 %v12383_v58 }
0x2551   : > { %12386 = vmatpush3.bf16.msra.mxu1 %v12385_v8 }
0x2552   : > { %12388 = vmatprep.subr.bf16.mxu1 %v12387_v43 }
0x2555   : > { %12390 = vmatpush3.bf16.msra.mxu1 %v12389_v13 }
0x260b   : > { %v11497_v16 = vpop.f32.mrb[40].mxu0 }
0x260c   : > { %v7278_v6 = vpop.f32.mrb[41].mxu0 }
0x2613   : > { %v11500_v18 = vpop.f32.mrb[42].mxu0 }
0x2614   : > { %v7288_v23 = vpop.f32.mrb[43].mxu0 }
0x261a   : > { %v11525_v46 = vpop.f32.mrb[44].mxu0 }
0x261b   : > { %v7512_v25 = vpop.f32.mrb[45].mxu0 }
0x261c   : > { %7634 = vmatprep.mubr.f32.mxu1 %v7512_v25 }
0x261d   : > { %7635 = vmatmul.mubr.f32.vlgmr.msra.gmra.mrb[56].mxu1 %v7278_v6 }
0x261e   : > { %7639 = vmatprep.mubr.f32.mxu1 %v11525_v46 }
0x2621   : > { %7640 = vmatmul.mubr.f32.gmra.mrb[58].mxu1 %v11497_v16 }
0x2622   : > { %v11528_v30 = vpop.f32.mrb[46].mxu0 }
0x2623   : > { %v7522_v31 = vpop.f32.mrb[47].mxu0 }
0x2624   : > { %7644 = vmatprep.mubr.f32.mxu1 %v7522_v31 }
0x2625   : > { %7645 = vmatmul.mubr.f32.gmra.mrb[60].mxu1 %v7288_v23 }
0x2626   : > { %7649 = vmatprep.mubr.f32.mxu1 %v11528_v30 }
0x2629   : > { %7650 = vmatmul.mubr.f32.gmra.mrb[62].mxu1 %v11500_v18 }
0x26f0   : > { %v10944_v44 = vpop.f32.mrb[56].mxu1 }
0x26f1   : > { %v10945_v35 = vpop.f32.mrb[57].mxu1 }
0x26f2   : > { %v10946_v36 = vadd.f32 %v10945_v35, %v10944_v44  ;;  %v7738_v35 = vld [vmem:[%s17906_s13 + $0x68] sm:$0xff] }
0x26f4   : > { %v7637_v39 = vadd.f32 %v10946_v36, %v10557_v33  ;;  %v10947_v40 = vpop.f32.mrb[58].mxu1  ;;  %v7740_v36 = vld [vmem:[%s17906_s13 + $0x78] sm:$0xff] }
0x26f5   : > { %v10948_v57 = vpop.f32.mrb[59].mxu1 }
0x26f6   : > { %v10949_v10 = vadd.f32 %v10948_v57, %v10947_v40  ;;  %v7655_v1 = vadd.f32 %v7637_v39, %v17244_v60  ;;  %v12403_v39 = vpack.c.bf16 %v7740_v36, %v7738_v35  ;;  %v7737_v40 = vld [vmem:[%s17906_s13 + $0x60] sm:$0xff]  ;;  %v7739_v57 = vld [vmem:[%s17906_s13 + $0x70] sm:$0xff] }
0x26f8   : > { %v7642_v62 = vadd.f32 %v10949_v10, %v10557_v33  ;;  %7659 = vadd.xlane.f32.xlu1 %v7655_v1  ;;  %v10950_v49 = vpop.f32.mrb[60].mxu1  ;;  %v12405_v10 = vpack.c.bf16 %v7739_v57, %v7737_v40  ;;  %v7873_v40 = vld [vmem:[#allocation18 + $0x38] sm:$0xff]  ;;  %v7890_v57 = vld [vmem:[#allocation18 + $0xc0] sm:$0xff] }
0x26f9   : > { %v10951_v14 = vpop.f32.mrb[61].mxu1 }
0x26fa   : > { %v10952_v9 = vadd.f32 %v10951_v14, %v10950_v49  ;;  %v7656_v32 = vadd.f32 %v7642_v62, %v17250_v45  ;;  %v7728_v45 = vld [vmem:[%s17906_s13 + $0x18] sm:$0xff]  ;;  %v7741_v14 = vld [vmem:[%s17906_s13 + $0x80] sm:$0xff] }
0x26fb   : > { %v12391_v37 = vpack.c.bf16 %v7728_v45, %v7726_v53  ;;  %v7744_v62 = vld [vmem:[%s17906_s13 + $0x98] sm:$0xff] }
0x26fc   : > { %v7647_v41 = vadd.f32 %v10952_v9, %v10557_v33  ;;  %7661 = vadd.xlane.f32.xlu0 %v7656_v32  ;;  %v10953_v28 = vpop.f32.mrb[62].mxu1  ;;  %v7743_v9 = vld [vmem:[%s17906_s13 + $0x90] sm:$0xff]  ;;  %v7752_v53 = vld [vmem:[%s17906_s13 + $0xd8] sm:$0xff] }
0x26fd   : > { %v10954_v26 = vpop.f32.mrb[63].mxu1  ;;  %12392 = vmatprep.subr.bf16.mxu0 %v12391_v37  ;;  %v7751_v37 = vld [vmem:[%s17906_s13 + $0xd0] sm:$0xff] }
0x26fe   : > { %v10955_v34 = vadd.f32 %v10954_v26, %v10953_v28  ;;  %v7657_v60 = vadd.f32 %v7647_v41, %v17257_v17  ;;  %v7731_v17 = vld [vmem:[%s17906_s13 + $0x30] sm:$0xff]  ;;  %12394 = vmatpush1.bf16.msra.mxu0 %v12393_v22  ;;  %v7746_v41 = vld [vmem:[%s17906_s13 + $0xa8] sm:$0xff]  ;;  %v7748_v28 = vld [vmem:[%s17906_s13 + $0xb8] sm:$0xff]  ;;  %v12417_v54 = vpack.c.bf16 %v7751_v37, %v7749_v24  ;;  %v12419_v22 = vpack.c.bf16 %v7756_v61, %v7754_v59 }
0x26ff   : > { %v12397_v58 = vpack.c.bf16 %v7731_v17, %v7729_v56  ;;  %12396 = vmatprep.subr.bf16.mxu0 %v12395_v47  ;;  %v12411_v26 = vpack.c.bf16 %v7748_v28, %v7746_v41  ;;  %v7753_v47 = vld [vmem:[%s17906_s13 + $0xe0] sm:$0xff]  ;;  %v7755_v56 = vld [vmem:[%s17906_s13 + $0xf0] sm:$0xff] }
0x2700   : > { %v7652_v51 = vadd.f32 %v10955_v34, %v10557_v33  ;;  %7663 = vadd.xlane.f32.xlu1 %v7657_v60  ;;  %v7745_v34 = vld [vmem:[%s17906_s13 + $0xa0] sm:$0xff]  ;;  %v12421_v17 = vpack.c.bf16 %v7755_v56, %v7753_v47 }
0x2702   : > { %v7658_v52 = vadd.f32 %v7652_v51, %v17264_v29  ;;  %v12399_v29 = vpack.c.bf16 %v7736_v27, %v7734_v48  ;;  %12398 = vmatpush1.bf16.msra.mxu0 %v12397_v58  ;;  %v7882_v48 = vld [vmem:[#allocation18 + $0x80] sm:$0xff]  ;;  %v7883_v27 = vld [vmem:[#allocation18 + $0x88] sm:$0xff] }
0x2703   : > { %v7866_v58 = vld [vmem:[#allocation18] sm:$0xff] }
0x2704   : > { %7665 = vadd.xlane.f32.xlu0 %v7658_v52  ;;  %12400 = vmatprep.subr.bf16.mxu0 %v12399_v29  ;;  %v12423_v29 = vpack.c.bf16 %v7883_v27, %v7882_v48 }
0x2706   : > { %12402 = vmatpush1.bf16.msra.mxu0 %v12401_v15  ;;  %v7885_v15 = vld [vmem:[#allocation18 + $0x98] sm:$0xff]  ;;  %12424 = vmatprep.subr.bf16.mxu1 %v12423_v29 }
0x2707   : > { %12404 = vmatprep.subr.bf16.mxu0 %v12403_v39  ;;  %v7872_v39 = vld [vmem:[#allocation18 + $0x30] sm:$0xff]  ;;  %v10558_v29 = vld [vmem:[#allocation13] ss:$0 sm:$0xff] }
0x270a   : > { %12406 = vmatpush1.bf16.msra.mxu0 %v12405_v10  ;;  %v7891_v10 = vld [vmem:[#allocation18 + $0xc8] sm:$0xff] }
0x2785   : > { %v7660_v8 = vpop.xlane.xlu1 %7659 }
0x2786   : > { %v7667_v50 = vmul.f32 0.0078125, %v7660_v8  ;;  %v12425_v8 = vpack.c.bf16 %v7867_v55, %v7866_v58 }
0x2788   : > { %v17376_v43 = vsub.f32 %v7655_v1, %v7667_v50  ;;  %v7742_v1 = vld [vmem:[%s17906_s13 + $0x88] sm:$0xff]  ;;  %v12427_v50 = vpack.c.bf16 %v7885_v15, %v7884_v21  ;;  %12426 = vmatpush3.bf16.msra.mxu1 %v12425_v8 }
0x2789   : > { %v7662_v4 = vpop.xlane.xlu0 %7661  ;;  %v12407_v49 = vpack.c.bf16 %v7744_v62, %v7742_v1  ;;  %v12437_v1 = vpack.c.bf16 %v7873_v40, %v7872_v39  ;;  %v12439_v62 = vpack.c.bf16 %v7891_v10, %v7890_v57  ;;  %v10559_v21 = vld [vmem:[#allocation12] ss:$0 sm:$0xff]  ;;  %v7880_v57 = vld [vmem:[#allocation18 + $0x70] sm:$0xff] }
0x278a   : > { %v7668_v12 = vmul.f32 0.0078125, %v7662_v4  ;;  %v7675_v13 = vmul.f32 %v17376_v43, %v17376_v43  ;;  %v7868_v4 = vld [vmem:[#allocation18 + $0x10] sm:$0xff]  ;;  %12428 = vmatprep.subr.bf16.mxu1 %v12427_v50  ;;  %v7897_v39 = vld [vmem:[#allocation18 + $0xf8] sm:$0xff] }
0x278b   : > { %12408 = vmatprep.subr.bf16.mxu0 %v12407_v49  ;;  %v7874_v49 = vld [vmem:[#allocation18 + $0x40] sm:$0xff] }
0x278c   : > { %v17380_v16 = vsub.f32 %v7656_v32, %v7668_v12  ;;  %7679 = vadd.xlane.f32.xlu1 %v7675_v13  ;;  %v12409_v32 = vpack.c.bf16 %v7743_v9, %v7741_v14  ;;  %v7869_v12 = vld [vmem:[#allocation18 + $0x18] sm:$0xff]  ;;  %v7886_v13 = vld [vmem:[#allocation18 + $0xa0] sm:$0xff]  ;;  %v7875_v14 = vld [vmem:[#allocation18 + $0x48] sm:$0xff] }
0x278d   : > { %v7664_v6 = vpop.xlane.xlu1 %7663  ;;  %v7892_v9 = vld [vmem:[#allocation18 + $0xd0] sm:$0xff]  ;;  %v12441_v41 = vpack.c.bf16 %v7875_v14, %v7874_v49 }
0x278e   : > { %v7669_v18 = vmul.f32 0.0078125, %v7664_v6  ;;  %v7676_v23 = vmul.f32 %v17380_v16, %v17380_v16  ;;  %12410 = vmatpush1.bf16.msra.mxu0 %v12409_v32  ;;  %v7887_v6 = vld [vmem:[#allocation18 + $0xa8] sm:$0xff]  ;;  %v7893_v32 = vld [vmem:[#allocation18 + $0xd8] sm:$0xff] }
0x278f   : > { %12412 = vmatprep.subr.bf16.mxu0 %v12411_v26  ;;  %v12443_v28 = vpack.c.bf16 %v7893_v32, %v7892_v9  ;;  %v7876_v26 = vld [vmem:[#allocation18 + $0x50] sm:$0xff] }
0x2790   : > { %v17384_v46 = vsub.f32 %v7657_v60, %v7669_v18  ;;  %7681 = vadd.xlane.f32.xlu0 %v7676_v23  ;;  %v7747_v60 = vld [vmem:[%s17906_s13 + $0xb0] sm:$0xff]  ;;  %v12429_v18 = vpack.c.bf16 %v7869_v12, %v7868_v4  ;;  %v12431_v23 = vpack.c.bf16 %v7887_v6, %v7886_v13 }
0x2791   : > { %v7666_v25 = vpop.xlane.xlu0 %7665  ;;  %v12413_v51 = vpack.c.bf16 %v7747_v60, %v7745_v34  ;;  %v7877_v34 = vld [vmem:[#allocation18 + $0x58] sm:$0xff]  ;;  %v7894_v60 = vld [vmem:[#allocation18 + $0xe0] sm:$0xff] }
0x2792   : > { %v7670_v30 = vmul.f32 0.0078125, %v7666_v25  ;;  %v7677_v31 = vmul.f32 %v17384_v46, %v17384_v46  ;;  %v7870_v25 = vld [vmem:[#allocation18 + $0x20] sm:$0xff]  ;;  %12430 = vmatpush3.bf16.msra.mxu1 %v12429_v18 }
0x2793   : > { %12414 = vmatpush1.bf16.msra.mxu0 %v12413_v51  ;;  %12432 = vmatprep.subr.bf16.mxu1 %v12431_v23  ;;  %v7895_v51 = vld [vmem:[#allocation18 + $0xe8] sm:$0xff] }
0x2794   : > { %v17388_v44 = vsub.f32 %v7658_v52, %v7670_v30  ;;  %7683 = vadd.xlane.f32.xlu1 %v7677_v31  ;;  %v7750_v52 = vld [vmem:[%s17906_s13 + $0xc8] sm:$0xff]  ;;  %v7871_v30 = vld [vmem:[#allocation18 + $0x28] sm:$0xff] }
0x2795   : > { %v12415_v45 = vpack.c.bf16 %v7752_v53, %v7750_v52  ;;  %v7888_v31 = vld [vmem:[#allocation18 + $0xb0] sm:$0xff]  ;;  %v12433_v35 = vpack.c.bf16 %v7871_v30, %v7870_v25  ;;  %v12445_v52 = vpack.c.bf16 %v7877_v34, %v7876_v26  ;;  %v12447_v53 = vpack.c.bf16 %v7895_v51, %v7894_v60 }
0x2796   : > { %v7678_v33 = vmul.f32 %v17388_v44, %v17388_v44 }
0x2797   : > { %12416 = vmatprep.subr.bf16.mxu0 %v12415_v45  ;;  %12434 = vmatpush3.bf16.msra.mxu1 %v12433_v35 }
0x2798   : > { %7685 = vadd.xlane.f32.xlu0 %v7678_v33  ;;  %12418 = vmatpush1.bf16.msra.mxu0 %v12417_v54  ;;  %v7889_v33 = vld [vmem:[#allocation18 + $0xb8] sm:$0xff] }
0x2799   : > { %12420 = vmatprep.subr.bf16.mxu0 %v12419_v22  ;;  %v12435_v36 = vpack.c.bf16 %v7889_v33, %v7888_v31  ;;  %v7879_v33 = vld [vmem:[#allocation18 + $0x68] sm:$0xff] }
0x279b   : > { %12436 = vmatprep.subr.bf16.mxu1 %v12435_v36  ;;  %v7896_v36 = vld [vmem:[#allocation18 + $0xf0] sm:$0xff] }
0x279c   : > { %12422 = vmatpush1.bf16.msra.mxu0 %v12421_v17  ;;  %12438 = vmatpush3.bf16.msra.mxu1 %v12437_v1  ;;  %v12451_v40 = vpack.c.bf16 %v7897_v39, %v7896_v36  ;;  %v7757_v1 = vld [vmem:[#allocation7] sm:$0x3] }
0x279d   : > { %12440 = vmatprep.subr.bf16.mxu1 %v12439_v62  ;;  %v7762_v62 = vrot.slane %v7757_v1, %v16899_v5  ;;  %v7766_v49 = vrot.slane %v7757_v1, %v16904_v7 }
0x27a0   : > { %12442 = vmatpush3.bf16.msra.mxu1 %v12441_v41 }
0x27a1   : > { %12444 = vmatprep.subr.bf16.mxu1 %v12443_v28 }
0x27a4   : > { %12446 = vmatpush3.bf16.msra.mxu1 %v12445_v52 }
0x27a5   : > { %12448 = vmatprep.subr.bf16.mxu1 %v12447_v53 }
0x2819   : > { %v7680_v45 = vpop.xlane.xlu1 %7679 }
0x281a   : > { %v7687_v24 = vmul.f32 0.0078125, %v7680_v45 }
0x281c   : > { %v7691_v37 = vadd.f32 1e-05, %v7687_v24 }
0x281d   : > { %v7682_v54 = vpop.xlane.xlu0 %7681 }
0x281e   : > { %13347 = vrsqrt.f32 %v7691_v37  ;;  %v7688_v59 = vmul.f32 0.0078125, %v7682_v54 }
0x2820   : > { %v7692_v61 = vadd.f32 1e-05, %v7688_v59 }
0x2821   : > { %v7684_v22 = vpop.xlane.xlu1 %7683 }
0x2822   : > { %13349 = vrsqrt.f32 %v7692_v61  ;;  %v7689_v47 = vmul.f32 0.0078125, %v7684_v22 }
0x2824   : > { %v7693_v56 = vadd.f32 1e-05, %v7689_v47 }
0x2825   : > { %v7686_v17 = vpop.xlane.xlu0 %7685 }
0x2826   : > { %13351 = vrsqrt.f32 %v7693_v56  ;;  %v7690_v48 = vmul.f32 0.0078125, %v7686_v17 }
0x2828   : > { %v13348_v27 = vpop.eup %13347  ;;  %v7694_v58 = vadd.f32 1e-05, %v7690_v48 }
0x2829   : > { %v7699_v55 = vmul.f32 %v13348_v27, %v17376_v43 }
0x282a   : > { %13353 = vrsqrt.f32 %v7694_v58 }
0x282b   : > { %v7710_v15 = vmul.f32 %v10558_v29, %v7699_v55  ;;  %v10560_v55 = vld [vmem:[#allocation9] ss:$0 sm:$0xff] }
0x282c   : > { %v13350_v8 = vpop.eup %13349 }
0x282d   : > { %v17413_v50 = vadd.f32 %v10559_v21, %v7710_v15  ;;  %v7700_v4 = vmul.f32 %v13350_v8, %v17380_v16 }
0x282f   : > { %7834 = vmatmul.mubr.f32.vlgmr.msra.gmra.mrb[48].mxu0 %v17413_v50  ;;  %v7711_v12 = vmul.f32 %v10558_v29, %v7700_v4 }
0x2830   : > { %v13352_v13 = vpop.eup %13351  ;;  %7839 = vmatprep.mubr.f32.mxu0 %v15428_v11 }
0x2831   : > { %v17418_v6 = vadd.f32 %v10559_v21, %v7711_v12  ;;  %v7701_v18 = vmul.f32 %v13352_v13, %v17384_v46  ;;  %v7878_v46 = vld [vmem:[#allocation18 + $0x60] sm:$0xff] }
0x2832   : > { %v12449_v35 = vpack.c.bf16 %v7879_v33, %v7878_v46 }
0x2833   : > { %7840 = vmatmul.mubr.f32.gmra.mrb[50].mxu0 %v17418_v6  ;;  %v7712_v43 = vmul.f32 %v10558_v29, %v7701_v18 }
0x2834   : > { %v13354_v23 = vpop.eup %13353  ;;  %7845 = vmatprep.mubr.f32.mxu0 %v15428_v11  ;;  %12450 = vmatpush3.bf16.msra.mxu1 %v12449_v35 }
0x2835   : > { %v17423_v25 = vadd.f32 %v10559_v21, %v7712_v43  ;;  %v7702_v16 = vmul.f32 %v13354_v23, %v17388_v44  ;;  %v7881_v44 = vld [vmem:[#allocation18 + $0x78] sm:$0xff]  ;;  %12452 = vmatprep.subr.bf16.mxu1 %v12451_v40 }
0x2836   : > { %v12453_v10 = vpack.c.bf16 %v7881_v44, %v7880_v57  ;;  %v8061_v44 = vld [vmem:[#allocation37 + $0x8] sm:$0xff] }
0x2837   : > { %7846 = vmatmul.mubr.f32.gmra.mrb[52].mxu0 %v17423_v25  ;;  %v7713_v30 = vmul.f32 %v10558_v29, %v7702_v16 }
0x2838   : > { %7851 = vmatprep.mubr.f32.mxu0 %v15428_v11  ;;  %12454 = vmatpush3.bf16.msra.mxu1 %v12453_v10  ;;  %v8060_v10 = vld [vmem:[#allocation37] sm:$0xff] }
0x2839   : > { %v17428_v31 = vadd.f32 %v10559_v21, %v7713_v30 }
0x283b   : > { %7852 = vmatmul.mubr.f32.gmra.mrb[54].mxu0 %v17428_v31 }
0x283c   : > { %8252 = vmatprep.mubr.f32.mxu0 %v15428_v11 }
0x2902   : > { %v7835_v14 = vpop.f32.mrb[48].mxu0 }
0x2903   : > { %v7836_v9 = vadd.f32 %v7835_v14, %v7762_v62  ;;  %v7837_v32 = vpop.f32.mrb[49].mxu0  ;;  %v8069_v14 = vld [vmem:[#allocation37 + $0x48] sm:$0xff] }
0x2904   : > { %v7838_v41 = vadd.f32 %v7837_v32, %v7766_v49 }
0x2905   : > { %v7858_v34 = vmax.f32 %v7836_v9, 0.0 }
0x2906   : > { %v7859_v28 = vmax.f32 %v7838_v41, 0.0  ;;  %v7841_v26 = vpop.f32.mrb[50].mxu0  ;;  %v8062_v41 = vld [vmem:[#allocation37 + $0x10] sm:$0xff] }
0x2907   : > { %v7842_v60 = vadd.f32 %v7841_v26, %v7762_v62  ;;  %v7843_v51 = vpop.f32.mrb[51].mxu0 }
0x2908   : > { %v7844_v52 = vadd.f32 %v7843_v51, %v7766_v49  ;;  %7969 = vmatprep.mubr.f32.mxu1 %v7859_v28  ;;  %v8073_v28 = vld [vmem:[#allocation37 + $0x68] sm:$0xff] }
0x2909   : > { %7970 = vmatmul.mubr.f32.vlgmr.msra.gmra.mrb[64].mxu1 %v7858_v34  ;;  %v7860_v24 = vmax.f32 %v7842_v60, 0.0  ;;  %v8079_v34 = vld [vmem:[#allocation37 + $0x98] sm:$0xff]  ;;  %v8072_v60 = vld [vmem:[#allocation37 + $0x60] sm:$0xff] }
0x290a   : > { %v7861_v53 = vmax.f32 %v7844_v52, 0.0  ;;  %v7847_v45 = vpop.f32.mrb[52].mxu0  ;;  %v12459_v51 = vpack.c.bf16 %v8079_v34, %v8073_v28 }
0x290b   : > { %v7848_v37 = vadd.f32 %v7847_v45, %v7762_v62  ;;  %v7849_v54 = vpop.f32.mrb[53].mxu0  ;;  %v8081_v45 = vld [vmem:[#allocation37 + $0xa8] sm:$0xff] }
0x290c   : > { %v7850_v59 = vadd.f32 %v7849_v54, %v7766_v49  ;;  %7974 = vmatprep.mubr.f32.mxu1 %v7861_v53  ;;  %v8075_v53 = vld [vmem:[#allocation37 + $0x78] sm:$0xff]  ;;  %v8080_v54 = vld [vmem:[#allocation37 + $0xa0] sm:$0xff] }
0x290d   : > { %7975 = vmatmul.mubr.f32.gmra.mrb[66].mxu1 %v7860_v24  ;;  %v7862_v47 = vmax.f32 %v7848_v37, 0.0  ;;  %v8074_v24 = vld [vmem:[#allocation37 + $0x70] sm:$0xff]  ;;  %v12491_v37 = vpack.c.bf16 %v8081_v45, %v8075_v53  ;;  %v8117_v53 = vld [vmem:[#allocation37 + $0x1c8] sm:$0xff] }
0x290e   : > { %v7863_v61 = vmax.f32 %v7850_v59, 0.0  ;;  %v7853_v22 = vpop.f32.mrb[54].mxu0  ;;  %v8085_v59 = vld [vmem:[#allocation37 + $0xc8] sm:$0xff]  ;;  %v8110_v45 = vld [vmem:[#allocation37 + $0x190] sm:$0xff] }
0x290f   : > { %v7854_v56 = vadd.f32 %v7853_v22, %v7762_v62  ;;  %v7855_v17 = vpop.f32.mrb[55].mxu0  ;;  %v8066_v62 = vld [vmem:[#allocation37 + $0x30] sm:$0xff]  ;;  %v12493_v22 = vpack.c.bf16 %v8080_v54, %v8074_v24  ;;  %v8116_v24 = vld [vmem:[#allocation37 + $0x1c0] sm:$0xff] }
0x2910   : > { %v7856_v48 = vadd.f32 %v7855_v17, %v7766_v49  ;;  %7979 = vmatprep.mubr.f32.mxu1 %v7863_v61  ;;  %v8063_v49 = vld [vmem:[#allocation37 + $0x18] sm:$0xff]  ;;  %v12457_v9 = vpack.c.bf16 %v8066_v62, %v8060_v10  ;;  %v8090_v17 = vld [vmem:[#allocation37 + $0xf0] sm:$0xff]  ;;  %v8096_v62 = vld [vmem:[#allocation37 + $0x120] sm:$0xff]  ;;  %v12505_v54 = vpack.c.bf16 %v8116_v24, %v8110_v45 }
0x2911   : > { %7980 = vmatmul.mubr.f32.gmra.mrb[68].mxu1 %v7862_v47  ;;  %v7864_v58 = vmax.f32 %v7854_v56, 0.0  ;;  %v12487_v32 = vpack.c.bf16 %v8069_v14, %v8063_v49  ;;  %v8091_v61 = vld [vmem:[#allocation37 + $0xf8] sm:$0xff]  ;;  %v8084_v56 = vld [vmem:[#allocation37 + $0xc0] sm:$0xff] }
0x2912   : > { %v7865_v27 = vmax.f32 %v7856_v48, 0.0  ;;  %v12463_v47 = vpack.c.bf16 %v8091_v61, %v8085_v59  ;;  %v8087_v48 = vld [vmem:[#allocation37 + $0xd8] sm:$0xff]  ;;  %v8121_v59 = vld [vmem:[#allocation37 + $0x1e8] sm:$0xff] }
0x2913   : > { %12488 = vmatprep.subr.bf16.mxu1 %v12487_v32  ;;  %v8103_v10 = vld [vmem:[#allocation37 + $0x158] sm:$0xff]  ;;  %v8098_v32 = vld [vmem:[#allocation37 + $0x130] sm:$0xff] }
0x2914   : > { %7984 = vmatprep.mubr.f32.mxu1 %v7865_v27  ;;  %v8093_v27 = vld [vmem:[#allocation37 + $0x108] sm:$0xff]  ;;  %v8099_v49 = vld [vmem:[#allocation37 + $0x138] sm:$0xff] }
0x2915   : > { %7985 = vmatmul.mubr.f32.gmra.mrb[70].mxu1 %v7864_v58  ;;  %v8086_v58 = vld [vmem:[#allocation37 + $0xd0] sm:$0xff]  ;;  %v8127_v61 = vld [vmem:[#allocation37 + $0x218] sm:$0xff] }
0x2916   : > { %8341 = vmatprep.mubr.f32.mxu1 %v15428_v11 }
0x29dc   : > { %v10988_v29 = vpop.f32.mrb[64].mxu1 }
0x29dd   : > { %v10989_v21 = vpop.f32.mrb[65].mxu1 }
0x29de   : > { %v10990_v15 = vadd.f32 %v10989_v21, %v10988_v29  ;;  %v8092_v29 = vld [vmem:[#allocation37 + $0x100] sm:$0xff]  ;;  %v12495_v21 = vpack.c.bf16 %v8093_v27, %v8087_v48  ;;  %v8129_v27 = vld [vmem:[#allocation37 + $0x228] sm:$0xff] }
0x29e0   : > { %v7972_v8 = vadd.f32 %v10990_v15, %v10560_v55  ;;  %v10991_v4 = vpop.f32.mrb[66].mxu1  ;;  %v12497_v15 = vpack.c.bf16 %v8092_v29, %v8086_v58  ;;  %v8122_v58 = vld [vmem:[#allocation37 + $0x1f0] sm:$0xff]  ;;  %v8128_v29 = vld [vmem:[#allocation37 + $0x220] sm:$0xff] }
0x29e1   : > { %v10992_v12 = vpop.f32.mrb[67].mxu1 }
0x29e2   : > { %v10993_v13 = vadd.f32 %v10992_v12, %v10991_v4  ;;  %v17436_v18 = vadd.f32 %v7972_v8, %v17413_v50 }
0x29e4   : > { %v7977_v43 = vadd.f32 %v10993_v13, %v10560_v55  ;;  %7994 = vadd.xlane.f32.xlu1 %v17436_v18  ;;  %v10994_v23 = vpop.f32.mrb[68].mxu1 }
0x29e5   : > { %v10995_v16 = vpop.f32.mrb[69].mxu1 }
0x29e6   : > { %v10996_v30 = vadd.f32 %v10995_v16, %v10994_v23  ;;  %v17440_v46 = vadd.f32 %v7977_v43, %v17418_v6  ;;  %v8067_v6 = vld [vmem:[#allocation37 + $0x38] sm:$0xff] }
0x29e7   : > { %v12455_v1 = vpack.c.bf16 %v8067_v6, %v8061_v44  ;;  %v8097_v6 = vld [vmem:[#allocation37 + $0x128] sm:$0xff] }
0x29e8   : > { %v7982_v33 = vadd.f32 %v10996_v30, %v10560_v55  ;;  %7996 = vadd.xlane.f32.xlu0 %v17440_v46  ;;  %v10997_v35 = vpop.f32.mrb[70].mxu1 }
0x29e9   : > { %v10998_v36 = vpop.f32.mrb[71].mxu1  ;;  %12456 = vmatprep.subr.bf16.mxu0 %v12455_v1  ;;  %v12467_v1 = vpack.c.bf16 %v8103_v10, %v8097_v6  ;;  %v8151_v6 = vld [vmem:[#allocation37 + $0x2d8] sm:$0xff] }
0x29ea   : > { %v10999_v39 = vadd.f32 %v10998_v36, %v10997_v35  ;;  %v17444_v40 = vadd.f32 %v7982_v33, %v17423_v25  ;;  %v8068_v25 = vld [vmem:[#allocation37 + $0x40] sm:$0xff]  ;;  %12458 = vmatpush1.bf16.msra.mxu0 %v12457_v9  ;;  %v8105_v9 = vld [vmem:[#allocation37 + $0x168] sm:$0xff] }
0x29eb   : > { %v12489_v26 = vpack.c.bf16 %v8068_v25, %v8062_v41  ;;  %12460 = vmatprep.subr.bf16.mxu0 %v12459_v51  ;;  %v8104_v41 = vld [vmem:[#allocation37 + $0x160] sm:$0xff]  ;;  %v12499_v25 = vpack.c.bf16 %v8105_v9, %v8099_v49  ;;  %v8111_v51 = vld [vmem:[#allocation37 + $0x198] sm:$0xff]  ;;  %v8146_v9 = vld [vmem:[#allocation37 + $0x2b0] sm:$0xff] }
0x29ec   : > { %v7987_v50 = vadd.f32 %v10999_v39, %v10560_v55  ;;  %7998 = vadd.xlane.f32.xlu1 %v17444_v40  ;;  %v12465_v55 = vpack.c.bf16 %v8090_v17, %v8084_v56  ;;  %v12501_v28 = vpack.c.bf16 %v8104_v41, %v8098_v32  ;;  %v8126_v56 = vld [vmem:[#allocation37 + $0x210] sm:$0xff]  ;;  %v8123_v17 = vld [vmem:[#allocation37 + $0x1f8] sm:$0xff]  ;;  %v8152_v32 = vld [vmem:[#allocation37 + $0x2e0] sm:$0xff] }
0x29ed   : > { %12490 = vmatpush1.bf16.msra.mxu1 %v12489_v26  ;;  %v8115_v26 = vld [vmem:[#allocation37 + $0x1b8] sm:$0xff] }
0x29ee   : > { %v17448_v57 = vadd.f32 %v7987_v50, %v17428_v31  ;;  %v8078_v31 = vld [vmem:[#allocation37 + $0x90] sm:$0xff]  ;;  %12492 = vmatprep.subr.bf16.mxu1 %v12491_v37  ;;  %v12503_v37 = vpack.c.bf16 %v8117_v53, %v8111_v51 }
0x29ef   : > { %v12461_v52 = vpack.c.bf16 %v8078_v31, %v8072_v60  ;;  %v8108_v60 = vld [vmem:[#allocation37 + $0x180] sm:$0xff]  ;;  %v8114_v31 = vld [vmem:[#allocation37 + $0x1b0] sm:$0xff] }
0x29f0   : > { %8000 = vadd.xlane.f32.xlu0 %v17448_v57 }
0x29f1   : > { %12462 = vmatpush1.bf16.msra.mxu0 %v12461_v52  ;;  %12494 = vmatpush1.bf16.msra.mxu1 %v12493_v22  ;;  %v12473_v52 = vpack.c.bf16 %v8114_v31, %v8108_v60  ;;  %v12475_v22 = vpack.c.bf16 %v8127_v61, %v8121_v59 }
0x29f2   : > { %12464 = vmatprep.subr.bf16.mxu0 %v12463_v47  ;;  %12496 = vmatprep.subr.bf16.mxu1 %v12495_v21  ;;  %v8120_v47 = vld [vmem:[#allocation37 + $0x1e0] sm:$0xff]  ;;  %v12509_v21 = vpack.c.bf16 %v8128_v29, %v8122_v58  ;;  %v8077_v58 = vld [vmem:[#allocation37 + $0x88] sm:$0xff]  ;;  %v8083_v29 = vld [vmem:[#allocation37 + $0xb8] sm:$0xff] }
0x29f3   : > { %v12477_v48 = vpack.c.bf16 %v8126_v56, %v8120_v47  ;;  %v10561_v47 = vld [vmem:[#allocation16] ss:$0 sm:$0xff] }
0x29f5   : > { %12466 = vmatpush1.bf16.msra.mxu0 %v12465_v55  ;;  %12498 = vmatpush1.bf16.msra.mxu1 %v12497_v15  ;;  %v12507_v55 = vpack.c.bf16 %v8129_v27, %v8123_v17  ;;  %v8133_v15 = vld [vmem:[#allocation37 + $0x248] sm:$0xff]  ;;  %v8064_v17 = vld [vmem:[#allocation37 + $0x20] sm:$0xff] }
0x29f6   : > { %12468 = vmatprep.subr.bf16.mxu0 %v12467_v1  ;;  %12500 = vmatprep.subr.bf16.mxu1 %v12499_v25  ;;  %v8144_v1 = vld [vmem:[#allocation37 + $0x2a0] sm:$0xff]  ;;  %v12517_v25 = vpack.c.bf16 %v8152_v32, %v8146_v9  ;;  %v10562_v27 = vld [vmem:[#allocation15] ss:$0 sm:$0xff] }
0x29f7   : > { %v8100_v32 = vld [vmem:[#allocation37 + $0x140] sm:$0xff] }
0x29f9   : > { %12502 = vmatpush1.bf16.msra.mxu1 %v12501_v28  ;;  %v8065_v28 = vld [vmem:[#allocation37 + $0x28] sm:$0xff] }
0x29fa   : > { %12504 = vmatprep.subr.bf16.mxu1 %v12503_v37 }
0x29fd   : > { %12506 = vmatpush1.bf16.msra.mxu1 %v12505_v54 }
0x29fe   : > { %12508 = vmatprep.subr.bf16.mxu1 %v12507_v55 }
0x2a01   : > { %12510 = vmatpush1.bf16.msra.mxu1 %v12509_v21 }
0x2a71   : > { %v7995_v8 = vpop.xlane.xlu1 %7994 }
0x2a72   : > { %v8002_v4 = vmul.f32 0.0078125, %v7995_v8  ;;  %v8139_v8 = vld [vmem:[#allocation37 + $0x278] sm:$0xff] }
0x2a74   : > { %v17452_v12 = vsub.f32 %v17436_v18, %v8002_v4  ;;  %v12479_v4 = vpack.c.bf16 %v8139_v8, %v8133_v15 }
0x2a75   : > { %v7997_v13 = vpop.xlane.xlu0 %7996 }
0x2a76   : > { %v8003_v43 = vmul.f32 0.0078125, %v7997_v13  ;;  %v8010_v23 = vmul.f32 %v17452_v12, %v17452_v12  ;;  %v8132_v13 = vld [vmem:[#allocation37 + $0x240] sm:$0xff] }
0x2a78   : > { %v17457_v16 = vsub.f32 %v17440_v46, %v8003_v43  ;;  %8014 = vadd.xlane.f32.xlu1 %v8010_v23  ;;  %v8138_v43 = vld [vmem:[#allocation37 + $0x270] sm:$0xff]  ;;  %v8135_v23 = vld [vmem:[#allocation37 + $0x258] sm:$0xff] }
0x2a79   : > { %v7999_v30 = vpop.xlane.xlu1 %7998 }
0x2a7a   : > { %v8004_v33 = vmul.f32 0.0078125, %v7999_v30  ;;  %v8011_v35 = vmul.f32 %v17457_v16, %v17457_v16  ;;  %v12481_v30 = vpack.c.bf16 %v8138_v43, %v8132_v13  ;;  %v8076_v43 = vld [vmem:[#allocation37 + $0x80] sm:$0xff] }
0x2a7c   : > { %v17462_v36 = vsub.f32 %v17444_v40, %v8004_v33  ;;  %8016 = vadd.xlane.f32.xlu0 %v8011_v35  ;;  %v8102_v40 = vld [vmem:[#allocation37 + $0x150] sm:$0xff]  ;;  %v8141_v33 = vld [vmem:[#allocation37 + $0x288] sm:$0xff] }
0x2a7d   : > { %v8001_v18 = vpop.xlane.xlu0 %8000  ;;  %v12469_v14 = vpack.c.bf16 %v8102_v40, %v8096_v62  ;;  %v8134_v35 = vld [vmem:[#allocation37 + $0x250] sm:$0xff]  ;;  %v8147_v40 = vld [vmem:[#allocation37 + $0x2b8] sm:$0xff] }
0x2a7e   : > { %v8005_v39 = vmul.f32 0.0078125, %v8001_v18  ;;  %v8012_v50 = vmul.f32 %v17462_v36, %v17462_v36  ;;  %v8140_v18 = vld [vmem:[#allocation37 + $0x280] sm:$0xff]  ;;  %v8150_v62 = vld [vmem:[#allocation37 + $0x2d0] sm:$0xff] }
0x2a7f   : > { %12470 = vmatpush1.bf16.msra.mxu0 %v12469_v14  ;;  %v12485_v49 = vpack.c.bf16 %v8150_v62, %v8144_v1  ;;  %v8153_v14 = vld [vmem:[#allocation37 + $0x2e8] sm:$0xff]  ;;  %v8107_v1 = vld [vmem:[#allocation37 + $0x178] sm:$0xff] }
0x2a80   : > { %v17467_v44 = vsub.f32 %v17448_v57, %v8005_v39  ;;  %8018 = vadd.xlane.f32.xlu1 %v8012_v50  ;;  %v8109_v57 = vld [vmem:[#allocation37 + $0x188] sm:$0xff]  ;;  %v12511_v39 = vpack.c.bf16 %v8141_v33, %v8135_v23  ;;  %v12513_v50 = vpack.c.bf16 %v8140_v18, %v8134_v35  ;;  %v12515_v41 = vpack.c.bf16 %v8153_v14, %v8147_v40  ;;  %v8082_v23 = vld [vmem:[#allocation37 + $0xb0] sm:$0xff]  ;;  %v8095_v33 = vld [vmem:[#allocation37 + $0x118] sm:$0xff] }
0x2a81   : > { %v12471_v34 = vpack.c.bf16 %v8115_v26, %v8109_v57  ;;  %v8071_v57 = vld [vmem:[#allocation37 + $0x58] sm:$0xff]  ;;  %v12525_v18 = vpack.c.bf16 %v8082_v23, %v8076_v43 }
0x2a82   : > { %v8013_v46 = vmul.f32 %v17467_v44, %v17467_v44  ;;  %12512 = vmatprep.subr.bf16.mxu1 %v12511_v39  ;;  %v12519_v26 = vpack.c.bf16 %v8071_v57, %v8065_v28  ;;  %v8119_v28 = vld [vmem:[#allocation37 + $0x1d8] sm:$0xff] }
0x2a83   : > { %12472 = vmatprep.subr.bf16.mxu0 %v12471_v34  ;;  %12514 = vmatpush1.bf16.msra.mxu1 %v12513_v50 }
0x2a84   : > { %8020 = vadd.xlane.f32.xlu0 %v8013_v46  ;;  %12474 = vmatpush1.bf16.msra.mxu0 %v12473_v52  ;;  %v8145_v46 = vld [vmem:[#allocation37 + $0x2a8] sm:$0xff] }
0x2a85   : > { %12476 = vmatprep.subr.bf16.mxu0 %v12475_v22  ;;  %v12483_v10 = vpack.c.bf16 %v8151_v6, %v8145_v46  ;;  %12516 = vmatprep.subr.bf16.mxu1 %v12515_v41  ;;  %v8088_v46 = vld [vmem:[#allocation37 + $0xe0] sm:$0xff]  ;;  %v8094_v6 = vld [vmem:[#allocation37 + $0x110] sm:$0xff] }
0x2a86   : > { %v8106_v41 = vld [vmem:[#allocation37 + $0x170] sm:$0xff] }
0x2a87   : > { %12518 = vmatpush1.bf16.msra.mxu1 %v12517_v25  ;;  %v8113_v25 = vld [vmem:[#allocation37 + $0x1a8] sm:$0xff] }
0x2a88   : > { %12478 = vmatpush1.bf16.msra.mxu0 %v12477_v48  ;;  %v8070_v48 = vld [vmem:[#allocation37 + $0x50] sm:$0xff] }
0x2a89   : > { %12480 = vmatprep.subr.bf16.mxu0 %v12479_v4  ;;  %v12521_v15 = vpack.c.bf16 %v8070_v48, %v8064_v17  ;;  %v12523_v4 = vpack.c.bf16 %v8083_v29, %v8077_v58  ;;  %v8149_v17 = vld [vmem:[#allocation37 + $0x2c8] sm:$0xff]  ;;  %v8155_v48 = vld [vmem:[#allocation37 + $0x2f8] sm:$0xff]  ;;  %v8148_v29 = vld [vmem:[#allocation37 + $0x2c0] sm:$0xff] }
0x2a8a   : > { %v12547_v58 = vpack.c.bf16 %v8155_v48, %v8149_v17 }
0x2a8c   : > { %12482 = vmatpush1.bf16.msra.mxu0 %v12481_v30  ;;  %v8089_v30 = vld [vmem:[#allocation37 + $0xe8] sm:$0xff] }
0x2a8d   : > { %12484 = vmatprep.subr.bf16.mxu0 %v12483_v10  ;;  %v8101_v10 = vld [vmem:[#allocation37 + $0x148] sm:$0xff] }
0x2a90   : > { %12486 = vmatpush1.bf16.msra.mxu0 %v12485_v49  ;;  %v12529_v49 = vpack.c.bf16 %v8094_v6, %v8088_v46 }
0x2a91   : > { %12520 = vmatprep.subr.bf16.mxu0 %v12519_v26  ;;  %v12533_v26 = vpack.c.bf16 %v8106_v41, %v8100_v32 }
0x2b05   : > { %v8015_v34 = vpop.xlane.xlu1 %8014 }
0x2b06   : > { %v8022_v60 = vmul.f32 0.0078125, %v8015_v34 }
0x2b08   : > { %v8026_v31 = vadd.f32 1e-05, %v8022_v60  ;;  %v12535_v60 = vpack.c.bf16 %v8119_v28, %v8113_v25 }
0x2b09   : > { %v8017_v51 = vpop.xlane.xlu0 %8016 }
0x2b0a   : > { %13355 = vrsqrt.f32 %v8026_v31  ;;  %v8023_v52 = vmul.f32 0.0078125, %v8017_v51  ;;  %v8118_v31 = vld [vmem:[#allocation37 + $0x1d0] sm:$0xff]  ;;  %v8125_v51 = vld [vmem:[#allocation37 + $0x208] sm:$0xff] }
0x2b0c   : > { %v8027_v53 = vadd.f32 1e-05, %v8023_v52  ;;  %v8131_v52 = vld [vmem:[#allocation37 + $0x238] sm:$0xff] }
0x2b0d   : > { %v8019_v45 = vpop.xlane.xlu1 %8018 }
0x2b0e   : > { %13357 = vrsqrt.f32 %v8027_v53  ;;  %v8024_v24 = vmul.f32 0.0078125, %v8019_v45  ;;  %v12539_v45 = vpack.c.bf16 %v8131_v52, %v8125_v51 }
0x2b10   : > { %v8028_v37 = vadd.f32 1e-05, %v8024_v24  ;;  %v8124_v24 = vld [vmem:[#allocation37 + $0x200] sm:$0xff] }
0x2b11   : > { %v8021_v54 = vpop.xlane.xlu0 %8020 }
0x2b12   : > { %13359 = vrsqrt.f32 %v8028_v37  ;;  %v8025_v59 = vmul.f32 0.0078125, %v8021_v54  ;;  %v8130_v37 = vld [vmem:[#allocation37 + $0x230] sm:$0xff]  ;;  %v8137_v54 = vld [vmem:[#allocation37 + $0x268] sm:$0xff] }
0x2b14   : > { %v13356_v61 = vpop.eup %13355  ;;  %v8029_v22 = vadd.f32 1e-05, %v8025_v59  ;;  %v8143_v59 = vld [vmem:[#allocation37 + $0x298] sm:$0xff] }
0x2b15   : > { %v8034_v56 = vmul.f32 %v13356_v61, %v17452_v12  ;;  %v12541_v61 = vpack.c.bf16 %v8130_v37, %v8124_v24 }
0x2b16   : > { %13361 = vrsqrt.f32 %v8029_v22  ;;  %v12543_v22 = vpack.c.bf16 %v8143_v59, %v8137_v54 }
0x2b17   : > { %v8045_v55 = vmul.f32 %v10561_v47, %v8034_v56  ;;  %v8142_v56 = vld [vmem:[#allocation37 + $0x290] sm:$0xff] }
0x2b18   : > { %v13358_v21 = vpop.eup %13357 }
0x2b19   : > { %v17472_v8 = vadd.f32 %v10562_v27, %v8045_v55  ;;  %v8035_v13 = vmul.f32 %v13358_v21, %v17457_v16  ;;  %v12527_v16 = vpack.c.bf16 %v8095_v33, %v8089_v30  ;;  %v8154_v55 = vld [vmem:[#allocation37 + $0x2f0] sm:$0xff] }
0x2b1a   : > { %v12549_v21 = vpack.c.bf16 %v8154_v55, %v8148_v29 }
0x2b1b   : > { %8253 = vmatmul.mubr.f32.vlgmr.msra.gmra.mrb[56].mxu0 %v17472_v8  ;;  %8342 = vmatmul.mubr.f32.vlgmr.msra.gmra.mrb[72].mxu1 %v17472_v8  ;;  %v8046_v12 = vmul.f32 %v10561_v47, %v8035_v13 }
0x2b1c   : > { %v13360_v35 = vpop.eup %13359  ;;  %12522 = vmatpush1.bf16.msra.mxu0 %v12521_v15  ;;  %8258 = vmatprep.mubr.f32.mxu0 %v15428_v11  ;;  %v8156_v15 = vld [vmem:[%s17907_s9] sm:$0x3f] }
0x2b1d   : > { %8347 = vmatprep.mubr.f32.mxu1 %v15428_v11  ;;  %12524 = vmatprep.subr.bf16.mxu0 %v12523_v4  ;;  %v17479_v39 = vadd.f32 %v10562_v27, %v8046_v12  ;;  %v8036_v50 = vmul.f32 %v13360_v35, %v17462_v36  ;;  %v12531_v36 = vpack.c.bf16 %v8107_v1, %v8101_v10 }
0x2b1e   : > { %v8161_v4 = vrot.slane %v8156_v15, %v16899_v5  ;;  %v8169_v30 = vrot.slane %v8156_v15, %v16890_v0  ;;  %v8173_v35 = vrot.slane %v8156_v15, %v16896_v2  ;;  %v8177_v59 = vrot.slane %v8156_v15, %v16916_v20 }
0x2b1f   : > { %8259 = vmatmul.mubr.f32.gmra.mrb[58].mxu0 %v17479_v39  ;;  %8348 = vmatmul.mubr.f32.gmra.mrb[74].mxu1 %v17479_v39  ;;  %v8047_v62 = vmul.f32 %v10561_v47, %v8036_v50 }
0x2b20   : > { %v13362_v40 = vpop.eup %13361  ;;  %12526 = vmatpush1.bf16.msra.mxu0 %v12525_v18  ;;  %8264 = vmatprep.mubr.f32.mxu0 %v15428_v11 }
0x2b21   : > { %8353 = vmatprep.mubr.f32.mxu1 %v15428_v11  ;;  %12528 = vmatprep.subr.bf16.mxu0 %v12527_v16  ;;  %v17486_v14 = vadd.f32 %v10562_v27, %v8047_v62  ;;  %v8037_v9 = vmul.f32 %v13362_v40, %v17467_v44  ;;  %v8112_v44 = vld [vmem:[#allocation37 + $0x1a0] sm:$0xff] }
0x2b22   : > { %v12537_v53 = vpack.c.bf16 %v8118_v31, %v8112_v44 }
0x2b23   : > { %8265 = vmatmul.mubr.f32.gmra.mrb[60].mxu0 %v17486_v14  ;;  %8354 = vmatmul.mubr.f32.gmra.mrb[76].mxu1 %v17486_v14  ;;  %v8048_v57 = vmul.f32 %v10561_v47, %v8037_v9  ;;  %v8136_v47 = vld [vmem:[#allocation37 + $0x260] sm:$0xff] }
0x2b24   : > { %12530 = vmatpush1.bf16.msra.mxu0 %v12529_v49  ;;  %8270 = vmatprep.mubr.f32.mxu0 %v15428_v11 }
0x2b25   : > { %8359 = vmatprep.mubr.f32.mxu1 %v15428_v11  ;;  %12532 = vmatprep.subr.bf16.mxu0 %v12531_v36  ;;  %v17493_v34 = vadd.f32 %v10562_v27, %v8048_v57  ;;  %v12545_v27 = vpack.c.bf16 %v8142_v56, %v8136_v47 }
0x2b27   : > { %8271 = vmatmul.mubr.f32.gmra.mrb[62].mxu0 %v17493_v34  ;;  %8360 = vmatmul.mubr.f32.gmra.mrb[78].mxu1 %v17493_v34 }
0x2b28   : > { %12534 = vmatpush1.bf16.msra.mxu0 %v12533_v26  ;;  %8430 = vmatprep.mubr.f32.mxu0 %v15428_v11 }
0x2b29   : > { %12536 = vmatprep.subr.bf16.mxu0 %v12535_v60 }
0x2b2c   : > { %12538 = vmatpush1.bf16.msra.mxu0 %v12537_v53  ;;  %v8165_v53 = vrot.slane %v8156_v15, %v16904_v7 }
0x2b2d   : > { %12540 = vmatprep.subr.bf16.mxu0 %v12539_v45 }
0x2b30   : > { %12542 = vmatpush1.bf16.msra.mxu0 %v12541_v61 }
0x2b31   : > { %12544 = vmatprep.subr.bf16.mxu0 %v12543_v22  ;;  %v8181_v22 = vrot.slane %v8156_v15, %v16934_v38 }
0x2b34   : > { %12546 = vmatpush1.bf16.msra.mxu0 %v12545_v27 }
0x2b35   : > { %12548 = vmatprep.subr.bf16.mxu0 %v12547_v58 }
0x2b38   : > { %12550 = vmatpush1.bf16.msra.mxu0 %v12549_v21 }
0x2b3b   : > { %8431 = vmatmul.mubr.f32.vlgmr.msra.gmra.mrb[64].mxu0 %v17472_v8 }
0x2b3c   : > { %8436 = vmatprep.mubr.f32.mxu0 %v15428_v11 }
0x2b3f   : > { %8437 = vmatmul.mubr.f32.gmra.mrb[66].mxu0 %v17479_v39 }
0x2b40   : > { %8442 = vmatprep.mubr.f32.mxu0 %v15428_v11 }
0x2b43   : > { %8443 = vmatmul.mubr.f32.gmra.mrb[68].mxu0 %v17486_v14 }
0x2b44   : > { %8448 = vmatprep.mubr.f32.mxu0 %v15428_v11 }
0x2b47   : > { %8449 = vmatmul.mubr.f32.gmra.mrb[70].mxu0 %v17493_v34 }
0x2bee   : > { %v8254_v13 = vpop.f32.mrb[56].mxu0  ;;  %v8343_v43 = vpop.f32.mrb[72].mxu1 }
0x2bef   : > { %v8255_v23 = vadd.f32 %v8254_v13, %v8161_v4  ;;  %v8256_v33 = vpop.f32.mrb[57].mxu0  ;;  %v8345_v12 = vpop.f32.mrb[73].mxu1  ;;  %v8344_v50 = vadd.f32 %v8343_v43, %v8169_v30 }
0x2bf0   : > { %v8346_v1 = vadd.f32 %v8345_v12, %v8173_v35  ;;  %v8257_v37 = vadd.f32 %v8256_v33, %v8165_v53 }
0x2bf1   : > { %11537 = vmatprep.mubr.f32.mxu1 %v8255_v23 }
0x2bf2   : > { %v8260_v18 = vpop.f32.mrb[58].mxu0  ;;  %v8349_v16 = vpop.f32.mrb[74].mxu1 }
0x2bf3   : > { %v8350_v46 = vadd.f32 %v8349_v16, %v8169_v30  ;;  %v8262_v6 = vpop.f32.mrb[59].mxu0  ;;  %v8351_v10 = vpop.f32.mrb[75].mxu1  ;;  %v8261_v52 = vadd.f32 %v8260_v18, %v8161_v4 }
0x2bf4   : > { %v8352_v62 = vadd.f32 %v8351_v10, %v8173_v35  ;;  %v8263_v29 = vadd.f32 %v8262_v6, %v8165_v53 }
0x2bf5   : > { %v12551_v40 = vpack.c.bf16 %v8350_v46, %v8344_v50 }
0x2bf6   : > { %v12567_v49 = vpack.c.bf16 %v8352_v62, %v8346_v1  ;;  %v8266_v36 = vpop.f32.mrb[60].mxu0  ;;  %v8355_v9 = vpop.f32.mrb[76].mxu1 }
0x2bf7   : > { %v8268_v32 = vpop.f32.mrb[61].mxu0  ;;  %v8357_v41 = vpop.f32.mrb[77].mxu1  ;;  %12552 = vmatprep.subr.bf16.mxu1 %v12551_v40  ;;  %v8356_v2 = vadd.f32 %v8355_v9, %v8169_v30  ;;  %v8267_v45 = vadd.f32 %v8266_v36, %v8161_v4 }
0x2bf8   : > { %12554 = vmatpush3.bf16.xpose.msra.mxu1 %v12551_v40  ;;  %v8358_v60 = vadd.f32 %v8357_v41, %v8173_v35  ;;  %v8269_v21 = vadd.f32 %v8268_v32, %v8165_v53 }
0x2bfa   : > { %v8272_v0 = vpop.f32.mrb[62].mxu0  ;;  %v8361_v25 = vpop.f32.mrb[78].mxu1 }
0x2bfb   : > { %v8362_v28 = vadd.f32 %v8361_v25, %v8169_v30  ;;  %v8274_v57 = vpop.f32.mrb[63].mxu0  ;;  %v8363_v26 = vpop.f32.mrb[79].mxu1  ;;  %v8273_v24 = vadd.f32 %v8272_v0, %v8161_v4 }
0x2bfc   : > { %v8364_v44 = vadd.f32 %v8363_v26, %v8173_v35  ;;  %v8275_v38 = vadd.f32 %v8274_v57, %v8165_v53 }
0x2bfd   : > { %v12555_v31 = vpack.c.bf16 %v8362_v28, %v8356_v2 }
0x2bfe   : > { %v12571_v51 = vpack.c.bf16 %v8364_v44, %v8358_v60 }
0x2bff   : > { %12556 = vmatprep.subr.bf16.mxu1 %v12555_v31 }
0x2c00   : > { %12558 = vmatpush3.bf16.xpose.msra.mxu1 %v12555_v31 }
0x2c01   : > { %12568 = vmatprep.subr.bf16.mxu1 %v12567_v49 }
0x2c07   : > { %11538 = vmatmul.mubr.f32.vlgmr.msra.gmra.mrb[80].mxu1 %v8261_v52 }
0x2c08   : > { %11540 = vmatprep.mubr.f32.mxu1 %v8267_v45  ;;  %12570 = vmatpush3.bf16.xpose.msra.mxu1 %v12567_v49 }
0x2c09   : > { %12572 = vmatprep.subr.bf16.mxu1 %v12571_v51 }
0x2c0b   : > { %11541 = vmatmul.mubr.f32.gmra.mrb[82].mxu1 %v8273_v24 }
0x2c0c   : > { %11565 = vmatprep.mubr.f32.mxu1 %v8257_v37 }
0x2c0e   : > { %v8432_v54 = vpop.f32.mrb[64].mxu0 }
0x2c0f   : > { %v8434_v61 = vpop.f32.mrb[65].mxu0  ;;  %v8433_v56 = vadd.f32 %v8432_v54, %v8177_v59 }
0x2c10   : > { %12574 = vmatpush3.bf16.xpose.msra.mxu1 %v12571_v51  ;;  %v8435_v27 = vadd.f32 %v8434_v61, %v8181_v22 }
0x2c12   : > { %v8438_v47 = vpop.f32.mrb[66].mxu0 }
0x2c13   : > { %v8439_v17 = vadd.f32 %v8438_v47, %v8177_v59  ;;  %v8440_v48 = vpop.f32.mrb[67].mxu0 }
0x2c14   : > { %v8441_v58 = vadd.f32 %v8440_v48, %v8181_v22 }
0x2c15   : > { %v12559_v55 = vpack.c.bf16 %v8439_v17, %v8433_v56 }
0x2c16   : > { %v17512_v4 = vpack.c.bf16 %v8441_v58, %v8435_v27  ;;  %v8444_v13 = vpop.f32.mrb[68].mxu0 }
0x2c17   : > { %v8446_v43 = vpop.f32.mrb[69].mxu0  ;;  %12560 = vmatprep.subr.bf16.mxu0 %v12559_v55  ;;  %11566 = vmatmul.mubr.f32.vlgmr.msra.gmra.mrb[84].mxu1 %v8263_v29  ;;  %v8445_v23 = vadd.f32 %v8444_v13, %v8177_v59 }
0x2c18   : > { %v8447_v20 = vadd.f32 %v8446_v43, %v8181_v22  ;;  %12562 = vmatpush3.bf16.msra.mxu0 %v12559_v55  ;;  %11568 = vmatprep.mubr.f32.mxu1 %v8269_v21 }
0x2c1a   : > { %v8450_v15 = vpop.f32.mrb[70].mxu0 }
0x2c1b   : > { %v8451_v30 = vadd.f32 %v8450_v15, %v8177_v59  ;;  %v8452_v33 = vpop.f32.mrb[71].mxu0  ;;  %11569 = vmatmul.mubr.f32.gmra.mrb[86].mxu1 %v8275_v38 }
0x2c1c   : > { %v8453_v12 = vadd.f32 %v8452_v33, %v8181_v22  ;;  %9225 = vmatprep.mubr.f32.mxu1 %v15428_v11 }
0x2c1d   : > { %v12563_v35 = vpack.c.bf16 %v8451_v30, %v8445_v23 }
0x2c1e   : > { %v17515_v18 = vpack.c.bf16 %v8453_v12, %v8447_v20 }
0x2c1f   : > { %12564 = vmatprep.subr.bf16.mxu0 %v12563_v35 }
0x2c20   : > { %12566 = vmatpush3.bf16.msra.mxu0 %v12563_v35 }
0x2c21   : > { %12576 = vmatprep.subr.bf16.mxu0 %v17512_v4 }
0x2cda   : > { %v11539_v16 = vpop.f32.mrb[80].mxu1 }
0x2cdb   : > { %v8541_v50 = vmul.f32 0.125, %v11539_v16  ;;  %v8521_v46 = vpop.f32.mrb[81].mxu1 }
0x2cdc   : > { %v8540_v6 = vmul.f32 0.125, %v8521_v46 }
0x2cdd   : > { %v8545_v10 = vadd.f32 %v8541_v50, %v17290_v19 }
0x2cde   : > { %v11542_v1 = vpop.f32.mrb[82].mxu1  ;;  %v8544_v62 = vadd.f32 %v8540_v6, %v17290_v19 }
0x2cdf   : > { %v8543_v40 = vmul.f32 0.125, %v11542_v1  ;;  %v8531_v49 = vpop.f32.mrb[83].mxu1  ;;  %v8551_v36 = vsel %vm7155_vm9, %v8545_v10, -inf }
0x2ce0   : > { %v8542_v9 = vmul.f32 0.125, %v8531_v49  ;;  %8552 = vmax.xlane.f32.xlu0 %v8551_v36  ;;  %v8548_v32 = vsel %vm7155_vm9, %v8544_v62, -inf }
0x2ce1   : > { %8549 = vmax.xlane.f32.xlu1 %v8548_v32  ;;  %v8547_v41 = vadd.f32 %v8543_v40, %v17290_v19 }
0x2ce2   : > { %v8546_v0 = vadd.f32 %v8542_v9, %v17290_v19 }
0x2ce3   : > { %v8557_v25 = vsel %vm7155_vm9, %v8547_v41, -inf }
0x2ce4   : > { %8558 = vmax.xlane.f32.xlu0 %v8557_v25  ;;  %v8554_v2 = vsel %vm7155_vm9, %v8546_v0, -inf }
0x2ce5   : > { %8555 = vmax.xlane.f32.xlu1 %v8554_v2 }
0x2cea   : > { %v11567_v28 = vpop.f32.mrb[84].mxu1 }
0x2ceb   : > { %v8775_v57 = vmul.f32 0.125, %v11567_v28  ;;  %v8755_v26 = vpop.f32.mrb[85].mxu1 }
0x2cec   : > { %v8774_v60 = vmul.f32 0.125, %v8755_v26 }
0x2ced   : > { %v8779_v44 = vadd.f32 %v8775_v57, %v17290_v19 }
0x2cee   : > { %v11570_v31 = vpop.f32.mrb[86].mxu1  ;;  %v8778_v51 = vadd.f32 %v8774_v60, %v17290_v19 }
0x2cef   : > { %v8777_v52 = vmul.f32 0.125, %v11570_v31  ;;  %v8765_v53 = vpop.f32.mrb[87].mxu1  ;;  %v8785_v45 = vsel %vm7155_vm9, %v8779_v44, -inf }
0x2cf0   : > { %v8776_v24 = vmul.f32 0.125, %v8765_v53  ;;  %8786 = vmax.xlane.f32.xlu0 %v8785_v45  ;;  %v8782_v37 = vsel %vm7155_vm9, %v8778_v51, -inf }
0x2cf1   : > { %8783 = vmax.xlane.f32.xlu1 %v8782_v37  ;;  %v8781_v54 = vadd.f32 %v8777_v52, %v17290_v19 }
0x2cf2   : > { %v8780_v59 = vadd.f32 %v8776_v24, %v17290_v19 }
0x2cf3   : > { %v8791_v61 = vsel %vm7155_vm9, %v8781_v54, -inf }
0x2cf4   : > { %8792 = vmax.xlane.f32.xlu0 %v8791_v61  ;;  %v8788_v22 = vsel %vm7155_vm9, %v8780_v59, -inf  ;;  %v8940_v61 = vld [vmem:[#allocation36 + $0x88] sm:$0xff] }
0x2cf5   : > { %8789 = vmax.xlane.f32.xlu1 %v8788_v22 }
0x2d6d   : > { %v8553_v47 = vpop.xlane.xlu0 %8552 }
0x2d6e   : > { %v8561_v56 = vsub.f32 %v8545_v10, %v8553_v47  ;;  %v8550_v17 = vpop.xlane.xlu1 %8549 }
0x2d6f   : > { %v8560_v48 = vsub.f32 %v8544_v62, %v8550_v17 }
0x2d70   : > { %v8566_v27 = vmul.f32 1.442695, %v8561_v56 }
0x2d71   : > { %v8564_v58 = vmul.f32 1.442695, %v8560_v48  ;;  %v8559_v29 = vpop.xlane.xlu0 %8558 }
0x2d72   : > { %13363 = vpow2.f32 %v8566_v27  ;;  %v8563_v55 = vsub.f32 %v8547_v41, %v8559_v29  ;;  %v8556_v21 = vpop.xlane.xlu1 %8555 }
0x2d73   : > { %13365 = vpow2.f32 %v8564_v58  ;;  %v8562_v13 = vsub.f32 %v8546_v0, %v8556_v21 }
0x2d74   : > { %v8570_v43 = vmul.f32 1.442695, %v8563_v55  ;;  %v8923_v55 = vld [vmem:[#allocation36] sm:$0xff] }
0x2d75   : > { %v8568_v19 = vmul.f32 1.442695, %v8562_v13  ;;  %v8941_v13 = vld [vmem:[#allocation36 + $0x90] sm:$0xff] }
0x2d76   : > { %13367 = vpow2.f32 %v8570_v43  ;;  %v8942_v43 = vld [vmem:[#allocation36 + $0x98] sm:$0xff] }
0x2d77   : > { %13369 = vpow2.f32 %v8568_v19 }
0x2d7c   : > { %v13364_v20 = vpop.eup %13363 }
0x2d7d   : > { %v13366_v38 = vpop.eup %13365  ;;  %v8787_v15 = vpop.xlane.xlu0 %8786  ;;  %v8575_v23 = vsel %vm7155_vm9, %v13364_v20, 0.0 }
0x2d7e   : > { %v8795_v30 = vsub.f32 %v8779_v44, %v8787_v15  ;;  %8576 = vadd.xlane.f32.xlu0 %v8575_v23  ;;  %v8784_v33 = vpop.xlane.xlu1 %8783  ;;  %v8572_v12 = vsel %vm7155_vm9, %v13366_v38, 0.0  ;;  %v12587_v23 = vpack.c.bf16 %v8942_v43, %v8941_v13 }
0x2d7f   : > { %v8794_v35 = vsub.f32 %v8778_v51, %v8784_v33  ;;  %8573 = vadd.xlane.f32.xlu1 %v8572_v12  ;;  %v8926_v33 = vld [vmem:[#allocation36 + $0x18] sm:$0xff] }
0x2d80   : > { %v13368_v16 = vpop.eup %13367  ;;  %v8800_v50 = vmul.f32 1.442695, %v8795_v30  ;;  %v8925_v30 = vld [vmem:[#allocation36 + $0x10] sm:$0xff] }
0x2d81   : > { %v13370_v46 = vpop.eup %13369  ;;  %v8798_v6 = vmul.f32 1.442695, %v8794_v35  ;;  %v8793_v10 = vpop.xlane.xlu0 %8792  ;;  %v8581_v1 = vsel %vm7155_vm9, %v13368_v16, 0.0  ;;  %v8943_v35 = vld [vmem:[#allocation36 + $0xa0] sm:$0xff] }
0x2d82   : > { %13371 = vpow2.f32 %v8800_v50  ;;  %v8797_v62 = vsub.f32 %v8781_v54, %v8793_v10  ;;  %8582 = vadd.xlane.f32.xlu0 %v8581_v1  ;;  %v8790_v40 = vpop.xlane.xlu1 %8789  ;;  %v8578_v49 = vsel %vm7155_vm9, %v13370_v46, 0.0  ;;  %v8927_v1 = vld [vmem:[#allocation36 + $0x20] sm:$0xff] }
0x2d83   : > { %13373 = vpow2.f32 %v8798_v6  ;;  %v8796_v36 = vsub.f32 %v8780_v59, %v8790_v40  ;;  %8579 = vadd.xlane.f32.xlu1 %v8578_v49  ;;  %v8939_v59 = vld [vmem:[#allocation36 + $0x80] sm:$0xff]  ;;  %v8945_v40 = vld [vmem:[#allocation36 + $0xb0] sm:$0xff]  ;;  %v8946_v49 = vld [vmem:[#allocation36 + $0xb8] sm:$0xff] }
0x2d84   : > { %v8804_v9 = vmul.f32 1.442695, %v8797_v62  ;;  %v12583_v27 = vpack.c.bf16 %v8940_v61, %v8939_v59  ;;  %v8928_v62 = vld [vmem:[#allocation36 + $0x28] sm:$0xff]  ;;  %v8935_v59 = vld [vmem:[#allocation36 + $0x60] sm:$0xff] }
0x2d85   : > { %v8802_v32 = vmul.f32 1.442695, %v8796_v36  ;;  %v12593_v36 = vpack.c.bf16 %v8928_v62, %v8927_v1  ;;  %v8936_v61 = vld [vmem:[#allocation36 + $0x68] sm:$0xff] }
0x2d86   : > { %13375 = vpow2.f32 %v8804_v9  ;;  %v12595_v9 = vpack.c.bf16 %v8946_v49, %v8945_v40 }
0x2d87   : > { %13377 = vpow2.f32 %v8802_v32  ;;  %v8929_v32 = vld [vmem:[#allocation36 + $0x30] sm:$0xff] }
0x2d8c   : > { %v13372_v41 = vpop.eup %13371 }
0x2d8d   : > { %v13374_v0 = vpop.eup %13373  ;;  %v8809_v25 = vsel %vm7155_vm9, %v13372_v41, 0.0 }
0x2d8e   : > { %8810 = vadd.xlane.f32.xlu0 %v8809_v25  ;;  %v8806_v2 = vsel %vm7155_vm9, %v13374_v0, 0.0  ;;  %v8947_v25 = vld [vmem:[#allocation36 + $0xc0] sm:$0xff] }
0x2d8f   : > { %8807 = vadd.xlane.f32.xlu1 %v8806_v2  ;;  %v8948_v2 = vld [vmem:[#allocation36 + $0xc8] sm:$0xff] }
0x2d90   : > { %v13376_v28 = vpop.eup %13375 }
0x2d91   : > { %v13378_v57 = vpop.eup %13377  ;;  %v8815_v26 = vsel %vm7155_vm9, %v13376_v28, 0.0 }
0x2d92   : > { %8816 = vadd.xlane.f32.xlu0 %v8815_v26  ;;  %v8812_v60 = vsel %vm7155_vm9, %v13378_v57, 0.0  ;;  %v8932_v26 = vld [vmem:[#allocation36 + $0x48] sm:$0xff] }
0x2d93   : > { %8813 = vadd.xlane.f32.xlu1 %v8812_v60 }
0x2e0b   : > { %v8577_v44 = vpop.xlane.xlu0 %8576 }
0x2e0c   : > { %13379 = vrcp.f32 %v8577_v44  ;;  %v8574_v31 = vpop.xlane.xlu1 %8573  ;;  %v8949_v44 = vld [vmem:[#allocation36 + $0xd0] sm:$0xff] }
0x2e0d   : > { %13381 = vrcp.f32 %v8574_v31  ;;  %v8950_v31 = vld [vmem:[#allocation36 + $0xd8] sm:$0xff] }
0x2e0f   : > { %v8583_v51 = vpop.xlane.xlu0 %8582 }
0x2e10   : > { %13383 = vrcp.f32 %v8583_v51  ;;  %v8580_v52 = vpop.xlane.xlu1 %8579  ;;  %v8933_v51 = vld [vmem:[#allocation36 + $0x50] sm:$0xff] }
0x2e11   : > { %13385 = vrcp.f32 %v8580_v52  ;;  %v12603_v52 = vpack.c.bf16 %v8950_v31, %v8949_v44  ;;  %v9121_v44 = vld [vmem:[#allocation33 + $0x20] sm:$0xff]  ;;  %v9123_v31 = vld [vmem:[#allocation33 + $0x30] sm:$0xff] }
0x2e16   : > { %v13380_v53 = vpop.eup %13379 }
0x2e17   : > { %v13382_v45 = vpop.eup %13381  ;;  %v8589_v37 = vmul.f32 %v13380_v53, %v13364_v20  ;;  %v8934_v53 = vld [vmem:[#allocation36 + $0x58] sm:$0xff] }
0x2e18   : > { %v8588_v24 = vmul.f32 %v13382_v45, %v13366_v38  ;;  %v8951_v45 = vld [vmem:[#allocation36 + $0xe0] sm:$0xff] }
0x2e1a   : > { %v13384_v54 = vpop.eup %13383  ;;  %11551 = vmatprep.mubr.msk.f32.mxu0 %vm7155_vm9, %v8588_v24  ;;  %v8952_v24 = vld [vmem:[#allocation36 + $0xe8] sm:$0xff] }
0x2e1b   : > { %v13386_v22 = vpop.eup %13385  ;;  %v8811_v47 = vpop.xlane.xlu0 %8810  ;;  %11552 = vmatmul.mubr.msk.f32.vlgmr.msra.gmra.mrb[72].mxu0 %vm7155_vm9, %v8589_v37  ;;  %v8591_v48 = vmul.f32 %v13384_v54, %v13368_v16  ;;  %v12605_v37 = vpack.c.bf16 %v8934_v53, %v8933_v51  ;;  %v12607_v54 = vpack.c.bf16 %v8952_v24, %v8951_v45  ;;  %v9126_v51 = vld [vmem:[#allocation33 + $0x48] sm:$0xff]  ;;  %v9127_v45 = vld [vmem:[#allocation33 + $0x50] sm:$0xff] }
0x2e1c   : > { %13387 = vrcp.f32 %v8811_v47  ;;  %12578 = vmatpush3.bf16.msra.mxu0 %v17512_v4  ;;  %v8808_v56 = vpop.xlane.xlu1 %8807  ;;  %v8590_v17 = vmul.f32 %v13386_v22, %v13370_v46  ;;  %v8924_v4 = vld [vmem:[#allocation36 + $0x8] sm:$0xff]  ;;  %v12589_v46 = vpack.c.bf16 %v8926_v33, %v8925_v30  ;;  %v8953_v22 = vld [vmem:[#allocation36 + $0xf0] sm:$0xff]  ;;  %v8954_v47 = vld [vmem:[#allocation36 + $0xf8] sm:$0xff] }
0x2e1d   : > { %12580 = vmatprep.subr.bf16.mxu0 %v17515_v18  ;;  %13389 = vrcp.f32 %v8808_v56  ;;  %v12585_v38 = vpack.c.bf16 %v8924_v4, %v8923_v55  ;;  %v12609_v56 = vpack.c.bf16 %v8936_v61, %v8935_v59 }
0x2e1e   : > { %11554 = vmatprep.mubr.msk.f32.mxu0 %vm7155_vm9, %v8590_v17  ;;  %v12611_v17 = vpack.c.bf16 %v8954_v47, %v8953_v22 }
0x2e1f   : > { %v8817_v58 = vpop.xlane.xlu0 %8816  ;;  %11555 = vmatmul.mubr.msk.f32.gmra.mrb[74].mxu0 %vm7155_vm9, %v8591_v48  ;;  %v8937_v48 = vld [vmem:[#allocation36 + $0x70] sm:$0xff] }
0x2e20   : > { %13391 = vrcp.f32 %v8817_v58  ;;  %12582 = vmatpush3.bf16.msra.mxu0 %v17515_v18  ;;  %v8814_v29 = vpop.xlane.xlu1 %8813  ;;  %v8944_v18 = vld [vmem:[#allocation36 + $0xa8] sm:$0xff] }
0x2e21   : > { %13393 = vrcp.f32 %v8814_v29  ;;  %12584 = vmatprep.subr.bf16.mxu0 %v12583_v27  ;;  %v12591_v10 = vpack.c.bf16 %v8944_v18, %v8943_v35  ;;  %v8938_v27 = vld [vmem:[#allocation36 + $0x78] sm:$0xff] }
0x2e22   : > { %v12613_v58 = vpack.c.bf16 %v8938_v27, %v8937_v48 }
0x2e26   : > { %v13388_v21 = vpop.eup %13387 }
0x2e27   : > { %v13390_v19 = vpop.eup %13389  ;;  %v8823_v15 = vmul.f32 %v13388_v21, %v13372_v41  ;;  %v8930_v41 = vld [vmem:[#allocation36 + $0x38] sm:$0xff] }
0x2e28   : > { %v8822_v20 = vmul.f32 %v13390_v19, %v13374_v0  ;;  %v12597_v0 = vpack.c.bf16 %v8930_v41, %v8929_v32 }
0x2e2a   : > { %v13392_v12 = vpop.eup %13391  ;;  %11579 = vmatprep.mubr.msk.f32.mxu0 %vm7155_vm9, %v8822_v20 }
0x2e2b   : > { %v13394_v16 = vpop.eup %13393  ;;  %11580 = vmatmul.mubr.msk.f32.vlgmr.msra.gmra.mrb[76].mxu0 %vm7155_vm9, %v8823_v15  ;;  %v8825_v6 = vmul.f32 %v13392_v12, %v13376_v28  ;;  %v12599_v28 = vpack.c.bf16 %v8948_v2, %v8947_v25  ;;  %v10571_v15 = vld [vmem:[#allocation25] ss:$0 sm:$0xff]  ;;  %v9117_v25 = vld [vmem:[#allocation33] sm:$0xff] }
0x2e2c   : > { %v8824_v50 = vmul.f32 %v13394_v16, %v13378_v57  ;;  %12586 = vmatpush3.bf16.msra.mxu0 %v12585_v38  ;;  %v8931_v57 = vld [vmem:[#allocation36 + $0x40] sm:$0xff] }
0x2e2d   : > { %12588 = vmatprep.subr.bf16.mxu0 %v12587_v23  ;;  %v12601_v60 = vpack.c.bf16 %v8932_v26, %v8931_v57  ;;  %v9122_v57 = vld [vmem:[#allocation33 + $0x28] sm:$0xff]  ;;  %v9124_v26 = vld [vmem:[#allocation33 + $0x38] sm:$0xff] }
0x2e2e   : > { %11582 = vmatprep.mubr.msk.f32.mxu0 %vm7155_vm9, %v8824_v50 }
0x2e2f   : > { %11583 = vmatmul.mubr.msk.f32.gmra.mrb[78].mxu0 %vm7155_vm9, %v8825_v6 }
0x2e30   : > { %12590 = vmatpush3.bf16.msra.mxu0 %v12589_v46 }
0x2e31   : > { %12592 = vmatprep.subr.bf16.mxu0 %v12591_v10 }
0x2e34   : > { %12594 = vmatpush3.bf16.msra.mxu0 %v12593_v36 }
0x2e35   : > { %12596 = vmatprep.subr.bf16.mxu0 %v12595_v9 }
0x2e38   : > { %12598 = vmatpush3.bf16.msra.mxu0 %v12597_v0  ;;  %v9120_v0 = vld [vmem:[#allocation33 + $0x18] sm:$0xff] }
0x2e39   : > { %12600 = vmatprep.subr.bf16.mxu0 %v12599_v28  ;;  %v9119_v28 = vld [vmem:[#allocation33 + $0x10] sm:$0xff] }
0x2e3c   : > { %12602 = vmatpush3.bf16.msra.mxu0 %v12601_v60  ;;  %v12619_v60 = vpack.c.bf16 %v9124_v26, %v9122_v57  ;;  %v9274_v26 = vld [vmem:[#allocation34 + $0x80] sm:$0xff] }
0x2e3d   : > { %12604 = vmatprep.subr.bf16.mxu0 %v12603_v52  ;;  %v9128_v52 = vld [vmem:[#allocation33 + $0x58] sm:$0xff] }
0x2e3e   : > { %v12623_v53 = vpack.c.bf16 %v9128_v52, %v9126_v51  ;;  %v9276_v51 = vld [vmem:[#allocation34 + $0x90] sm:$0xff]  ;;  %v9277_v52 = vld [vmem:[#allocation34 + $0x98] sm:$0xff] }
0x2e40   : > { %12606 = vmatpush3.bf16.msra.mxu0 %v12605_v37 }
0x2e41   : > { %12608 = vmatprep.subr.bf16.mxu0 %v12607_v54 }
0x2e44   : > { %12610 = vmatpush3.bf16.msra.mxu0 %v12609_v56 }
0x2e45   : > { %12612 = vmatprep.subr.bf16.mxu0 %v12611_v17 }
0x2e48   : > { %12614 = vmatpush3.bf16.msra.mxu0 %v12613_v58 }
0x2eee   : > { %v11553_v29 = vpop.f32.mrb[72].mxu0 }
0x2eef   : > { %v8670_v55 = vpop.f32.mrb[73].mxu0 }
0x2ef2   : > { %v11556_v4 = vpop.f32.mrb[74].mxu0 }
0x2ef3   : > { %v8680_v21 = vpop.f32.mrb[75].mxu0 }
0x2efe   : > { %v11581_v13 = vpop.f32.mrb[76].mxu0 }
0x2eff   : > { %v8904_v43 = vpop.f32.mrb[77].mxu0 }
0x2f00   : > { %9026 = vmatprep.mubr.f32.mxu0 %v8904_v43  ;;  %v9130_v43 = vld [vmem:[#allocation33 + $0x68] sm:$0xff] }
0x2f01   : > { %9027 = vmatmul.mubr.f32.vlgmr.msra.gmra.mrb[80].mxu0 %v8670_v55 }
0x2f02   : > { %v11584_v19 = vpop.f32.mrb[78].mxu0  ;;  %9031 = vmatprep.mubr.f32.mxu0 %v11581_v13 }
0x2f03   : > { %v8914_v20 = vpop.f32.mrb[79].mxu0 }
0x2f05   : > { %9032 = vmatmul.mubr.f32.gmra.mrb[82].mxu0 %v11553_v29 }
0x2f06   : > { %9036 = vmatprep.mubr.f32.mxu0 %v8914_v20 }
0x2f09   : > { %9037 = vmatmul.mubr.f32.gmra.mrb[84].mxu0 %v8680_v21 }
0x2f0a   : > { %9041 = vmatprep.mubr.f32.mxu0 %v11584_v19  ;;  %v9132_v19 = vld [vmem:[#allocation33 + $0x78] sm:$0xff] }
0x2f0b   : > { %v12627_v20 = vpack.c.bf16 %v9132_v19, %v9130_v43  ;;  %v9283_v43 = vld [vmem:[#allocation34 + $0xc8] sm:$0xff] }
0x2f0d   : > { %9042 = vmatmul.mubr.f32.gmra.mrb[86].mxu0 %v11556_v4 }
0x2fd4   : > { %v11064_v38 = vpop.f32.mrb[80].mxu0 }
0x2fd5   : > { %v11065_v23 = vpop.f32.mrb[81].mxu0 }
0x2fd6   : > { %v11066_v30 = vadd.f32 %v11065_v23, %v11064_v38  ;;  %v9129_v38 = vld [vmem:[#allocation33 + $0x60] sm:$0xff] }
0x2fd8   : > { %v9029_v33 = vadd.f32 %v11066_v30, %v10571_v15  ;;  %v11067_v12 = vpop.f32.mrb[82].mxu0  ;;  %v9134_v30 = vld [vmem:[#allocation33 + $0x88] sm:$0xff] }
0x2fd9   : > { %v11068_v35 = vpop.f32.mrb[83].mxu0 }
0x2fda   : > { %v11069_v18 = vadd.f32 %v11068_v35, %v11067_v12  ;;  %v9047_v16 = vadd.f32 %v9029_v33, %v17472_v8  ;;  %v9118_v8 = vld [vmem:[#allocation33 + $0x8] sm:$0xff]  ;;  %v9136_v33 = vld [vmem:[#allocation33 + $0x98] sm:$0xff]  ;;  %v9133_v35 = vld [vmem:[#allocation33 + $0x80] sm:$0xff] }
0x2fdb   : > { %v12615_v2 = vpack.c.bf16 %v9120_v0, %v9118_v8  ;;  %v12631_v12 = vpack.c.bf16 %v9136_v33, %v9134_v30  ;;  %v9146_v8 = vld [vmem:[#allocation33 + $0xe8] sm:$0xff]  ;;  %v9148_v0 = vld [vmem:[#allocation33 + $0xf8] sm:$0xff] }
0x2fdc   : > { %v9034_v50 = vadd.f32 %v11069_v18, %v10571_v15  ;;  %v11070_v46 = vpop.f32.mrb[84].mxu0  ;;  %9051 = vadd.xlane.f32.xlu1 %v9047_v16  ;;  %v9135_v18 = vld [vmem:[#allocation33 + $0x90] sm:$0xff]  ;;  %v9285_v30 = vld [vmem:[#allocation34 + $0xd8] sm:$0xff] }
0x2fdd   : > { %v11071_v6 = vpop.f32.mrb[85].mxu0  ;;  %12616 = vmatprep.subr.bf16.mxu1 %v12615_v2  ;;  %v9145_v2 = vld [vmem:[#allocation33 + $0xe0] sm:$0xff] }
0x2fde   : > { %v11072_v10 = vadd.f32 %v11071_v6, %v11070_v46  ;;  %v9048_v1 = vadd.f32 %v9034_v50, %v17479_v39  ;;  %v12617_v39 = vpack.c.bf16 %v9119_v28, %v9117_v25  ;;  %v9138_v50 = vld [vmem:[#allocation33 + $0xa8] sm:$0xff]  ;;  %v9140_v46 = vld [vmem:[#allocation33 + $0xb8] sm:$0xff]  ;;  %v12643_v25 = vpack.c.bf16 %v9148_v0, %v9146_v8  ;;  %v9147_v28 = vld [vmem:[#allocation33 + $0xf0] sm:$0xff] }
0x2fdf   : > { %v12635_v6 = vpack.c.bf16 %v9140_v46, %v9138_v50  ;;  %v12645_v57 = vpack.c.bf16 %v9147_v28, %v9145_v2  ;;  %v9287_v50 = vld [vmem:[#allocation34 + $0xe8] sm:$0xff]  ;;  %v10572_v28 = vld [vmem:[#allocation28] ss:$0 sm:$0xff] }
0x2fe0   : > { %v9039_v62 = vadd.f32 %v11072_v10, %v10571_v15  ;;  %v11073_v40 = vpop.f32.mrb[86].mxu0  ;;  %9053 = vadd.xlane.f32.xlu0 %v9048_v1  ;;  %12618 = vmatpush1.bf16.msra.mxu1 %v12617_v39  ;;  %v9137_v10 = vld [vmem:[#allocation33 + $0xa0] sm:$0xff]  ;;  %v9275_v39 = vld [vmem:[#allocation34 + $0x88] sm:$0xff] }
0x2fe1   : > { %v11074_v49 = vpop.f32.mrb[87].mxu0  ;;  %12620 = vmatprep.subr.bf16.mxu1 %v12619_v60  ;;  %v9258_v60 = vld [vmem:[#allocation34] sm:$0xff] }
0x2fe2   : > { %v11075_v36 = vadd.f32 %v11074_v49, %v11073_v40  ;;  %v9049_v9 = vadd.f32 %v9039_v62, %v17486_v14  ;;  %v12621_v14 = vpack.c.bf16 %v9123_v31, %v9121_v44  ;;  %v9142_v40 = vld [vmem:[#allocation33 + $0xc8] sm:$0xff]  ;;  %v9144_v49 = vld [vmem:[#allocation33 + $0xd8] sm:$0xff]  ;;  %v12647_v44 = vpack.c.bf16 %v9275_v39, %v9274_v26 }
0x2fe3   : > { %v9259_v31 = vld [vmem:[#allocation34 + $0x8] sm:$0xff]  ;;  %v10573_v26 = vld [vmem:[#allocation27] ss:$0 sm:$0xff] }
0x2fe4   : > { %v9044_v32 = vadd.f32 %v11075_v36, %v10571_v15  ;;  %9055 = vadd.xlane.f32.xlu1 %v9049_v9  ;;  %12622 = vmatpush1.bf16.msra.mxu1 %v12621_v14  ;;  %v9131_v15 = vld [vmem:[#allocation33 + $0x70] sm:$0xff]  ;;  %v12639_v36 = vpack.c.bf16 %v9144_v49, %v9142_v40  ;;  %v12649_v14 = vpack.c.bf16 %v9259_v31, %v9258_v60 }
0x2fe5   : > { %12624 = vmatprep.subr.bf16.mxu1 %v12623_v53  ;;  %v12629_v23 = vpack.c.bf16 %v9131_v15, %v9129_v38  ;;  %v12651_v53 = vpack.c.bf16 %v9277_v52, %v9276_v51  ;;  %12648 = vmatprep.subr.bf16.mxu0 %v12647_v44  ;;  %v9266_v38 = vld [vmem:[#allocation34 + $0x40] sm:$0xff]  ;;  %v9267_v15 = vld [vmem:[#allocation34 + $0x48] sm:$0xff] }
0x2fe6   : > { %v9050_v41 = vadd.f32 %v9044_v32, %v17493_v34  ;;  %v9125_v34 = vld [vmem:[#allocation33 + $0x40] sm:$0xff]  ;;  %v9143_v32 = vld [vmem:[#allocation33 + $0xd0] sm:$0xff]  ;;  %12650 = vmatpush3.bf16.msra.mxu0 %v12649_v14  ;;  %v12665_v33 = vpack.c.bf16 %v9267_v15, %v9266_v38 }
0x2fe7   : > { %v12625_v24 = vpack.c.bf16 %v9127_v45, %v9125_v34  ;;  %v9260_v34 = vld [vmem:[#allocation34 + $0x10] sm:$0xff]  ;;  %v9261_v45 = vld [vmem:[#allocation34 + $0x18] sm:$0xff]  ;;  %12652 = vmatprep.subr.bf16.mxu0 %v12651_v53 }
0x2fe8   : > { %9057 = vadd.xlane.f32.xlu0 %v9050_v41 }
0x2fe9   : > { %12626 = vmatpush1.bf16.msra.mxu1 %v12625_v24  ;;  %v9278_v24 = vld [vmem:[#allocation34 + $0xa0] sm:$0xff] }
0x2fea   : > { %12628 = vmatprep.subr.bf16.mxu1 %v12627_v20 }
0x2fed   : > { %12630 = vmatpush1.bf16.msra.mxu1 %v12629_v23  ;;  %v9284_v23 = vld [vmem:[#allocation34 + $0xd0] sm:$0xff] }
0x2fee   : > { %12632 = vmatprep.subr.bf16.mxu1 %v12631_v12  ;;  %v12667_v12 = vpack.c.bf16 %v9285_v30, %v9284_v23 }
0x3069   : > { %v9052_v37 = vpop.xlane.xlu1 %9051 }
0x306a   : > { %v9059_v54 = vmul.f32 0.0078125, %v9052_v37  ;;  %v9279_v37 = vld [vmem:[#allocation34 + $0xa8] sm:$0xff] }
0x306c   : > { %v17557_v59 = vsub.f32 %v9047_v16, %v9059_v54  ;;  %v12633_v16 = vpack.c.bf16 %v9135_v18, %v9133_v35  ;;  %v12653_v54 = vpack.c.bf16 %v9261_v45, %v9260_v34  ;;  %v9268_v35 = vld [vmem:[#allocation34 + $0x50] sm:$0xff]  ;;  %v9269_v18 = vld [vmem:[#allocation34 + $0x58] sm:$0xff] }
0x306d   : > { %v9054_v61 = vpop.xlane.xlu0 %9053  ;;  %v12669_v46 = vpack.c.bf16 %v9269_v18, %v9268_v35 }
0x306e   : > { %v9060_v22 = vmul.f32 0.0078125, %v9054_v61  ;;  %v9067_v47 = vmul.f32 %v17557_v59, %v17557_v59  ;;  %12634 = vmatpush1.bf16.msra.mxu1 %v12633_v16  ;;  %v12655_v61 = vpack.c.bf16 %v9279_v37, %v9278_v24  ;;  %12654 = vmatpush3.bf16.msra.mxu0 %v12653_v54  ;;  %v9286_v16 = vld [vmem:[#allocation34 + $0xe0] sm:$0xff]  ;;  %v9271_v54 = vld [vmem:[#allocation34 + $0x68] sm:$0xff] }
0x306f   : > { %12636 = vmatprep.subr.bf16.mxu1 %v12635_v6  ;;  %v12671_v6 = vpack.c.bf16 %v9287_v50, %v9286_v16 }
0x3070   : > { %v17561_v56 = vsub.f32 %v9048_v1, %v9060_v22  ;;  %9071 = vadd.xlane.f32.xlu1 %v9067_v47  ;;  %v9139_v1 = vld [vmem:[#allocation33 + $0xb0] sm:$0xff]  ;;  %v9262_v22 = vld [vmem:[#allocation34 + $0x20] sm:$0xff]  ;;  %v9263_v47 = vld [vmem:[#allocation34 + $0x28] sm:$0xff]  ;;  %12656 = vmatprep.subr.bf16.mxu0 %v12655_v61 }
0x3071   : > { %v9056_v17 = vpop.xlane.xlu1 %9055  ;;  %v12637_v62 = vpack.c.bf16 %v9139_v1, %v9137_v10 }
0x3072   : > { %v9061_v48 = vmul.f32 0.0078125, %v9056_v17  ;;  %v9068_v27 = vmul.f32 %v17561_v56, %v17561_v56  ;;  %v9280_v17 = vld [vmem:[#allocation34 + $0xb0] sm:$0xff] }
0x3073   : > { %12638 = vmatpush1.bf16.msra.mxu1 %v12637_v62 }
0x3074   : > { %v17565_v58 = vsub.f32 %v9049_v9, %v9061_v48  ;;  %9073 = vadd.xlane.f32.xlu0 %v9068_v27  ;;  %v9141_v9 = vld [vmem:[#allocation33 + $0xc0] sm:$0xff]  ;;  %12640 = vmatprep.subr.bf16.mxu1 %v12639_v36  ;;  %v9281_v48 = vld [vmem:[#allocation34 + $0xb8] sm:$0xff]  ;;  %v12657_v27 = vpack.c.bf16 %v9263_v47, %v9262_v22  ;;  %v9288_v22 = vld [vmem:[#allocation34 + $0xf0] sm:$0xff] }
0x3075   : > { %v9058_v29 = vpop.xlane.xlu0 %9057  ;;  %v9289_v47 = vld [vmem:[#allocation34 + $0xf8] sm:$0xff] }
0x3076   : > { %v9062_v55 = vmul.f32 0.0078125, %v9058_v29  ;;  %v9069_v4 = vmul.f32 %v17565_v58, %v17565_v58  ;;  %v12659_v29 = vpack.c.bf16 %v9281_v48, %v9280_v17  ;;  %12658 = vmatpush3.bf16.msra.mxu0 %v12657_v27  ;;  %v12675_v17 = vpack.c.bf16 %v9289_v47, %v9288_v22  ;;  %v9272_v48 = vld [vmem:[#allocation34 + $0x70] sm:$0xff]  ;;  %v9273_v27 = vld [vmem:[#allocation34 + $0x78] sm:$0xff] }
0x3077   : > { %v9455_v47 = vld [vmem:[#allocation103 + $0x18] sm:$0xff] }
0x3078   : > { %v17569_v21 = vsub.f32 %v9050_v41, %v9062_v55  ;;  %9075 = vadd.xlane.f32.xlu1 %v9069_v4  ;;  %v12641_v41 = vpack.c.bf16 %v9143_v32, %v9141_v9  ;;  %v9264_v55 = vld [vmem:[#allocation34 + $0x30] sm:$0xff]  ;;  %v9265_v4 = vld [vmem:[#allocation34 + $0x38] sm:$0xff]  ;;  %12660 = vmatprep.subr.bf16.mxu0 %v12659_v29  ;;  %v12677_v29 = vpack.c.bf16 %v9273_v27, %v9272_v48 }
0x3079   : > { %v12661_v19 = vpack.c.bf16 %v9265_v4, %v9264_v55 }
0x307a   : > { %v9070_v13 = vmul.f32 %v17569_v21, %v17569_v21  ;;  %12642 = vmatpush1.bf16.msra.mxu1 %v12641_v41 }
0x307b   : > { %12644 = vmatprep.subr.bf16.mxu1 %v12643_v25  ;;  %12662 = vmatpush3.bf16.msra.mxu0 %v12661_v19 }
0x307c   : > { %9077 = vadd.xlane.f32.xlu0 %v9070_v13  ;;  %v9282_v13 = vld [vmem:[#allocation34 + $0xc0] sm:$0xff] }
0x307d   : > { %v12663_v20 = vpack.c.bf16 %v9283_v43, %v9282_v13 }
0x307e   : > { %12646 = vmatpush1.bf16.msra.mxu1 %v12645_v57 }
0x307f   : > { %12664 = vmatprep.subr.bf16.mxu0 %v12663_v20 }
0x3080   : > { %12666 = vmatpush3.bf16.msra.mxu0 %v12665_v33 }
0x3081   : > { %12668 = vmatprep.subr.bf16.mxu0 %v12667_v12 }
0x3084   : > { %12670 = vmatpush3.bf16.msra.mxu0 %v12669_v46 }
0x3085   : > { %12672 = vmatprep.subr.bf16.mxu0 %v12671_v6 }
0x30fd   : > { %v9072_v10 = vpop.xlane.xlu1 %9071 }
0x30fe   : > { %v9079_v1 = vmul.f32 0.0078125, %v9072_v10 }
0x3100   : > { %v9083_v62 = vadd.f32 1e-05, %v9079_v1 }
0x3101   : > { %v9074_v40 = vpop.xlane.xlu0 %9073 }
0x3102   : > { %13395 = vrsqrt.f32 %v9083_v62  ;;  %v9080_v49 = vmul.f32 0.0078125, %v9074_v40 }
0x3104   : > { %v9084_v36 = vadd.f32 1e-05, %v9080_v49 }
0x3105   : > { %v9076_v9 = vpop.xlane.xlu1 %9075 }
0x3106   : > { %13397 = vrsqrt.f32 %v9084_v36  ;;  %v9081_v32 = vmul.f32 0.0078125, %v9076_v9 }
0x3108   : > { %v9085_v41 = vadd.f32 1e-05, %v9081_v32  ;;  %v10574_v32 = vld [vmem:[#allocation24] ss:$0 sm:$0xff] }
0x3109   : > { %v9078_v8 = vpop.xlane.xlu0 %9077 }
0x310a   : > { %13399 = vrsqrt.f32 %v9085_v41  ;;  %v9082_v0 = vmul.f32 0.0078125, %v9078_v8 }
0x310c   : > { %v13396_v25 = vpop.eup %13395  ;;  %v9086_v2 = vadd.f32 1e-05, %v9082_v0 }
0x310d   : > { %v9091_v57 = vmul.f32 %v13396_v25, %v17557_v59 }
0x310e   : > { %13401 = vrsqrt.f32 %v9086_v2 }
0x310f   : > { %v9102_v39 = vmul.f32 %v10572_v28, %v9091_v57 }
0x3110   : > { %v13398_v60 = vpop.eup %13397 }
0x3111   : > { %v17574_v44 = vadd.f32 %v10573_v26, %v9102_v39  ;;  %v9092_v31 = vmul.f32 %v13398_v60, %v17561_v56 }
0x3113   : > { %9226 = vmatmul.mubr.f32.vlgmr.msra.gmra.mrb[88].mxu1 %v17574_v44  ;;  %v9103_v51 = vmul.f32 %v10572_v28, %v9092_v31 }
0x3114   : > { %v13400_v52 = vpop.eup %13399  ;;  %9231 = vmatprep.mubr.f32.mxu1 %v15428_v11 }
0x3115   : > { %v17579_v14 = vadd.f32 %v10573_v26, %v9103_v51  ;;  %v9093_v53 = vmul.f32 %v13400_v52, %v17565_v58  ;;  %v9270_v58 = vld [vmem:[#allocation34 + $0x60] sm:$0xff] }
0x3116   : > { %v12673_v61 = vpack.c.bf16 %v9271_v54, %v9270_v58  ;;  %v9453_v54 = vld [vmem:[#allocation103 + $0x8] sm:$0xff] }
0x3117   : > { %9232 = vmatmul.mubr.f32.gmra.mrb[90].mxu1 %v17579_v14  ;;  %v9104_v59 = vmul.f32 %v10572_v28, %v9093_v53 }
0x3118   : > { %v13402_v34 = vpop.eup %13401  ;;  %9237 = vmatprep.mubr.f32.mxu1 %v15428_v11  ;;  %12674 = vmatpush3.bf16.msra.mxu0 %v12673_v61  ;;  %v9454_v61 = vld [vmem:[#allocation103 + $0x10] sm:$0xff] }
0x3119   : > { %v17584_v45 = vadd.f32 %v10573_v26, %v9104_v59  ;;  %v9094_v56 = vmul.f32 %v13402_v34, %v17569_v21  ;;  %12676 = vmatprep.subr.bf16.mxu0 %v12675_v17  ;;  %v9149_v21 = vld [vmem:[#allocation22] sm:$0x3]  ;;  %v12683_v17 = vpack.c.bf16 %v9455_v47, %v9454_v61  ;;  %v10575_v47 = vld [vmem:[#allocation31] ss:$0 sm:$0xff] }
0x311a   : > { %v9154_v55 = vrot.slane %v9149_v21, %v16899_v5  ;;  %v9158_v4 = vrot.slane %v9149_v21, %v16904_v7 }
0x311b   : > { %9238 = vmatmul.mubr.f32.gmra.mrb[92].mxu1 %v17584_v45  ;;  %v9105_v24 = vmul.f32 %v10572_v28, %v9094_v56 }
0x311c   : > { %9243 = vmatprep.mubr.f32.mxu1 %v15428_v11  ;;  %12678 = vmatpush3.bf16.msra.mxu0 %v12677_v29 }
0x311d   : > { %v17589_v37 = vadd.f32 %v10573_v26, %v9105_v24 }
0x311f   : > { %9244 = vmatmul.mubr.f32.gmra.mrb[94].mxu1 %v17589_v37 }
0x31e6   : > { %v9227_v13 = vpop.f32.mrb[88].mxu1 }
0x31e7   : > { %v9228_v43 = vadd.f32 %v9227_v13, %v9154_v55  ;;  %v9229_v19 = vpop.f32.mrb[89].mxu1 }
0x31e8   : > { %v9230_v20 = vadd.f32 %v9229_v19, %v9158_v4 }
0x31e9   : > { %v9250_v23 = vmax.f32 %v9228_v43, 0.0 }
0x31ea   : > { %v9251_v38 = vmax.f32 %v9230_v20, 0.0  ;;  %v9233_v15 = vpop.f32.mrb[90].mxu1 }
0x31eb   : > { %v9234_v30 = vadd.f32 %v9233_v15, %v9154_v55  ;;  %v9235_v33 = vpop.f32.mrb[91].mxu1 }
0x31ec   : > { %v9236_v12 = vadd.f32 %v9235_v33, %v9158_v4  ;;  %9361 = vmatprep.mubr.f32.mxu0 %v9251_v38  ;;  %v6642_v33 = vadd.s32 16, %v16887_v63 }
0x31ed   : > { %9362 = vmatmul.mubr.f32.vlgmr.msra.gmra.mrb[88].mxu0 %v9250_v23  ;;  %v9252_v16 = vmax.f32 %v9234_v30, 0.0  ;;  %v6644_v30 = vcvt.s32.f32 %v16887_v63 }
0x31ee   : > { %v9253_v35 = vmax.f32 %v9236_v12, 0.0  ;;  %v9239_v18 = vpop.f32.mrb[92].mxu1  ;;  %v9456_v12 = vld [vmem:[#allocation103 + $0x20] sm:$0xff] }
0x31ef   : > { %v9240_v50 = vadd.f32 %v9239_v18, %v9154_v55  ;;  %v9241_v46 = vpop.f32.mrb[93].mxu1  ;;  %vm6648_vm10 = vcmp.lt.f32.partialorder %v6644_v30, %v17228_v42 }
0x31f0   : > { %v9242_v5 = vadd.f32 %v9241_v46, %v9158_v4  ;;  %9366 = vmatprep.mubr.f32.mxu0 %v9253_v35  ;;  %v9457_v35 = vld [vmem:[#allocation103 + $0x28] sm:$0xff]  ;;  %v6641_v46 = vadd.s32 8, %v16887_v63 }
0x31f1   : > { %9367 = vmatmul.mubr.f32.gmra.mrb[90].mxu0 %v9252_v16  ;;  %v9254_v10 = vmax.f32 %v9240_v50, 0.0  ;;  %v12687_v18 = vpack.c.bf16 %v9457_v35, %v9456_v12  ;;  %v6646_v16 = vcvt.s32.f32 %v6642_v33  ;;  %v6643_v50 = vadd.s32 24, %v16887_v63  ;;  %v10577_v12 = vld [vmem:[#allocation5] ss:$0 sm:$0xff] }
0x31f2   : > { %v9255_v7 = vmax.f32 %v9242_v5, 0.0  ;;  %v9245_v6 = vpop.f32.mrb[94].mxu1  ;;  %v9458_v5 = vld [vmem:[#allocation103 + $0x30] sm:$0xff] }
0x31f3   : > { %v9246_v1 = vadd.f32 %v9245_v6, %v9154_v55  ;;  %v9247_v62 = vpop.f32.mrb[95].mxu1  ;;  %v10545_v6 = vsel %vm6648_vm10, 1.0, %v15428_v11  ;;  %vm6650_vm11 = vcmp.lt.f32.partialorder %v6646_v16, %v17228_v42 }
0x31f4   : > { %v9248_v40 = vadd.f32 %v9247_v62, %v9158_v4  ;;  %9371 = vmatprep.mubr.f32.mxu0 %v9255_v7  ;;  %v9459_v7 = vld [vmem:[#allocation103 + $0x38] sm:$0xff]  ;;  %v6645_v62 = vcvt.s32.f32 %v6641_v46  ;;  %vm9560_vm12 = vcmp.gt.f32.partialorder %v10545_v6, 0.0 }
0x31f5   : > { %9372 = vmatmul.mubr.f32.gmra.mrb[92].mxu0 %v9254_v10  ;;  %v9256_v36 = vmax.f32 %v9246_v1, 0.0  ;;  %v12691_v10 = vpack.c.bf16 %v9459_v7, %v9458_v5  ;;  %v6647_v1 = vcvt.s32.f32 %v6643_v50  ;;  %v9564_v63 = vsel %vm9560_vm12, 1, %v15425_v3 }
0x31f6   : > { %v9257_v49 = vmax.f32 %v9248_v40, 0.0  ;;  %v9460_v40 = vld [vmem:[#allocation103 + $0x40] sm:$0xff]  ;;  %vm6649_vm14 = vcmp.lt.f32.partialorder %v6645_v62, %v17228_v42 }
0x31f7   : > { %vm6651_vm13 = vcmp.lt.f32.partialorder %v6647_v1, %v17228_v42 }
0x31f8   : > { %9376 = vmatprep.mubr.f32.mxu0 %v9257_v49  ;;  %v9461_v49 = vld [vmem:[#allocation103 + $0x48] sm:$0xff] }
0x31f9   : > { %9377 = vmatmul.mubr.f32.gmra.mrb[94].mxu0 %v9256_v36  ;;  %v10547_v36 = vsel %vm6650_vm11, 1.0, %v15428_v11 }
0x31fa   : > { %vm9562_vm15 = vcmp.gt.f32.partialorder %v10547_v36, 0.0 }
0x32c0   : > { %v11108_v9 = vpop.f32.mrb[88].mxu0 }
0x32c1   : > { %v11109_v41 = vpop.f32.mrb[89].mxu0 }
0x32c2   : > { %v11110_v8 = vadd.f32 %v11109_v41, %v11108_v9  ;;  %v12695_v9 = vpack.c.bf16 %v9461_v49, %v9460_v40  ;;  %v9463_v41 = vld [vmem:[#allocation103 + $0x58] sm:$0xff] }
0x32c4   : > { %v9364_v0 = vadd.f32 %v11110_v8, %v10574_v32  ;;  %v11111_v25 = vpop.f32.mrb[90].mxu0  ;;  %v10548_v8 = vsel %vm6651_vm13, 1.0, %v15428_v11 }
0x32c5   : > { %v11112_v2 = vpop.f32.mrb[91].mxu0  ;;  %vm9563_vm0 = vcmp.gt.f32.partialorder %v10548_v8, 0.0 }
0x32c6   : > { %v11113_v28 = vadd.f32 %v11112_v2, %v11111_v25  ;;  %v9382_v57 = vadd.f32 %v9364_v0, %v17574_v44  ;;  %v9452_v44 = vld [vmem:[#allocation103] sm:$0xff]  ;;  %v10546_v25 = vsel %vm6649_vm14, 1.0, %v15428_v11  ;;  %v9566_v2 = vsel %vm9562_vm15, 1, %v15425_v3 }
0x32c7   : > { %v12679_v22 = vpack.c.bf16 %v9453_v54, %v9452_v44  ;;  %vm9561_vm1 = vcmp.gt.f32.partialorder %v10546_v25, 0.0 }
0x32c8   : > { %v9369_v26 = vadd.f32 %v11113_v28, %v10574_v32  ;;  %9386 = vadd.xlane.f32.xlu1 %v9382_v57  ;;  %v11114_v39 = vpop.f32.mrb[92].mxu0  ;;  %v9464_v28 = vld [vmem:[#allocation103 + $0x60] sm:$0xff] }
0x32c9   : > { %v11115_v60 = vpop.f32.mrb[93].mxu0  ;;  %12680 = vmatprep.subr.bf16.mxu1 %v12679_v22 }
0x32ca   : > { %v11116_v31 = vadd.f32 %v11115_v60, %v11114_v39  ;;  %v9383_v51 = vadd.f32 %v9369_v26, %v17579_v14  ;;  %12682 = vmatpush3.bf16.msra.mxu1 %v12679_v22  ;;  %v9567_v26 = vsel %vm9563_vm0, 1, %v15425_v3  ;;  %v9565_v39 = vsel %vm9561_vm1, 1, %v15425_v3  ;;  %v9466_v60 = vld [vmem:[#allocation103 + $0x70] sm:$0xff] }
0x32cb   : > { %12684 = vmatprep.subr.bf16.mxu1 %v12683_v17 }
0x32cc   : > { %v9374_v52 = vadd.f32 %v11116_v31, %v10574_v32  ;;  %9388 = vadd.xlane.f32.xlu0 %v9383_v51  ;;  %v11117_v53 = vpop.f32.mrb[94].mxu0  ;;  %v9467_v31 = vld [vmem:[#allocation103 + $0x78] sm:$0xff] }
0x32cd   : > { %v11118_v59 = vpop.f32.mrb[95].mxu0  ;;  %v12707_v11 = vpack.c.bf16 %v9467_v31, %v9466_v60 }
0x32ce   : > { %v11119_v34 = vadd.f32 %v11118_v59, %v11117_v53  ;;  %v9384_v56 = vadd.f32 %v9374_v52, %v17584_v45  ;;  %12686 = vmatpush3.bf16.msra.mxu1 %v12683_v17 }
0x32cf   : > { %12688 = vmatprep.subr.bf16.mxu1 %v12687_v18 }
0x32d0   : > { %v9379_v24 = vadd.f32 %v11119_v34, %v10574_v32  ;;  %9390 = vadd.xlane.f32.xlu1 %v9384_v56  ;;  %v9462_v32 = vld [vmem:[#allocation103 + $0x50] sm:$0xff] }
0x32d1   : > { %v12699_v0 = vpack.c.bf16 %v9463_v41, %v9462_v32 }
0x32d2   : > { %v9385_v58 = vadd.f32 %v9379_v24, %v17589_v37  ;;  %12690 = vmatpush3.bf16.msra.mxu1 %v12687_v18 }
0x32d3   : > { %12692 = vmatprep.subr.bf16.mxu1 %v12691_v10 }
0x32d4   : > { %9392 = vadd.xlane.f32.xlu0 %v9385_v58 }
0x32d6   : > { %12694 = vmatpush3.bf16.msra.mxu1 %v12691_v10 }
0x32d7   : > { %12696 = vmatprep.subr.bf16.mxu1 %v12695_v9 }
0x32da   : > { %12698 = vmatpush3.bf16.msra.mxu1 %v12695_v9 }
0x32db   : > { %12700 = vmatprep.subr.bf16.mxu1 %v12699_v0 }
0x32de   : > { %12702 = vmatpush3.bf16.msra.mxu1 %v12699_v0 }
0x3355   : > { %v9387_v14 = vpop.xlane.xlu1 %9386 }
0x3356   : > { %v9394_v48 = vmul.f32 0.0078125, %v9387_v14  ;;  %v10576_v14 = vld [vmem:[#allocation30] ss:$0 sm:$0xff] }
0x3358   : > { %v17598_v27 = vsub.f32 %v9382_v57, %v9394_v48  ;;  %v9465_v57 = vld [vmem:[#allocation103 + $0x68] sm:$0xff] }
0x3359   : > { %v9389_v45 = vpop.xlane.xlu0 %9388  ;;  %v12703_v42 = vpack.c.bf16 %v9465_v57, %v9464_v28 }
0x335a   : > { %v9395_v29 = vmul.f32 0.0078125, %v9389_v45  ;;  %v9402_v37 = vmul.f32 %v17598_v27, %v17598_v27 }
0x335b   : > { %12704 = vmatprep.subr.bf16.mxu1 %v12703_v42 }
0x335c   : > { %v17602_v21 = vsub.f32 %v9383_v51, %v9395_v29  ;;  %9406 = vadd.xlane.f32.xlu1 %v9402_v37  ;;  %12706 = vmatpush3.bf16.msra.mxu1 %v12703_v42 }
0x335d   : > { %v9391_v55 = vpop.xlane.xlu1 %9390  ;;  %12708 = vmatprep.subr.bf16.mxu1 %v12707_v11 }
0x335e   : > { %v9396_v4 = vmul.f32 0.0078125, %v9391_v55  ;;  %v9403_v13 = vmul.f32 %v17602_v21, %v17602_v21 }
0x3360   : > { %v17606_v43 = vsub.f32 %v9384_v56, %v9396_v4  ;;  %9408 = vadd.xlane.f32.xlu0 %v9403_v13  ;;  %12710 = vmatpush3.bf16.msra.mxu1 %v12707_v11 }
0x3361   : > { %v9393_v19 = vpop.xlane.xlu0 %9392 }
0x3362   : > { %v9397_v20 = vmul.f32 0.0078125, %v9393_v19  ;;  %v9404_v38 = vmul.f32 %v17606_v43, %v17606_v43 }
0x3364   : > { %v17610_v15 = vsub.f32 %v9385_v58, %v9397_v20  ;;  %9410 = vadd.xlane.f32.xlu1 %v9404_v38 }
0x3366   : > { %v9405_v23 = vmul.f32 %v17610_v15, %v17610_v15 }
0x3368   : > { %9412 = vadd.xlane.f32.xlu0 %v9405_v23 }
0x3375   : > { %9569 = vperm.xlu1 %13276, %v9564_v63  }
0x3379   : > { %9575 = vperm.xlu1 %13276, %v9566_v2  }
0x337d   : > { %9578 = vperm.xlu1 %13276, %v9567_v26  }
0x337e   : > { %9572 = vperm.xlu0 %13275, %v9565_v39  }
0x33e9   : > { %v9407_v51 = vpop.xlane.xlu1 %9406 }
0x33ea   : > { %v9414_v52 = vmul.f32 0.0078125, %v9407_v51 }
0x33ec   : > { %v9418_v53 = vadd.f32 1e-05, %v9414_v52 }
0x33ed   : > { %v9409_v59 = vpop.xlane.xlu0 %9408 }
0x33ee   : > { %13403 = vrsqrt.f32 %v9418_v53  ;;  %v9415_v34 = vmul.f32 0.0078125, %v9409_v59 }
0x33f0   : > { %v9419_v56 = vadd.f32 1e-05, %v9415_v34 }
0x33f1   : > { %v9411_v24 = vpop.xlane.xlu1 %9410 }
0x33f2   : > { %13405 = vrsqrt.f32 %v9419_v56  ;;  %v9416_v58 = vmul.f32 0.0078125, %v9411_v24 }
0x33f4   : > { %v9420_v44 = vadd.f32 1e-05, %v9416_v58 }
0x33f5   : > { %v9413_v54 = vpop.xlane.xlu0 %9412 }
0x33f6   : > { %13407 = vrsqrt.f32 %v9420_v44  ;;  %v9417_v3 = vmul.f32 0.0078125, %v9413_v54 }
0x33f8   : > { %v13404_v61 = vpop.eup %13403  ;;  %v9421_v22 = vadd.f32 1e-05, %v9417_v3 }
0x33f9   : > { %v9426_v17 = vmul.f32 %v13404_v61, %v17598_v27 }
0x33fa   : > { %13409 = vrsqrt.f32 %v9421_v22 }
0x33fb   : > { %v9437_v48 = vmul.f32 %v10575_v47, %v9426_v17 }
0x33fc   : > { %v13406_v45 = vpop.eup %13405 }
0x33fd   : > { %v9427_v29 = vmul.f32 %v13406_v45, %v17602_v21  ;;  %v9448_v37 = vadd.f32 %v10576_v14, %v9437_v48  ;;  %v9570_v21 = vpop.permute.xlu1 %9569  ;;  %v9573_v35 = vpop.permute.xlu0 %9572 }
0x33fe   : > { %vm9581_vm2 = vcmp.eq.s32.totalorder %v9573_v35, 1  ;;  %vm9580_vm3 = vcmp.eq.s32.totalorder %v9570_v21, 1 }
0x33ff   : > { %11617 = vmatprep.mubr.f32.mxu1 %v9448_v37  ;;  %v9438_v55 = vmul.f32 %v10575_v47, %v9427_v29 }
0x3400   : > { %v13408_v4 = vpop.eup %13407 }
0x3401   : > { %v9449_v13 = vadd.f32 %v10576_v14, %v9438_v55  ;;  %v9428_v19 = vmul.f32 %v13408_v4, %v17606_v43  ;;  %v9576_v16 = vpop.permute.xlu1 %9575 }
0x3402   : > { %vm9582_vm5 = vcmp.eq.s32.totalorder %v9576_v16, 1 }
0x3403   : > { %11618 = vmatmul.mubr.f32.vlgmr.msra.gmra.mrb[96].mxu1 %v9449_v13  ;;  %v9439_v20 = vmul.f32 %v10575_v47, %v9428_v19 }
0x3404   : > { %v13410_v38 = vpop.eup %13409 }
0x3405   : > { %v9450_v23 = vadd.f32 %v10576_v14, %v9439_v20  ;;  %v9429_v27 = vmul.f32 %v13410_v38, %v17610_v15  ;;  %v9579_v15 = vpop.permute.xlu1 %9578 }
0x3406   : > { %vm9583_vm4 = vcmp.eq.s32.totalorder %v9579_v15, 1 }
0x3407   : > { %11620 = vmatprep.mubr.f32.mxu1 %v9450_v23  ;;  %v9440_v30 = vmul.f32 %v10575_v47, %v9429_v27 }
0x3409   : > { %v9451_v33 = vadd.f32 %v10576_v14, %v9440_v30 }
0x340b   : > { %11621 = vmatmul.mubr.f32.gmra.mrb[98].mxu1 %v9451_v33 }
0x34d6   : > { %v11619_v18 = vpop.f32.mrb[96].mxu1 }
0x34d7   : > { %v9547_v50 = vadd.f32 %v11619_v18, %v10577_v12  ;;  %v9541_v46 = vpop.f32.mrb[97].mxu1 }
0x34d8   : > { %v9542_v43 = vadd.f32 %v10577_v12, %v9541_v46 }
0x34d9   : > { %v9585_v5 = vsel %vm9581_vm2, %v9547_v50, -11.512925 }
0x34da   : > { %9589 = vst [vmem:[%s3255_s4 + $0x8] sm:$0xff] %v9585_v5  ;;  %v9584_v7 = vsel %vm9580_vm3, %v9542_v43, -11.512925 }
0x34db   : > { %9588 = vst [vmem:[%s3255_s4] sm:$0xff] %v9584_v7 }
0x34de   : > { %v11622_v6 = vpop.f32.mrb[98].mxu1 }
0x34df   : > { %v9557_v10 = vadd.f32 %v11622_v6, %v10577_v12  ;;  %v9551_v1 = vpop.f32.mrb[99].mxu1 }
0x34e0   : > { %v9552_v62 = vadd.f32 %v10577_v12, %v9551_v1 }
0x34e1   : > { %v9587_v40 = vsel %vm9583_vm4, %v9557_v10, -11.512925 }
0x34e2   : > { %9591 = vst [vmem:[%s3255_s4 + $0x18] sm:$0xff] %v9587_v40  ;;  %v9586_v49 = vsel %vm9582_vm5, %v9552_v62, -11.512925 }
0x34e3   : > { %9590 = vst [vmem:[%s3255_s4 + $0x10] sm:$0xff] %v9586_v49 }
0x34e4 PF: > { %s215_s0 = sadd.s32 1, %s15269_s0  }
0x34e5   : > { %p212_p3 = scmp.ge.s32.totalorder %s215_s0, 4  }
0x34e7   :  { %214 = sbr.rel (!%p212_p3) target bundleno = 199 (0xc7), region = 725 }
0x34ee   :  { %9613 = vsyncpa [#allocation6], 1 }
0x34ef   :  { %9615 = vsyncpa [#allocation6 + $0x1], 1 }
0x34f0   :  { %9616 = vsyncpa [#allocation8], 1 }
0x34f1   :  { %9617 = vsyncpa [#allocation11], 1 }
0x34f2   :  { %9618 = vsyncpa [#allocation14], 1 }
0x34f3   :  { %9619 = vsyncpa [#allocation17], 1 }
0x34f4   :  { %9620 = vsyncpa [#allocation20], 1 }
0x34f5   :  { %9621 = vsyncpa [#allocation23], 1 }
0x34f6   :  { %9622 = vsyncpa [#allocation26], 1 }
0x34f7   :  { %9623 = vsyncpa [#allocation29], 1 }
0x34f8   :  { %9624 = vsyncpa [#allocation32], 1 }
0x34f9   :  { %9625 = vsyncpa [#allocation35], 1 }
0x34fa   :  { %9626 = vsyncpa [#allocation38], 1 }
0x34fb   :  { %9627 = vsyncpa [#allocation41], 1 }
0x34fc   :  { %9628 = vsyncpa [#allocation44], 1 }
0x34fd   :  { %9629 = vsyncpa [#allocation47], 1 }
0x34fe   :  { %9630 = vsyncpa [#allocation50], 1 }
0x34ff   :  { %9631 = vsyncpa [#allocation53], 1 }
0x3500   :  { %9632 = vsyncpa [#allocation56], 1 }
0x3501   :  { %9633 = vsyncpa [#allocation59], 1 }
0x3502   :  { %9634 = vsyncpa [#allocation62], 1 }
0x3503   :  { %9635 = vsyncpa [#allocation65], 1 }
0x3504   :  { %9636 = vsyncpa [#allocation68], 1 }
0x3505   :  { %9637 = vsyncpa [#allocation71], 1 }
0x3506   :  { %9638 = vsyncpa [#allocation74], 1 }
0x3507   :  { %9639 = vsyncpa [#allocation77], 1 }
0x3508   :  { %9640 = vsyncpa [#allocation80], 1 }
0x3509   :  { %9641 = vsyncpa [#allocation83], 1 }
0x350a   :  { %9642 = vsyncpa [#allocation86], 1 }
0x350b   :  { %9643 = vsyncpa [#allocation89], 1 }
0x350c   :  { %9644 = vsyncpa [#allocation92], 1 }
0x350d   :  { %9645 = vsyncpa [#allocation95], 1 }
0x350e   :  { %9646 = vsyncpa [#allocation98], 1 }
0x350f   :  { %9647 = vsyncpa [#allocation101], 1 }
0x3510   :  { %9648 = vsyncpa [#allocation104], 1 }

</bundles_post_ra>
